<compile_context>
chip_gen: v5e
topology: v5e:2x2
jax: 0.10.0
libtpu: 0.0.40
codegen_flags: <defaults>
</compile_context>

<pallas_src>
import functools
import math

import jax
import jax.numpy as jnp
from jax.experimental import pallas as pl
from jax.experimental.pallas import tpu as pltpu

EPS = 1e-5


# ----------------------------------------------------------------------------
# Pallas kernel: the FULL encoder (all layers) on one (TILE_M, D) row tile.
# Grid = (row_tiles, layers); the activation is carried in VMEM across layers.
# ----------------------------------------------------------------------------
def _tim_layers_kernel(
    x_ref,        # (TM, D)       f32 activation tile (read at l == 0 only)
    wqkv_ref,     # (1, D, 3D)    bf16 fused QKV projection (layer l)
    bqkv_ref,     # (1, 1, 3D)    f32
    wo_ref,       # (1, D, D)     bf16 output projection
    bo_ref,       # (1, 1, D)     f32
    ln1w_ref,     # (1, 1, D)
    ln1b_ref,     # (1, 1, D)
    w1_ref,       # (1, D, Dff)   bf16
    b1_ref,       # (1, 1, Dff)
    w2_ref,       # (1, Dff, D)   bf16
    b2_ref,       # (1, 1, D)
    ln2w_ref,     # (1, 1, D)
    ln2b_ref,     # (1, 1, D)
    out_ref,      # (TM, D)       f32 (written at l == L-1 only)
    act_ref,      # (TM, D)       f32 VMEM carry
    *,
    S, H, Dh,
):
    l = pl.program_id(1)
    n_layers = pl.num_programs(1)

    @pl.when(l == 0)
    def _():
        act_ref[...] = x_ref[...]

    x = act_ref[...]                                 # (TM, D) f32
    TM, D = x.shape
    nb = TM // S                                     # whole sequences per tile
    scale = 1.0 / math.sqrt(Dh)

    # ---- fused QKV projection (lane-dense, bf16 MXU, f32 accumulate) -------
    xb = x.astype(jnp.bfloat16)
    qkv = jnp.dot(xb, wqkv_ref[0],
                  preferred_element_type=jnp.float32) + bqkv_ref[0]  # (TM, 3D)

    # ---- multi-head attention: heads batched into ONE rank-3 einsum pair ---
    def to_heads(t2d):  # (TM, D) -> (H * nb, S, Dh); batch rows ordered (h, b)
        return jnp.concatenate(
            [t2d[:, h * Dh:(h + 1) * Dh].reshape(nb, S, Dh) for h in range(H)],
            axis=0)

    qh = to_heads(qkv[:, :D])
    kh = to_heads(qkv[:, D:2 * D])
    vh = to_heads(qkv[:, 2 * D:])

    s = jnp.einsum("bqe,bke->bqk", qh, kh,
                   preferred_element_type=jnp.float32) * scale       # (H*nb,S,S)
    s = s - jnp.max(s, axis=-1, keepdims=True)
    p = jnp.exp(s)
    p = p * pl.reciprocal(jnp.sum(p, axis=-1, keepdims=True), approx=True)
    oh = jnp.einsum("bqk,bke->bqe", p, vh,
                    preferred_element_type=jnp.float32)              # (H*nb,S,Dh)

    # heads back onto the lane axis -> (TM, D), single fused output projection
    o = jnp.concatenate(
        [oh[h * nb:(h + 1) * nb].reshape(TM, Dh) for h in range(H)], axis=-1)
    attn = jnp.dot(o.astype(jnp.bfloat16), wo_ref[0],
                   preferred_element_type=jnp.float32) + bo_ref[0]

    # residual + LayerNorm1
    x = x + attn
    mu = jnp.mean(x, axis=-1, keepdims=True)
    xc = x - mu
    var = jnp.mean(xc * xc, axis=-1, keepdims=True)
    x = xc * jax.lax.rsqrt(var + EPS) * ln1w_ref[0] + ln1b_ref[0]

    # ---- feed-forward (ReLU), bf16 MXU inputs, f32 accumulate --------------
    h1 = jnp.dot(x.astype(jnp.bfloat16), w1_ref[0],
                 preferred_element_type=jnp.float32) + b1_ref[0]
    h1 = jnp.maximum(h1, 0.0)
    h2 = jnp.dot(h1.astype(jnp.bfloat16), w2_ref[0],
                 preferred_element_type=jnp.float32) + b2_ref[0]

    # residual + LayerNorm2
    x = x + h2
    mu = jnp.mean(x, axis=-1, keepdims=True)
    xc = x - mu
    var = jnp.mean(xc * xc, axis=-1, keepdims=True)
    x = xc * jax.lax.rsqrt(var + EPS) * ln2w_ref[0] + ln2b_ref[0]

    act_ref[...] = x                    # carry to next layer (same tile)

    @pl.when(l == n_layers - 1)
    def _():
        out_ref[...] = x


# ----------------------------------------------------------------------------
# Tile selection: whole sequences, sublane-aligned, near target, VMEM-capped.
# Rows are padded wrapper-side to a whole number of tiles, so the tile no
# longer has to divide BN exactly (handles prime BN without a full-M fallback).
# ----------------------------------------------------------------------------
def _choose_tile_rows(BN, S, *, target_rows=512, dff=2048,
                      vmem_budget_bytes=24 << 20):
    base = S * 8 // math.gcd(S, 8)            # lcm(S, 8): whole seqs + sublanes
    M = BN * S
    # dominant per-tile temporaries: FFN hidden (f32 + bf16 copy) ~ rows*dff*6 B
    cap = max(base, (vmem_budget_bytes // (dff * 6)) // base * base)
    tile = max(base, (target_rows // base) * base)
    tile = min(tile, cap)
    m_seq = -(-M // base) * base              # no point exceeding padded M
    return min(tile, m_seq)


def tim_encoder_pallas(x2d, stacked, *, S, H, tile_rows):
    Mp, D = x2d.shape
    L = stacked["wqkv"].shape[0]
    Dh = D // H
    grid = (Mp // tile_rows, L)

    names = ["wqkv", "bqkv", "wo", "bo", "ln1w", "ln1b",
             "w1", "b1", "w2", "b2", "ln2w", "ln2b"]
    weights = [stacked[n] for n in names]

    # Activation tile moves with the row-tile axis; weights are selected by the
    # layer axis (l) and stay resident per step, double-buffered across layers.
    in_specs = [pl.BlockSpec((tile_rows, D), lambda i, l: (i, 0))]
    in_specs += [pl.BlockSpec((1,) + w.shape[1:], lambda i, l: (l, 0, 0))
                 for w in weights]
    out_specs = pl.BlockSpec((tile_rows, D), lambda i, l: (i, 0))

    kernel = functools.partial(_tim_layers_kernel, S=S, H=H, Dh=Dh)
    return pl.pallas_call(
        kernel,
        out_shape=jax.ShapeDtypeStruct((Mp, D), jnp.float32),
        grid=grid,
        in_specs=in_specs,
        out_specs=out_specs,
        scratch_shapes=[pltpu.VMEM((tile_rows, D), jnp.float32)],
        compiler_params=pltpu.CompilerParams(
            dimension_semantics=("parallel", "arbitrary"),
            vmem_limit_bytes=48 << 20),
    )(x2d, *weights)


# ----------------------------------------------------------------------------
# Parameter init / packing (shapes match nn.TransformerEncoderLayer defaults:
# nhead=8, dim_feedforward=2048, activation=relu, post-LN, eval mode).
# ----------------------------------------------------------------------------
def init_layer_params(key, D, Dff):
    ks = jax.random.split(key, 8)
    return dict(
        in_proj_w=jax.random.normal(ks[0], (3 * D, D), jnp.float32) / math.sqrt(D),
        in_proj_b=jax.random.normal(ks[1], (3 * D,), jnp.float32) * 0.01,
        out_w=jax.random.normal(ks[2], (D, D), jnp.float32) / math.sqrt(D),
        out_b=jax.random.normal(ks[3], (D,), jnp.float32) * 0.01,
        w1=jax.random.normal(ks[4], (Dff, D), jnp.float32) / math.sqrt(D),
        b1=jax.random.normal(ks[5], (Dff,), jnp.float32) * 0.01,
        w2=jax.random.normal(ks[6], (D, Dff), jnp.float32) / math.sqrt(Dff),
        b2=jax.random.normal(ks[7], (D,), jnp.float32) * 0.01,
        ln1_w=jnp.ones((D,), jnp.float32), ln1_b=jnp.zeros((D,), jnp.float32),
        ln2_w=jnp.ones((D,), jnp.float32), ln2_b=jnp.zeros((D,), jnp.float32),
    )


def pack_layer_params(p):
    """Fused, MXU-friendly layouts.  Matmul weights bf16; biases/LN stay f32."""
    D = p["out_w"].shape[0]
    Dff = p["w1"].shape[0]
    return dict(
        wqkv=p["in_proj_w"].T.astype(jnp.bfloat16),          # (D, 3D)
        bqkv=p["in_proj_b"].reshape(1, 3 * D),
        wo=p["out_w"].T.astype(jnp.bfloat16),                 # (D, D)
        bo=p["out_b"].reshape(1, D),
        ln1w=p["ln1_w"].reshape(1, D), ln1b=p["ln1_b"].reshape(1, D),
        w1=p["w1"].T.astype(jnp.bfloat16),                    # (D, Dff)
        b1=p["b1"].reshape(1, Dff),
        w2=p["w2"].T.astype(jnp.bfloat16),                    # (Dff, D)
        b2=p["b2"].reshape(1, D),
        ln2w=p["ln2_w"].reshape(1, D), ln2b=p["ln2_b"].reshape(1, D),
    )


def pack_and_stack(raw_layers):
    """Stack per-layer packed params along a leading L axis (layer grid axis)."""
    packed = [pack_layer_params(p) for p in raw_layers]
    return {k: jnp.stack([q[k] for q in packed], axis=0) for k in packed[0]}


# ----------------------------------------------------------------------------
# TIM forward: reshapes follow the literal torch .view/.permute semantics.
# NOTE: torch's traj.view(B*N, T, D) on a (B,T,N,D)-contiguous tensor is a raw
# flat reinterpretation (it interleaves t and n within a "sequence"); the
# kernel reproduces exactly that.  If the real model stores traj as (B,N,T,D),
# transpose before calling.
# ----------------------------------------------------------------------------
def tim_forward(traj, stacked, H, *, target_rows=512):
    B, T, N, D = traj.shape
    BN = B * N
    M = BN * T
    x2d = jnp.reshape(traj, (M, D)).astype(jnp.float32)

    tile_rows = _choose_tile_rows(BN, T, target_rows=target_rows,
                                  dff=stacked["w1"].shape[-1])
    M_pad = -(-M // tile_rows) * tile_rows
    if M_pad != M:                      # pad with whole (zero) sequences
        x2d = jnp.pad(x2d, ((0, M_pad - M), (0, 0)))

    out2d = tim_encoder_pallas(x2d, stacked, S=T, H=H, tile_rows=tile_rows)
    out2d = out2d[:M]
    # torch: out.permute(1,0,2).view(B, T, N, D)  (flat row-major reshape)
    return out2d.reshape(B, T, N, D)


# ----------------------------------------------------------------------------
# Pure-JAX f32 reference (eval-mode TransformerEncoderLayer) for sanity check.
# ----------------------------------------------------------------------------
def _ref_layer(x, p, H):
    BN, S, D = x.shape
    Dh = D // H
    hp = jax.lax.Precision.HIGHEST
    qkv = jnp.einsum("bsd,ed->bse", x, p["in_proj_w"], precision=hp) + p["in_proj_b"]
    q, k, v = jnp.split(qkv, 3, axis=-1)
    sh = lambda t: t.reshape(BN, S, H, Dh)
    q, k, v = sh(q), sh(k), sh(v)
    s = jnp.einsum("bqhe,bkhe->bhqk", q, k, precision=hp) / math.sqrt(Dh)
    a = jax.nn.softmax(s, axis=-1)
    o = jnp.einsum("bhqk,bkhe->bqhe", a, v, precision=hp).reshape(BN, S, D)
    o = jnp.einsum("bsd,ed->bse", o, p["out_w"], precision=hp) + p["out_b"]

    def ln(y, w, b):
        mu = jnp.mean(y, axis=-1, keepdims=True)
        var = jnp.mean((y - mu) ** 2, axis=-1, keepdims=True)
        return (y - mu) / jnp.sqrt(var + EPS) * w + b

    x = ln(x + o, p["ln1_w"], p["ln1_b"])
    h = jax.nn.relu(jnp.einsum("bsd,fd->bsf", x, p["w1"], precision=hp) + p["b1"])
    h = jnp.einsum("bsf,df->bsd", h, p["w2"], precision=hp) + p["b2"]
    return ln(x + h, p["ln2_w"], p["ln2_b"])


def tim_forward_ref(traj, raw_layers, H):
    B, T, N, D = traj.shape
    x = jnp.reshape(traj, (B * N, T, D)).astype(jnp.float32)
    for p in raw_layers:
        x = _ref_layer(x, p, H)
    return x.reshape(B, T, N, D)


if __name__ == "__main__":
    B, T, N, D = 2, 8, 4, 64          # traj: (batch, time, num_objects, dim)
    H = 8                             # nn.TransformerEncoderLayer nhead=8
    DFF = 2048                        # torch default dim_feedforward
    LAYERS = 2

    key = jax.random.PRNGKey(0)
    k_traj, k_params = jax.random.split(key)
    traj = jax.random.normal(k_traj, (B, T, N, D), jnp.float32)

    layer_keys = jax.random.split(k_params, LAYERS)
    raw_layers = [init_layer_params(layer_keys[i], D, DFF) for i in range(LAYERS)]
    stacked = pack_and_stack(raw_layers)

    out = tim_forward(traj, stacked, H)
    out = jax.block_until_ready(out)
    assert out.shape == (B, T, N, D) and out.dtype == jnp.float32
    assert jnp.isfinite(out).all(), "non-finite output"

    ref = jax.block_until_ready(tim_forward_ref(traj, raw_layers, H))
    # Kernel feeds the MXU bf16 inputs with f32 accumulation; reference is full
    # f32 HIGHEST precision -> allow bf16-level error through 2 layers.
    max_err = float(jnp.max(jnp.abs(out - ref)))
    assert max_err < 1e-1, f"mismatch vs reference: {max_err}"

    print("KERNEL_OK")
</pallas_src>

<mosaic_0001>
module attributes {stable_mosaic.version = 11 : i64} {
  func.func @_tim_layers_kernel(%arg0: i32, %arg1: i32, %arg2: memref<64x64xf32, #tpu.memory_space<vmem>>, %arg3: memref<1x64x192xbf16, #tpu.memory_space<vmem>>, %arg4: memref<1x1x192xf32, #tpu.memory_space<vmem>>, %arg5: memref<1x64x64xbf16, #tpu.memory_space<vmem>>, %arg6: memref<1x1x64xf32, #tpu.memory_space<vmem>>, %arg7: memref<1x1x64xf32, #tpu.memory_space<vmem>>, %arg8: memref<1x1x64xf32, #tpu.memory_space<vmem>>, %arg9: memref<1x64x2048xbf16, #tpu.memory_space<vmem>>, %arg10: memref<1x1x2048xf32, #tpu.memory_space<vmem>>, %arg11: memref<1x2048x64xbf16, #tpu.memory_space<vmem>>, %arg12: memref<1x1x64xf32, #tpu.memory_space<vmem>>, %arg13: memref<1x1x64xf32, #tpu.memory_space<vmem>>, %arg14: memref<1x1x64xf32, #tpu.memory_space<vmem>>, %arg15: memref<64x64xf32, #tpu.memory_space<vmem>>, %arg16: memref<64x64xf32, #tpu.memory_space<vmem>>) attributes {dimension_semantics = [#tpu.dimension_semantics<parallel>, #tpu.dimension_semantics<arbitrary>], iteration_bounds = array<i64: 1, 2>, scalar_prefetch = 0 : i64, scratch_operands = 1 : i64, tpu.core_type = #tpu.core_type<tc>, window_params = [{transform_indices = @transform_0, window_bounds = array<i64: 64, 64>}, {transform_indices = @transform_1, window_bounds = array<i64: 1, 64, 192>}, {transform_indices = @transform_2, window_bounds = array<i64: 1, 1, 192>}, {transform_indices = @transform_3, window_bounds = array<i64: 1, 64, 64>}, {transform_indices = @transform_4, window_bounds = array<i64: 1, 1, 64>}, {transform_indices = @transform_5, window_bounds = array<i64: 1, 1, 64>}, {transform_indices = @transform_6, window_bounds = array<i64: 1, 1, 64>}, {transform_indices = @transform_7, window_bounds = array<i64: 1, 64, 2048>}, {transform_indices = @transform_8, window_bounds = array<i64: 1, 1, 2048>}, {transform_indices = @transform_9, window_bounds = array<i64: 1, 2048, 64>}, {transform_indices = @transform_10, window_bounds = array<i64: 1, 1, 64>}, {transform_indices = @transform_11, window_bounds = array<i64: 1, 1, 64>}, {transform_indices = @transform_12, window_bounds = array<i64: 1, 1, 64>}, {transform_indices = @transform_13, window_bounds = array<i64: 64, 64>}]} {
    %c0_i32 = arith.constant 0 : i32
    %0 = arith.cmpi eq, %arg1, %c0_i32 : i32
    %1 = arith.extui %0 : i1 to i32
    %c0_i32_0 = arith.constant 0 : i32
    %2 = arith.cmpi ne, %1, %c0_i32_0 : i32
    scf.if %2 {
      %c0_60 = arith.constant 0 : index
      %c0_61 = arith.constant 0 : index
      %177 = vector.load %arg2[%c0_60, %c0_61] : memref<64x64xf32, #tpu.memory_space<vmem>>, vector<64x64xf32>
      %c0_62 = arith.constant 0 : index
      %c0_63 = arith.constant 0 : index
      %178 = vector.load %arg16[%c0_62, %c0_63] : memref<64x64xf32, #tpu.memory_space<vmem>>, vector<64x64xf32>
      tpu.vector_store %arg16[%c0_62, %c0_63], %177 {strides = array<i32>} : memref<64x64xf32, #tpu.memory_space<vmem>>, vector<64x64xf32>,
    } else {
    }
    %c0 = arith.constant 0 : index
    %c0_1 = arith.constant 0 : index
    %3 = vector.load %arg16[%c0, %c0_1] : memref<64x64xf32, #tpu.memory_space<vmem>>, vector<64x64xf32>
    %4 = arith.truncf %3 : vector<64x64xf32> to vector<64x64xbf16>
    %c0_2 = arith.constant 0 : index
    %c0_3 = arith.constant 0 : index
    %c0_4 = arith.constant 0 : index
    %5 = vector.load %arg3[%c0_2, %c0_3, %c0_4] : memref<1x64x192xbf16, #tpu.memory_space<vmem>>, vector<1x64x192xbf16>
    %6 = vector.shape_cast %5 : vector<1x64x192xbf16> to vector<64x192xbf16>
    %cst = arith.constant dense<0.000000e+00> : vector<64x192xf32>
    %7 = tpu.matmul %4, %6, %cst {dimension_numbers = #tpu.dot_dimension_numbers<[1], [0], [0], [1], [0, 0, 1, 1], [], []>} : vector<64x64xbf16>, vector<64x192xbf16>, vector<64x192xf32> -> vector<64x192xf32>
    %c0_5 = arith.constant 0 : index
    %c0_6 = arith.constant 0 : index
    %c0_7 = arith.constant 0 : index
    %8 = vector.load %arg4[%c0_5, %c0_6, %c0_7] : memref<1x1x192xf32, #tpu.memory_space<vmem>>, vector<1x1x192xf32>
    %9 = vector.shape_cast %8 : vector<1x1x192xf32> to vector<1x192xf32>
    %10 = vector.broadcast %9 : vector<1x192xf32> to vector<64x192xf32>
    %11 = arith.addf %7, %10 : vector<64x192xf32>
    %12 = vector.extract_strided_slice %11 {offsets = [0, 0], sizes = [64, 64], strides = [1, 1]} : vector<64x192xf32> to vector<64x64xf32>
    %13 = vector.extract_strided_slice %12 {offsets = [0, 0], sizes = [64, 8], strides = [1, 1]} : vector<64x64xf32> to vector<64x8xf32>
    %14 = vector.shape_cast %13 : vector<64x8xf32> to vector<8x8x8xf32>
    %15 = vector.extract_strided_slice %12 {offsets = [0, 8], sizes = [64, 8], strides = [1, 1]} : vector<64x64xf32> to vector<64x8xf32>
    %16 = vector.shape_cast %15 : vector<64x8xf32> to vector<8x8x8xf32>
    %17 = vector.extract_strided_slice %12 {offsets = [0, 16], sizes = [64, 8], strides = [1, 1]} : vector<64x64xf32> to vector<64x8xf32>
    %18 = vector.shape_cast %17 : vector<64x8xf32> to vector<8x8x8xf32>
    %19 = vector.extract_strided_slice %12 {offsets = [0, 24], sizes = [64, 8], strides = [1, 1]} : vector<64x64xf32> to vector<64x8xf32>
    %20 = vector.shape_cast %19 : vector<64x8xf32> to vector<8x8x8xf32>
    %21 = vector.extract_strided_slice %12 {offsets = [0, 32], sizes = [64, 8], strides = [1, 1]} : vector<64x64xf32> to vector<64x8xf32>
    %22 = vector.shape_cast %21 : vector<64x8xf32> to vector<8x8x8xf32>
    %23 = vector.extract_strided_slice %12 {offsets = [0, 40], sizes = [64, 8], strides = [1, 1]} : vector<64x64xf32> to vector<64x8xf32>
    %24 = vector.shape_cast %23 : vector<64x8xf32> to vector<8x8x8xf32>
    %25 = vector.extract_strided_slice %12 {offsets = [0, 48], sizes = [64, 8], strides = [1, 1]} : vector<64x64xf32> to vector<64x8xf32>
    %26 = vector.shape_cast %25 : vector<64x8xf32> to vector<8x8x8xf32>
    %27 = vector.extract_strided_slice %12 {offsets = [0, 56], sizes = [64, 8], strides = [1, 1]} : vector<64x64xf32> to vector<64x8xf32>
    %28 = vector.shape_cast %27 : vector<64x8xf32> to vector<8x8x8xf32>
    %29 = tpu.concatenate %14, %16, %18, %20, %22, %24, %26, %28 in 0 : vector<8x8x8xf32>, vector<8x8x8xf32>, vector<8x8x8xf32>, vector<8x8x8xf32>, vector<8x8x8xf32>, vector<8x8x8xf32>, vector<8x8x8xf32>, vector<8x8x8xf32> -> vector<64x8x8xf32>
    %30 = vector.extract_strided_slice %11 {offsets = [0, 64], sizes = [64, 64], strides = [1, 1]} : vector<64x192xf32> to vector<64x64xf32>
    %31 = vector.extract_strided_slice %30 {offsets = [0, 0], sizes = [64, 8], strides = [1, 1]} : vector<64x64xf32> to vector<64x8xf32>
    %32 = vector.shape_cast %31 : vector<64x8xf32> to vector<8x8x8xf32>
    %33 = vector.extract_strided_slice %30 {offsets = [0, 8], sizes = [64, 8], strides = [1, 1]} : vector<64x64xf32> to vector<64x8xf32>
    %34 = vector.shape_cast %33 : vector<64x8xf32> to vector<8x8x8xf32>
    %35 = vector.extract_strided_slice %30 {offsets = [0, 16], sizes = [64, 8], strides = [1, 1]} : vector<64x64xf32> to vector<64x8xf32>
    %36 = vector.shape_cast %35 : vector<64x8xf32> to vector<8x8x8xf32>
    %37 = vector.extract_strided_slice %30 {offsets = [0, 24], sizes = [64, 8], strides = [1, 1]} : vector<64x64xf32> to vector<64x8xf32>
    %38 = vector.shape_cast %37 : vector<64x8xf32> to vector<8x8x8xf32>
    %39 = vector.extract_strided_slice %30 {offsets = [0, 32], sizes = [64, 8], strides = [1, 1]} : vector<64x64xf32> to vector<64x8xf32>
    %40 = vector.shape_cast %39 : vector<64x8xf32> to vector<8x8x8xf32>
    %41 = vector.extract_strided_slice %30 {offsets = [0, 40], sizes = [64, 8], strides = [1, 1]} : vector<64x64xf32> to vector<64x8xf32>
    %42 = vector.shape_cast %41 : vector<64x8xf32> to vector<8x8x8xf32>
    %43 = vector.extract_strided_slice %30 {offsets = [0, 48], sizes = [64, 8], strides = [1, 1]} : vector<64x64xf32> to vector<64x8xf32>
    %44 = vector.shape_cast %43 : vector<64x8xf32> to vector<8x8x8xf32>
    %45 = vector.extract_strided_slice %30 {offsets = [0, 56], sizes = [64, 8], strides = [1, 1]} : vector<64x64xf32> to vector<64x8xf32>
    %46 = vector.shape_cast %45 : vector<64x8xf32> to vector<8x8x8xf32>
    %47 = tpu.concatenate %32, %34, %36, %38, %40, %42, %44, %46 in 0 : vector<8x8x8xf32>, vector<8x8x8xf32>, vector<8x8x8xf32>, vector<8x8x8xf32>, vector<8x8x8xf32>, vector<8x8x8xf32>, vector<8x8x8xf32>, vector<8x8x8xf32> -> vector<64x8x8xf32>
    %48 = vector.extract_strided_slice %11 {offsets = [0, 128], sizes = [64, 64], strides = [1, 1]} : vector<64x192xf32> to vector<64x64xf32>
    %49 = vector.extract_strided_slice %48 {offsets = [0, 0], sizes = [64, 8], strides = [1, 1]} : vector<64x64xf32> to vector<64x8xf32>
    %50 = vector.shape_cast %49 : vector<64x8xf32> to vector<8x8x8xf32>
    %51 = vector.extract_strided_slice %48 {offsets = [0, 8], sizes = [64, 8], strides = [1, 1]} : vector<64x64xf32> to vector<64x8xf32>
    %52 = vector.shape_cast %51 : vector<64x8xf32> to vector<8x8x8xf32>
    %53 = vector.extract_strided_slice %48 {offsets = [0, 16], sizes = [64, 8], strides = [1, 1]} : vector<64x64xf32> to vector<64x8xf32>
    %54 = vector.shape_cast %53 : vector<64x8xf32> to vector<8x8x8xf32>
    %55 = vector.extract_strided_slice %48 {offsets = [0, 24], sizes = [64, 8], strides = [1, 1]} : vector<64x64xf32> to vector<64x8xf32>
    %56 = vector.shape_cast %55 : vector<64x8xf32> to vector<8x8x8xf32>
    %57 = vector.extract_strided_slice %48 {offsets = [0, 32], sizes = [64, 8], strides = [1, 1]} : vector<64x64xf32> to vector<64x8xf32>
    %58 = vector.shape_cast %57 : vector<64x8xf32> to vector<8x8x8xf32>
    %59 = vector.extract_strided_slice %48 {offsets = [0, 40], sizes = [64, 8], strides = [1, 1]} : vector<64x64xf32> to vector<64x8xf32>
    %60 = vector.shape_cast %59 : vector<64x8xf32> to vector<8x8x8xf32>
    %61 = vector.extract_strided_slice %48 {offsets = [0, 48], sizes = [64, 8], strides = [1, 1]} : vector<64x64xf32> to vector<64x8xf32>
    %62 = vector.shape_cast %61 : vector<64x8xf32> to vector<8x8x8xf32>
    %63 = vector.extract_strided_slice %48 {offsets = [0, 56], sizes = [64, 8], strides = [1, 1]} : vector<64x64xf32> to vector<64x8xf32>
    %64 = vector.shape_cast %63 : vector<64x8xf32> to vector<8x8x8xf32>
    %65 = tpu.concatenate %50, %52, %54, %56, %58, %60, %62, %64 in 0 : vector<8x8x8xf32>, vector<8x8x8xf32>, vector<8x8x8xf32>, vector<8x8x8xf32>, vector<8x8x8xf32>, vector<8x8x8xf32>, vector<8x8x8xf32>, vector<8x8x8xf32> -> vector<64x8x8xf32>
    "tpu.trace_start"() <{level = 10 : i32, message = "bqe,bke->bqk"}> : () -> ()
    %cst_8 = arith.constant dense<0.000000e+00> : vector<64x8x8xf32>
    %66 = tpu.matmul %29, %47, %cst_8 {dimension_numbers = #tpu.dot_dimension_numbers<[2], [2], [1], [1], [0, 0, 0, 1, 1, 1], [0], [0]>} : vector<64x8x8xf32>, vector<64x8x8xf32>, vector<64x8x8xf32> -> vector<64x8x8xf32>
    "tpu.trace_stop"() : () -> ()
    %cst_9 = arith.constant 0.353553385 : f32
    %67 = vector.broadcast %cst_9 : f32 to vector<64x8x8xf32>
    %68 = arith.mulf %66, %67 : vector<64x8x8xf32>
    %cst_10 = arith.constant dense<0xFF800000> : vector<64x8xf32>
    %69 = vector.multi_reduction <maximumf>, %68, %cst_10 [2] : vector<64x8x8xf32> to vector<64x8xf32>
    %70 = vector.shape_cast %69 : vector<64x8xf32> to vector<64x8x1xf32>
    %71 = vector.broadcast %70 : vector<64x8x1xf32> to vector<64x8x8xf32>
    %72 = arith.subf %68, %71 : vector<64x8x8xf32>
    %73 = math.exp %72 : vector<64x8x8xf32>
    %cst_11 = arith.constant dense<0.000000e+00> : vector<64x8xf32>
    %74 = vector.multi_reduction <add>, %73, %cst_11 [2] : vector<64x8x8xf32> to vector<64x8xf32>
    %75 = vector.shape_cast %74 : vector<64x8xf32> to vector<64x8x1xf32>
    %76 = tpu.reciprocal %75 {approx = true} : vector<64x8x1xf32> -> vector<64x8x1xf32>
    %77 = vector.broadcast %76 : vector<64x8x1xf32> to vector<64x8x8xf32>
    %78 = arith.mulf %73, %77 : vector<64x8x8xf32>
    "tpu.trace_start"() <{level = 10 : i32, message = "bqk,bke->bqe"}> : () -> ()
    %cst_12 = arith.constant dense<0.000000e+00> : vector<64x8x8xf32>
    %79 = tpu.matmul %78, %65, %cst_12 {dimension_numbers = #tpu.dot_dimension_numbers<[2], [1], [1], [2], [0, 0, 0, 1, 1, 2], [0], [0]>} : vector<64x8x8xf32>, vector<64x8x8xf32>, vector<64x8x8xf32> -> vector<64x8x8xf32>
    "tpu.trace_stop"() : () -> ()
    %80 = vector.extract_strided_slice %79 {offsets = [0, 0, 0], sizes = [8, 8, 8], strides = [1, 1, 1]} : vector<64x8x8xf32> to vector<8x8x8xf32>
    %81 = vector.shape_cast %80 : vector<8x8x8xf32> to vector<64x8xf32>
    %82 = vector.extract_strided_slice %79 {offsets = [8, 0, 0], sizes = [8, 8, 8], strides = [1, 1, 1]} : vector<64x8x8xf32> to vector<8x8x8xf32>
    %83 = vector.shape_cast %82 : vector<8x8x8xf32> to vector<64x8xf32>
    %84 = vector.extract_strided_slice %79 {offsets = [16, 0, 0], sizes = [8, 8, 8], strides = [1, 1, 1]} : vector<64x8x8xf32> to vector<8x8x8xf32>
    %85 = vector.shape_cast %84 : vector<8x8x8xf32> to vector<64x8xf32>
    %86 = vector.extract_strided_slice %79 {offsets = [24, 0, 0], sizes = [8, 8, 8], strides = [1, 1, 1]} : vector<64x8x8xf32> to vector<8x8x8xf32>
    %87 = vector.shape_cast %86 : vector<8x8x8xf32> to vector<64x8xf32>
    %88 = vector.extract_strided_slice %79 {offsets = [32, 0, 0], sizes = [8, 8, 8], strides = [1, 1, 1]} : vector<64x8x8xf32> to vector<8x8x8xf32>
    %89 = vector.shape_cast %88 : vector<8x8x8xf32> to vector<64x8xf32>
    %90 = vector.extract_strided_slice %79 {offsets = [40, 0, 0], sizes = [8, 8, 8], strides = [1, 1, 1]} : vector<64x8x8xf32> to vector<8x8x8xf32>
    %91 = vector.shape_cast %90 : vector<8x8x8xf32> to vector<64x8xf32>
    %92 = vector.extract_strided_slice %79 {offsets = [48, 0, 0], sizes = [8, 8, 8], strides = [1, 1, 1]} : vector<64x8x8xf32> to vector<8x8x8xf32>
    %93 = vector.shape_cast %92 : vector<8x8x8xf32> to vector<64x8xf32>
    %94 = vector.extract_strided_slice %79 {offsets = [56, 0, 0], sizes = [8, 8, 8], strides = [1, 1, 1]} : vector<64x8x8xf32> to vector<8x8x8xf32>
    %95 = vector.shape_cast %94 : vector<8x8x8xf32> to vector<64x8xf32>
    %96 = tpu.concatenate %81, %83, %85, %87, %89, %91, %93, %95 in 1 : vector<64x8xf32>, vector<64x8xf32>, vector<64x8xf32>, vector<64x8xf32>, vector<64x8xf32>, vector<64x8xf32>, vector<64x8xf32>, vector<64x8xf32> -> vector<64x64xf32>
    %97 = arith.truncf %96 : vector<64x64xf32> to vector<64x64xbf16>
    %c0_13 = arith.constant 0 : index
    %c0_14 = arith.constant 0 : index
    %c0_15 = arith.constant 0 : index
    %98 = vector.load %arg5[%c0_13, %c0_14, %c0_15] : memref<1x64x64xbf16, #tpu.memory_space<vmem>>, vector<1x64x64xbf16>
    %99 = vector.shape_cast %98 : vector<1x64x64xbf16> to vector<64x64xbf16>
    %cst_16 = arith.constant dense<0.000000e+00> : vector<64x64xf32>
    %100 = tpu.matmul %97, %99, %cst_16 {dimension_numbers = #tpu.dot_dimension_numbers<[1], [0], [0], [1], [0, 0, 1, 1], [], []>} : vector<64x64xbf16>, vector<64x64xbf16>, vector<64x64xf32> -> vector<64x64xf32>
    %c0_17 = arith.constant 0 : index
    %c0_18 = arith.constant 0 : index
    %c0_19 = arith.constant 0 : index
    %101 = vector.load %arg6[%c0_17, %c0_18, %c0_19] : memref<1x1x64xf32, #tpu.memory_space<vmem>>, vector<1x1x64xf32>
    %102 = vector.shape_cast %101 : vector<1x1x64xf32> to vector<1x64xf32>
    %103 = vector.broadcast %102 : vector<1x64xf32> to vector<64x64xf32>
    %104 = arith.addf %100, %103 : vector<64x64xf32>
    %105 = arith.addf %3, %104 : vector<64x64xf32>
    %cst_20 = arith.constant dense<0.000000e+00> : vector<64xf32>
    %106 = vector.multi_reduction <add>, %105, %cst_20 [1] : vector<64x64xf32> to vector<64xf32>
    %107 = vector.shape_cast %106 : vector<64xf32> to vector<64x1xf32>
    %cst_21 = arith.constant 6.400000e+01 : f32
    %108 = vector.broadcast %cst_21 : f32 to vector<64x1xf32>
    %109 = arith.divf %107, %108 : vector<64x1xf32>
    %110 = vector.broadcast %109 : vector<64x1xf32> to vector<64x64xf32>
    %111 = arith.subf %105, %110 : vector<64x64xf32>
    %112 = arith.mulf %111, %111 : vector<64x64xf32>
    %cst_22 = arith.constant dense<0.000000e+00> : vector<64xf32>
    %113 = vector.multi_reduction <add>, %112, %cst_22 [1] : vector<64x64xf32> to vector<64xf32>
    %114 = vector.shape_cast %113 : vector<64xf32> to vector<64x1xf32>
    %cst_23 = arith.constant 6.400000e+01 : f32
    %115 = vector.broadcast %cst_23 : f32 to vector<64x1xf32>
    %116 = arith.divf %114, %115 : vector<64x1xf32>
    %cst_24 = arith.constant 9.99999974E-6 : f32
    %117 = vector.broadcast %cst_24 : f32 to vector<64x1xf32>
    %118 = arith.addf %116, %117 : vector<64x1xf32>
    %119 = math.rsqrt %118 : vector<64x1xf32>
    %120 = vector.broadcast %119 : vector<64x1xf32> to vector<64x64xf32>
    %121 = arith.mulf %111, %120 : vector<64x64xf32>
    %c0_25 = arith.constant 0 : index
    %c0_26 = arith.constant 0 : index
    %c0_27 = arith.constant 0 : index
    %122 = vector.load %arg7[%c0_25, %c0_26, %c0_27] : memref<1x1x64xf32, #tpu.memory_space<vmem>>, vector<1x1x64xf32>
    %123 = vector.shape_cast %122 : vector<1x1x64xf32> to vector<1x64xf32>
    %124 = vector.broadcast %123 : vector<1x64xf32> to vector<64x64xf32>
    %125 = arith.mulf %121, %124 : vector<64x64xf32>
    %c0_28 = arith.constant 0 : index
    %c0_29 = arith.constant 0 : index
    %c0_30 = arith.constant 0 : index
    %126 = vector.load %arg8[%c0_28, %c0_29, %c0_30] : memref<1x1x64xf32, #tpu.memory_space<vmem>>, vector<1x1x64xf32>
    %127 = vector.shape_cast %126 : vector<1x1x64xf32> to vector<1x64xf32>
    %128 = vector.broadcast %127 : vector<1x64xf32> to vector<64x64xf32>
    %129 = arith.addf %125, %128 : vector<64x64xf32>
    %130 = arith.truncf %129 : vector<64x64xf32> to vector<64x64xbf16>
    %c0_31 = arith.constant 0 : index
    %c0_32 = arith.constant 0 : index
    %c0_33 = arith.constant 0 : index
    %131 = vector.load %arg9[%c0_31, %c0_32, %c0_33] : memref<1x64x2048xbf16, #tpu.memory_space<vmem>>, vector<1x64x2048xbf16>
    %132 = vector.shape_cast %131 : vector<1x64x2048xbf16> to vector<64x2048xbf16>
    %cst_34 = arith.constant dense<0.000000e+00> : vector<64x2048xf32>
    %133 = tpu.matmul %130, %132, %cst_34 {dimension_numbers = #tpu.dot_dimension_numbers<[1], [0], [0], [1], [0, 0, 1, 1], [], []>} : vector<64x64xbf16>, vector<64x2048xbf16>, vector<64x2048xf32> -> vector<64x2048xf32>
    %c0_35 = arith.constant 0 : index
    %c0_36 = arith.constant 0 : index
    %c0_37 = arith.constant 0 : index
    %134 = vector.load %arg10[%c0_35, %c0_36, %c0_37] : memref<1x1x2048xf32, #tpu.memory_space<vmem>>, vector<1x1x2048xf32>
    %135 = vector.shape_cast %134 : vector<1x1x2048xf32> to vector<1x2048xf32>
    %136 = vector.broadcast %135 : vector<1x2048xf32> to vector<64x2048xf32>
    %137 = arith.addf %133, %136 : vector<64x2048xf32>
    %cst_38 = arith.constant 0.000000e+00 : f32
    %138 = vector.broadcast %cst_38 : f32 to vector<64x2048xf32>
    %139 = arith.maximumf %137, %138 : vector<64x2048xf32>
    %140 = arith.truncf %139 : vector<64x2048xf32> to vector<64x2048xbf16>
    %c0_39 = arith.constant 0 : index
    %c0_40 = arith.constant 0 : index
    %c0_41 = arith.constant 0 : index
    %141 = vector.load %arg11[%c0_39, %c0_40, %c0_41] : memref<1x2048x64xbf16, #tpu.memory_space<vmem>>, vector<1x2048x64xbf16>
    %142 = vector.shape_cast %141 : vector<1x2048x64xbf16> to vector<2048x64xbf16>
    %cst_42 = arith.constant dense<0.000000e+00> : vector<64x64xf32>
    %143 = tpu.matmul %140, %142, %cst_42 {dimension_numbers = #tpu.dot_dimension_numbers<[1], [0], [0], [1], [0, 0, 1, 1], [], []>} : vector<64x2048xbf16>, vector<2048x64xbf16>, vector<64x64xf32> -> vector<64x64xf32>
    %c0_43 = arith.constant 0 : index
    %c0_44 = arith.constant 0 : index
    %c0_45 = arith.constant 0 : index
    %144 = vector.load %arg12[%c0_43, %c0_44, %c0_45] : memref<1x1x64xf32, #tpu.memory_space<vmem>>, vector<1x1x64xf32>
    %145 = vector.shape_cast %144 : vector<1x1x64xf32> to vector<1x64xf32>
    %146 = vector.broadcast %145 : vector<1x64xf32> to vector<64x64xf32>
    %147 = arith.addf %143, %146 : vector<64x64xf32>
    %148 = arith.addf %129, %147 : vector<64x64xf32>
    %cst_46 = arith.constant dense<0.000000e+00> : vector<64xf32>
    %149 = vector.multi_reduction <add>, %148, %cst_46 [1] : vector<64x64xf32> to vector<64xf32>
    %150 = vector.shape_cast %149 : vector<64xf32> to vector<64x1xf32>
    %cst_47 = arith.constant 6.400000e+01 : f32
    %151 = vector.broadcast %cst_47 : f32 to vector<64x1xf32>
    %152 = arith.divf %150, %151 : vector<64x1xf32>
    %153 = vector.broadcast %152 : vector<64x1xf32> to vector<64x64xf32>
    %154 = arith.subf %148, %153 : vector<64x64xf32>
    %155 = arith.mulf %154, %154 : vector<64x64xf32>
    %cst_48 = arith.constant dense<0.000000e+00> : vector<64xf32>
    %156 = vector.multi_reduction <add>, %155, %cst_48 [1] : vector<64x64xf32> to vector<64xf32>
    %157 = vector.shape_cast %156 : vector<64xf32> to vector<64x1xf32>
    %cst_49 = arith.constant 6.400000e+01 : f32
    %158 = vector.broadcast %cst_49 : f32 to vector<64x1xf32>
    %159 = arith.divf %157, %158 : vector<64x1xf32>
    %cst_50 = arith.constant 9.99999974E-6 : f32
    %160 = vector.broadcast %cst_50 : f32 to vector<64x1xf32>
    %161 = arith.addf %159, %160 : vector<64x1xf32>
    %162 = math.rsqrt %161 : vector<64x1xf32>
    %163 = vector.broadcast %162 : vector<64x1xf32> to vector<64x64xf32>
    %164 = arith.mulf %154, %163 : vector<64x64xf32>
    %c0_51 = arith.constant 0 : index
    %c0_52 = arith.constant 0 : index
    %c0_53 = arith.constant 0 : index
    %165 = vector.load %arg13[%c0_51, %c0_52, %c0_53] : memref<1x1x64xf32, #tpu.memory_space<vmem>>, vector<1x1x64xf32>
    %166 = vector.shape_cast %165 : vector<1x1x64xf32> to vector<1x64xf32>
    %167 = vector.broadcast %166 : vector<1x64xf32> to vector<64x64xf32>
    %168 = arith.mulf %164, %167 : vector<64x64xf32>
    %c0_54 = arith.constant 0 : index
    %c0_55 = arith.constant 0 : index
    %c0_56 = arith.constant 0 : index
    %169 = vector.load %arg14[%c0_54, %c0_55, %c0_56] : memref<1x1x64xf32, #tpu.memory_space<vmem>>, vector<1x1x64xf32>
    %170 = vector.shape_cast %169 : vector<1x1x64xf32> to vector<1x64xf32>
    %171 = vector.broadcast %170 : vector<1x64xf32> to vector<64x64xf32>
    %172 = arith.addf %168, %171 : vector<64x64xf32>
    %c0_57 = arith.constant 0 : index
    %c0_58 = arith.constant 0 : index
    %173 = vector.load %arg16[%c0_57, %c0_58] : memref<64x64xf32, #tpu.memory_space<vmem>>, vector<64x64xf32>
    tpu.vector_store %arg16[%c0_57, %c0_58], %172 {strides = array<i32>} : memref<64x64xf32, #tpu.memory_space<vmem>>, vector<64x64xf32>,
    %c1_i32 = arith.constant 1 : i32
    %174 = arith.cmpi eq, %arg1, %c1_i32 : i32
    %175 = arith.extui %174 : i1 to i32
    %c0_i32_59 = arith.constant 0 : i32
    %176 = arith.cmpi ne, %175, %c0_i32_59 : i32
    scf.if %176 {
      %c0_60 = arith.constant 0 : index
      %c0_61 = arith.constant 0 : index
      %177 = vector.load %arg15[%c0_60, %c0_61] : memref<64x64xf32, #tpu.memory_space<vmem>>, vector<64x64xf32>
      tpu.vector_store %arg15[%c0_60, %c0_61], %172 {strides = array<i32>} : memref<64x64xf32, #tpu.memory_space<vmem>>, vector<64x64xf32>,
    } else {
    }
    return
  }
  func.func @transform_0(%arg0: i32, %arg1: i32) -> (i32, i32) {
    %c0_i32 = arith.constant 0 : i32
    %c0_i32_0 = arith.constant 0 : i32
    return %arg0, %c0_i32 : i32, i32
  }
  func.func @transform_1(%arg0: i32, %arg1: i32) -> (i32, i32, i32) {
    %c0_i32 = arith.constant 0 : i32
    %c0_i32_0 = arith.constant 0 : i32
    %c0_i32_1 = arith.constant 0 : i32
    return %arg1, %c0_i32, %c0_i32_0 : i32, i32, i32
  }
  func.func @transform_2(%arg0: i32, %arg1: i32) -> (i32, i32, i32) {
    %c0_i32 = arith.constant 0 : i32
    %c0_i32_0 = arith.constant 0 : i32
    %c0_i32_1 = arith.constant 0 : i32
    return %arg1, %c0_i32, %c0_i32_0 : i32, i32, i32
  }
  func.func @transform_3(%arg0: i32, %arg1: i32) -> (i32, i32, i32) {
    %c0_i32 = arith.constant 0 : i32
    %c0_i32_0 = arith.constant 0 : i32
    %c0_i32_1 = arith.constant 0 : i32
    return %arg1, %c0_i32, %c0_i32_0 : i32, i32, i32
  }
  func.func @transform_4(%arg0: i32, %arg1: i32) -> (i32, i32, i32) {
    %c0_i32 = arith.constant 0 : i32
    %c0_i32_0 = arith.constant 0 : i32
    %c0_i32_1 = arith.constant 0 : i32
    return %arg1, %c0_i32, %c0_i32_0 : i32, i32, i32
  }
  func.func @transform_5(%arg0: i32, %arg1: i32) -> (i32, i32, i32) {
    %c0_i32 = arith.constant 0 : i32
    %c0_i32_0 = arith.constant 0 : i32
    %c0_i32_1 = arith.constant 0 : i32
    return %arg1, %c0_i32, %c0_i32_0 : i32, i32, i32
  }
  func.func @transform_6(%arg0: i32, %arg1: i32) -> (i32, i32, i32) {
    %c0_i32 = arith.constant 0 : i32
    %c0_i32_0 = arith.constant 0 : i32
    %c0_i32_1 = arith.constant 0 : i32
    return %arg1, %c0_i32, %c0_i32_0 : i32, i32, i32
  }
  func.func @transform_7(%arg0: i32, %arg1: i32) -> (i32, i32, i32) {
    %c0_i32 = arith.constant 0 : i32
    %c0_i32_0 = arith.constant 0 : i32
    %c0_i32_1 = arith.constant 0 : i32
    return %arg1, %c0_i32, %c0_i32_0 : i32, i32, i32
  }
  func.func @transform_8(%arg0: i32, %arg1: i32) -> (i32, i32, i32) {
    %c0_i32 = arith.constant 0 : i32
    %c0_i32_0 = arith.constant 0 : i32
    %c0_i32_1 = arith.constant 0 : i32
    return %arg1, %c0_i32, %c0_i32_0 : i32, i32, i32
  }
  func.func @transform_9(%arg0: i32, %arg1: i32) -> (i32, i32, i32) {
    %c0_i32 = arith.constant 0 : i32
    %c0_i32_0 = arith.constant 0 : i32
    %c0_i32_1 = arith.constant 0 : i32
    return %arg1, %c0_i32, %c0_i32_0 : i32, i32, i32
  }
  func.func @transform_10(%arg0: i32, %arg1: i32) -> (i32, i32, i32) {
    %c0_i32 = arith.constant 0 : i32
    %c0_i32_0 = arith.constant 0 : i32
    %c0_i32_1 = arith.constant 0 : i32
    return %arg1, %c0_i32, %c0_i32_0 : i32, i32, i32
  }
  func.func @transform_11(%arg0: i32, %arg1: i32) -> (i32, i32, i32) {
    %c0_i32 = arith.constant 0 : i32
    %c0_i32_0 = arith.constant 0 : i32
    %c0_i32_1 = arith.constant 0 : i32
    return %arg1, %c0_i32, %c0_i32_0 : i32, i32, i32
  }
  func.func @transform_12(%arg0: i32, %arg1: i32) -> (i32, i32, i32) {
    %c0_i32 = arith.constant 0 : i32
    %c0_i32_0 = arith.constant 0 : i32
    %c0_i32_1 = arith.constant 0 : i32
    return %arg1, %c0_i32, %c0_i32_0 : i32, i32, i32
  }
  func.func @transform_13(%arg0: i32, %arg1: i32) -> (i32, i32) {
    %c0_i32 = arith.constant 0 : i32
    %c0_i32_0 = arith.constant 0 : i32
    return %arg0, %c0_i32 : i32, i32
  }
}

</mosaic_0001>

<bundles_post_ra>
// kernel: tpu_custom_call.1
= control target key start
LH: loop header
LB: loop body
LE: loop exit
PB: predicated region body
PF: predicated region fallthrough
CT: control target
= control target key end

     0   :  { %s13944_s0 = inlined_call_operand.vmem [shape: f32[64,64], index: 0, kind: input, shape index: {}]   ;;  %s13945_s1 = inlined_call_operand.vmem [shape: bf16[2,64,192], index: 1, kind: input, shape index: {}]   ;;  %s13946_s2 = inlined_call_operand.vmem [shape: f32[2,1,192], index: 2, kind: input, shape index: {}]   ;;  %s13947_s3 = inlined_call_operand.vmem [shape: bf16[2,64,64], index: 3, kind: input, shape index: {}]   ;;  %s13948_s4 = inlined_call_operand.vmem [shape: f32[2,1,64], index: 4, kind: input, shape index: {}]   ;;  %s13949_s5 = inlined_call_operand.vmem [shape: f32[2,1,64], index: 5, kind: input, shape index: {}]   ;;  %s13950_s6 = inlined_call_operand.vmem [shape: f32[2,1,64], index: 6, kind: input, shape index: {}]   ;;  %s13951_s7 = inlined_call_operand.vmem [shape: bf16[2,64,2048], index: 7, kind: input, shape index: {}]   ;;  %s13952_s8 = inlined_call_operand.vmem [shape: f32[2,1,2048], index: 8, kind: input, shape index: {}]   ;;  %s13953_s9 = inlined_call_operand.vmem [shape: bf16[2,2048,64], index: 9, kind: input, shape index: {}]   ;;  %s13954_s10 = inlined_call_operand.vmem [shape: f32[2,1,64], index: 10, kind: input, shape index: {}]   ;;  %s13955_s11 = inlined_call_operand.vmem [shape: f32[2,1,64], index: 11, kind: input, shape index: {}]   ;;  %s13956_s12 = inlined_call_operand.vmem [shape: f32[2,1,64], index: 12, kind: input, shape index: {}]   ;;  %s13957_s13 = inlined_call_operand.hbm [shape: f32[64,64], index: 13, kind: output, shape index: {}]  }
   0x1   :  { %14007 = sst [smem:[#allocation36_spill]] %s13945_s1 }
   0x2   :  { %14008 = sst [smem:[#allocation37_spill]] %s13946_s2 }
   0x3   :  { %14009 = sst [smem:[#allocation38_spill]] %s13947_s3 }
   0x4   :  { %14010 = sst [smem:[#allocation39_spill]] %s13957_s13 }
   0x5   :  { %18 = vsyncpa [#allocation4], 0  ;;  %s10685_s25 = smov 0   ;;  %s10687_s26 = smov 0  }
   0x6   :  { %s10689_s27 = smov 0  }
   0x7 LB: > { %14011 = sst [smem:[#allocation6_spill]] %s10591_s26  ;;  %s33_s29 = sadd.s32 1, %s10591_s26  ;;  %s10595_s27 = sphi %s10689_s27, %s24_s27   ;;  %s10591_s26 = sphi %s10687_s26, %s14127_s26   ;;  %s10587_s25 = sphi %s10685_s25, %s14126_s25  }
   0x8   : > { %14012 = sst [smem:[#allocation7_spill]] %s10595_s27  ;;  %p34_p0 = scmp.ge.s32.totalorder %s33_s29, 2 }
   0x9   : > { %p8596_p1 = scmp.ge.s32.totalorder %s10595_s27, 1  ;;  %p507_p2 = scmp.lt.s32.totalorder %s10595_s27, 3 }
   0xa   : > { %s14129_s29 = smov (%p34_p0, %s33_s29), 0 }
   0xb   : > { %14013 = sst [smem:[#allocation8_spill]] %s14129_s29  ;;  %p508_p3 = pnand %p8596_p1, %p507_p2 }
   0xd   : > { %511 = sbr.rel (%p508_p3) target bundleno = 3082 (0xc0a), region = 72 }
  0x12   : > { %p598_p4 = scmp.lt.s32.totalorder %s10587_s25, 1  ;;  %s14014_s1 = sld [smem:[#allocation36_spill]] }
  0x13   : > { %s14015_s2 = sld [smem:[#allocation37_spill]]  ;;  %p8607_p5 = scmp.ne.s32.totalorder %s10587_s25, 0 }
  0x14   : > { %s10708_s30 = scalar_select %p598_p4, %s10587_s25, 1 }
  0x15   : > { %s14017_s3 = sld [smem:[#allocation38_spill]] }
  0x16   : > { %s9697_s14 = sshll.u32 %s10708_s30, 6  ;;  %s8599_s15 = sshll.u32 %s10708_s30, 1 }
  0x17   : > { %s9698_s22 = sshll.u32 %s10708_s30, 5  ;;  %s8604_s23 = sshll.u32 %s10708_s30, 4 }
  0x18   : > { %s10715_s18 = scalar_lea.vmem %s14014_s1, %s9697_s14  ;;  %s10750_s26 = scalar_lea.vmem %s13952_s8, %s8604_s23 }
  0x19   : > { %s10720_s21 = scalar_lea.vmem %s14015_s2, %s8599_s15  ;;  %s9699_s15 = sshll.u32 %s10708_s30, 9 }
  0x1a   : > { %14016 = sst [smem:[#allocation9_spill]] %s10720_s21  ;;  %s10744_s21 = scalar_lea.vmem %s13951_s7, %s9699_s15 }
  0x1b   : > { %s10730_s13 = scalar_lea.vmem %s14017_s3, %s9698_s22  ;;  %s9700_s29 = sshll.u32 %s10708_s30, 10 }
  0x1c   : > { %s10756_s16 = scalar_lea.vmem %s13953_s9, %s9700_s29  ;;  %s637_s19 = scalar_lea.vmem %s13954_s10, %s10708_s30 }
  0x1d   : > { %s640_s15 = scalar_lea.vmem %s13955_s11, %s10708_s30  ;;  %s643_s28 = scalar_lea.vmem %s13956_s12, %s10708_s30 }
  0x1e   : > { %649 = sbr.rel (%p8607_p5) target bundleno = 44 (0x2c), region = 76 }
  0x23   : > { %v650_v0 = vld [vmem:[%s13944_s0] sm:$0xff]  ;;  %vm658_vm0 = vcmask 523264   ;;  %v651_v1 = vld [vmem:[%s13944_s0 + $0x8] sm:$0xff]  ;;  %v652_v2 = vld [vmem:[%s13944_s0 + $0x10] sm:$0xff] }
  0x24   : > { %659 = vst.msk [vmem:[#allocation2] sm:$0xff] %vm658_vm0, %v650_v0  ;;  %v653_v3 = vld [vmem:[%s13944_s0 + $0x18] sm:$0xff]  ;;  %v654_v4 = vld [vmem:[%s13944_s0 + $0x20] sm:$0xff]  ;;  %v655_v5 = vld [vmem:[%s13944_s0 + $0x28] sm:$0xff] }
  0x25   : > { %660 = vst.msk [vmem:[#allocation2 + $0x8] sm:$0xff] %vm658_vm0, %v651_v1  ;;  %v656_v6 = vld [vmem:[%s13944_s0 + $0x30] sm:$0xff]  ;;  %v657_v7 = vld [vmem:[%s13944_s0 + $0x38] sm:$0xff] }
  0x26   : > { %661 = vst.msk [vmem:[#allocation2 + $0x10] sm:$0xff] %vm658_vm0, %v652_v2 }
  0x27   : > { %662 = vst.msk [vmem:[#allocation2 + $0x18] sm:$0xff] %vm658_vm0, %v653_v3 }
  0x28   : > { %663 = vst.msk [vmem:[#allocation2 + $0x20] sm:$0xff] %vm658_vm0, %v654_v4 }
  0x29   : > { %664 = vst.msk [vmem:[#allocation2 + $0x28] sm:$0xff] %vm658_vm0, %v655_v5 }
  0x2a   : > { %665 = vst.msk [vmem:[#allocation2 + $0x30] sm:$0xff] %vm658_vm0, %v656_v6 }
  0x2b   : > { %666 = vst.msk [vmem:[#allocation2 + $0x38] sm:$0xff] %vm658_vm0, %v657_v7 }
  0x2c PF: > { %v8634_v8 = vld [vmem:[%s10715_s18 + $0x30] sm:$0xf]  ;;  %v9708_v9 = vld [vmem:[%s10715_s18 + $0x34] sm:$0xf0]  ;;  %v8626_v10 = vld [vmem:[%s10715_s18 + $0x20] sm:$0xf] }
  0x2d   : > { %v8635_v11 = vor.u32 %v9708_v9, %v8634_v8  ;;  %v9706_v12 = vld [vmem:[%s10715_s18 + $0x24] sm:$0xf0]  ;;  %v8618_v14 = vld [vmem:[%s10715_s18 + $0x10] sm:$0xf]  ;;  %v9704_v15 = vld [vmem:[%s10715_s18 + $0x14] sm:$0xf0] }
  0x2e   : > { %v8627_v13 = vor.u32 %v9706_v12, %v8626_v10  ;;  %v8619_v16 = vor.u32 %v9704_v15, %v8618_v14  ;;  %v8610_v17 = vld [vmem:[%s10715_s18] sm:$0xf]  ;;  %v9702_v18 = vld [vmem:[%s10715_s18 + $0x4] sm:$0xf0]  ;;  %s14018_s1 = sld [smem:[#allocation9_spill]]  ;;  %vm733_vm1 = vcmask 523264  }
  0x2f   : > { %750 = vmatpush.bf16.msra.mxu0 %v8635_v11  ;;  %9905 = vmatpush.bf16.msra.mxu1 %v8635_v11  ;;  %v667_v19 = vld [vmem:[#allocation2] sm:$0xff]  ;;  %v8611_v20 = vor.u32 %v9702_v18, %v8610_v17  ;;  %v668_v21 = vld [vmem:[#allocation2 + $0x8] sm:$0xff]  ;;  %v669_v28 = vld [vmem:[#allocation2 + $0x10] sm:$0xff]  ;;  %s10597_s14 = smov 120   ;;  %s10598_s3 = smov 64   ;;  %vm1102_vm2 = vcmask 64512  }
  0x30   : > { %v671_v22 = vld [vmem:[#allocation2 + $0x20] sm:$0xff]  ;;  %v672_v23 = vld [vmem:[#allocation2 + $0x28] sm:$0xff]  ;;  %v10803_v24 = vpack.c.bf16 %v668_v21, %v667_v19  ;;  %v670_v29 = vld [vmem:[#allocation2 + $0x18] sm:$0xff]  ;;  %s10599_s17 = smov 104   ;;  %s10600_s2 = smov 112   ;;  %vm5237_vm3 = vcmask 130048  }
  0x31   : > { %v10805_v25 = vpack.c.bf16 %v672_v23, %v671_v22  ;;  %v673_v26 = vld [vmem:[#allocation2 + $0x30] sm:$0xff]  ;;  %v10813_v31 = vpack.c.bf16 %v670_v29, %v669_v28  ;;  %s10601_s20 = smov 80   ;;  %s10602_s23 = smov 96   ;;  %v8636_v53 = vld [vmem:[%s10715_s18 + $0x38] sm:$0xf0]  ;;  %vm5246_vm4 = vcmask 195584  }
  0x32   : > { %v674_v27 = vld [vmem:[#allocation2 + $0x38] sm:$0xff]  ;;  %s10603_s24 = smov 88   ;;  %s10604_s29 = smov 72   ;;  %v9707_v52 = vld [vmem:[%s10715_s18 + $0x34] sm:$0xf]  ;;  %vm5255_vm5 = vcmask 261120  }
  0x33   : > { %751 = vmatpush.bf16.msra.mxu0 %v8627_v13  ;;  %9906 = vmatpush.bf16.msra.mxu1 %v8627_v13  ;;  %v10811_v30 = vpack.c.bf16 %v674_v27, %v673_v26  ;;  %v8639_v54 = vor.u32 %v9707_v52, %v8636_v53  ;;  %v9705_v55 = vld [vmem:[%s10715_s18 + $0x24] sm:$0xf]  ;;  %v8628_v56 = vld [vmem:[%s10715_s18 + $0x28] sm:$0xf0]  ;;  %v9703_v59 = vld [vmem:[%s10715_s18 + $0x14] sm:$0xf] }
  0x34   : > { %v10820_v32 = vld [vmem:[%s14018_s1] sm:$0x3]  ;;  %v8631_v58 = vor.u32 %v9705_v55, %v8628_v56  ;;  %v8620_v60 = vld [vmem:[%s10715_s18 + $0x18] sm:$0xf0]  ;;  %v9701_v62 = vld [vmem:[%s10715_s18 + $0x4] sm:$0xf] }
  0x35   : > { %v689_v33 = vperm.slane %v10820_v32, 0  ;;  %v8623_v61 = vor.u32 %v9703_v59, %v8620_v60  ;;  %v8612_v63 = vld [vmem:[%s10715_s18 + $0x8] sm:$0xf0]  ;;  %s10605_s18 = smov 8   ;;  %s10606_s22 = smov 24   ;;  %vm5264_vm6 = vcmask 326656  }
  0x36   : > { %v8615_v2 = vor.u32 %v9701_v62, %v8612_v63  ;;  %s10607_s27 = smov 40   ;;  %s10608_s1 = smov 16   ;;  %vm5273_vm7 = vcmask 392192   ;;  %vm5282_vm8 = vcmask 457728  }
  0x37   : > { %752 = vmatpush.bf16.msra.mxu0 %v8619_v16  ;;  %9907 = vmatpush.bf16.msra.mxu1 %v8619_v16  ;;  %p9692_p6 = scmp.ne.s32.totalorder %s10587_s25, 1 }
  0x3b   : > { %753 = vmatpush.bf16.msra.mxu0 %v8611_v20  ;;  %9908 = vmatpush.bf16.msra.mxu1 %v8611_v20 }
  0x3e   : > { %8640 = vmatmul.msk.bf16.vlgmr.msra.gmra.mxu0 %vm733_vm1, %v10803_v24  ;;  %8642 = vmatmul.msk.bf16.vlgmr.msra.gmra.mxu1 %vm733_vm1, %v10805_v25 }
  0x3f   : > { %779 = vmatpush.bf16.msrb.mxu1 %v8639_v54 }
  0x43   : > { %780 = vmatpush.bf16.msrb.mxu1 %v8631_v58 }
  0x47   : > { %781 = vmatpush.bf16.msrb.mxu1 %v8623_v61 }
  0x4b   : > { %782 = vmatpush.bf16.msrb.mxu1 %v8615_v2 }
  0x4e   : > { %8643 = vmatmul.msk.bf16.gmra.mxu1 %vm733_vm1, %v10811_v30  ;;  %8641 = vmatmul.msk.bf16.gmra.mxu0 %vm733_vm1, %v10813_v31 }
  0x5e   : > { %8644 = vmatmul.msk.bf16.vlgmr.msrb.gmra.mxu1 %vm733_vm1, %v10803_v24 }
  0x6e   : > { %8645 = vmatmul.msk.bf16.gmra.mxu1 %vm733_vm1, %v10813_v31 }
  0x7e   : > { %8646 = vmatmul.msk.bf16.gmra.mxu1 %vm733_vm1, %v10805_v25 }
  0x8e   : > { %8647 = vmatmul.msk.bf16.gmra.mxu1 %vm733_vm1, %v10811_v30 }
  0xbb   : > { %v755_v34 = vpop.f32.mrf.mxu0  ;;  %v765_v35 = vpop.f32.mrf.mxu1 }
  0xbc   : > { %v10823_v36 = vadd.f32 %v755_v34, %v689_v33  ;;  %v10825_v37 = vadd.f32 %v765_v35, %v689_v33 }
  0xbe   : > { %820 = vrot.lane.b32.xlu2 %v10825_v37, %s10597_s14  ;;  %1100 = vrot.lane.b32.xlu1 %v10823_v36, %s10598_s3 }
  0xbf   : > { %812 = vrot.lane.b32.xlu0 %v10823_v36, %s10597_s14 }
  0xc3   : > { %v757_v38 = vpop.f32.mrf.mxu0  ;;  %v767_v40 = vpop.f32.mrf.mxu1 }
  0xc4   : > { %v10845_v39 = vadd.f32 %v757_v38, %v689_v33  ;;  %v10853_v41 = vadd.f32 %v767_v40, %v689_v33 }
  0xc6   : > { %844 = vrot.lane.b32.xlu2 %v10823_v36, %s10599_s17  ;;  %1205 = vrot.lane.b32.xlu1 %v10825_v37, %s10598_s3 }
  0xc7   : > { %836 = vrot.lane.b32.xlu0 %v10825_v37, %s10600_s2 }
  0xcb   : > { %v770_v42 = vpop.f32.mrf.mxu1  ;;  %v760_v44 = vpop.f32.mrf.mxu0 }
  0xcc   : > { %v10873_v43 = vadd.f32 %v770_v42, %v689_v33  ;;  %v10903_v49 = vadd.f32 %v760_v44, %v689_v33 }
  0xce   : > { %852 = vrot.lane.b32.xlu2 %v10825_v37, %s10599_s17  ;;  %828 = vrot.lane.b32.xlu1 %v10823_v36, %s10600_s2 }
  0xcf   : > { %900 = vrot.lane.b32.xlu0 %v10825_v37, %s10601_s20 }
  0xd3   : > { %v762_v45 = vpop.f32.mrf.mxu0  ;;  %v772_v47 = vpop.f32.mrf.mxu1 }
  0xd4   : > { %v10887_v46 = vadd.f32 %v762_v45, %v689_v33  ;;  %v10895_v48 = vadd.f32 %v772_v47, %v689_v33 }
  0xd6   : > { %860 = vrot.lane.b32.xlu2 %v10823_v36, %s10602_s23  ;;  %892 = vrot.lane.b32.xlu1 %v10823_v36, %s10601_s20 }
  0xd7   : > { %814 = vrot.lane.b32.xlu0 %v10845_v39, %s10597_s14 }
  0xdb   : > { %v11176_v63 = vpop.f32.mrf.mxu1 }
  0xde   : > { %868 = vrot.lane.b32.xlu2 %v10825_v37, %s10602_s23  ;;  %1127 = vrot.lane.b32.xlu1 %v10845_v39, %s10598_s3 }
  0xdf   : > { %822 = vrot.lane.b32.xlu0 %v10853_v41, %s10597_s14 }
  0xe3   : > { %v11187_v2 = vpop.f32.mrf.mxu1 }
  0xe6   : > { %876 = vrot.lane.b32.xlu2 %v10823_v36, %s10603_s24  ;;  %838 = vrot.lane.b32.xlu1 %v10853_v41, %s10600_s2 }
  0xe7   : > { %846 = vrot.lane.b32.xlu0 %v10845_v39, %s10599_s17 }
  0xee   : > { %884 = vrot.lane.b32.xlu2 %v10825_v37, %s10603_s24  ;;  %902 = vrot.lane.b32.xlu1 %v10853_v41, %s10601_s20 }
  0xef   : > { %854 = vrot.lane.b32.xlu0 %v10853_v41, %s10599_s17 }
  0xf6   : > { %908 = vrot.lane.b32.xlu2 %v10823_v36, %s10604_s29  ;;  %840 = vrot.lane.b32.xlu1 %v10873_v43, %s10600_s2 }
  0xf7   : > { %862 = vrot.lane.b32.xlu0 %v10845_v39, %s10602_s23 }
  0xfe   : > { %1231 = vrot.lane.b32.xlu2 %v10853_v41, %s10598_s3  ;;  %904 = vrot.lane.b32.xlu1 %v10873_v43, %s10601_s20 }
  0xff   : > { %870 = vrot.lane.b32.xlu0 %v10853_v41, %s10602_s23 }
 0x106   : > { %830 = vrot.lane.b32.xlu2 %v10845_v39, %s10600_s2  ;;  %1179 = vrot.lane.b32.xlu1 %v10887_v46, %s10598_s3 }
 0x107   : > { %878 = vrot.lane.b32.xlu0 %v10845_v39, %s10603_s24 }
 0x10e   : > { %894 = vrot.lane.b32.xlu2 %v10845_v39, %s10601_s20  ;;  %826 = vrot.lane.b32.xlu1 %v10895_v48, %s10597_s14 }
 0x10f   : > { %886 = vrot.lane.b32.xlu0 %v10853_v41, %s10603_s24 }
 0x116   : > { %816 = vrot.lane.b32.xlu2 %v10903_v49, %s10597_s14  ;;  %850 = vrot.lane.b32.xlu1 %v10887_v46, %s10599_s17 }
 0x117   : > { %1153 = vrot.lane.b32.xlu0 %v10903_v49, %s10598_s3 }
 0x118   : > { %v10911_v50 = vpop.permute.xlu2 %820 }
 0x11e   : > { %1257 = vrot.lane.b32.xlu2 %v10873_v43, %s10598_s3  ;;  %858 = vrot.lane.b32.xlu1 %v10895_v48, %s10599_s17 }
 0x11f   : > { %824 = vrot.lane.b32.xlu0 %v10873_v43, %s10597_s14 }
 0x120   : > { %v10919_v51 = vpop.permute.xlu2 %844 }
 0x126   : > { %832 = vrot.lane.b32.xlu2 %v10903_v49, %s10600_s2  ;;  %866 = vrot.lane.b32.xlu1 %v10887_v46, %s10602_s23 }
 0x127   : > { %848 = vrot.lane.b32.xlu0 %v10903_v49, %s10599_s17 }
 0x128   : > { %v10931_v57 = vpop.permute.xlu2 %852 }
 0x12e   : > { %896 = vrot.lane.b32.xlu2 %v10903_v49, %s10601_s20  ;;  %874 = vrot.lane.b32.xlu1 %v10895_v48, %s10602_s23 }
 0x12f   : > { %856 = vrot.lane.b32.xlu0 %v10873_v43, %s10599_s17 }
 0x130   : > { %v10943_v0 = vpop.permute.xlu2 %860  ;;  %v1101_v1 = vpop.permute.xlu1 %1100 }
 0x131   : > { %v10945_v3 = vpop.permute.xlu0 %812  ;;  %8648 = vmatpush.xpose.msk.msra.mxu2 %vm1102_vm2, %v1101_v1 }
 0x134   : > { %8649 = vmatmul.msk.f32.vlgmr.msra.gmra.mxu2 %vm1102_vm2, %v10823_v36 }
 0x136   : > { %818 = vrot.lane.b32.xlu2 %v10887_v46, %s10597_s14  ;;  %882 = vrot.lane.b32.xlu1 %v10887_v46, %s10603_s24 }
 0x137   : > { %864 = vrot.lane.b32.xlu0 %v10903_v49, %s10602_s23 }
 0x138   : > { %v10958_v4 = vpop.permute.xlu2 %868  ;;  %v10960_v5 = vpop.permute.xlu1 %1205 }
 0x139   : > { %v10962_v6 = vpop.permute.xlu0 %836 }
 0x13e   : > { %842 = vrot.lane.b32.xlu2 %v10895_v48, %s10600_s2  ;;  %890 = vrot.lane.b32.xlu1 %v10895_v48, %s10603_s24 }
 0x13f   : > { %872 = vrot.lane.b32.xlu0 %v10873_v43, %s10602_s23 }
 0x140   : > { %v10970_v7 = vpop.permute.xlu2 %876  ;;  %v10972_v8 = vpop.permute.xlu1 %828 }
 0x141   : > { %v10974_v9 = vpop.permute.xlu0 %900 }
 0x146   : > { %918 = vrot.lane.b32.xlu2 %v10853_v41, %s10604_s29  ;;  %916 = vrot.lane.b32.xlu1 %v10825_v37, %s10604_s29 }
 0x147   : > { %880 = vrot.lane.b32.xlu0 %v10903_v49, %s10603_s24 }
 0x148   : > { %v10984_v10 = vpop.permute.xlu2 %884  ;;  %v10986_v11 = vpop.permute.xlu1 %892 }
 0x149   : > { %v10988_v12 = vpop.permute.xlu0 %814 }
 0x14e   : > { %906 = vrot.lane.b32.xlu2 %v10895_v48, %s10601_s20  ;;  %914 = vrot.lane.b32.xlu1 %v10887_v46, %s10604_s29 }
 0x14f   : > { %888 = vrot.lane.b32.xlu0 %v10873_v43, %s10603_s24 }
 0x150   : > { %v10996_v13 = vpop.permute.xlu2 %908  ;;  %v1128_v14 = vpop.permute.xlu1 %1127 }
 0x151   : > { %v10998_v15 = vpop.permute.xlu0 %822  ;;  %8650 = vmatpush.xpose.msk.msra.mxu3 %vm1102_vm2, %v1128_v14 }
 0x154   : > { %8651 = vmatmul.msk.f32.vlgmr.msra.gmra.mxu3 %vm1102_vm2, %v10845_v39 }
 0x156   : > { %1413 = vrot.lane.b32.xlu2 %v10911_v50, %s10598_s3  ;;  %1517 = vrot.lane.b32.xlu1 %v10972_v8, %s10598_s3 }
 0x157   : > { %1283 = vrot.lane.b32.xlu0 %v10895_v48, %s10598_s3 }
 0x158   : > { %v1232_v16 = vpop.permute.xlu2 %1231  ;;  %v11011_v17 = vpop.permute.xlu1 %838 }
 0x159   : > { %v11013_v18 = vpop.permute.xlu0 %846 }
 0x15e   : > { %1829 = vrot.lane.b32.xlu2 %v10931_v57, %s10598_s3  ;;  %1621 = vrot.lane.b32.xlu1 %v10962_v6, %s10598_s3 }
 0x15f   : > { %834 = vrot.lane.b32.xlu0 %v10887_v46, %s10600_s2 }
 0x160   : > { %v11021_v19 = vpop.permute.xlu2 %830  ;;  %v11023_v20 = vpop.permute.xlu1 %902 }
 0x161   : > { %v11025_v21 = vpop.permute.xlu0 %854 }
 0x166   : > { %2141 = vrot.lane.b32.xlu2 %v10970_v7, %s10598_s3  ;;  %1725 = vrot.lane.b32.xlu1 %v10919_v51, %s10598_s3 }
 0x167   : > { %898 = vrot.lane.b32.xlu0 %v10887_v46, %s10601_s20 }
 0x168   : > { %v11035_v22 = vpop.permute.xlu2 %894  ;;  %v11037_v23 = vpop.permute.xlu1 %840 }
 0x169   : > { %v11039_v24 = vpop.permute.xlu0 %862 }
 0x16e   : > { %1933 = vrot.lane.b32.xlu1 %v10943_v0, %s10598_s3  ;;  %2453 = vrot.lane.b32.xlu2 %v10974_v9, %s10598_s3 }
 0x16f   : > { %910 = vrot.lane.b32.xlu0 %v10845_v39, %s10604_s29 }
 0x170   : > { %v11047_v25 = vpop.permute.xlu2 %816  ;;  %v11049_v26 = vpop.permute.xlu1 %904 }
 0x171   : > { %14019 = vst [vmem:[#allocation10_spill] sm:$0xff] %v11049_v26  ;;  %v11051_v27 = vpop.permute.xlu0 %870 }
 0x176   : > { %2349 = vrot.lane.b32.xlu1 %v10986_v11, %s10598_s3  ;;  %1543 = vrot.lane.b32.xlu2 %v11021_v19, %s10598_s3 }
 0x177   : > { %912 = vrot.lane.b32.xlu0 %v10903_v49, %s10604_s29 }
 0x178   : > { %v1258_v28 = vpop.permute.xlu2 %1257  ;;  %v1180_v29 = vpop.permute.xlu1 %1179 }
 0x179   : > { %v11059_v30 = vpop.permute.xlu0 %878  ;;  %8654 = vmatpush.xpose.msk.msrb.mxu3 %vm1102_vm2, %v1180_v29 }
 0x17c   : > { %8655 = vmatmul.msk.f32.vlgmr.msrb.gmra.mxu3 %vm1102_vm2, %v10887_v46 }
 0x17d   : > { %8658 = vmatpush.xpose.msk.msra.mxu3 %vm1102_vm2, %v1232_v16 }
 0x17e   : > { %1647 = vrot.lane.b32.xlu2 %v11011_v17, %s10598_s3  ;;  %1335 = vrot.lane.b32.xlu1 %v10988_v12, %s10598_s3 }
 0x17f   : > { %1309 = vrot.lane.b32.xlu0 %v10945_v3, %s10598_s3 }
 0x180   : > { %v11071_v31 = vpop.permute.xlu2 %832  ;;  %v11073_v33 = vpop.permute.xlu1 %826 }
 0x181   : > { %v11075_v34 = vpop.permute.xlu0 %886 }
 0x184   : > { %8659 = vmatmul.msk.f32.vlgmr.msra.gmra.mxu3 %vm1102_vm2, %v10853_v41 }
 0x186   : > { %1751 = vrot.lane.b32.xlu2 %v11013_v18, %s10598_s3  ;;  %2063 = vrot.lane.b32.xlu1 %v11051_v27, %s10598_s3 }
 0x187   : > { %2037 = vrot.lane.b32.xlu0 %v10958_v4, %s10598_s3 }
 0x188   : > { %v11085_v35 = vpop.permute.xlu2 %896  ;;  %v11087_v36 = vpop.permute.xlu1 %850 }
 0x189   : > { %14020 = vst [vmem:[#allocation11_spill] sm:$0xff] %v11085_v35  ;;  %v1154_v38 = vpop.permute.xlu0 %1153 }
 0x18a   : > { %8652 = vmatpush.xpose.msk.msrb.mxu2 %vm1102_vm2, %v1154_v38 }
 0x18d   : > { %8653 = vmatmul.msk.f32.vlgmr.msrb.gmra.mxu2 %vm1102_vm2, %v10903_v49 }
 0x18e   : > { %8656 = vmatpush.xpose.msk.msra.mxu2 %vm1102_vm2, %v10960_v5  ;;  %1959 = vrot.lane.b32.xlu2 %v11039_v24, %s10598_s3 }
 0x18f   : > { %2245 = vrot.lane.b32.xlu0 %v10984_v10, %s10598_s3  ;;  %2271 = vrot.lane.b32.xlu1 %v11075_v34, %s10598_s3 }
 0x190   : > { %v11101_v39 = vpop.permute.xlu2 %818  ;;  %v11103_v40 = vpop.permute.xlu1 %858 }
 0x191   : > { %v11105_v41 = vpop.permute.xlu0 %824 }
 0x192   : > { %8660 = vmatpush.xpose.msk.msrb.mxu2 %vm1102_vm2, %v1258_v28  ;;  %v789_v28 = vpop.f32.mrf.mxu1 }
 0x195   : > { %8657 = vmatmul.msk.f32.vlgmr.msra.gmra.mxu2 %vm1102_vm2, %v10825_v37 }
 0x196   : > { %2375 = vrot.lane.b32.xlu2 %v11035_v22, %s10598_s3 }
 0x197   : > { %1439 = vrot.lane.b32.xlu0 %v10998_v15, %s10598_s3  ;;  %1361 = vrot.lane.b32.xlu1 %v11047_v25, %s10598_s3 }
 0x198   : > { %v11115_v42 = vpop.permute.xlu2 %842  ;;  %v11117_v44 = vpop.permute.xlu1 %866 }
 0x199   : > { %v11119_v45 = vpop.permute.xlu0 %848 }
 0x19d   : > { %8661 = vmatmul.msk.f32.vlgmr.msrb.gmra.mxu2 %vm1102_vm2, %v10873_v43 }
 0x19f   : > { %1855 = vrot.lane.b32.xlu0 %v11025_v21, %s10598_s3  ;;  %1569 = vrot.lane.b32.xlu1 %v11071_v31, %s10598_s3 }
 0x1a0   : > { %v11127_v37 = vpop.permute.xlu2 %918  ;;  %v11129_v46 = vpop.permute.xlu1 %874 }
 0x1a1   : > { %14021 = vst [vmem:[#allocation12_spill] sm:$0xff] %v11129_v46  ;;  %v11131_v47 = vpop.permute.xlu0 %856 }
 0x1a7   : > { %2167 = vrot.lane.b32.xlu0 %v11059_v30, %s10598_s3  ;;  %1673 = vrot.lane.b32.xlu1 %v11037_v23, %s10598_s3 }
 0x1a8   : > { %v11137_v49 = vpop.permute.xlu2 %906  ;;  %v11139_v52 = vpop.permute.xlu1 %882 }
 0x1a9   : > { %14022 = vst [vmem:[#allocation13_spill] sm:$0xff] %v11137_v49  ;;  %v11141_v53 = vpop.permute.xlu0 %864 }
 0x1aa   : > { %1985 = vrot.lane.b32.xlu2 %v11141_v53, %s10598_s3 }
 0x1af   : > { %2479 = vrot.lane.b32.xlu0 %v11023_v20, %s10598_s3  ;;  %1777 = vrot.lane.b32.xlu1 %v11119_v45, %s10598_s3 }
 0x1b0   : > { %v11149_v54 = vpop.permute.xlu2 %1413  ;;  %v11151_v55 = vpop.permute.xlu1 %890 }
 0x1b1   : > { %14023 = vst [vmem:[#allocation14_spill] sm:$0xff] %v11151_v55  ;;  %v11153_v56 = vpop.permute.xlu0 %872 }
 0x1b7   : > { %1465 = vrot.lane.b32.xlu0 %v11105_v41, %s10598_s3  ;;  %2089 = vrot.lane.b32.xlu1 %v11153_v56, %s10598_s3 }
 0x1b8   : > { %v1830_v58 = vpop.permute.xlu2 %1829  ;;  %v11159_v59 = vpop.permute.xlu1 %916 }
 0x1b9   : > { %v11161_v60 = vpop.permute.xlu0 %880  ;;  %8704 = vmatpush.xpose.msk.msrb.mxu0 %vm1102_vm2, %v1830_v58 }
 0x1ba   : > { %14024 = vst [vmem:[#allocation15_spill] sm:$0xff] %v11161_v60 }
 0x1bc   : > { %8705 = vmatmul.msk.f32.vlgmr.msrb.gmra.mxu0 %vm1102_vm2, %v10931_v57 }
 0x1bf   : > { %1881 = vrot.lane.b32.xlu0 %v11131_v47, %s10598_s3  ;;  %2193 = vrot.lane.b32.xlu1 %v11161_v60, %s10598_s3 }
 0x1c0   : > { %v11170_v61 = vpop.permute.xlu1 %914  ;;  %v2142_v5 = vpop.permute.xlu2 %2141 }
 0x1c1   : > { %14025 = vst [vmem:[#allocation16_spill] sm:$0xff] %v11170_v61  ;;  %v11172_v62 = vpop.permute.xlu0 %888 }
 0x1c2   : > { %14026 = vst [vmem:[#allocation17_spill] sm:$0xff] %v11172_v62  ;;  %2297 = vrot.lane.b32.xlu2 %v11172_v62, %s10598_s3 }
 0x1c7   : > { %2401 = vrot.lane.b32.xlu0 %v11085_v35, %s10598_s3  ;;  %1491 = vrot.lane.b32.xlu1 %v11073_v33, %s10598_s3  ;;  %v791_v35 = vpop.f32.mrf.mxu1 }
 0x1c8   : > { %v11182_v57 = vpop.permute.xlu1 %1517  ;;  %v2454_v58 = vpop.permute.xlu2 %2453 }
 0x1c9   : > { %v1284_v1 = vpop.permute.xlu0 %1283 }
 0x1ca   : > { %1387 = vrot.lane.b32.xlu2 %v11101_v39, %s10598_s3  ;;  %8662 = vmatpush.xpose.msk.msrb.mxu3 %vm1102_vm2, %v1284_v1 }
 0x1cd   : > { %8663 = vmatmul.msk.f32.vlgmr.msrb.gmra.mxu3 %vm1102_vm2, %v10895_v48 }
 0x1cf   : > { %2011 = vrot.lane.b32.xlu0 %v11117_v44, %s10598_s3  ;;  %1907 = vrot.lane.b32.xlu1 %v11103_v40, %s10598_s3 }
 0x1d0   : > { %v11195_v14 = vpop.permute.xlu1 %1621 }
 0x1d1   : > { %v11197_v16 = vpop.permute.xlu0 %834 }
 0x1d2   : > { %1595 = vrot.lane.b32.xlu2 %v11197_v16, %s10598_s3 }
 0x1d7   : > { %2323 = vrot.lane.b32.xlu0 %v11151_v55, %s10598_s3  ;;  %v11220_v55 = vpop.permute.xlu2 %1543 }
 0x1d8   : > { %v11203_v29 = vpop.permute.xlu1 %1725 }
 0x1d9   : > { %v11205_v38 = vpop.permute.xlu0 %898 }
 0x1da   : > { %14027 = vst [vmem:[#allocation18_spill] sm:$0xff] %v11205_v38  ;;  %1699 = vrot.lane.b32.xlu2 %v11115_v42, %s10598_s3  ;;  %2427 = vrot.lane.b32.xlu1 %v11205_v38, %s10598_s3 }
 0x1df   : > { %2505 = vrot.lane.b32.xlu0 %v11049_v26, %s10598_s3  ;;  %v11232_v60 = vpop.permute.xlu2 %1647 }
 0x1e0   : > { %v1934_v1 = vpop.permute.xlu1 %1933 }
 0x1e1   : > { %v11213_v62 = vpop.permute.xlu0 %910  ;;  %8712 = vmatpush.xpose.msk.msra.mxu0 %vm1102_vm2, %v1934_v1  ;;  %v794_v1 = vpop.f32.mrf.mxu1 }
 0x1e2   : > { %1803 = vrot.lane.b32.xlu2 %v11087_v36, %s10598_s3  ;;  %2531 = vrot.lane.b32.xlu1 %v11137_v49, %s10598_s3 }
 0x1e4   : > { %8713 = vmatmul.msk.f32.vlgmr.msra.gmra.mxu0 %vm1102_vm2, %v10943_v0 }
 0x1e7   : > { %922 = vrot.lane.b32.xlu0 %v10895_v48, %s10604_s29  ;;  %v11242_v48 = vperm.slane %v10820_v32, 1  ;;  %v11257_v32 = vpop.permute.xlu2 %1751 }
 0x1e8   : > { %v2350_v38 = vpop.permute.xlu1 %2349 }
 0x1e9   : > { %v11226_v26 = vpop.permute.xlu0 %912 }
 0x1ea   : > { %14028 = vst [vmem:[#allocation19_spill] sm:$0xff] %v11226_v26  ;;  %2115 = vrot.lane.b32.xlu2 %v11129_v46, %s10598_s3  ;;  %2557 = vrot.lane.b32.xlu1 %v10996_v13, %s10598_s3  ;;  %v796_v46 = vpop.f32.mrf.mxu1 }
 0x1ef   : > { %2609 = vrot.lane.b32.xlu0 %v11226_v26, %s10598_s3 }
 0x1f0   : > { %v1336_v49 = vpop.permute.xlu1 %1335 }
 0x1f1   : > { %v1310_v0 = vpop.permute.xlu0 %1309  ;;  %8666 = vmatpush.xpose.msk.msra.mxu3 %vm1102_vm2, %v1336_v49  ;;  %v11250_v49 = vadd.f32 %v794_v1, %v11242_v48 }
 0x1f2   : > { %2219 = vrot.lane.b32.xlu2 %v11139_v52, %s10598_s3  ;;  %2635 = vrot.lane.b32.xlu1 %v11170_v61, %s10598_s3  ;;  %v11255_v61 = vadd.f32 %v796_v46, %v11242_v48  ;;  %v11273_v46 = vadd.f32 %v791_v35, %v11242_v48 }
 0x1f3   : > { %8664 = vmatpush.xpose.msk.msra.mxu2 %vm1102_vm2, %v1310_v0 }
 0x1f4   : > { %8667 = vmatmul.msk.f32.vlgmr.msra.gmra.mxu3 %vm1102_vm2, %v10988_v12  ;;  %v11270_v12 = vadd.f32 %v789_v28, %v11242_v48 }
 0x1f6   : > { %8665 = vmatmul.msk.f32.vlgmr.msra.gmra.mxu2 %vm1102_vm2, %v10945_v3  ;;  %v11265_v3 = vpack.i.bf16 %v11255_v61, %v11250_v49 }
 0x1f7   : > { %2687 = vrot.lane.b32.xlu0 %v11127_v37, %s10598_s3 }
 0x1f8   : > { %v2064_v26 = vpop.permute.xlu1 %2063 }
 0x1f9   : > { %v2038_v0 = vpop.permute.xlu0 %2037 }
 0x1fa   : > { %920 = vrot.lane.b32.xlu2 %v10873_v43, %s10604_s29  ;;  %8720 = vmatpush.xpose.msk.msrb.mxu0 %vm1102_vm2, %v2038_v0  ;;  %v1960_v0 = vpop.permute.xlu2 %1959 }
 0x1fd   : > { %8721 = vmatmul.msk.f32.vlgmr.msrb.gmra.mxu0 %vm1102_vm2, %v10958_v4  ;;  %v11282_v4 = vpack.i.bf16 %v11273_v46, %v11270_v12 }
 0x1fe   : > { %8728 = vmatpush.xpose.msk.msra.mxu0 %vm1102_vm2, %v2142_v5 }
 0x1ff   : > { %9963 = vrot.lane.b32.xlu0 %v11265_v3, %s10597_s14  ;;  %14029 = vst [vmem:[#allocation20_spill] sm:$0xff] %v11282_v4 }
 0x201   : > { %v2272_v43 = vpop.permute.xlu1 %2271  ;;  %v2246_v1 = vpop.permute.xlu0 %2245 }
 0x202   : > { %2583 = vrot.lane.b32.xlu2 %v11213_v62, %s10598_s3  ;;  %8736 = vmatpush.xpose.msk.msrb.mxu0 %vm1102_vm2, %v2246_v1  ;;  %v2376_v28 = vpop.permute.xlu2 %2375 }
 0x205   : > { %8729 = vmatmul.msk.f32.vlgmr.msra.gmra.mxu0 %vm1102_vm2, %v10970_v7 }
 0x206   : > { %8744 = vmatpush.xpose.msk.msra.mxu0 %vm1102_vm2, %v2350_v38 }
 0x207   : > { %9968 = vrot.lane.b32.xlu0 %v11282_v4, %s10597_s14 }
 0x209   : > { %v1362_v35 = vpop.permute.xlu1 %1361  ;;  %v1440_v5 = vpop.permute.xlu0 %1439 }
 0x20a   : > { %2661 = vrot.lane.b32.xlu2 %v11159_v59, %s10598_s3  ;;  %8668 = vmatpush.xpose.msk.msrb.mxu2 %vm1102_vm2, %v1362_v35  ;;  %v11301_v1 = vpop.permute.xlu2 %1985 }
 0x20d   : > { %8669 = vmatmul.msk.f32.vlgmr.msrb.gmra.mxu2 %vm1102_vm2, %v11047_v25  ;;  %8737 = vmatmul.msk.f32.vlgmr.msrb.gmra.mxu0 %vm1102_vm2, %v10984_v10 }
 0x20e   : > { %8672 = vmatpush.xpose.msk.msra.mxu2 %vm1102_vm2, %v11149_v54  ;;  %8752 = vmatpush.xpose.msk.msrb.mxu0 %vm1102_vm2, %v2454_v58 }
 0x211   : > { %v1570_v7 = vpop.permute.xlu1 %1569  ;;  %v1856_v38 = vpop.permute.xlu0 %1855 }
 0x212   : > { %8706 = vmatpush.xpose.msk.msra.mxu1 %vm1102_vm2, %v1856_v38 }
 0x215   : > { %8673 = vmatmul.msk.f32.vlgmr.msra.gmra.mxu2 %vm1102_vm2, %v10911_v50  ;;  %8707 = vmatmul.msk.f32.vlgmr.msra.gmra.mxu1 %vm1102_vm2, %v11025_v21 }
 0x216   : > { %8714 = vmatpush.xpose.msk.msrb.mxu1 %vm1102_vm2, %v1960_v0  ;;  %8745 = vmatmul.msk.f32.vlgmr.msra.gmra.mxu0 %vm1102_vm2, %v10986_v11  ;;  %v1124_v11 = vpop.f32.mrf.mxu2 }
 0x219   : > { %v1674_v10 = vpop.permute.xlu1 %1673  ;;  %v2168_v25 = vpop.permute.xlu0 %2167 }
 0x21a   : > { %8722 = vmatpush.xpose.msk.msra.mxu1 %vm1102_vm2, %v2064_v26 }
 0x21c   : > { %v11310_v54 = vpop.permute.xlu2 %2297 }
 0x21d   : > { %8715 = vmatmul.msk.f32.vlgmr.msrb.gmra.mxu1 %vm1102_vm2, %v11039_v24 }
 0x21e   : > { %8730 = vmatpush.xpose.msk.msrb.mxu1 %vm1102_vm2, %v2168_v25  ;;  %8753 = vmatmul.msk.f32.vlgmr.msrb.gmra.mxu0 %vm1102_vm2, %v10974_v9  ;;  %v11329_v9 = vmul.f32 0.35355338, %v1124_v11 }
 0x221   : > { %v1778_v50 = vpop.permute.xlu1 %1777  ;;  %v2480_v58 = vpop.permute.xlu0 %2479 }
 0x224   : > { %v1388_v21 = vpop.permute.xlu2 %1387 }
 0x225   : > { %8670 = vmatpush.xpose.msk.msrb.mxu3 %vm1102_vm2, %v1388_v21  ;;  %8723 = vmatmul.msk.f32.vlgmr.msra.gmra.mxu1 %vm1102_vm2, %v11051_v27  ;;  %v2829_v27 = vsel %vm1102_vm2, %v11329_v9, -inf }
 0x226   : > { %8738 = vmatpush.xpose.msk.msra.mxu1 %vm1102_vm2, %v2272_v43 }
 0x228   : > { %8671 = vmatmul.msk.f32.vlgmr.msrb.gmra.mxu3 %vm1102_vm2, %v11101_v39 }
 0x229   : > { %8674 = vmatpush.xpose.msk.msra.mxu3 %vm1102_vm2, %v1440_v5  ;;  %v11324_v24 = vpop.permute.xlu1 %2089  ;;  %v1466_v26 = vpop.permute.xlu0 %1465 }
 0x22a   : > { %8676 = vmatpush.xpose.msk.msrb.mxu2 %vm1102_vm2, %v1466_v26 }
 0x22c   : > { %v1596_v0 = vpop.permute.xlu2 %1595 }
 0x22d   : > { %8677 = vmatmul.msk.f32.vlgmr.msrb.gmra.mxu2 %vm1102_vm2, %v11105_v41  ;;  %8731 = vmatmul.msk.f32.vlgmr.msrb.gmra.mxu1 %vm1102_vm2, %v11059_v30 }
 0x22e   : > { %8680 = vmatpush.xpose.msk.msra.mxu2 %vm1102_vm2, %v11182_v57  ;;  %8746 = vmatpush.xpose.msk.msrb.mxu1 %vm1102_vm2, %v2376_v28  ;;  %v14034_v28 = vld [vmem:[#allocation11_spill] sm:$0xff] }
 0x230   : > { %8675 = vmatmul.msk.f32.vlgmr.msra.gmra.mxu3 %vm1102_vm2, %v10998_v15 }
 0x231   : > { %v11341_v39 = vpop.permute.xlu1 %2193  ;;  %2830 = vmax.xlane.f32.xlu0 %v2829_v27  ;;  %v1882_v57 = vpop.permute.xlu0 %1881 }
 0x232   : > { %8684 = vmatpush.xpose.msk.msrb.mxu2 %vm1102_vm2, %v1570_v7 }
 0x234   : > { %v1700_v43 = vpop.permute.xlu2 %1699 }
 0x235   : > { %8681 = vmatmul.msk.f32.vlgmr.msra.gmra.mxu2 %vm1102_vm2, %v10972_v8  ;;  %8739 = vmatmul.msk.f32.vlgmr.msra.gmra.mxu1 %vm1102_vm2, %v11075_v34 }
 0x236   : > { %8688 = vmatpush.xpose.msk.msra.mxu2 %vm1102_vm2, %v11195_v14  ;;  %8754 = vmatpush.xpose.msk.msra.mxu1 %vm1102_vm2, %v2480_v58  ;;  %v14036_v58 = vld [vmem:[#allocation10_spill] sm:$0xff] }
 0x239   : > { %v1492_v15 = vpop.permute.xlu1 %1491  ;;  %v11350_v30 = vpop.permute.xlu0 %2401 }
 0x23a   : > { %8678 = vmatpush.xpose.msk.msrb.mxu3 %vm1102_vm2, %v1492_v15  ;;  %v1852_v11 = vpop.f32.mrf.mxu0  ;;  %v14038_v15 = vld [vmem:[#allocation19_spill] sm:$0xff] }
 0x23c   : > { %v1804_v41 = vpop.permute.xlu2 %1803 }
 0x23d   : > { %8679 = vmatmul.msk.f32.vlgmr.msrb.gmra.mxu3 %vm1102_vm2, %v11073_v33  ;;  %8685 = vmatmul.msk.f32.vlgmr.msrb.gmra.mxu2 %vm1102_vm2, %v11071_v31 }
 0x23e   : > { %8682 = vmatpush.xpose.msk.msra.mxu3 %vm1102_vm2, %v11220_v55  ;;  %8692 = vmatpush.xpose.msk.msrb.mxu2 %vm1102_vm2, %v1674_v10 }
 0x23f   : > { %8747 = vmatmul.msk.f32.vlgmr.msrb.gmra.mxu1 %vm1102_vm2, %v11035_v22 }
 0x241   : > { %v11363_v8 = vpop.permute.xlu0 %2011  ;;  %v1908_v34 = vpop.permute.xlu1 %1907 }
 0x242   : > { %8686 = vmatpush.xpose.msk.msrb.mxu3 %vm1102_vm2, %v1596_v0 }
 0x244   : > { %v11365_v14 = vpop.permute.xlu2 %2115 }
 0x245   : > { %9983 = vrot.lane.b32.xlu0 %v11265_v3, %s10600_s2  ;;  %8683 = vmatmul.msk.f32.vlgmr.msra.gmra.mxu3 %vm1102_vm2, %v11021_v19 }
 0x246   : > { %8689 = vmatmul.msk.f32.vlgmr.msra.gmra.mxu2 %vm1102_vm2, %v10962_v6  ;;  %8690 = vmatpush.xpose.msk.msra.mxu3 %vm1102_vm2, %v11232_v60  ;;  %v799_v6 = vpop.f32.mrf.mxu1  ;;  %v787_v60 = vadd.f32 %v11187_v2, %v11242_v48 }
 0x247   : > { %8696 = vmatpush.xpose.msk.msra.mxu2 %vm1102_vm2, %v11203_v29  ;;  %8755 = vmatmul.msk.f32.vlgmr.msra.gmra.mxu1 %vm1102_vm2, %v11023_v20 }
 0x249   : > { %v11379_v22 = vpop.permute.xlu0 %2323 }
 0x24c   : > { %v11381_v31 = vpop.permute.xlu2 %2219  ;;  %v11383_v33 = vpop.permute.xlu1 %2427 }
 0x24d   : > { %8687 = vmatmul.msk.f32.vlgmr.msrb.gmra.mxu3 %vm1102_vm2, %v11197_v16 }
 0x24e   : > { %8693 = vmatmul.msk.f32.vlgmr.msrb.gmra.mxu2 %vm1102_vm2, %v11037_v23  ;;  %8694 = vmatpush.xpose.msk.msrb.mxu3 %vm1102_vm2, %v1700_v43  ;;  %v785_v23 = vadd.f32 %v11176_v63, %v11242_v48  ;;  %v11424_v63 = vadd.f32 %v799_v6, %v11242_v48  ;;  %v14039_v6 = vld [vmem:[#allocation13_spill] sm:$0xff] }
 0x24f   : > { %8700 = vmatpush.xpose.msk.msrb.mxu2 %vm1102_vm2, %v1778_v50 }
 0x250   : > { %v11414_v29 = vpack.i.bf16 %v787_v60, %v785_v23 }
 0x251   : > { %v11391_v19 = vpop.permute.xlu0 %2505 }
 0x252   : > { %14030 = vst [vmem:[#allocation21_spill] sm:$0xff] %v11414_v29 }
 0x254   : > { %v11393_v20 = vpop.permute.xlu2 %920  ;;  %v11395_v55 = vpop.permute.xlu1 %2531 }
 0x255   : > { %2713 = vrot.lane.b32.xlu1 %v11393_v20, %s10598_s3  ;;  %8691 = vmatmul.msk.f32.vlgmr.msra.gmra.mxu3 %vm1102_vm2, %v11011_v17  ;;  %v801_v17 = vpop.f32.mrf.mxu1 }
 0x256   : > { %8697 = vmatmul.msk.f32.vlgmr.msra.gmra.mxu2 %vm1102_vm2, %v10919_v51  ;;  %8698 = vmatpush.xpose.msk.msra.mxu3 %vm1102_vm2, %v11257_v32  ;;  %v11427_v2 = vadd.f32 %v801_v17, %v11242_v48 }
 0x257   : > { %8708 = vmatpush.xpose.msk.msra.mxu2 %vm1102_vm2, %v1882_v57  ;;  %v14037_v57 = vld [vmem:[#allocation18_spill] sm:$0xff] }
 0x259   : > { %v11410_v16 = vpop.permute.xlu0 %922 }
 0x25a   : > { %2739 = vrot.lane.b32.xlu2 %v11410_v16, %s10598_s3  ;;  %s10610_s3 = smov 48  }
 0x25c   : > { %v2558_v51 = vpop.permute.xlu1 %2557  ;;  %v2584_v35 = vpop.permute.xlu2 %2583 }
 0x25d   : > { %9958 = vrot.lane.b32.xlu1 %v11414_v29, %s10597_s14  ;;  %8695 = vmatmul.msk.f32.vlgmr.msrb.gmra.mxu3 %vm1102_vm2, %v11115_v42  ;;  %v11441_v42 = vpack.i.bf16 %v11427_v2, %v11424_v63 }
 0x25e   : > { %8701 = vmatmul.msk.f32.vlgmr.msrb.gmra.mxu2 %vm1102_vm2, %v11119_v45  ;;  %8702 = vmatpush.xpose.msk.msrb.mxu3 %vm1102_vm2, %v1804_v41 }
 0x25f   : > { %8716 = vmatpush.xpose.msk.msrb.mxu2 %vm1102_vm2, %v11301_v1  ;;  %8760 = vmatpush.xpose.msk.msra.mxu0 %vm1102_vm2, %v2558_v51 }
 0x260   : > { %8762 = vmatpush.xpose.msk.msrb.mxu1 %vm1102_vm2, %v2584_v35 }
 0x261   : > { %v2610_v32 = vpop.permute.xlu0 %2609  ;;  %v1956_v41 = vpop.f32.mrf.mxu0 }
 0x262   : > { %8761 = vmatmul.msk.f32.vlgmr.msra.gmra.mxu0 %vm1102_vm2, %v10996_v13  ;;  %9973 = vrot.lane.b32.xlu2 %v11414_v29, %s10600_s2  ;;  %v1176_v13 = vpop.f32.mrf.mxu2 }
 0x263   : > { %8763 = vmatmul.msk.f32.vlgmr.msrb.gmra.mxu1 %vm1102_vm2, %v11213_v62  ;;  %v11456_v48 = vmul.f32 0.35355338, %v1176_v13 }
 0x264   : > { %v2662_v45 = vpop.permute.xlu2 %2661 }
 0x265   : > { %9978 = vrot.lane.b32.xlu1 %v11441_v42, %s10597_s14  ;;  %8699 = vmatmul.msk.f32.vlgmr.msra.gmra.mxu3 %vm1102_vm2, %v11013_v18  ;;  %v2835_v18 = vsel %vm1102_vm2, %v11456_v48, -inf  ;;  %s10609_s14 = smov 32  }
 0x266   : > { %8709 = vmatmul.msk.f32.vlgmr.msra.gmra.mxu2 %vm1102_vm2, %v11131_v47  ;;  %8710 = vmatpush.xpose.msk.msra.mxu3 %vm1102_vm2, %v1908_v34 }
 0x267   : > { %8724 = vmatpush.xpose.msk.msra.mxu2 %vm1102_vm2, %v11324_v24  ;;  %8768 = vmatpush.xpose.msk.msrb.mxu0 %vm1102_vm2, %v2662_v45 }
 0x269   : > { %v2688_v62 = vpop.permute.xlu0 %2687 }
 0x26a   : > { %8769 = vmatmul.msk.f32.vlgmr.msrb.gmra.mxu0 %vm1102_vm2, %v11159_v59  ;;  %8770 = vmatpush.xpose.msk.msra.mxu1 %vm1102_vm2, %v2688_v62  ;;  %v1228_v47 = vpop.f32.mrf.mxu2  ;;  %v14041_v62 = vld [vmem:[#allocation16_spill] sm:$0xff] }
 0x26b   : > { %3551 = vmatpush.msra.mxu0 %v785_v23 }
 0x26d   : > { %3643 = vmatpush.msrb.mxu0 %v11250_v49  ;;  %8703 = vmatmul.msk.f32.vlgmr.msrb.gmra.mxu3 %vm1102_vm2, %v11087_v36  ;;  %v1150_v36 = vpop.f32.mrf.mxu3 }
 0x26e   : > { %3574 = vmatpush.msrb.mxu1 %v787_v60  ;;  %8717 = vmatmul.msk.f32.vlgmr.msrb.gmra.mxu2 %vm1102_vm2, %v11141_v53  ;;  %v14032_v53 = vld [vmem:[#allocation12_spill] sm:$0xff]  ;;  %v11500_v59 = vmul.f32 0.35355338, %v1150_v36  ;;  %v11557_v60 = vmul.f32 0.35355338, %v1852_v11 }
 0x26f   : > { %8771 = vmatmul.msk.f32.vlgmr.msra.gmra.mxu1 %vm1102_vm2, %v11127_v37  ;;  %8718 = vmatpush.xpose.msk.msrb.mxu3 %vm1102_vm2, %v11363_v8  ;;  %v14031_v37 = vld [vmem:[#allocation15_spill] sm:$0xff] }
 0x270   : > { %8732 = vmatpush.xpose.msk.msrb.mxu2 %vm1102_vm2, %v11341_v39  ;;  %3666 = vmatpush.msra.mxu1 %v11255_v61  ;;  %v2832_v7 = vsel %vm1102_vm2, %v11500_v59, -inf  ;;  %v2636_v39 = vpop.permute.xlu1 %2635  ;;  %v2913_v13 = vsel %vm1102_vm2, %v11557_v60, -inf }
 0x271   : > { %2836 = vmax.xlane.f32.xlu0 %v2835_v18  ;;  %v11515_v38 = vpop.permute.xlu0 %9963 }
 0x272   : > { %v1280_v10 = vpop.f32.mrf.mxu2 }
 0x273   : > { %v11531_v24 = vmul.f32 0.35355338, %v1280_v10 }
 0x275   : > { %8711 = vmatmul.msk.f32.vlgmr.msra.gmra.mxu3 %vm1102_vm2, %v11103_v40  ;;  %v1202_v40 = vpop.f32.mrf.mxu3 }
 0x276   : > { %8725 = vmatmul.msk.f32.vlgmr.msra.gmra.mxu2 %vm1102_vm2, %v11153_v56  ;;  %8726 = vmatpush.xpose.msk.msra.mxu3 %vm1102_vm2, %v11365_v14  ;;  %v11492_v56 = vmul.f32 0.35355338, %v1228_v47  ;;  %v11517_v1 = vmul.f32 0.35355338, %v1202_v40 }
 0x277   : > { %8740 = vmatpush.xpose.msk.msra.mxu2 %vm1102_vm2, %v11310_v54  ;;  %v14035_v54 = vld [vmem:[#allocation14_spill] sm:$0xff] }
 0x278   : > { %v2841_v61 = vsel %vm1102_vm2, %v11492_v56, -inf  ;;  %v2838_v21 = vsel %vm1102_vm2, %v11517_v1, -inf }
 0x279   : > { %v11535_v0 = vpop.permute.xlu0 %9968 }
 0x27a   : > { %v1332_v27 = vpop.f32.mrf.mxu2  ;;  %v2060_v23 = vpop.f32.mrf.mxu0 }
 0x27b   : > { %v11539_v43 = vmul.f32 0.35355338, %v1332_v27  ;;  %v11559_v35 = vmul.f32 0.35355338, %v2060_v23 }
 0x27d   : > { %8719 = vmatmul.msk.f32.vlgmr.msrb.gmra.mxu3 %vm1102_vm2, %v11117_v44  ;;  %v14033_v44 = vld [vmem:[#allocation17_spill] sm:$0xff]  ;;  %v1254_v49 = vpop.f32.mrf.mxu3  ;;  %v2853_v14 = vsel %vm1102_vm2, %v11539_v43, -inf  ;;  %14040 = vst [vmem:[#allocation15_spill] sm:$0xff] %v11559_v35  ;;  %v2937_v36 = vsel %vm1102_vm2, %v11559_v35, -inf }
 0x27e   : > { %8733 = vmatmul.msk.f32.vlgmr.msrb.gmra.mxu2 %vm1102_vm2, %v14031_v37  ;;  %8734 = vmatpush.xpose.msk.msrb.mxu3 %vm1102_vm2, %v11381_v31  ;;  %v11506_v5 = vmul.f32 0.35355338, %v1254_v49 }
 0x27f   : > { %8748 = vmatpush.xpose.msk.msrb.mxu2 %vm1102_vm2, %v11350_v30  ;;  %v2847_v30 = vsel %vm1102_vm2, %v11531_v24, -inf }
 0x285   : > { %9988 = vrot.lane.b32.xlu0 %v11282_v4, %s10600_s2  ;;  %8727 = vmatmul.msk.f32.vlgmr.msra.gmra.mxu3 %vm1102_vm2, %v14032_v53  ;;  %v1306_v25 = vpop.f32.mrf.mxu3 }
 0x286   : > { %8741 = vmatmul.msk.f32.vlgmr.msra.gmra.mxu2 %vm1102_vm2, %v14033_v44  ;;  %8742 = vmatpush.xpose.msk.msra.mxu3 %vm1102_vm2, %v11379_v22  ;;  %v11523_v50 = vmul.f32 0.35355338, %v1306_v25 }
 0x287   : > { %8756 = vmatpush.xpose.msk.msra.mxu2 %vm1102_vm2, %v11391_v19  ;;  %v11553_v19 = vmul.f32 0.35355338, %v1956_v41 }
 0x288   : > { %v2850_v26 = vsel %vm1102_vm2, %v11523_v50, -inf }
 0x28b   : > { %2842 = vmax.xlane.f32.xlu2 %v2841_v61 }
 0x28d   : > { %8735 = vmatmul.msk.f32.vlgmr.msrb.gmra.mxu3 %vm1102_vm2, %v11139_v52  ;;  %v2844_v52 = vsel %vm1102_vm2, %v11506_v5, -inf  ;;  %v1358_v31 = vpop.f32.mrf.mxu3 }
 0x28e   : > { %8749 = vmatmul.msk.f32.vlgmr.msrb.gmra.mxu2 %vm1102_vm2, %v14034_v28  ;;  %8750 = vmatpush.xpose.msk.msrb.mxu3 %vm1102_vm2, %v11383_v33  ;;  %v11571_v37 = vmul.f32 0.35355338, %v1358_v31 }
 0x28f   : > { %8764 = vmatpush.xpose.msk.msrb.mxu2 %vm1102_vm2, %v2610_v32  ;;  %2833 = vmax.xlane.f32.xlu1 %v2832_v7  ;;  %v2925_v32 = vsel %vm1102_vm2, %v11553_v19, -inf }
 0x290   : > { %v2856_v61 = vsel %vm1102_vm2, %v11571_v37, -inf }
 0x292   : > { %v1878_v8 = vpop.f32.mrf.mxu1 }
 0x293   : > { %2845 = vmax.xlane.f32.xlu2 %v2844_v52  ;;  %v11546_v34 = vmul.f32 0.35355338, %v1878_v8 }
 0x295   : > { %8743 = vmatmul.msk.f32.vlgmr.msra.gmra.mxu3 %vm1102_vm2, %v14035_v54  ;;  %v2164_v54 = vpop.f32.mrf.mxu0 }
 0x296   : > { %8757 = vmatmul.msk.f32.vlgmr.msra.gmra.mxu2 %vm1102_vm2, %v14036_v58  ;;  %8758 = vmatpush.xpose.msk.msra.mxu3 %vm1102_vm2, %v11395_v55  ;;  %v2916_v55 = vsel %vm1102_vm2, %v11546_v34, -inf  ;;  %v11596_v58 = vmul.f32 0.35355338, %v2164_v54 }
 0x297   : > { %2839 = vmax.xlane.f32.xlu1 %v2838_v21 }
 0x29a   : > { %v1982_v17 = vpop.f32.mrf.mxu1 }
 0x29b   : > { %2851 = vmax.xlane.f32.xlu2 %v2850_v26  ;;  %v11587_v52 = vmul.f32 0.35355338, %v1982_v17 }
 0x29d   : > { %8751 = vmatmul.msk.f32.vlgmr.msrb.gmra.mxu3 %vm1102_vm2, %v14037_v57 }
 0x29e   : > { %8765 = vmatmul.msk.f32.vlgmr.msrb.gmra.mxu2 %vm1102_vm2, %v14038_v15  ;;  %8766 = vmatpush.xpose.msk.msrb.mxu3 %vm1102_vm2, %v2636_v39 }
 0x29f   : > { %2848 = vmax.xlane.f32.xlu1 %v2847_v30 }
 0x2a2   : > { %v2086_v53 = vpop.f32.mrf.mxu1 }
 0x2a3   : > { %2854 = vmax.xlane.f32.xlu2 %v2853_v14  ;;  %v11580_v49 = vmul.f32 0.35355338, %v2086_v53 }
 0x2a4   : > { %v2831_v22 = vpop.xlane.xlu0 %2830 }
 0x2a5   : > { %v3021_v33 = vsub.f32 %v11329_v9, %v2831_v22  ;;  %8759 = vmatmul.msk.f32.vlgmr.msra.gmra.mxu3 %vm1102_vm2, %v14039_v6  ;;  %v1384_v9 = vpop.f32.mrf.mxu2  ;;  %14042 = vst [vmem:[#allocation12_spill] sm:$0xff] %v11580_v49  ;;  %v2940_v25 = vsel %vm1102_vm2, %v11580_v49, -inf }
 0x2a6   : > { %v11567_v18 = vmul.f32 0.35355338, %v1384_v9 }
 0x2a7   : > { %2917 = vmax.xlane.f32.xlu1 %v2916_v55  ;;  %v3085_v51 = vmul.f32 1.442695, %v3021_v33 }
 0x2a8   : > { %v2859_v40 = vsel %vm1102_vm2, %v11567_v18, -inf }
 0x2a9   : > { %10243 = vpow2.f32 %v3085_v51 }
 0x2aa   : > { %v2190_v15 = vpop.f32.mrf.mxu1 }
 0x2ab   : > { %2926 = vmax.xlane.f32.xlu2 %v2925_v32  ;;  %v1410_v45 = vpop.f32.mrf.mxu3  ;;  %v11615_v30 = vmul.f32 0.35355338, %v2190_v15  ;;  %v2268_v32 = vpop.f32.mrf.mxu0 }
 0x2ac   : > { %v11607_v39 = vmul.f32 0.35355338, %v1410_v45 }
 0x2ad   : > { %8767 = vmatmul.msk.f32.vlgmr.msrb.gmra.mxu3 %vm1102_vm2, %v14041_v62  ;;  %v1436_v21 = vpop.f32.mrf.mxu2  ;;  %14043 = vst [vmem:[#allocation17_spill] sm:$0xff] %v11615_v30  ;;  %v2952_v41 = vsel %vm1102_vm2, %v11615_v30, -inf }
 0x2ae   : > { %v11600_v11 = vmul.f32 0.35355338, %v1436_v21  ;;  %v2862_v57 = vsel %vm1102_vm2, %v11607_v39, -inf }
 0x2af   : > { %2914 = vmax.xlane.f32.xlu0 %v2913_v13  ;;  %2938 = vmax.xlane.f32.xlu1 %v2937_v36  ;;  %v11575_v47 = vpop.eup %10243 }
 0x2b0   : > { %v3213_v28 = vsel %vm1102_vm2, %v11575_v47, 0.0  ;;  %v2865_v26 = vsel %vm1102_vm2, %v11600_v11, -inf }
 0x2b2   : > { %v2294_v13 = vpop.f32.mrf.mxu1 }
 0x2b3   : > { %2860 = vmax.xlane.f32.xlu2 %v2859_v40  ;;  %v1462_v7 = vpop.f32.mrf.mxu3  ;;  %v11644_v36 = vmul.f32 0.35355338, %v2294_v13 }
 0x2b4   : > { %v2740_v44 = vpop.permute.xlu2 %2739  ;;  %v11590_v10 = vmul.f32 0.35355338, %v1462_v7 }
 0x2b5   : > { %8774 = vmatpush.xpose.msk.msra.mxu3 %vm1102_vm2, %v2740_v44  ;;  %v1488_v14 = vpop.f32.mrf.mxu2  ;;  %14045 = vst [vmem:[#allocation14_spill] sm:$0xff] %v11644_v36 }
 0x2b6   : > { %v11634_v51 = vmul.f32 0.35355338, %v1488_v14 }
 0x2b7   : > { %2857 = vmax.xlane.f32.xlu0 %v2856_v61  ;;  %3214 = vadd.xlane.f32.xlu1 %v3213_v28  ;;  %v11619_v8 = vpop.permute.xlu0 %9983  ;;  %v2964_v61 = vsel %vm1102_vm2, %v11644_v36, -inf  ;;  %v2372_v28 = vpop.f32.mrf.mxu0 }
 0x2b8   : > { %8775 = vmatmul.msk.f32.vlgmr.msra.gmra.mxu3 %vm1102_vm2, %v11410_v16  ;;  %v2868_v16 = vsel %vm1102_vm2, %v11590_v10, -inf  ;;  %14044 = vst [vmem:[#allocation11_spill] sm:$0xff] %v11619_v8  ;;  %v2871_v45 = vsel %vm1102_vm2, %v11634_v51, -inf }
 0x2b9   : > { %3620 = vmatpush.msrb.mxu3 %v11273_v46  ;;  %v2928_v46 = vsel %vm1102_vm2, %v11587_v52, -inf }
 0x2bb   : > { %3712 = vmatpush.msra.mxu3 %v11427_v2  ;;  %2941 = vmax.xlane.f32.xlu2 %v2940_v25  ;;  %v2949_v2 = vsel %vm1102_vm2, %v11596_v58, -inf }
 0x2bc   : > { %v11636_v9 = vpop.permute.xlu2 %9973 }
 0x2bd   : > { %v1540_v31 = vpop.f32.mrf.mxu2 }
 0x2bf   : > { %2929 = vmax.xlane.f32.xlu0 %v2928_v46  ;;  %2869 = vmax.xlane.f32.xlu1 %v2868_v16  ;;  %v11651_v46 = vmul.f32 0.35355338, %v2372_v28 }
 0x2c1   : > { %14046 = vst [vmem:[#allocation10_spill] sm:$0xff] %v11651_v46 }
 0x2c3   : > { %2950 = vmax.xlane.f32.xlu2 %v2949_v2 }
 0x2c5   : > { %v11632_v17 = vpop.f32.mrf.mxu2 }
 0x2c7   : > { %2866 = vmax.xlane.f32.xlu0 %v2865_v26  ;;  %v2714_v27 = vpop.permute.xlu1 %2713 }
 0x2c8   : > { %8772 = vmatpush.xpose.msk.msra.mxu2 %vm1102_vm2, %v2714_v27 }
 0x2cb   : > { %8773 = vmatmul.msk.f32.vlgmr.msra.gmra.mxu2 %vm1102_vm2, %v11393_v20 }
 0x2cc   : > { %3597 = vmatpush.msrb.mxu2 %v11270_v12  ;;  %v11621_v12 = vpop.f32.mrf.mxu3 }
 0x2cd   : > { %v11646_v40 = vpop.f32.mrf.mxu2 }
 0x2ce   : > { %3689 = vmatpush.msra.mxu2 %v11424_v63 }
 0x2cf   : > { %2863 = vmax.xlane.f32.xlu0 %v2862_v57  ;;  %v11630_v23 = vpop.permute.xlu1 %9958 }
 0x2d0   : > { %v9960_v36 = vunpack.i.l.bf16 %v11630_v23 }
 0x2d4   : > { %v11624_v33 = vpop.f32.mrf.mxu3 }
 0x2d5   : > { %v11654_v16 = vpop.f32.mrf.mxu2 }
 0x2d7   : > { %2953 = vmax.xlane.f32.xlu0 %v2952_v41  ;;  %v11642_v62 = vpop.permute.xlu1 %9978 }
 0x2e4   : > { %v2837_v22 = vpop.xlane.xlu0 %2836 }
 0x2e5   : > { %v3023_v20 = vsub.f32 %v11456_v48, %v2837_v22  ;;  %v11638_v48 = vpop.f32.mrf.mxu3 }
 0x2e7   : > { %v3089_v63 = vmul.f32 1.442695, %v3023_v20 }
 0x2e9   : > { %10245 = vpow2.f32 %v3089_v63 }
 0x2ed   : > { %v1670_v7 = vpop.f32.mrf.mxu3 }
 0x2ef   : > { %v11626_v6 = vpop.eup %10245 }
 0x2f0   : > { %v3219_v55 = vsel %vm1102_vm2, %v11626_v6, 0.0 }
 0x2f1   : > { %3220 = vadd.xlane.f32.xlu0 %v3219_v55  ;;  %v1748_v55 = vpop.f32.mrf.mxu2 }
 0x2f5   : > { %v1722_v41 = vpop.f32.mrf.mxu3 }
 0x2f9   : > { %2872 = vmax.xlane.f32.xlu0 %v2871_v45 }
 0x2fe   : > { %v2843_v53 = vpop.xlane.xlu2 %2842 }
 0x2ff   : > { %v3025_v44 = vsub.f32 %v11492_v56, %v2843_v53  ;;  %v2973_v56 = vsel %vm1102_vm2, %v11651_v46, -inf  ;;  %v11668_v53 = vmul.f32 0.35355338, %v2268_v32  ;;  %v11680_v32 = vmul.f32 0.35355338, %v1540_v31  ;;  %v2476_v31 = vpop.f32.mrf.mxu0 }
 0x301   : > { %2965 = vmax.xlane.f32.xlu0 %v2964_v61  ;;  %v3093_v25 = vmul.f32 1.442695, %v3025_v44  ;;  %14047 = vst [vmem:[#allocation18_spill] sm:$0xff] %v11668_v53  ;;  %v2961_v28 = vsel %vm1102_vm2, %v11668_v53, -inf }
 0x302   : > { %v2834_v54 = vpop.xlane.xlu1 %2833 }
 0x303   : > { %10247 = vpow2.f32 %v3093_v25  ;;  %v3022_v21 = vsub.f32 %v11500_v59, %v2834_v54  ;;  %v2398_v54 = vpop.f32.mrf.mxu1 }
 0x305   : > { %v3087_v2 = vmul.f32 1.442695, %v3022_v21 }
 0x306   : > { %v2846_v26 = vpop.xlane.xlu2 %2845 }
 0x307   : > { %10249 = vpow2.f32 %v3087_v2  ;;  %v11682_v2 = vmul.f32 0.35355338, %v2398_v54 }
 0x309   : > { %2974 = vmax.xlane.f32.xlu0 %v2973_v56  ;;  %v11658_v27 = vpop.eup %10247  ;;  %14048 = vst [vmem:[#allocation19_spill] sm:$0xff] %v11682_v2 }
 0x30a   : > { %v2840_v57 = vpop.xlane.xlu1 %2839  ;;  %v3225_v15 = vsel %vm1102_vm2, %v11658_v27, 0.0 }
 0x30b   : > { %v3024_v14 = vsub.f32 %v11517_v1, %v2840_v57  ;;  %3226 = vadd.xlane.f32.xlu1 %v3225_v15  ;;  %v1774_v1 = vpop.f32.mrf.mxu3  ;;  %v3026_v15 = vsub.f32 %v11506_v5, %v2846_v26 }
 0x30d   : > { %v11663_v59 = vpop.eup %10249  ;;  %v3091_v22 = vmul.f32 1.442695, %v3024_v14  ;;  %v11689_v14 = vmul.f32 0.35355338, %v1670_v7 }
 0x30e   : > { %v2852_v20 = vpop.xlane.xlu2 %2851  ;;  %v3216_v63 = vsel %vm1102_vm2, %v11663_v59, 0.0 }
 0x30f   : > { %10251 = vpow2.f32 %v3091_v22  ;;  %v3028_v45 = vsub.f32 %v11523_v50, %v2852_v20  ;;  %3217 = vadd.xlane.f32.xlu2 %v3216_v63  ;;  %v11678_v50 = vpop.f32.mrf.mxu2  ;;  %v2976_v22 = vsel %vm1102_vm2, %v11682_v2, -inf  ;;  %v2877_v20 = vsel %vm1102_vm2, %v11680_v32, -inf }
 0x310   : > { %v2892_v7 = vsel %vm1102_vm2, %v11689_v14, -inf  ;;  %v11716_v2 = vmul.f32 0.35355338, %v11632_v17 }
 0x311   : > { %v3099_v13 = vmul.f32 1.442695, %v3028_v45  ;;  %v11695_v45 = vpop.permute.xlu0 %9988 }
 0x312   : > { %v2849_v44 = vpop.xlane.xlu1 %2848 }
 0x313   : > { %10253 = vpow2.f32 %v3099_v13  ;;  %v1826_v63 = vpop.f32.mrf.mxu3  ;;  %v3095_v13 = vmul.f32 1.442695, %v3026_v15  ;;  %v3027_v54 = vsub.f32 %v11531_v24, %v2849_v44 }
 0x315   : > { %v11670_v61 = vpop.eup %10251  ;;  %10255 = vpow2.f32 %v3095_v13 }
 0x316   : > { %v3222_v25 = vsel %vm1102_vm2, %v11670_v61, 0.0  ;;  %v2855_v8 = vpop.xlane.xlu2 %2854 }
 0x317   : > { %2962 = vmax.xlane.f32.xlu2 %v2961_v28  ;;  %3223 = vadd.xlane.f32.xlu1 %v3222_v25  ;;  %v11697_v28 = vmul.f32 0.35355338, %v2476_v31  ;;  %v11700_v25 = vmul.f32 0.35355338, %v11621_v12  ;;  %v1904_v26 = vpop.f32.mrf.mxu2 }
 0x319   : > { %v11676_v21 = vpop.eup %10253  ;;  %14049 = vst [vmem:[#allocation13_spill] sm:$0xff] %v11697_v28  ;;  %v2985_v15 = vsel %vm1102_vm2, %v11697_v28, -inf }
 0x31a   : > { %v11684_v56 = vpop.xlane.xlu1 %2917  ;;  %v3234_v57 = vsel %vm1102_vm2, %v11676_v21, 0.0 }
 0x31b   : > { %3235 = vadd.xlane.f32.xlu0 %v3234_v57  ;;  %v11707_v57 = vmul.f32 0.35355338, %v1748_v55  ;;  %v11713_v12 = vpop.f32.mrf.mxu3  ;;  %v11720_v55 = vpop.eup %10255 }
 0x31d   : > { %v2901_v24 = vsel %vm1102_vm2, %v11707_v57, -inf }
 0x31f   : > { %2977 = vmax.xlane.f32.xlu2 %v2976_v22  ;;  %2878 = vmax.xlane.f32.xlu1 %v2877_v20  ;;  %v2874_v22 = vsel %vm1102_vm2, %v11700_v25, -inf  ;;  %v3097_v20 = vmul.f32 1.442695, %v3027_v54  ;;  %v2008_v44 = vpop.f32.mrf.mxu2  ;;  %v2883_v54 = vsel %vm1102_vm2, %v11716_v2, -inf }
 0x322   : > { %v11702_v5 = vpop.xlane.xlu1 %2938  ;;  %v2915_v31 = vpop.xlane.xlu0 %2914 }
 0x323   : > { %14050 = vst [vmem:[#allocation16_spill] sm:$0xff] %v11702_v5  ;;  %2893 = vmax.xlane.f32.xlu0 %v2892_v7  ;;  %v11722_v7 = vmul.f32 0.35355338, %v1722_v41 }
 0x325   : > { %v2898_v28 = vsel %vm1102_vm2, %v11722_v7, -inf }
 0x327   : > { %2986 = vmax.xlane.f32.xlu2 %v2985_v15  ;;  %2875 = vmax.xlane.f32.xlu1 %v2874_v22  ;;  %v3228_v15 = vsel %vm1102_vm2, %v11720_v55, 0.0  ;;  %v11728_v22 = vmul.f32 0.35355338, %v1774_v1  ;;  %v11745_v30 = vpop.f32.mrf.mxu2 }
 0x32a   : > { %v3215_v13 = vpop.xlane.xlu1 %3214 }
 0x32b   : > { %2902 = vmax.xlane.f32.xlu0 %v2901_v24  ;;  %10257 = vrcp.f32 %v3215_v13  ;;  %v2034_v13 = vpop.f32.mrf.mxu3 }
 0x32c   : > { %10259 = vpow2.f32 %v3097_v20  ;;  %v11734_v20 = vpop.xlane.xlu0 %2857 }
 0x32f   : > { %3229 = vadd.xlane.f32.xlu2 %v3228_v15  ;;  %2884 = vmax.xlane.f32.xlu1 %v2883_v54  ;;  %v11739_v15 = vmul.f32 0.35355338, %v1826_v63  ;;  %v2904_v54 = vsel %vm1102_vm2, %v11728_v22, -inf }
 0x331   : > { %v10258_v17 = vpop.eup %10257  ;;  %v2910_v63 = vsel %vm1102_vm2, %v11739_v15, -inf }
 0x332   : > { %v11732_v24 = vpop.eup %10259  ;;  %v3469_v41 = vmul.f32 %v10258_v17, %v11575_v47  ;;  %v11748_v47 = vmul.f32 0.35355338, %v11624_v33  ;;  %v11762_v33 = vpop.f32.mrf.mxu2 }
 0x333   : > { %2899 = vmax.xlane.f32.xlu0 %v2898_v28  ;;  %v3231_v1 = vsel %vm1102_vm2, %v11732_v24, 0.0  ;;  %v11750_v28 = vmul.f32 0.35355338, %v1904_v26  ;;  %v11765_v26 = vmul.f32 0.35355338, %v11646_v40 }
 0x334   : > { %8776 = vmatmul.msk.f32.vlgmr.msra.gmra.mxu0 %vm1102_vm2, %v3469_v41  ;;  %v11754_v17 = vpop.xlane.xlu0 %2929  ;;  %v11756_v41 = vmul.f32 0.35355338, %v2008_v44  ;;  %v2880_v46 = vsel %vm1102_vm2, %v11748_v47, -inf  ;;  %v3049_v44 = vsub.f32 %v11557_v60, %v2915_v31 }
 0x335   : > { %3735 = vmatpush.msra.mxu0 %v9960_v36  ;;  %v2138_v36 = vpop.f32.mrf.mxu3 }
 0x336   : > { %v11772_v53 = vmul.f32 0.35355338, %v2138_v36  ;;  %v3141_v35 = vmul.f32 1.442695, %v3049_v44 }
 0x337   : > { %3232 = vadd.xlane.f32.xlu2 %v3231_v1  ;;  %2905 = vmax.xlane.f32.xlu1 %v2904_v54  ;;  %v2919_v1 = vsel %vm1102_vm2, %v11750_v28, -inf  ;;  %v11767_v54 = vmul.f32 0.35355338, %v2034_v13  ;;  %v3029_v13 = vsub.f32 %v11539_v43, %v2855_v8  ;;  %v11795_v8 = vmul.f32 0.35355338, %v11654_v16 }
 0x338   : > { %14051 = vst [vmem:[#allocation22_spill] sm:$0xff] %v11772_v53  ;;  %v2946_v31 = vsel %vm1102_vm2, %v11772_v53, -inf  ;;  %10261 = vpow2.f32 %v3141_v35 }
 0x339   : > { %v3101_v5 = vmul.f32 1.442695, %v3029_v13  ;;  %v2895_v35 = vsel %vm1102_vm2, %v11795_v8, -inf }
 0x33a   : > { %v2320_v36 = vpop.f32.mrf.mxu2 }
 0x33b   : > { %2911 = vmax.xlane.f32.xlu0 %v2910_v63  ;;  %v2931_v63 = vsel %vm1102_vm2, %v11756_v41, -inf  ;;  %v11788_v4 = vmul.f32 0.35355338, %v2320_v36  ;;  %10263 = vpow2.f32 %v3101_v5  ;;  %v11808_v5 = vmul.f32 0.35355338, %v11678_v50 }
 0x33c   : > { %v11778_v40 = vpop.xlane.xlu0 %2866  ;;  %v11822_v50 = vmul.f32 0.35355338, %v11713_v12 }
 0x33d   : > { %v2242_v49 = vpop.f32.mrf.mxu3  ;;  %14053 = vst [vmem:[#allocation24_spill] sm:$0xff] %v11788_v4 }
 0x33e   : > { %v11784_v60 = vmul.f32 0.35355338, %v2242_v49  ;;  %v11799_v44 = vpop.eup %10261 }
 0x33f   : > { %2881 = vmax.xlane.f32.xlu2 %v2880_v46  ;;  %2920 = vmax.xlane.f32.xlu1 %v2919_v1  ;;  %v2889_v46 = vsel %vm1102_vm2, %v11765_v26, -inf  ;;  %v2934_v1 = vsel %vm1102_vm2, %v11767_v54, -inf  ;;  %14054 = vst [vmem:[#allocation25_spill] sm:$0xff] %v11799_v44 }
 0x340   : > { %14052 = vst [vmem:[#allocation23_spill] sm:$0xff] %v11784_v60  ;;  %v2958_v43 = vsel %vm1102_vm2, %v11784_v60, -inf }
 0x341   : > { %v11805_v13 = vpop.eup %10263 }
 0x342   : > { %v3237_v16 = vsel %vm1102_vm2, %v11805_v13, 0.0 }
 0x343   : > { %2932 = vmax.xlane.f32.xlu0 %v2931_v63  ;;  %v11782_v63 = vmul.f32 0.35355338, %v11638_v48  ;;  %v2967_v48 = vsel %vm1102_vm2, %v11788_v4, -inf  ;;  %v2502_v4 = vpop.f32.mrf.mxu1 }
 0x344   : > { %v2864_v49 = vpop.xlane.xlu0 %2863  ;;  %v11826_v60 = vmul.f32 0.35355338, %v2502_v4 }
 0x346   : > { %14057 = vst [vmem:[#allocation28_spill] sm:$0xff] %v11826_v60 }
 0x347   : > { %2890 = vmax.xlane.f32.xlu2 %v2889_v46  ;;  %2935 = vmax.xlane.f32.xlu1 %v2934_v1  ;;  %v2886_v46 = vsel %vm1102_vm2, %v11782_v63, -inf  ;;  %v3297_v1 = vsel %vm1102_vm2, %v11799_v44, 0.0 }
 0x34b   : > { %2947 = vmax.xlane.f32.xlu0 %v2946_v31  ;;  %v2346_v31 = vpop.f32.mrf.mxu3 }
 0x34c   : > { %v11812_v36 = vpop.xlane.xlu0 %2953 }
 0x34d   : > { %14055 = vst [vmem:[#allocation26_spill] sm:$0xff] %v11812_v36  ;;  %v2870_v36 = vpop.xlane.xlu1 %2869 }
 0x34f   : > { %2887 = vmax.xlane.f32.xlu2 %v2886_v46  ;;  %2959 = vmax.xlane.f32.xlu1 %v2958_v43  ;;  %v11814_v46 = vpop.xlane.xlu2 %2926  ;;  %v11816_v43 = vmul.f32 0.35355338, %v2346_v31 }
 0x351   : > { %14056 = vst [vmem:[#allocation27_spill] sm:$0xff] %v11816_v43 }
 0x353   : > { %2968 = vmax.xlane.f32.xlu0 %v2967_v48  ;;  %v2907_v48 = vsel %vm1102_vm2, %v11808_v5, -inf }
 0x357   : > { %2896 = vmax.xlane.f32.xlu2 %v2895_v35  ;;  %3298 = vadd.xlane.f32.xlu1 %v3297_v1  ;;  %v3032_v35 = vsub.f32 %v11607_v39, %v2864_v49  ;;  %v2970_v1 = vsel %vm1102_vm2, %v11816_v43, -inf  ;;  %v11828_v31 = vpop.xlane.xlu2 %2860  ;;  %v3034_v39 = vsub.f32 %v11590_v10, %v2870_v36  ;;  %v11834_v49 = vmul.f32 0.35355338, %v11745_v30 }
 0x359   : > { %14058 = vst [vmem:[#allocation29_spill] sm:$0xff] %v11834_v49  ;;  %v2943_v10 = vsel %vm1102_vm2, %v11834_v49, -inf }
 0x35b   : > { %3238 = vadd.xlane.f32.xlu0 %v3237_v16  ;;  %v3107_v16 = vmul.f32 1.442695, %v3032_v35  ;;  %v9970_v35 = vunpack.i.l.bf16 %v11535_v0 }
 0x35f   : > { %2908 = vmax.xlane.f32.xlu2 %v2907_v48  ;;  %v2922_v48 = vsel %vm1102_vm2, %v11822_v50, -inf  ;;  %v11845_v30 = vpop.xlane.xlu2 %2941 }
 0x363   : > { %2971 = vmax.xlane.f32.xlu0 %v2970_v1  ;;  %v3111_v1 = vmul.f32 1.442695, %v3034_v39 }
 0x364   : > { %v3221_v44 = vpop.xlane.xlu0 %3220 }
 0x365   : > { %10265 = vrcp.f32 %v3221_v44  ;;  %v2988_v44 = vsel %vm1102_vm2, %v11826_v60, -inf }
 0x366   : > { %10267 = vpow2.f32 %v3107_v16 }
 0x367   : > { %2923 = vmax.xlane.f32.xlu2 %v2922_v48  ;;  %10269 = vpow2.f32 %v3111_v1 }
 0x36b   : > { %v10266_v12 = vpop.eup %10265  ;;  %2989 = vmax.xlane.f32.xlu0 %v2988_v44  ;;  %v2424_v44 = vpop.f32.mrf.mxu2 }
 0x36c   : > { %v3471_v4 = vmul.f32 %v10266_v12, %v11626_v6  ;;  %v11843_v36 = vpop.eup %10267  ;;  %v11850_v6 = vmul.f32 0.35355338, %v11762_v33  ;;  %v11852_v16 = vpop.xlane.xlu0 %2872 }
 0x36d   : > { %v3246_v48 = vsel %vm1102_vm2, %v11843_v36, 0.0  ;;  %v11858_v12 = vpop.eup %10269  ;;  %v2580_v33 = vpop.f32.mrf.mxu0 }
 0x36e   : > { %8778 = vmatmul.msk.f32.vlgmr.msrb.gmra.mxu2 %vm1102_vm2, %v3471_v4  ;;  %14059 = vst [vmem:[#allocation30_spill] sm:$0xff] %v11850_v6  ;;  %v2955_v39 = vsel %vm1102_vm2, %v11850_v6, -inf  ;;  %v11860_v4 = vpop.xlane.xlu2 %2950 }
 0x36f   : > { %3781 = vmatpush.msrb.mxu2 %v9970_v35  ;;  %2944 = vmax.xlane.f32.xlu2 %v2943_v10  ;;  %14060 = vst [vmem:[#allocation31_spill] sm:$0xff] %v11858_v12  ;;  %v3252_v35 = vsel %vm1102_vm2, %v11858_v12, 0.0  ;;  %v11866_v10 = vmul.f32 0.35355338, %v2580_v33  ;;  %v9965_v33 = vunpack.i.l.bf16 %v11515_v38 }
 0x370   : > { %9993 = vrot.lane.b32.xlu1 %v11414_v29, %s10599_s17 }
 0x371   : > { %14062 = vst [vmem:[#allocation33_spill] sm:$0xff] %v11866_v10 }
 0x373   : > { %3247 = vadd.xlane.f32.xlu0 %v3246_v48  ;;  %v11868_v48 = vpop.f32.mrf.mxu3  ;;  %v2528_v6 = vpop.f32.mrf.mxu2 }
 0x374   : > { %v11864_v1 = vpop.xlane.xlu0 %2965  ;;  %v11872_v53 = vmul.f32 0.35355338, %v2528_v6  ;;  %v9961_v6 = vunpack.i.h.bf16 %v11630_v23 }
 0x375   : > { %14061 = vst [vmem:[#allocation32_spill] sm:$0xff] %v11864_v1 }
 0x376   : > { %14063 = vst [vmem:[#allocation34_spill] sm:$0xff] %v11872_v53 }
 0x377   : > { %2956 = vmax.xlane.f32.xlu2 %v2955_v39  ;;  %v2997_v39 = vsel %vm1102_vm2, %v11866_v10, -inf }
 0x37b   : > { %3253 = vadd.xlane.f32.xlu0 %v3252_v35 }
 0x37c   : > { %v11874_v49 = vpop.xlane.xlu0 %2974 }
 0x37e   : > { %v3227_v60 = vpop.xlane.xlu1 %3226 }
 0x37f   : > { %10271 = vrcp.f32 %v3227_v60 }
 0x382   : > { %v3218_v43 = vpop.xlane.xlu2 %3217 }
 0x383   : > { %10273 = vrcp.f32 %v3218_v43  ;;  %2998 = vmax.xlane.f32.xlu0 %v2997_v39  ;;  %v2991_v43 = vsel %vm1102_vm2, %v11872_v53, -inf  ;;  %v2554_v39 = vpop.f32.mrf.mxu3 }
 0x385   : > { %v10272_v29 = vpop.eup %10271 }
 0x386   : > { %v3473_v35 = vmul.f32 %v10272_v29, %v11658_v27  ;;  %v11886_v29 = vmul.f32 0.35355338, %v2554_v39 }
 0x388   : > { %8780 = vmatmul.msk.f32.vlgmr.msrb.gmra.mxu0 %vm1102_vm2, %v3473_v35  ;;  %14064 = vst [vmem:[#allocation35_spill] sm:$0xff] %v11886_v29 }
 0x389   : > { %v10274_v60 = vpop.eup %10273  ;;  %3827 = vmatpush.msrb.mxu0 %v9965_v33 }
 0x38a   : > { %v3470_v1 = vmul.f32 %v10274_v60, %v11663_v59  ;;  %v11880_v12 = vpop.xlane.xlu2 %2962  ;;  %v3224_v10 = vpop.xlane.xlu1 %3223  ;;  %v3030_v59 = vsub.f32 %v11571_v37, %v11734_v20  ;;  %v9971_v60 = vunpack.i.h.bf16 %v11535_v0 }
 0x38b   : > { %10275 = vrcp.f32 %v3224_v10  ;;  %2992 = vmax.xlane.f32.xlu0 %v2991_v43 }
 0x38c   : > { %8777 = vmatmul.msk.f32.vlgmr.msrb.gmra.mxu1 %vm1102_vm2, %v3470_v1  ;;  %v2994_v1 = vsel %vm1102_vm2, %v11886_v29, -inf  ;;  %v3103_v43 = vmul.f32 1.442695, %v3030_v59 }
 0x38d   : > { %3758 = vmatpush.msrb.mxu1 %v9961_v6  ;;  %v11899_v6 = vmul.f32 0.35355338, %v2424_v44  ;;  %v9981_v44 = vunpack.i.h.bf16 %v11642_v62 }
 0x38e   : > { %v3236_v27 = vpop.xlane.xlu0 %3235 }
 0x38f   : > { %9998 = vrot.lane.b32.xlu2 %v11441_v42, %s10600_s2  ;;  %10277 = vrcp.f32 %v3236_v27  ;;  %v2979_v39 = vsel %vm1102_vm2, %v11899_v6, -inf }
 0x390   : > { %10279 = vpow2.f32 %v3103_v43 }
 0x391   : > { %v10276_v35 = vpop.eup %10275 }
 0x392   : > { %v3472_v33 = vmul.f32 %v10276_v35, %v11670_v61  ;;  %v11893_v23 = vpop.xlane.xlu2 %2977  ;;  %v2879_v10 = vpop.xlane.xlu1 %2878 }
 0x393   : > { %2995 = vmax.xlane.f32.xlu0 %v2994_v1  ;;  %v3037_v61 = vsub.f32 %v11680_v32, %v2879_v10 }
 0x394   : > { %8779 = vmatmul.msk.f32.vlgmr.msrb.gmra.mxu3 %vm1102_vm2, %v3472_v33 }
 0x395   : > { %3804 = vmatpush.msrb.mxu3 %v9971_v60  ;;  %v10278_v20 = vpop.eup %10277  ;;  %v3117_v59 = vmul.f32 1.442695, %v3037_v61  ;;  %v3050_v61 = vsub.f32 %v11546_v34, %v11684_v56  ;;  %v3054_v34 = vsub.f32 %v11587_v52, %v11754_v17  ;;  %v9980_v17 = vunpack.i.l.bf16 %v11642_v62 }
 0x396   : > { %v11901_v37 = vpop.xlane.xlu0 %2893  ;;  %v3476_v27 = vmul.f32 %v10278_v20, %v11676_v21  ;;  %v11913_v33 = vpop.eup %10279 }
 0x397   : > { %10281 = vpow2.f32 %v3117_v59  ;;  %v3240_v32 = vsel %vm1102_vm2, %v11913_v33, 0.0  ;;  %v3143_v59 = vmul.f32 1.442695, %v3050_v61  ;;  %v3031_v61 = vsub.f32 %v11567_v18, %v11828_v31 }
 0x398   : > { %v3033_v18 = vsub.f32 %v11600_v11, %v11778_v40  ;;  %v3035_v40 = vsub.f32 %v11634_v51, %v11852_v16 }
 0x399   : > { %v3105_v62 = vmul.f32 1.442695, %v3031_v61 }
 0x39a   : > { %v11907_v35 = vpop.xlane.xlu2 %2986  ;;  %v11909_v0 = vpop.xlane.xlu1 %2875  ;;  %2980 = vmax.xlane.f32.xlu1 %v2979_v39 }
 0x39b   : > { %v3036_v51 = vsub.f32 %v11700_v25, %v11909_v0 }
 0x39c   : > { %8783 = vmatmul.msk.f32.vlgmr.msra.gmra.mxu3 %vm1102_vm2, %v3476_v27 }
 0x39d   : > { %3896 = vmatpush.msra.mxu3 %v9981_v44  ;;  %v11920_v20 = vpop.eup %10281 }
 0x39e   : > { %v11915_v1 = vpop.xlane.xlu0 %2902  ;;  %v3261_v27 = vsel %vm1102_vm2, %v11920_v20, 0.0 }
 0x3a2   : > { %v3230_v21 = vpop.xlane.xlu2 %3229  ;;  %v2885_v10 = vpop.xlane.xlu1 %2884  ;;  %3241 = vadd.xlane.f32.xlu1 %v3240_v32 }
 0x3a3   : > { %v3039_v60 = vsub.f32 %v11716_v2, %v2885_v10  ;;  %10283 = vrcp.f32 %v3230_v21  ;;  %v9966_v21 = vunpack.i.h.bf16 %v11515_v38 }
 0x3a5   : > { %v3121_v43 = vmul.f32 1.442695, %v3039_v60 }
 0x3a6   : > { %v11924_v39 = vpop.xlane.xlu0 %2899 }
 0x3a7   : > { %10285 = vpow2.f32 %v3121_v43  ;;  %v3151_v43 = vmul.f32 1.442695, %v3054_v34 }
 0x3a9   : > { %v10284_v44 = vpop.eup %10283 }
 0x3aa   : > { %v3233_v53 = vpop.xlane.xlu2 %3232  ;;  %v2906_v29 = vpop.xlane.xlu1 %2905  ;;  %3262 = vadd.xlane.f32.xlu1 %v3261_v27  ;;  %v3474_v2 = vmul.f32 %v10284_v44, %v11720_v55 }
 0x3ab   : > { %v3046_v32 = vsub.f32 %v11728_v22, %v2906_v29  ;;  %10287 = vrcp.f32 %v3233_v53 }
 0x3ac   : > { %8781 = vmatmul.msk.f32.vlgmr.msra.gmra.mxu1 %vm1102_vm2, %v3474_v2  ;;  %10289 = vpow2.f32 %v3143_v59 }
 0x3ad   : > { %v3135_v56 = vmul.f32 1.442695, %v3046_v32  ;;  %v11934_v10 = vpop.eup %10285  ;;  %3850 = vmatpush.msra.mxu1 %v9966_v21  ;;  %v11962_v32 = vmul.f32 0.35355338, %v11868_v48 }
 0x3ae   : > { %v11936_v60 = vpop.xlane.xlu0 %2911  ;;  %v3267_v55 = vsel %vm1102_vm2, %v11934_v10, 0.0 }
 0x3af   : > { %10291 = vpow2.f32 %v3135_v56  ;;  %v2982_v34 = vsel %vm1102_vm2, %v11962_v32, -inf  ;;  %v3109_v56 = vmul.f32 1.442695, %v3033_v18 }
 0x3b0   : > { %10293 = vpow2.f32 %v3151_v43 }
 0x3b1   : > { %v10288_v22 = vpop.eup %10287  ;;  %10295 = vpow2.f32 %v3105_v62 }
 0x3b2   : > { %v11940_v38 = vpop.xlane.xlu2 %2881  ;;  %3268 = vadd.xlane.f32.xlu1 %v3267_v55  ;;  %v3475_v52 = vmul.f32 %v10288_v22, %v11732_v24  ;;  %v11943_v53 = vpop.eup %10289  ;;  %v3042_v22 = vsub.f32 %v11689_v14, %v11901_v37  ;;  %10297 = vpow2.f32 %v3109_v56  ;;  %v3045_v14 = vsub.f32 %v11707_v57, %v11915_v1 }
 0x3b3   : > { %v3300_v24 = vsel %vm1102_vm2, %v11943_v53, 0.0  ;;  %v3038_v1 = vsub.f32 %v11748_v47, %v11940_v38 }
 0x3b4   : > { %8782 = vmatmul.msk.f32.vlgmr.msra.gmra.mxu2 %vm1102_vm2, %v3475_v52  ;;  %v3127_v61 = vmul.f32 1.442695, %v3042_v22  ;;  %v3133_v18 = vmul.f32 1.442695, %v3045_v14 }
 0x3b5   : > { %v11946_v29 = vpop.eup %10291  ;;  %3873 = vmatpush.msra.mxu2 %v9980_v17 }
 0x3b6   : > { %v11951_v27 = vpop.xlane.xlu0 %2932  ;;  %v3288_v44 = vsel %vm1102_vm2, %v11946_v29, 0.0  ;;  %v11959_v2 = vpop.eup %10293 }
 0x3b7   : > { %3289 = vadd.xlane.f32.xlu0 %v3288_v44  ;;  %v3312_v21 = vsel %vm1102_vm2, %v11959_v2, 0.0  ;;  %v11973_v48 = vpop.eup %10295  ;;  %v3113_v44 = vmul.f32 1.442695, %v3035_v40  ;;  %v3119_v40 = vmul.f32 1.442695, %v3038_v1 }
 0x3b8   : > { %3301 = vadd.xlane.f32.xlu2 %v3300_v24  ;;  %v3243_v17 = vsel %vm1102_vm2, %v11973_v48, 0.0 }
 0x3ba   : > { %v11957_v59 = vpop.xlane.xlu2 %2890 }
 0x3be   : > { %v11966_v31 = vpop.xlane.xlu0 %2947 }
 0x3bf   : > { %3313 = vadd.xlane.f32.xlu0 %v3312_v21  ;;  %v3115_v21 = vmul.f32 1.442695, %v3036_v51 }
 0x3c0   : > { %2983 = vmax.xlane.f32.xlu2 %v2982_v34 }
 0x3c2   : > { %v2888_v43 = vpop.xlane.xlu2 %2887 }
 0x3c3   : > { %v3040_v55 = vsub.f32 %v11782_v63, %v2888_v43  ;;  %v11983_v63 = vpop.eup %10297 }
 0x3c4   : > { %v3249_v62 = vsel %vm1102_vm2, %v11983_v63, 0.0 }
 0x3c5   : > { %v3123_v11 = vmul.f32 1.442695, %v3040_v55 }
 0x3c6   : > { %v11979_v52 = vpop.xlane.xlu0 %2968 }
 0x3c7   : > { %10299 = vpow2.f32 %v3123_v11  ;;  %v9975_v11 = vunpack.i.l.bf16 %v11636_v9 }
 0x3c8   : > { %3244 = vadd.xlane.f32.xlu2 %v3243_v17  ;;  %10301 = vpow2.f32 %v3127_v61  ;;  %v2921_v17 = vpop.xlane.xlu1 %2920 }
 0x3c9   : > { %10303 = vpow2.f32 %v3113_v44  ;;  %v3051_v61 = vsub.f32 %v11750_v28, %v2921_v17 }
 0x3ca   : > { %v2897_v25 = vpop.xlane.xlu2 %2896 }
 0x3cd   : > { %v11985_v24 = vpop.eup %10299 }
 0x3ce   : > { %v3239_v16 = vpop.xlane.xlu0 %3238  ;;  %v3270_v37 = vsel %vm1102_vm2, %v11985_v24, 0.0  ;;  %v11995_v34 = vpop.eup %10301 }
 0x3cf   : > { %3271 = vadd.xlane.f32.xlu1 %v3270_v37  ;;  %10305 = vrcp.f32 %v3239_v16  ;;  %v11999_v57 = vpop.eup %10303  ;;  %v3276_v43 = vsel %vm1102_vm2, %v11995_v34, 0.0  ;;  %v2606_v16 = vpop.f32.mrf.mxu1 }
 0x3d0   : > { %3250 = vadd.xlane.f32.xlu2 %v3249_v62  ;;  %10307 = vpow2.f32 %v3133_v18  ;;  %v3255_v22 = vsel %vm1102_vm2, %v11999_v57, 0.0  ;;  %v3145_v62 = vmul.f32 1.442695, %v3051_v61  ;;  %v12025_v18 = vmul.f32 0.35355338, %v2606_v16 }
 0x3d1   : > { %10309 = vpow2.f32 %v3115_v21 }
 0x3d2   : > { %10311 = vpow2.f32 %v3119_v40  ;;  %v2909_v44 = vpop.xlane.xlu2 %2908 }
 0x3d3   : > { %10003 = vrot.lane.b32.xlu0 %v11265_v3, %s10599_s17  ;;  %10313 = vpow2.f32 %v3145_v62 }
 0x3d5   : > { %v10306_v0 = vpop.eup %10305 }
 0x3d6   : > { %v12003_v56 = vpop.xlane.xlu0 %2971  ;;  %v3477_v55 = vmul.f32 %v10306_v0, %v11805_v13  ;;  %v12012_v47 = vpop.eup %10307  ;;  %v3041_v13 = vsub.f32 %v11765_v26, %v11957_v59  ;;  %v3043_v26 = vsub.f32 %v11795_v8, %v2897_v25  ;;  %v3000_v0 = vsel %vm1102_vm2, %v12025_v18, -inf }
 0x3d7   : > { %3277 = vadd.xlane.f32.xlu1 %v3276_v43  ;;  %v12014_v38 = vpop.eup %10309  ;;  %v3285_v51 = vsel %vm1102_vm2, %v12012_v47, 0.0  ;;  %v3044_v25 = vsub.f32 %v11722_v7, %v11924_v39  ;;  %v3055_v7 = vsub.f32 %v11756_v41, %v11951_v27 }
 0x3d8   : > { %3256 = vadd.xlane.f32.xlu2 %v3255_v22  ;;  %8784 = vmatmul.msk.f32.vlgmr.msra.gmra.mxu0 %vm1102_vm2, %v3477_v55  ;;  %v3258_v37 = vsel %vm1102_vm2, %v12014_v38, 0.0  ;;  %v3125_v28 = vmul.f32 1.442695, %v3041_v13  ;;  %v12027_v21 = vpop.eup %10311  ;;  %v2936_v55 = vpop.xlane.xlu1 %2935  ;;  %v3129_v22 = vmul.f32 1.442695, %v3043_v26 }
 0x3d9   : > { %3919 = vmatpush.msra.mxu0 %v9975_v11  ;;  %v3264_v1 = vsel %vm1102_vm2, %v12027_v21, 0.0  ;;  %v12034_v11 = vpop.eup %10313 }
 0x3da   : > { %10315 = vpow2.f32 %v3125_v28  ;;  %v2924_v43 = vpop.xlane.xlu2 %2923  ;;  %v3303_v61 = vsel %vm1102_vm2, %v12034_v11, 0.0  ;;  %v3153_v28 = vmul.f32 1.442695, %v3055_v7 }
 0x3db   : > { %v3052_v40 = vsub.f32 %v11822_v50, %v2924_v43  ;;  %v3131_v50 = vmul.f32 1.442695, %v3044_v25 }
 0x3dd   : > { %v3147_v13 = vmul.f32 1.442695, %v3052_v40 }
 0x3de   : > { %v12019_v14 = vpop.xlane.xlu0 %2989 }
 0x3df   : > { %3286 = vadd.xlane.f32.xlu1 %v3285_v51 }
 0x3e0   : > { %3259 = vadd.xlane.f32.xlu2 %v3258_v37  ;;  %v12037_v17 = vpop.eup %10315  ;;  %v9991_v37 = vunpack.i.h.bf16 %v11695_v45  ;;  %v12050_v39 = vpop.xlane.xlu1 %2959 }
 0x3e1   : > { %v3273_v16 = vsel %vm1102_vm2, %v12037_v17, 0.0 }
 0x3e6   : > { %v3248_v59 = vpop.xlane.xlu0 %3247 }
 0x3e7   : > { %3001 = vmax.xlane.f32.xlu1 %v3000_v0  ;;  %10317 = vrcp.f32 %v3248_v59 }
 0x3e8   : > { %3265 = vadd.xlane.f32.xlu2 %v3264_v1  ;;  %10319 = vpow2.f32 %v3129_v22  ;;  %v3056_v1 = vsub.f32 %v11767_v54, %v2936_v55  ;;  %v12064_v43 = vpop.xlane.xlu1 %3298  ;;  %v3061_v55 = vsub.f32 %v11596_v58, %v11860_v4 }
 0x3e9   : > { %10321 = vpow2.f32 %v3147_v13 }
 0x3ea   : > { %10323 = vpow2.f32 %v3131_v50 }
 0x3eb   : > { %10325 = vpow2.f32 %v3153_v28 }
 0x3ed   : > { %v10318_v8 = vpop.eup %10317 }
 0x3ee   : > { %v3480_v51 = vmul.f32 %v10318_v8, %v11843_v36  ;;  %v12052_v62 = vpop.eup %10319  ;;  %v3047_v36 = vsub.f32 %v11808_v5, %v2909_v44  ;;  %v3048_v5 = vsub.f32 %v11739_v15, %v11936_v60  ;;  %v3155_v44 = vmul.f32 1.442695, %v3056_v1  ;;  %v2632_v1 = vpop.f32.mrf.mxu2 }
 0x3ef   : > { %3304 = vadd.xlane.f32.xlu1 %v3303_v61  ;;  %v3279_v26 = vsel %vm1102_vm2, %v12052_v62, 0.0  ;;  %v12057_v59 = vpop.eup %10321  ;;  %v3053_v15 = vsub.f32 %v11553_v19, %v11814_v46  ;;  %v3165_v60 = vmul.f32 1.442695, %v3061_v55  ;;  %v2945_v19 = vpop.xlane.xlu2 %2944  ;;  %v9976_v55 = vunpack.i.h.bf16 %v11636_v9 }
 0x3f0   : > { %3274 = vadd.xlane.f32.xlu2 %v3273_v16  ;;  %8787 = vmatmul.msk.f32.vlgmr.msrb.gmra.mxu3 %vm1102_vm2, %v3480_v51  ;;  %v3137_v0 = vmul.f32 1.442695, %v3047_v36  ;;  %v12060_v41 = vpop.eup %10323  ;;  %v3306_v27 = vsel %vm1102_vm2, %v12057_v59, 0.0  ;;  %v3139_v54 = vmul.f32 1.442695, %v3048_v5  ;;  %v12078_v61 = vpop.permute.xlu1 %9993  ;;  %v14065_v51 = vld [vmem:[#allocation20_spill] sm:$0xff] }
 0x3f1   : > { %3988 = vmatpush.msrb.mxu3 %v9991_v37  ;;  %v3282_v22 = vsel %vm1102_vm2, %v12060_v41, 0.0  ;;  %v12070_v40 = vpop.eup %10325  ;;  %v3149_v4 = vmul.f32 1.442695, %v3053_v15  ;;  %v3254_v5 = vpop.xlane.xlu0 %3253  ;;  %v14068_v15 = vld [vmem:[#allocation15_spill] sm:$0xff] }
 0x3f2   : > { %10327 = vpow2.f32 %v3137_v0  ;;  %v3315_v25 = vsel %vm1102_vm2, %v12070_v40, 0.0 }
 0x3f3   : > { %10329 = vpow2.f32 %v3155_v44  ;;  %v12106_v44 = vmul.f32 0.35355338, %v2632_v1  ;;  %v14070_v1 = vld [vmem:[#allocation31_spill] sm:$0xff] }
 0x3f4   : > { %10331 = vpow2.f32 %v3139_v54 }
 0x3f5   : > { %10333 = vpow2.f32 %v3165_v60  ;;  %14066 = vst [vmem:[#allocation20_spill] sm:$0xff] %v12106_v44 }
 0x3f6   : > { %10335 = vpow2.f32 %v3149_v4  ;;  %v14069_v4 = vld [vmem:[#allocation12_spill] sm:$0xff] }
 0x3f8   : > { %3280 = vadd.xlane.f32.xlu2 %v3279_v26  ;;  %v12074_v8 = vpop.eup %10327 }
 0x3f9   : > { %v3291_v13 = vsel %vm1102_vm2, %v12074_v8, 0.0  ;;  %v12086_v58 = vpop.eup %10329 }
 0x3fa   : > { %v12088_v16 = vpop.eup %10331  ;;  %v3318_v37 = vsel %vm1102_vm2, %v12086_v58, 0.0 }
 0x3fb   : > { %v3294_v46 = vsel %vm1102_vm2, %v12088_v16, 0.0  ;;  %v12096_v7 = vpop.eup %10333 }
 0x3fc   : > { %v12098_v36 = vpop.eup %10335  ;;  %v3333_v28 = vsel %vm1102_vm2, %v12096_v7, 0.0 }
 0x3fd   : > { %3307 = vadd.xlane.f32.xlu0 %v3306_v27  ;;  %v3309_v0 = vsel %vm1102_vm2, %v12098_v36, 0.0  ;;  %v12104_v27 = vpop.xlane.xlu2 %2956 }
 0x400   : > { %3283 = vadd.xlane.f32.xlu2 %v3282_v22 }
 0x405   : > { %3316 = vadd.xlane.f32.xlu0 %v3315_v25  ;;  %v14067_v25 = vld [vmem:[#allocation16_spill] sm:$0xff] }
 0x406   : > { %v3057_v60 = vsub.f32 %v14068_v15, %v14067_v25 }
 0x408   : > { %10008 = vrot.lane.b32.xlu1 %v14065_v51, %s10599_s17  ;;  %3292 = vadd.xlane.f32.xlu2 %v3291_v13  ;;  %v3003_v13 = vsel %vm1102_vm2, %v12106_v44, -inf }
 0x40d   : > { %v12092_v50 = vpop.xlane.xlu1 %2980  ;;  %3319 = vadd.xlane.f32.xlu0 %v3318_v37  ;;  %v3058_v37 = vsub.f32 %v14069_v4, %v11845_v30 }
 0x40f   : > { %v3159_v9 = vmul.f32 1.442695, %v3058_v37 }
 0x410   : > { %3295 = vadd.xlane.f32.xlu2 %v3294_v46  ;;  %v2658_v46 = vpop.f32.mrf.mxu3 }
 0x415   : > { %v3242_v26 = vpop.xlane.xlu1 %3241  ;;  %3334 = vadd.xlane.f32.xlu0 %v3333_v28 }
 0x416   : > { %10337 = vrcp.f32 %v3242_v26  ;;  %v3157_v26 = vmul.f32 1.442695, %v3057_v60 }
 0x417   : > { %10339 = vrcp.f32 %v3254_v5 }
 0x418   : > { %3310 = vadd.xlane.f32.xlu2 %v3309_v0  ;;  %v12117_v0 = vmul.f32 0.35355338, %v2658_v46  ;;  %10341 = vpow2.f32 %v3157_v26  ;;  %v14073_v46 = vld [vmem:[#allocation22_spill] sm:$0xff] }
 0x419   : > { %10343 = vpow2.f32 %v3159_v9 }
 0x41a   : > { %v3006_v30 = vsel %vm1102_vm2, %v12117_v0, -inf }
 0x41c   : > { %v10338_v22 = vpop.eup %10337 }
 0x41d   : > { %v3478_v54 = vmul.f32 %v10338_v22, %v11913_v33  ;;  %v10340_v28 = vpop.eup %10339  ;;  %v12119_v33 = vpop.permute.xlu2 %9998  ;;  %v14071_v22 = vld [vmem:[#allocation11_spill] sm:$0xff] }
 0x41e   : > { %v3482_v5 = vmul.f32 %v10340_v28, %v14070_v1  ;;  %v12131_v60 = vpop.eup %10341  ;;  %v3060_v28 = vsub.f32 %v14073_v46, %v11966_v31 }
 0x41f   : > { %8785 = vmatmul.msk.f32.vlgmr.msrb.gmra.mxu1 %vm1102_vm2, %v3478_v54  ;;  %v9986_v54 = vunpack.i.h.bf16 %v14071_v22  ;;  %v12133_v4 = vpop.eup %10343  ;;  %v3321_v37 = vsel %vm1102_vm2, %v12131_v60, 0.0 }
 0x420   : > { %3942 = vmatpush.msrb.mxu1 %v9976_v55  ;;  %3004 = vmax.xlane.f32.xlu2 %v3003_v13  ;;  %v14072_v55 = vld [vmem:[#allocation29_spill] sm:$0xff]  ;;  %v3163_v9 = vmul.f32 1.442695, %v3060_v28 }
 0x421   : > { %v3059_v25 = vsub.f32 %v14072_v55, %v2945_v19  ;;  %v3324_v19 = vsel %vm1102_vm2, %v12133_v4, 0.0 }
 0x423   : > { %v3161_v13 = vmul.f32 1.442695, %v3059_v25  ;;  %v14075_v25 = vld [vmem:[#allocation18_spill] sm:$0xff] }
 0x425   : > { %10345 = vpow2.f32 %v3161_v13  ;;  %v3065_v13 = vsub.f32 %v14075_v25, %v11880_v12  ;;  %v14077_v12 = vld [vmem:[#allocation21_spill] sm:$0xff] }
 0x426   : > { %10347 = vpow2.f32 %v3163_v9 }
 0x427   : > { %8789 = vmatmul.msk.f32.vlgmr.msra.gmra.mxu1 %vm1102_vm2, %v3482_v5  ;;  %v3263_v5 = vpop.xlane.xlu1 %3262  ;;  %v3173_v44 = vmul.f32 1.442695, %v3065_v13 }
 0x428   : > { %4034 = vmatpush.msra.mxu1 %v9986_v54  ;;  %3007 = vmax.xlane.f32.xlu2 %v3006_v30  ;;  %v12147_v30 = vpop.xlane.xlu0 %2998 }
 0x429   : > { %10023 = vrot.lane.b32.xlu0 %v11265_v3, %s10602_s23 }
 0x42b   : > { %v12129_v15 = vpop.xlane.xlu2 %3301  ;;  %v12143_v1 = vpop.eup %10345 }
 0x42c   : > { %14074 = vst [vmem:[#allocation16_spill] sm:$0xff] %v12143_v1  ;;  %v3327_v54 = vsel %vm1102_vm2, %v12143_v1, 0.0  ;;  %v12149_v55 = vpop.eup %10347 }
 0x42f   : > { %v3269_v28 = vpop.xlane.xlu1 %3268 }
 0x430   : > { %3322 = vadd.xlane.f32.xlu2 %v3321_v37  ;;  %v3330_v37 = vsel %vm1102_vm2, %v12149_v55, 0.0  ;;  %v12157_v1 = vpop.xlane.xlu0 %2992 }
 0x431   : > { %14076 = vst [vmem:[#allocation15_spill] sm:$0xff] %v12157_v1  ;;  %v2710_v1 = vpop.f32.mrf.mxu1 }
 0x432   : > { %3325 = vadd.xlane.f32.xlu1 %v3324_v19 }
 0x433   : > { %v12141_v26 = vpop.xlane.xlu2 %2983 }
 0x438   : > { %v12167_v13 = vpop.xlane.xlu0 %2995 }
 0x43a   : > { %3328 = vadd.xlane.f32.xlu1 %v3327_v54  ;;  %v9990_v54 = vunpack.i.l.bf16 %v11695_v45 }
 0x43b   : > { %v3245_v31 = vpop.xlane.xlu2 %3244 }
 0x43c   : > { %10349 = vrcp.f32 %v3245_v31 }
 0x442   : > { %v10350_v46 = vpop.eup %10349  ;;  %3331 = vadd.xlane.f32.xlu1 %v3330_v37  ;;  %v3272_v25 = vpop.xlane.xlu1 %3271 }
 0x443   : > { %v3479_v19 = vmul.f32 %v10350_v46, %v11973_v48  ;;  %v3251_v9 = vpop.xlane.xlu2 %3250  ;;  %v9985_v46 = vunpack.i.l.bf16 %v14071_v22 }
 0x444   : > { %10351 = vrcp.f32 %v3251_v9 }
 0x445   : > { %8786 = vmatmul.msk.f32.vlgmr.msrb.gmra.mxu2 %vm1102_vm2, %v3479_v19  ;;  %10353 = vpow2.f32 %v3173_v44 }
 0x446   : > { %3965 = vmatpush.msrb.mxu2 %v9990_v54  ;;  %10355 = vrcp.f32 %v3263_v5  ;;  %v2684_v5 = vpop.f32.mrf.mxu0 }
 0x448   : > { %10013 = vrot.lane.b32.xlu2 %v14077_v12, %s10602_s23 }
 0x44a   : > { %v10352_v31 = vpop.eup %10351 }
 0x44b   : > { %v3481_v37 = vmul.f32 %v10352_v31, %v11983_v63  ;;  %v3257_v48 = vpop.xlane.xlu2 %3256  ;;  %v12165_v45 = vpop.eup %10353  ;;  %v9995_v31 = vunpack.i.l.bf16 %v12078_v61 }
 0x44c   : > { %10357 = vrcp.f32 %v3257_v48  ;;  %v10356_v19 = vpop.eup %10355  ;;  %v3345_v63 = vsel %vm1102_vm2, %v12165_v45, 0.0  ;;  %v3278_v48 = vpop.xlane.xlu1 %3277 }
 0x44d   : > { %8788 = vmatmul.msk.f32.vlgmr.msrb.gmra.mxu0 %vm1102_vm2, %v3481_v37  ;;  %10359 = vrcp.f32 %v3269_v28  ;;  %v3485_v22 = vmul.f32 %v10356_v19, %v11920_v20  ;;  %v10000_v37 = vunpack.i.l.bf16 %v12119_v33  ;;  %v12179_v28 = vmul.f32 0.35355338, %v2684_v5 }
 0x44e   : > { %4011 = vmatpush.msrb.mxu0 %v9985_v46  ;;  %v3290_v46 = vpop.xlane.xlu0 %3289  ;;  %v10001_v5 = vunpack.i.h.bf16 %v12119_v33 }
 0x450   : > { %10018 = vrot.lane.b32.xlu2 %v11441_v42, %s10599_s17  ;;  %s10611_s17 = smov 56  }
 0x452   : > { %v10358_v44 = vpop.eup %10357 }
 0x453   : > { %v3483_v9 = vmul.f32 %v10358_v44, %v11999_v57  ;;  %v3260_v54 = vpop.xlane.xlu2 %3259  ;;  %3346 = vadd.xlane.f32.xlu0 %v3345_v63  ;;  %v10360_v20 = vpop.eup %10359  ;;  %v14078_v57 = vld [vmem:[#allocation10_spill] sm:$0xff]  ;;  %v3009_v63 = vsel %vm1102_vm2, %v12179_v28, -inf }
 0x454   : > { %10361 = vrcp.f32 %v3260_v54  ;;  %v3069_v19 = vsub.f32 %v14078_v57, %v11874_v49  ;;  %v3487_v54 = vmul.f32 %v10360_v20, %v11934_v10  ;;  %v12192_v49 = vmul.f32 0.35355338, %v2710_v1 }
 0x455   : > { %8790 = vmatmul.msk.f32.vlgmr.msra.gmra.mxu2 %vm1102_vm2, %v3483_v9  ;;  %8792 = vmatmul.msk.f32.vlgmr.msra.gmra.mxu0 %vm1102_vm2, %v3485_v22  ;;  %10363 = vrcp.f32 %v3272_v25  ;;  %v3287_v25 = vpop.xlane.xlu1 %3286  ;;  %v9996_v1 = vunpack.i.h.bf16 %v12078_v61 }
 0x456   : > { %4057 = vmatpush.msra.mxu2 %v10000_v37  ;;  %4103 = vmatpush.msra.mxu0 %v9995_v31  ;;  %v3181_v31 = vmul.f32 1.442695, %v3069_v19  ;;  %v3012_v20 = vsel %vm1102_vm2, %v12192_v49, -inf }
 0x45a   : > { %v10362_v44 = vpop.eup %10361 }
 0x45b   : > { %v3484_v9 = vmul.f32 %v10362_v44, %v12014_v38  ;;  %v3266_v22 = vpop.xlane.xlu2 %3265  ;;  %3010 = vmax.xlane.f32.xlu0 %v3009_v63  ;;  %10028 = vrot.lane.b32.xlu1 %v14065_v51, %s10602_s23  ;;  %v10364_v10 = vpop.eup %10363  ;;  %v14079_v44 = vld [vmem:[#allocation26_spill] sm:$0xff]  ;;  %v14080_v63 = vld [vmem:[#allocation17_spill] sm:$0xff] }
 0x45c   : > { %10365 = vrcp.f32 %v3266_v22  ;;  %v12194_v38 = vpop.xlane.xlu0 %3313  ;;  %v3488_v33 = vmul.f32 %v10364_v10, %v11985_v24  ;;  %v3062_v24 = vsub.f32 %v14080_v63, %v14079_v44 }
 0x45d   : > { %8791 = vmatmul.msk.f32.vlgmr.msra.gmra.mxu3 %vm1102_vm2, %v3484_v9  ;;  %8794 = vmatmul.msk.f32.vlgmr.msrb.gmra.mxu2 %vm1102_vm2, %v3487_v54  ;;  %10367 = vpow2.f32 %v3181_v31 }
 0x45e   : > { %4080 = vmatpush.msra.mxu3 %v10001_v5  ;;  %10369 = vrcp.f32 %v3278_v48  ;;  %v3167_v5 = vmul.f32 1.442695, %v3062_v24 }
 0x462   : > { %v10366_v37 = vpop.eup %10365 }
 0x463   : > { %v3486_v57 = vmul.f32 %v10366_v37, %v12027_v21  ;;  %v3275_v19 = vpop.xlane.xlu2 %3274  ;;  %3013 = vmax.xlane.f32.xlu0 %v3012_v20  ;;  %10033 = vrot.lane.b32.xlu1 %v14077_v12, %s10603_s24  ;;  %v12205_v48 = vpop.eup %10367 }
 0x464   : > { %10371 = vrcp.f32 %v3275_v19  ;;  %v10370_v54 = vpop.eup %10369  ;;  %v12209_v21 = vpop.xlane.xlu1 %3001  ;;  %v3357_v61 = vsel %vm1102_vm2, %v12205_v48, 0.0 }
 0x465   : > { %8793 = vmatmul.msk.f32.vlgmr.msrb.gmra.mxu1 %vm1102_vm2, %v3486_v57  ;;  %8795 = vmatmul.msk.f32.vlgmr.msrb.gmra.mxu3 %vm1102_vm2, %v3488_v33  ;;  %v10004_v9 = vpop.permute.xlu0 %10003  ;;  %10373 = vrcp.f32 %v3287_v25  ;;  %v3490_v31 = vmul.f32 %v10370_v54, %v11995_v34  ;;  %v14081_v25 = vld [vmem:[#allocation32_spill] sm:$0xff]  ;;  %v14082_v57 = vld [vmem:[#allocation14_spill] sm:$0xff] }
 0x466   : > { %4126 = vmatpush.msrb.mxu1 %v9996_v1  ;;  %10375 = vrcp.f32 %v3290_v46  ;;  %v10006_v20 = vunpack.i.h.bf16 %v10004_v9  ;;  %v10005_v33 = vunpack.i.l.bf16 %v10004_v9  ;;  %v3066_v19 = vsub.f32 %v14082_v57, %v14081_v25 }
 0x468   : > { %v3175_v44 = vmul.f32 1.442695, %v3066_v19  ;;  %v14085_v19 = vld [vmem:[#allocation25_spill] sm:$0xff] }
 0x46a   : > { %v10372_v22 = vpop.eup %10371 }
 0x46b   : > { %v3489_v10 = vmul.f32 %v10372_v22, %v12037_v17  ;;  %v3281_v37 = vpop.xlane.xlu2 %3280  ;;  %3358 = vadd.xlane.f32.xlu0 %v3357_v61  ;;  %v10374_v46 = vpop.eup %10373 }
 0x46c   : > { %10377 = vrcp.f32 %v3281_v37  ;;  %v10376_v1 = vpop.eup %10375  ;;  %v12220_v17 = vpop.xlane.xlu1 %3304  ;;  %v3493_v63 = vmul.f32 %v10374_v46, %v12012_v47 }
 0x46d   : > { %8796 = vmatmul.msk.f32.vlgmr.msrb.gmra.mxu0 %vm1102_vm2, %v3489_v10  ;;  %8797 = vmatmul.msk.f32.vlgmr.msra.gmra.mxu1 %vm1102_vm2, %v3490_v31  ;;  %10379 = vpow2.f32 %v3167_v5  ;;  %v3494_v9 = vmul.f32 %v10376_v1, %v11946_v29  ;;  %v14084_v5 = vld [vmem:[#allocation23_spill] sm:$0xff] }
 0x46e   : > { %4195 = vmatpush.msrb.mxu0 %v10005_v33  ;;  %4218 = vmatpush.msra.mxu1 %v10006_v20  ;;  %10381 = vrcp.f32 %v12064_v43  ;;  %v14083_v43 = vld [vmem:[#allocation30_spill] sm:$0xff]  ;;  %v3064_v31 = vsub.f32 %v14084_v5, %v12050_v39 }
 0x46f   : > { %10383 = vrcp.f32 %v12129_v15  ;;  %v3063_v15 = vsub.f32 %v14083_v43, %v12104_v27 }
 0x470   : > { %v3171_v39 = vmul.f32 1.442695, %v3064_v31 }
 0x471   : > { %v3169_v37 = vmul.f32 1.442695, %v3063_v15 }
 0x472   : > { %v10378_v34 = vpop.eup %10377 }
 0x473   : > { %v3491_v24 = vmul.f32 %v10378_v34, %v12052_v62  ;;  %v3284_v54 = vpop.xlane.xlu2 %3283  ;;  %v12226_v22 = vpop.eup %10379 }
 0x474   : > { %10385 = vrcp.f32 %v3284_v54  ;;  %v10382_v61 = vpop.eup %10381  ;;  %v3336_v47 = vsel %vm1102_vm2, %v12226_v22, 0.0 }
 0x475   : > { %8798 = vmatmul.msk.f32.vlgmr.msra.gmra.mxu2 %vm1102_vm2, %v3491_v24  ;;  %8800 = vmatmul.msk.f32.vlgmr.msra.gmra.mxu0 %vm1102_vm2, %v3493_v63  ;;  %10387 = vpow2.f32 %v3175_v44  ;;  %v10384_v62 = vpop.eup %10383  ;;  %v3497_v46 = vmul.f32 %v10382_v61, %v14085_v19 }
 0x476   : > { %8801 = vmatmul.msk.f32.vlgmr.msrb.gmra.mxu1 %vm1102_vm2, %v3494_v9  ;;  %v3498_v1 = vmul.f32 %v10384_v62, %v11943_v53  ;;  %v14086_v53 = vld [vmem:[#allocation24_spill] sm:$0xff]  ;;  %v3308_v9 = vpop.xlane.xlu0 %3307 }
 0x477   : > { %v3067_v44 = vsub.f32 %v14086_v53, %v11979_v52 }
 0x479   : > { %3337 = vadd.xlane.f32.xlu2 %v3336_v47  ;;  %v3177_v43 = vmul.f32 1.442695, %v3067_v44  ;;  %v3078_v44 = vsub.f32 %v12025_v18, %v12209_v21 }
 0x47a   : > { %v10386_v29 = vpop.eup %10385  ;;  %v10009_v10 = vpop.permute.xlu1 %10008 }
 0x47b   : > { %v3492_v20 = vmul.f32 %v10386_v29, %v12060_v41  ;;  %v10011_v33 = vunpack.i.h.bf16 %v10009_v10  ;;  %v10010_v25 = vunpack.i.l.bf16 %v10009_v10  ;;  %v3293_v57 = vpop.xlane.xlu2 %3292  ;;  %v12239_v27 = vpop.eup %10387 }
 0x47c   : > { %10389 = vrcp.f32 %v3293_v57  ;;  %v3348_v41 = vsel %vm1102_vm2, %v12239_v27, 0.0 }
 0x47d   : > { %8799 = vmatmul.msk.f32.vlgmr.msra.gmra.mxu3 %vm1102_vm2, %v3492_v20  ;;  %4149 = vmatpush.msrb.mxu2 %v10010_v25  ;;  %10391 = vpow2.f32 %v3169_v37  ;;  %v14088_v25 = vld [vmem:[#allocation13_spill] sm:$0xff] }
 0x47e   : > { %4172 = vmatpush.msrb.mxu3 %v10011_v33  ;;  %8804 = vmatmul.msk.f32.vlgmr.msrb.gmra.mxu0 %vm1102_vm2, %v3497_v46  ;;  %10393 = vpow2.f32 %v3171_v39  ;;  %v12267_v10 = vpop.xlane.xlu0 %3316  ;;  %v3073_v57 = vsub.f32 %v14088_v25, %v11907_v35 }
 0x47f   : > { %8805 = vmatmul.msk.f32.vlgmr.msra.gmra.mxu1 %vm1102_vm2, %v3498_v1  ;;  %10043 = vrot.lane.b32.xlu0 %v11265_v3, %s10603_s24  ;;  %v2736_v1 = vpop.f32.mrf.mxu2 }
 0x480   : > { %v3189_v39 = vmul.f32 1.442695, %v3073_v57 }
 0x481   : > { %3349 = vadd.xlane.f32.xlu2 %v3348_v41  ;;  %v12285_v41 = vmul.f32 0.35355338, %v2736_v1 }
 0x482   : > { %v10390_v34 = vpop.eup %10389 }
 0x483   : > { %v3495_v63 = vmul.f32 %v10390_v34, %v12074_v8  ;;  %v3296_v24 = vpop.xlane.xlu2 %3295  ;;  %v12252_v54 = vpop.eup %10391  ;;  %v14087_v8 = vld [vmem:[#allocation27_spill] sm:$0xff]  ;;  %v3015_v35 = vsel %vm1102_vm2, %v12285_v41, -inf }
 0x484   : > { %10395 = vrcp.f32 %v3296_v24  ;;  %v3339_v15 = vsel %vm1102_vm2, %v12252_v54, 0.0  ;;  %v12259_v61 = vpop.eup %10393  ;;  %v3068_v47 = vsub.f32 %v14087_v8, %v12003_v56  ;;  %v2762_v24 = vpop.f32.mrf.mxu3  ;;  %v3199_v8 = vmul.f32 1.442695, %v3078_v44 }
 0x485   : > { %8802 = vmatmul.msk.f32.vlgmr.msrb.gmra.mxu2 %vm1102_vm2, %v3495_v63  ;;  %10397 = vpow2.f32 %v3177_v43  ;;  %v3342_v5 = vsel %vm1102_vm2, %v12259_v61, 0.0 }
 0x486   : > { %v3179_v31 = vmul.f32 1.442695, %v3068_v47  ;;  %v12277_v33 = vpop.xlane.xlu0 %3319 }
 0x487   : > { %10048 = vrot.lane.b32.xlu0 %v14065_v51, %s10603_s24 }
 0x488   : > { %10399 = vpow2.f32 %v3179_v31 }
 0x489   : > { %3340 = vadd.xlane.f32.xlu2 %v3339_v15  ;;  %10401 = vpow2.f32 %v3189_v39 }
 0x48a   : > { %v10396_v52 = vpop.eup %10395  ;;  %10403 = vrcp.f32 %v12194_v38  ;;  %v12299_v38 = vmul.f32 0.35355338, %v2762_v24 }
 0x48b   : > { %v3496_v62 = vmul.f32 %v10396_v52, %v12088_v16  ;;  %v3311_v29 = vpop.xlane.xlu2 %3310  ;;  %v12269_v37 = vpop.eup %10397 }
 0x48c   : > { %v3351_v56 = vsel %vm1102_vm2, %v12269_v37, 0.0  ;;  %10405 = vrcp.f32 %v3311_v29  ;;  %v3018_v25 = vsel %vm1102_vm2, %v12299_v38, -inf }
 0x48d   : > { %3343 = vadd.xlane.f32.xlu1 %v3342_v5  ;;  %8803 = vmatmul.msk.f32.vlgmr.msrb.gmra.mxu3 %vm1102_vm2, %v3496_v62  ;;  %10407 = vrcp.f32 %v12220_v17 }
 0x48e   : > { %v12275_v16 = vpop.eup %10399  ;;  %v12290_v34 = vpop.xlane.xlu0 %3334  ;;  %10409 = vrcp.f32 %v3308_v9 }
 0x48f   : > { %v3354_v46 = vsel %vm1102_vm2, %v12275_v16, 0.0  ;;  %v12296_v63 = vpop.eup %10401 }
 0x490   : > { %v10404_v43 = vpop.eup %10403  ;;  %v3369_v18 = vsel %vm1102_vm2, %v12296_v63, 0.0 }
 0x491   : > { %v3502_v21 = vmul.f32 %v10404_v43, %v11959_v2 }
 0x492   : > { %v10406_v15 = vpop.eup %10405 }
 0x493   : > { %v12271_v20 = vpop.xlane.xlu2 %3004  ;;  %v3501_v31 = vmul.f32 %v10406_v15, %v12098_v36  ;;  %v10408_v9 = vpop.eup %10407  ;;  %v14089_v15 = vld [vmem:[#allocation19_spill] sm:$0xff] }
 0x494   : > { %v10410_v2 = vpop.eup %10409 }
 0x495   : > { %3352 = vadd.xlane.f32.xlu1 %v3351_v56  ;;  %v3500_v44 = vmul.f32 %v10410_v2, %v12057_v59 }
 0x49b   : > { %v12281_v19 = vpop.xlane.xlu2 %3007  ;;  %v10024_v47 = vpop.permute.xlu0 %10023 }
 0x49c   : > { %v10026_v17 = vunpack.i.h.bf16 %v10024_v47  ;;  %v10025_v56 = vunpack.i.l.bf16 %v10024_v47 }
 0x49d   : > { %3355 = vadd.xlane.f32.xlu1 %v3354_v46 }
 0x4a1   : > { %10038 = vrot.lane.b32.xlu2 %v11441_v42, %s10602_s23 }
 0x4a3   : > { %v3323_v53 = vpop.xlane.xlu2 %3322 }
 0x4a4   : > { %10411 = vrcp.f32 %v3323_v53 }
 0x4a5   : > { %3016 = vmax.xlane.f32.xlu1 %v3015_v35  ;;  %v3326_v52 = vpop.xlane.xlu1 %3325  ;;  %v3499_v35 = vmul.f32 %v10408_v9, %v12034_v11 }
 0x4a6   : > { %10413 = vrcp.f32 %v3326_v52  ;;  %v3070_v52 = vsub.f32 %v14089_v15, %v11893_v23 }
 0x4a7   : > { %10415 = vpow2.f32 %v3199_v8  ;;  %v14090_v8 = vld [vmem:[#allocation28_spill] sm:$0xff] }
 0x4a8   : > { %v3074_v47 = vsub.f32 %v14090_v8, %v12019_v14 }
 0x4aa   : > { %v10412_v36 = vpop.eup %10411  ;;  %v3191_v23 = vmul.f32 1.442695, %v3074_v47 }
 0x4ab   : > { %v10014_v62 = vpop.permute.xlu2 %10013  ;;  %v3505_v24 = vmul.f32 %v10412_v36, %v12131_v60  ;;  %v3183_v60 = vmul.f32 1.442695, %v3070_v52 }
 0x4ac   : > { %v10016_v29 = vunpack.i.h.bf16 %v10014_v62  ;;  %v10015_v5 = vunpack.i.l.bf16 %v10014_v62  ;;  %v10414_v57 = vpop.eup %10413  ;;  %v12329_v62 = vpop.f32.mrf.mxu1 }
 0x4ad   : > { %3370 = vadd.xlane.f32.xlu1 %v3369_v18  ;;  %v12309_v53 = vpop.eup %10415  ;;  %v3506_v43 = vmul.f32 %v10414_v57, %v12133_v4  ;;  %v12323_v59 = vpop.xlane.xlu1 %3328  ;;  %10417 = vpow2.f32 %v3183_v60 }
 0x4ae   : > { %4287 = vmatpush.msra.mxu0 %v10015_v5  ;;  %4310 = vmatpush.msrb.mxu1 %v10016_v29  ;;  %v3384_v11 = vsel %vm1102_vm2, %v12309_v53, 0.0  ;;  %v12325_v4 = vpop.f32.mrf.mxu0  ;;  %v12331_v29 = vpop.f32.mrf.mxu3  ;;  %10419 = vrcp.f32 %v12267_v10 }
 0x4af   : > { %8808 = vmatmul.msk.f32.vlgmr.msra.gmra.mxu0 %vm1102_vm2, %v3501_v31  ;;  %8809 = vmatmul.msk.f32.vlgmr.msrb.gmra.mxu1 %vm1102_vm2, %v3502_v21  ;;  %v12338_v21 = vpop.f32.mrf.mxu2  ;;  %10421 = vrcp.f32 %v12277_v33  ;;  %v3071_v31 = vsub.f32 %v11899_v6, %v12092_v50 }
 0x4b0   : > { %4379 = vmatpush.msrb.mxu0 %v10025_v56  ;;  %4402 = vmatpush.msra.mxu1 %v10026_v17  ;;  %10423 = vpow2.f32 %v3191_v23 }
 0x4b1   : > { %3019 = vmax.xlane.f32.xlu0 %v3018_v25  ;;  %v3185_v2 = vmul.f32 1.442695, %v3071_v31  ;;  %10425 = vrcp.f32 %v12290_v34 }
 0x4b3   : > { %v10019_v46 = vpop.permute.xlu2 %10018  ;;  %v12336_v18 = vpop.eup %10417  ;;  %10427 = vpow2.f32 %v3185_v2 }
 0x4b4   : > { %v10021_v1 = vunpack.i.h.bf16 %v10019_v46  ;;  %v10020_v39 = vunpack.i.l.bf16 %v10019_v46  ;;  %v12347_v17 = vpop.f32.mrf.mxu1  ;;  %v3360_v10 = vsel %vm1102_vm2, %v12336_v18, 0.0  ;;  %v10420_v56 = vpop.eup %10419 }
 0x4b5   : > { %v12334_v5 = vpop.xlane.xlu1 %3331  ;;  %v10422_v25 = vpop.eup %10421 }
 0x4b6   : > { %4241 = vmatpush.msra.mxu2 %v10020_v39  ;;  %4264 = vmatpush.msra.mxu3 %v10021_v1  ;;  %v12343_v14 = vpop.f32.mrf.mxu0  ;;  %v12353_v36 = vpop.eup %10423  ;;  %v3503_v1 = vmul.f32 %v10420_v56, %v12070_v40  ;;  %v3504_v39 = vmul.f32 %v10422_v25, %v12086_v58  ;;  %v14091_v56 = vld [vmem:[#allocation33_spill] sm:$0xff] }
 0x4b7   : > { %8806 = vmatmul.msk.f32.vlgmr.msra.gmra.mxu2 %vm1102_vm2, %v3499_v35  ;;  %8807 = vmatmul.msk.f32.vlgmr.msra.gmra.mxu3 %vm1102_vm2, %v3500_v44  ;;  %v12355_v57 = vpop.f32.mrf.mxu2  ;;  %v12358_v46 = vpop.f32.mrf.mxu3  ;;  %v3072_v35 = vsub.f32 %v11962_v32, %v12141_v26  ;;  %v3372_v34 = vsel %vm1102_vm2, %v12353_v36, 0.0 }
 0x4b8   : > { %8812 = vmatmul.msk.f32.vlgmr.msrb.gmra.mxu0 %vm1102_vm2, %v3505_v24  ;;  %8813 = vmatmul.msk.f32.vlgmr.msra.gmra.mxu1 %vm1102_vm2, %v3506_v43  ;;  %v10426_v40 = vpop.eup %10425 }
 0x4b9   : > { %3385 = vadd.xlane.f32.xlu0 %v3384_v11  ;;  %v3187_v58 = vmul.f32 1.442695, %v3072_v35  ;;  %v12374_v32 = vpop.eup %10427  ;;  %v3509_v60 = vmul.f32 %v10426_v40, %v12096_v7  ;;  %v3077_v7 = vsub.f32 %v14091_v56, %v12147_v30  ;;  %v14092_v30 = vld [vmem:[#allocation35_spill] sm:$0xff] }
 0x4ba   : > { %v3363_v23 = vsel %vm1102_vm2, %v12374_v32, 0.0 }
 0x4bb   : > { %10429 = vpow2.f32 %v3187_v58 }
 0x4bc   : > { %v12366_v24 = vpop.f32.mrf.mxu1 }
 0x4be   : > { %v12364_v44 = vpop.f32.mrf.mxu0 }
 0x4bf   : > { %v12379_v8 = vpop.f32.mrf.mxu3 }
 0x4c4   : > { %v12386_v31 = vpop.f32.mrf.mxu1 }
 0x4c6   : > { %10053 = vrot.lane.b32.xlu1 %v14077_v12, %s10601_s20  ;;  %v3347_v9 = vpop.xlane.xlu0 %3346 }
 0x4c8   : > { %v12376_v26 = vpop.f32.mrf.mxu2 }
 0x4ca   : > { %3361 = vadd.xlane.f32.xlu2 %v3360_v10  ;;  %v12381_v47 = vpop.f32.mrf.mxu0  ;;  %v12388_v10 = vpop.eup %10429 }
 0x4cd   : > { %10063 = vrot.lane.b32.xlu0 %v11265_v3, %s10601_s20  ;;  %v10029_v33 = vpop.permute.xlu1 %10028 }
 0x4ce   : > { %v10031_v6 = vunpack.i.h.bf16 %v10029_v33  ;;  %v10030_v50 = vunpack.i.l.bf16 %v10029_v33  ;;  %v12372_v43 = vpop.xlane.xlu0 %3010 }
 0x4d0   : > { %4333 = vmatpush.msrb.mxu2 %v10030_v50  ;;  %4356 = vmatpush.msrb.mxu3 %v10031_v6  ;;  %v3366_v6 = vsel %vm1102_vm2, %v12388_v10, 0.0  ;;  %v3197_v50 = vmul.f32 1.442695, %v3077_v7 }
 0x4d1   : > { %8810 = vmatmul.msk.f32.vlgmr.msrb.gmra.mxu2 %vm1102_vm2, %v3503_v1  ;;  %8811 = vmatmul.msk.f32.vlgmr.msrb.gmra.mxu3 %vm1102_vm2, %v3504_v39 }
 0x4d2   : > { %3373 = vadd.xlane.f32.xlu2 %v3372_v34  ;;  %v12400_v1 = vpop.f32.mrf.mxu0  ;;  %v3076_v34 = vsub.f32 %v14092_v30, %v12167_v13  ;;  %10431 = vpow2.f32 %v3197_v50 }
 0x4d3   : > { %10433 = vrcp.f32 %v3347_v9 }
 0x4d4   : > { %v3195_v40 = vmul.f32 1.442695, %v3076_v34 }
 0x4d5   : > { %v10034_v15 = vpop.permute.xlu1 %10033 }
 0x4d6   : > { %v10036_v52 = vunpack.i.h.bf16 %v10034_v15  ;;  %v10035_v11 = vunpack.i.l.bf16 %v10034_v15  ;;  %v12394_v2 = vpop.xlane.xlu0 %3013  ;;  %10435 = vpow2.f32 %v3195_v40 }
 0x4d8   : > { %4471 = vmatpush.msra.mxu0 %v10035_v11  ;;  %4494 = vmatpush.msrb.mxu1 %v10036_v52  ;;  %v12392_v25 = vpop.f32.mrf.mxu2 }
 0x4d9   : > { %8816 = vmatmul.msk.f32.vlgmr.msra.gmra.mxu0 %vm1102_vm2, %v3509_v60  ;;  %v12416_v60 = vpop.eup %10431 }
 0x4da   : > { %3364 = vadd.xlane.f32.xlu2 %v3363_v23  ;;  %v3080_v23 = vsub.f32 %v12117_v0, %v12281_v19  ;;  %v3381_v13 = vsel %vm1102_vm2, %v12416_v60, 0.0  ;;  %v10434_v7 = vpop.eup %10433 }
 0x4db   : > { %v3513_v35 = vmul.f32 %v10434_v7, %v12165_v45 }
 0x4dc   : > { %v12422_v30 = vpop.eup %10435 }
 0x4dd   : > { %v3378_v19 = vsel %vm1102_vm2, %v12422_v30, 0.0 }
 0x4de   : > { %v12412_v52 = vpop.xlane.xlu0 %3358 }
 0x4e0   : > { %v12396_v33 = vpop.f32.mrf.mxu3  ;;  %v12408_v58 = vpop.f32.mrf.mxu2 }
 0x4e2   : > { %3367 = vadd.xlane.f32.xlu2 %v3366_v6  ;;  %v12402_v39 = vpop.f32.mrf.mxu1  ;;  %v3203_v6 = vmul.f32 1.442695, %v3080_v23 }
 0x4e8   : > { %v12410_v15 = vpop.f32.mrf.mxu3 }
 0x4ec   : > { %v3338_v56 = vpop.xlane.xlu2 %3337 }
 0x4ed   : > { %10437 = vrcp.f32 %v3338_v56 }
 0x4ee   : > { %10439 = vpow2.f32 %v3203_v6 }
 0x4f0   : > { %3382 = vadd.xlane.f32.xlu1 %v3381_v13 }
 0x4f1   : > { %v10044_v50 = vpop.permute.xlu0 %10043 }
 0x4f2   : > { %v10046_v34 = vunpack.i.h.bf16 %v10044_v50  ;;  %v10045_v11 = vunpack.i.l.bf16 %v10044_v50 }
 0x4f3   : > { %v10438_v9 = vpop.eup %10437 }
 0x4f4   : > { %v3510_v40 = vmul.f32 %v10438_v9, %v12226_v22  ;;  %v3350_v0 = vpop.xlane.xlu2 %3349  ;;  %4563 = vmatpush.msrb.mxu0 %v10045_v11  ;;  %4586 = vmatpush.msra.mxu1 %v10046_v34  ;;  %v12430_v23 = vpop.eup %10439  ;;  %v14093_v9 = vld [vmem:[#allocation16_spill] sm:$0xff] }
 0x4f5   : > { %10441 = vrcp.f32 %v3350_v0  ;;  %8820 = vmatmul.msk.f32.vlgmr.msrb.gmra.mxu0 %vm1102_vm2, %v3513_v35  ;;  %v3390_v35 = vsel %vm1102_vm2, %v12430_v23, 0.0 }
 0x4f6   : > { %8817 = vmatmul.msk.f32.vlgmr.msrb.gmra.mxu1 %vm1102_vm2, %v3510_v40  ;;  %10443 = vrcp.f32 %v12323_v59 }
 0x4f7   : > { %3379 = vadd.xlane.f32.xlu0 %v3378_v19  ;;  %10445 = vrcp.f32 %v12334_v5 }
 0x4f9   : > { %v10049_v6 = vpop.permute.xlu0 %10048 }
 0x4fa   : > { %10058 = vrot.lane.b32.xlu2 %v11441_v42, %s10603_s24  ;;  %v10051_v5 = vunpack.i.h.bf16 %v10049_v6  ;;  %v10050_v0 = vunpack.i.l.bf16 %v10049_v6 }
 0x4fb   : > { %v10442_v45 = vpop.eup %10441 }
 0x4fc   : > { %v3514_v22 = vmul.f32 %v10442_v45, %v12239_v27  ;;  %v3341_v11 = vpop.xlane.xlu2 %3340  ;;  %v10444_v56 = vpop.eup %10443 }
 0x4fd   : > { %v10446_v7 = vpop.eup %10445  ;;  %10447 = vrcp.f32 %v3341_v11  ;;  %v3507_v27 = vmul.f32 %v10444_v56, %v14093_v9 }
 0x4fe   : > { %8821 = vmatmul.msk.f32.vlgmr.msra.gmra.mxu1 %vm1102_vm2, %v3514_v22  ;;  %v3508_v40 = vmul.f32 %v10446_v7, %v12149_v55  ;;  %v14094_v55 = vld [vmem:[#allocation15_spill] sm:$0xff] }
 0x4ff   : > { %3391 = vadd.xlane.f32.xlu0 %v3390_v35  ;;  %v14095_v35 = vld [vmem:[#allocation34_spill] sm:$0xff] }
 0x500   : > { %v3344_v13 = vpop.xlane.xlu1 %3343  ;;  %v3075_v56 = vsub.f32 %v14095_v35, %v14094_v55 }
 0x501   : > { %10449 = vrcp.f32 %v3344_v13 }
 0x502   : > { %v3193_v7 = vmul.f32 1.442695, %v3075_v56  ;;  %v12484_v56 = vpop.f32.mrf.mxu3 }
 0x503   : > { %v10448_v19 = vpop.eup %10447 }
 0x504   : > { %v10039_v50 = vpop.permute.xlu2 %10038  ;;  %v3511_v22 = vmul.f32 %v10448_v19, %v12252_v54  ;;  %10451 = vpow2.f32 %v3193_v7  ;;  %v14096_v54 = vld [vmem:[#allocation20_spill] sm:$0xff] }
 0x505   : > { %v10041_v34 = vunpack.i.h.bf16 %v10039_v50  ;;  %v10040_v59 = vunpack.i.l.bf16 %v10039_v50 }
 0x507   : > { %4425 = vmatpush.msra.mxu2 %v10040_v59  ;;  %4448 = vmatpush.msra.mxu3 %v10041_v34  ;;  %v10450_v45 = vpop.eup %10449 }
 0x508   : > { %8814 = vmatmul.msk.f32.vlgmr.msra.gmra.mxu2 %vm1102_vm2, %v3507_v27  ;;  %8815 = vmatmul.msk.f32.vlgmr.msra.gmra.mxu3 %vm1102_vm2, %v3508_v40  ;;  %v3512_v11 = vmul.f32 %v10450_v45, %v12259_v61  ;;  %v12452_v13 = vpop.xlane.xlu1 %3352  ;;  %v3079_v61 = vsub.f32 %v14096_v54, %v12271_v20  ;;  %v3082_v27 = vsub.f32 %v12192_v49, %v12394_v2 }
 0x509   : > { %4517 = vmatpush.msrb.mxu2 %v10050_v0  ;;  %4540 = vmatpush.msrb.mxu3 %v10051_v5 }
 0x50a   : > { %10068 = vrot.lane.b32.xlu1 %v14065_v51, %s10601_s20  ;;  %v12458_v50 = vpop.eup %10451  ;;  %v3201_v59 = vmul.f32 1.442695, %v3079_v61  ;;  %v3207_v5 = vmul.f32 1.442695, %v3082_v27  ;;  %v12490_v27 = vpop.f32.mrf.mxu0 }
 0x50b   : > { %v3375_v34 = vsel %vm1102_vm2, %v12458_v50, 0.0 }
 0x50c   : > { %10453 = vpow2.f32 %v3201_v59 }
 0x50d   : > { %10455 = vrcp.f32 %v12412_v52  ;;  %v12482_v52 = vpop.f32.mrf.mxu2 }
 0x50e   : > { %10457 = vpow2.f32 %v3207_v5 }
 0x510   : > { %8818 = vmatmul.msk.f32.vlgmr.msrb.gmra.mxu2 %vm1102_vm2, %v3511_v22  ;;  %8819 = vmatmul.msk.f32.vlgmr.msrb.gmra.mxu3 %vm1102_vm2, %v3512_v11  ;;  %v12456_v6 = vpop.xlane.xlu1 %3355 }
 0x512   : > { %v12470_v0 = vpop.eup %10453 }
 0x513   : > { %10078 = vrot.lane.b32.xlu0 %v11441_v42, %s10601_s20  ;;  %v3387_v20 = vsel %vm1102_vm2, %v12470_v0, 0.0  ;;  %v10456_v45 = vpop.eup %10455  ;;  %s14099_s20 = scalar_lea.vmem %s13948_s4, %s10708_s30 }
 0x514   : > { %v12477_v55 = vpop.eup %10457  ;;  %v3517_v35 = vmul.f32 %v10456_v45, %v12205_v48  ;;  %v12499_v45 = vpop.f32.mrf.mxu1 }
 0x515   : > { %v3396_v7 = vsel %vm1102_vm2, %v12477_v55, 0.0 }
 0x518   : > { %v12464_v9 = vpop.xlane.xlu1 %3016 }
 0x520   : > { %v3371_v19 = vpop.xlane.xlu1 %3370 }
 0x521   : > { %10459 = vrcp.f32 %v3371_v19  ;;  %v12494_v19 = vpop.f32.mrf.mxu2 }
 0x523   : > { %3376 = vadd.xlane.f32.xlu2 %v3375_v34 }
 0x524   : > { %v12468_v40 = vpop.xlane.xlu0 %3019 }
 0x527   : > { %v10460_v61 = vpop.eup %10459 }
 0x52c   : > { %v12475_v22 = vpop.xlane.xlu0 %3385 }
 0x534   : > { %3388 = vadd.xlane.f32.xlu1 %v3387_v20  ;;  %v12496_v20 = vpop.f32.mrf.mxu3 }
 0x538   : > { %v10054_v11 = vpop.permute.xlu1 %10053 }
 0x539   : > { %v10056_v49 = vunpack.i.h.bf16 %v10054_v11  ;;  %v10055_v2 = vunpack.i.l.bf16 %v10054_v11 }
 0x53b   : > { %10073 = vrot.lane.b32.xlu2 %v14077_v12, %s10604_s29  ;;  %4655 = vmatpush.msra.mxu0 %v10055_v2  ;;  %v3521_v12 = vmul.f32 %v10460_v61, %v12296_v63  ;;  %v12503_v2 = vpop.f32.mrf.mxu2  ;;  %v10097_v61 = vpack.i.bf16 %v12366_v24, %v12364_v44 }
 0x53c   : > { %4678 = vmatpush.msrb.mxu1 %v10056_v49  ;;  %8824 = vmatmul.msk.f32.vlgmr.msra.gmra.mxu0 %vm1102_vm2, %v3517_v35  ;;  %v12505_v35 = vpop.f32.mrf.mxu3 }
 0x53d   : > { %v3362_v54 = vpop.xlane.xlu2 %3361  ;;  %3397 = vadd.xlane.f32.xlu0 %v3396_v7 }
 0x53e   : > { %10461 = vrcp.f32 %v3362_v54  ;;  %v4105_v54 = vpop.f32.mrf.mxu0 }
 0x53f   : > { %v10064_v34 = vpop.permute.xlu0 %10063 }
 0x540   : > { %v10066_v48 = vunpack.i.h.bf16 %v10064_v34  ;;  %v10065_v59 = vunpack.i.l.bf16 %v10064_v34 }
 0x542   : > { %4747 = vmatpush.msrb.mxu0 %v10065_v59  ;;  %4770 = vmatpush.msra.mxu1 %v10066_v48 }
 0x543   : > { %10083 = vrot.lane.b32.xlu2 %v14065_v51, %s10604_s29 }
 0x544   : > { %v10462_v5 = vpop.eup %10461  ;;  %8828 = vmatmul.msk.f32.vlgmr.msrb.gmra.mxu0 %vm1102_vm2, %v3521_v12  ;;  %v3081_v12 = vsub.f32 %v12179_v28, %v12372_v43  ;;  %v3083_v28 = vsub.f32 %v12285_v41, %v12464_v9  ;;  %v3084_v43 = vsub.f32 %v12299_v38, %v12468_v40 }
 0x545   : > { %v3518_v11 = vmul.f32 %v10462_v5, %v12336_v18  ;;  %v3374_v49 = vpop.xlane.xlu2 %3373  ;;  %v4128_v18 = vpop.f32.mrf.mxu1 }
 0x546   : > { %10463 = vrcp.f32 %v3374_v49  ;;  %v10107_v59 = vpack.i.bf16 %v4128_v18, %v4105_v54  ;;  %v12522_v44 = vpop.f32.mrf.mxu0  ;;  %v3205_v49 = vmul.f32 1.442695, %v3081_v12 }
 0x547   : > { %8825 = vmatmul.msk.f32.vlgmr.msrb.gmra.mxu1 %vm1102_vm2, %v3518_v11  ;;  %10465 = vrcp.f32 %v12452_v13 }
 0x548   : > { %10467 = vrcp.f32 %v12456_v6 }
 0x549   : > { %10469 = vpow2.f32 %v3205_v49 }
 0x54c   : > { %v10464_v63 = vpop.eup %10463 }
 0x54d   : > { %v3522_v51 = vmul.f32 %v10464_v63, %v12353_v36  ;;  %10088 = vrot.lane.b32.xlu1 %v11265_v3, %s10604_s29  ;;  %v3365_v7 = vpop.xlane.xlu2 %3364  ;;  %v12524_v24 = vpop.f32.mrf.mxu1 }
 0x54e   : > { %v10466_v5 = vpop.eup %10465  ;;  %v12531_v54 = vpop.f32.mrf.mxu0 }
 0x54f   : > { %8829 = vmatmul.msk.f32.vlgmr.msra.gmra.mxu1 %vm1102_vm2, %v3522_v51  ;;  %v10468_v11 = vpop.eup %10467 }
 0x550   : > { %v3516_v6 = vmul.f32 %v10468_v11, %v12275_v16  ;;  %v3211_v16 = vmul.f32 1.442695, %v3084_v43  ;;  %v10132_v43 = vpack.i.bf16 %v12379_v8, %v12376_v26  ;;  %v10142_v26 = vpack.i.bf16 %v12496_v20, %v12494_v19 }
 0x551   : > { %10098 = vrot.lane.b32.xlu0 %v10097_v61, %s10605_s18  ;;  %v3515_v61 = vmul.f32 %v10466_v5, %v12269_v37  ;;  %v3209_v37 = vmul.f32 1.442695, %v3083_v28 }
 0x553   : > { %10471 = vpow2.f32 %v3209_v37 }
 0x554   : > { %v12514_v34 = vpop.f32.mrf.mxu2  ;;  %v12516_v48 = vpop.f32.mrf.mxu3  ;;  %10473 = vpow2.f32 %v3211_v16 }
 0x555   : > { %v10147_v3 = vpack.i.bf16 %v12516_v48, %v12514_v34  ;;  %v3368_v36 = vpop.xlane.xlu2 %3367  ;;  %v12533_v18 = vpop.f32.mrf.mxu1  ;;  %10475 = vrcp.f32 %v3365_v7  ;;  %v9712_v34 = vld [vmem:[%s10730_s13 + $0x18] sm:$0xff] }
 0x556   : > { %v12543_v12 = vpop.f32.mrf.mxu0  ;;  %10477 = vrcp.f32 %v3368_v36 }
 0x559   : > { %10108 = vrot.lane.b32.xlu0 %v10107_v59, %s10606_s22  ;;  %v12541_v59 = vpop.eup %10469 }
 0x55a   : > { %v3393_v11 = vsel %vm1102_vm2, %v12541_v59, 0.0 }
 0x55d   : > { %v10059_v13 = vpop.permute.xlu2 %10058  ;;  %v12545_v5 = vpop.f32.mrf.mxu1 }
 0x55e   : > { %v10061_v63 = vunpack.i.h.bf16 %v10059_v13  ;;  %v10060_v51 = vunpack.i.l.bf16 %v10059_v13  ;;  %v12549_v13 = vpop.eup %10471  ;;  %v4473_v41 = vpop.f32.mrf.mxu0 }
 0x55f   : > { %v12551_v9 = vpop.eup %10473  ;;  %v3399_v49 = vsel %vm1102_vm2, %v12549_v13, 0.0 }
 0x560   : > { %4609 = vmatpush.msra.mxu2 %v10060_v51  ;;  %4632 = vmatpush.msra.mxu3 %v10061_v63 }
 0x561   : > { %8822 = vmatmul.msk.f32.vlgmr.msra.gmra.mxu2 %vm1102_vm2, %v3515_v61  ;;  %8823 = vmatmul.msk.f32.vlgmr.msra.gmra.mxu3 %vm1102_vm2, %v3516_v6  ;;  %v3402_v61 = vsel %vm1102_vm2, %v12551_v9, 0.0  ;;  %v10476_v6 = vpop.eup %10475 }
 0x562   : > { %v10478_v28 = vpop.eup %10477 }
 0x563   : > { %v3383_v63 = vpop.xlane.xlu1 %3382  ;;  %v3520_v36 = vmul.f32 %v10478_v28, %v12388_v10  ;;  %v10112_v28 = vpack.i.bf16 %v12533_v18, %v12531_v54 }
 0x56a   : > { %v3380_v38 = vpop.xlane.xlu0 %3379 }
 0x56b   : > { %10479 = vrcp.f32 %v3380_v38 }
 0x56c   : > { %3394 = vadd.xlane.f32.xlu2 %v3393_v11  ;;  %10481 = vrcp.f32 %v12475_v22 }
 0x56d   : > { %10483 = vrcp.f32 %v3383_v63 }
 0x572   : > { %v3392_v16 = vpop.xlane.xlu0 %3391 }
 0x573   : > { %v4496_v40 = vpop.f32.mrf.mxu1 }
 0x574   : > { %v10117_v51 = vpack.i.bf16 %v4496_v40, %v4473_v41  ;;  %3400 = vadd.xlane.f32.xlu2 %v3399_v49  ;;  %v3519_v41 = vmul.f32 %v10476_v6, %v12374_v32  ;;  %v10480_v40 = vpop.eup %10479  ;;  %v14097_v6 = vpack.i.bf16 %v12402_v39, %v12400_v1 }
 0x575   : > { %v3524_v32 = vmul.f32 %v10480_v40, %v12422_v30 }
 0x576   : > { %10118 = vrot.lane.b32.xlu0 %v10117_v51, %s10607_s27 }
 0x577   : > { %3403 = vadd.xlane.f32.xlu1 %v3402_v61 }
 0x57b   : > { %v4588_v40 = vpop.f32.mrf.mxu1 }
 0x57c   : > { %v10069_v37 = vpop.permute.xlu1 %10068 }
 0x57d   : > { %v10071_v11 = vunpack.i.h.bf16 %v10069_v37  ;;  %v10070_v7 = vunpack.i.l.bf16 %v10069_v37  ;;  %v10167_v37 = vpack.i.bf16 %v12386_v31, %v12381_v47  ;;  %v10182_v47 = vpack.i.bf16 %v12545_v5, %v12543_v12  ;;  %v4565_v5 = vpop.f32.mrf.mxu0 }
 0x57e   : > { %10133 = vrot.lane.b32.xlu0 %v10132_v43, %s10605_s18 }
 0x57f   : > { %4701 = vmatpush.msrb.mxu2 %v10070_v7  ;;  %4724 = vmatpush.msrb.mxu3 %v10071_v11 }
 0x580   : > { %8826 = vmatmul.msk.f32.vlgmr.msrb.gmra.mxu2 %vm1102_vm2, %v3519_v41  ;;  %8827 = vmatmul.msk.f32.vlgmr.msrb.gmra.mxu3 %vm1102_vm2, %v3520_v36 }
 0x585   : > { %v10079_v8 = vpop.permute.xlu0 %10078 }
 0x586   : > { %v10081_v49 = vunpack.i.h.bf16 %v10079_v8  ;;  %v10080_v51 = vunpack.i.l.bf16 %v10079_v8  ;;  %10143 = vrot.lane.b32.xlu0 %v10142_v26, %s10606_s22 }
 0x588   : > { %4793 = vmatpush.msra.mxu2 %v10080_v51  ;;  %4816 = vmatpush.msra.mxu3 %v10081_v49 }
 0x589   : > { %8831 = vmatmul.msk.f32.vlgmr.msra.gmra.mxu3 %vm1102_vm2, %v3524_v32 }
 0x58b   : > { %v12570_v10 = vpop.f32.mrf.mxu2  ;;  %v12572_v38 = vpop.f32.mrf.mxu3 }
 0x58c   : > { %10093 = vrot.lane.b32.xlu2 %v11441_v42, %s10604_s29  ;;  %v10482_v42 = vpop.eup %10481  ;;  %s14101_s29 = scalar_lea.vmem %s13949_s5, %s10708_s30 }
 0x58d   : > { %v10484_v43 = vpop.eup %10483  ;;  %v3526_v7 = vmul.f32 %v10482_v42, %v12309_v53 }
 0x58e   : > { %v3525_v54 = vmul.f32 %v10484_v43, %v12416_v60 }
 0x593   : > { %v4519_v61 = vpop.f32.mrf.mxu2  ;;  %v4542_v19 = vpop.f32.mrf.mxu3 }
 0x594   : > { %v10152_v20 = vpack.i.bf16 %v4542_v19, %v4519_v61  ;;  %10103 = vrot.lane.b32.xlu2 %v14097_v6, %s10608_s1 }
 0x596   : > { %v3377_v30 = vpop.xlane.xlu2 %3376  ;;  %10153 = vrot.lane.b32.xlu0 %v10152_v20, %s10607_s27 }
 0x597   : > { %10485 = vrcp.f32 %v3377_v30 }
 0x598   : > { %10487 = vrcp.f32 %v3392_v16 }
 0x59c   : > { %10113 = vrot.lane.b32.xlu2 %v10112_v28, %s10609_s14 }
 0x59d   : > { %v10486_v1 = vpop.eup %10485 }
 0x59e   : > { %v3523_v39 = vmul.f32 %v10486_v1, %v12458_v50  ;;  %v10074_v22 = vpop.permute.xlu2 %10073  ;;  %10168 = vrot.lane.b32.xlu0 %v10167_v37, %s10605_s18  ;;  %v10488_v31 = vpop.eup %10487 }
 0x59f   : > { %v10076_v63 = vunpack.i.h.bf16 %v10074_v22  ;;  %v10075_v11 = vunpack.i.l.bf16 %v10074_v22  ;;  %v3528_v60 = vmul.f32 %v10488_v31, %v12430_v23 }
 0x5a0   : > { %8830 = vmatmul.msk.f32.vlgmr.msra.gmra.mxu2 %vm1102_vm2, %v3523_v39 }
 0x5a1   : > { %4839 = vmatpush.msra.mxu0 %v10075_v11  ;;  %4862 = vmatpush.msrb.mxu1 %v10076_v63 }
 0x5a2   : > { %8832 = vmatmul.msk.f32.vlgmr.msra.gmra.mxu0 %vm1102_vm2, %v3525_v54  ;;  %8833 = vmatmul.msk.f32.vlgmr.msrb.gmra.mxu1 %vm1102_vm2, %v3526_v7 }
 0x5a6   : > { %v10084_v50 = vpop.permute.xlu2 %10083  ;;  %10183 = vrot.lane.b32.xlu0 %v10182_v47, %s10609_s14  ;;  %v10172_v47 = vpack.i.bf16 %v12499_v45, %v12490_v27  ;;  %v10217_v27 = vpack.i.bf16 %v12572_v38, %v12570_v10  ;;  %v14098_v45 = vpack.i.bf16 %v12410_v15, %v12408_v58  ;;  %v10177_v10 = vpack.i.bf16 %v12524_v24, %v12522_v44  ;;  %v9710_v38 = vld [vmem:[%s10730_s13 + $0x8] sm:$0xff]  ;;  %v9709_v24 = vld [vmem:[%s10730_s13] sm:$0xff] }
 0x5a7   : > { %v3389_v18 = vpop.xlane.xlu1 %3388  ;;  %v10086_v16 = vunpack.i.h.bf16 %v10084_v50  ;;  %v10085_v53 = vunpack.i.l.bf16 %v10084_v50  ;;  %v10202_v50 = vpack.i.bf16 %v12396_v33, %v12392_v25  ;;  %v10207_v15 = vpack.i.bf16 %v12484_v56, %v12482_v52 }
 0x5a8   : > { %10489 = vrcp.f32 %v3389_v18  ;;  %v10212_v56 = vpack.i.bf16 %v12505_v35, %v12503_v2 }
 0x5a9   : > { %4885 = vmatpush.msrb.mxu2 %v10085_v53  ;;  %4908 = vmatpush.msrb.mxu3 %v10086_v16 }
 0x5aa   : > { %8835 = vmatmul.msk.f32.vlgmr.msrb.gmra.mxu3 %vm1102_vm2, %v3528_v60 }
 0x5ae   : > { %v10490_v41 = vpop.eup %10489 }
 0x5af   : > { %v3527_v36 = vmul.f32 %v10490_v41, %v12470_v0 }
 0x5b0   : > { %v3398_v12 = vpop.xlane.xlu0 %3397 }
 0x5b1   : > { %8834 = vmatmul.msk.f32.vlgmr.msrb.gmra.mxu2 %vm1102_vm2, %v3527_v36  ;;  %10491 = vrcp.f32 %v3398_v12 }
 0x5b7   : > { %v10492_v26 = vpop.eup %10491 }
 0x5b8   : > { %v3530_v23 = vmul.f32 %v10492_v26, %v12477_v55 }
 0x5b9   : > { %v4657_v32 = vpop.f32.mrf.mxu0 }
 0x5bf   : > { %v10089_v8 = vpop.permute.xlu1 %10088 }
 0x5c0   : > { %v10091_v49 = vunpack.i.h.bf16 %v10089_v8  ;;  %v10090_v51 = vunpack.i.l.bf16 %v10089_v8 }
 0x5c2   : > { %4931 = vmatpush.msrb.mxu0 %v10090_v51  ;;  %4954 = vmatpush.msra.mxu1 %v10091_v49 }
 0x5c3   : > { %8837 = vmatmul.msk.f32.vlgmr.msra.gmra.mxu1 %vm1102_vm2, %v3530_v23  ;;  %v10099_v44 = vpop.permute.xlu0 %10098 }
 0x5c4   : > { %v4680_v61 = vpop.f32.mrf.mxu1  ;;  %5347 = vmatpush.bf16.msra.mxu0 %v9712_v34  ;;  %v10101_v8 = vunpack.i.h.bf16 %v10099_v44  ;;  %v10100_v49 = vunpack.i.l.bf16 %v10099_v44 }
 0x5c5   : > { %v10122_v19 = vpack.i.bf16 %v4680_v61, %v4657_v32 }
 0x5c7   : > { %10123 = vrot.lane.b32.xlu1 %v10122_v19, %s10610_s3  ;;  %v5230_v19 = vsel %vm1102_vm2, %v12329_v62, %v10101_v8 }
 0x5cb   : > { %v10109_v52 = vpop.permute.xlu0 %10108 }
 0x5cc   : > { %v4772_v31 = vpop.f32.mrf.mxu1 }
 0x5df   : > { %v3395_v0 = vpop.xlane.xlu2 %3394 }
 0x5e0   : > { %10493 = vrcp.f32 %v3395_v0  ;;  %v5229_v0 = vsel %vm1102_vm2, %v12325_v4, %v10100_v49 }
 0x5e4   : > { %v4634_v63 = vpop.f32.mrf.mxu3 }
 0x5e6   : > { %v10494_v20 = vpop.eup %10493 }
 0x5e7   : > { %v3529_v6 = vmul.f32 %v10494_v20, %v12541_v59  ;;  %v3401_v30 = vpop.xlane.xlu2 %3400  ;;  %v4611_v59 = vpop.f32.mrf.mxu2 }
 0x5e8   : > { %10495 = vrcp.f32 %v3401_v30  ;;  %v10222_v48 = vpack.i.bf16 %v4634_v63, %v4611_v59  ;;  %v10119_v51 = vpop.permute.xlu0 %10118 }
 0x5e9   : > { %8836 = vmatmul.msk.f32.vlgmr.msrb.gmra.mxu0 %vm1102_vm2, %v3529_v6 }
 0x5ea   : > { %v3404_v55 = vpop.xlane.xlu1 %3403 }
 0x5eb   : > { %10497 = vrcp.f32 %v3404_v55  ;;  %v10111_v55 = vunpack.i.h.bf16 %v10109_v52 }
 0x5ee   : > { %v10496_v28 = vpop.eup %10495 }
 0x5ef   : > { %v10094_v42 = vpop.permute.xlu2 %10093  ;;  %v3531_v39 = vmul.f32 %v10496_v28, %v12549_v13  ;;  %v10187_v13 = vpack.i.bf16 %v4588_v40, %v4565_v5  ;;  %v10110_v28 = vunpack.i.l.bf16 %v10109_v52 }
 0x5f0   : > { %v10096_v43 = vunpack.i.h.bf16 %v10094_v42  ;;  %v10095_v37 = vunpack.i.l.bf16 %v10094_v42 }
 0x5f1   : > { %v10498_v1 = vpop.eup %10497 }
 0x5f2   : > { %v3532_v22 = vmul.f32 %v10498_v1, %v12551_v9  ;;  %4977 = vmatpush.msra.mxu2 %v10095_v37  ;;  %5000 = vmatpush.msra.mxu3 %v10096_v43  ;;  %v4749_v9 = vpop.f32.mrf.mxu0 }
 0x5f3   : > { %8838 = vmatmul.msk.f32.vlgmr.msra.gmra.mxu2 %vm1102_vm2, %v3531_v39  ;;  %v10192_v58 = vpack.i.bf16 %v4772_v31, %v4749_v9 }
 0x5f4   : > { %8839 = vmatmul.msk.f32.vlgmr.msra.gmra.mxu3 %vm1102_vm2, %v3532_v22 }
 0x5f7   : > { %v10104_v26 = vpop.permute.xlu2 %10103 }
 0x5f8   : > { %v10106_v23 = vunpack.i.h.bf16 %v10104_v26  ;;  %v10105_v32 = vunpack.i.l.bf16 %v10104_v26 }
 0x5fa   : > { %v5239_v20 = vsel %vm5237_vm3, %v5230_v19, %v10106_v23  ;;  %v5238_v2 = vsel %vm5237_vm3, %v5229_v0, %v10105_v32 }
 0x5fb   : > { %v5247_v62 = vsel %vm5246_vm4, %v5238_v2, %v10110_v28  ;;  %v5248_v39 = vsel %vm5246_vm4, %v5239_v20, %v10111_v55 }
 0x5ff   : > { %v10114_v61 = vpop.permute.xlu2 %10113 }
 0x600   : > { %v10116_v35 = vunpack.i.h.bf16 %v10114_v61  ;;  %v10115_v6 = vunpack.i.l.bf16 %v10114_v61 }
 0x602   : > { %v5257_v4 = vsel %vm5255_vm5, %v5248_v39, %v10116_v35  ;;  %v5256_v22 = vsel %vm5255_vm5, %v5247_v62, %v10115_v6 }
 0x603   : > { %v4703_v11 = vpop.f32.mrf.mxu2  ;;  %v4726_v7 = vpop.f32.mrf.mxu3 }
 0x604   : > { %v10157_v54 = vpack.i.bf16 %v4726_v7, %v4703_v11  ;;  %v10121_v11 = vunpack.i.h.bf16 %v10119_v51  ;;  %v10120_v7 = vunpack.i.l.bf16 %v10119_v51 }
 0x606   : > { %10158 = vrot.lane.b32.xlu1 %v10157_v54, %s10610_s3  ;;  %v10134_v54 = vpop.permute.xlu0 %10133  ;;  %v5266_v9 = vsel %vm5264_vm6, %v5257_v4, %v10121_v11 }
 0x60c   : > { %v4818_v33 = vpop.f32.mrf.mxu3 }
 0x60e   : > { %10173 = vrot.lane.b32.xlu1 %v10172_v47, %s10608_s1 }
 0x616   : > { %10188 = vrot.lane.b32.xlu1 %v10187_v13, %s10607_s27  ;;  %v5265_v13 = vsel %vm5264_vm6, %v5256_v22, %v10120_v7 }
 0x61e   : > { %10203 = vrot.lane.b32.xlu1 %v10202_v50, %s10605_s18 }
 0x61f   : > { %v4841_v18 = vpop.f32.mrf.mxu0  ;;  %v4864_v16 = vpop.f32.mrf.mxu1 }
 0x620   : > { %v10127_v53 = vpack.i.bf16 %v4864_v16, %v4841_v18 }
 0x622   : > { %10128 = vrot.lane.b32.xlu2 %v10127_v53, %s10611_s17 }
 0x623   : > { %v4795_v25 = vpop.f32.mrf.mxu2 }
 0x624   : > { %v10227_v42 = vpack.i.bf16 %v4818_v33, %v4795_v25  ;;  %v10144_v33 = vpop.permute.xlu0 %10143 }
 0x625   : > { %v10145_v44 = vunpack.i.l.bf16 %v10144_v33 }
 0x626   : > { %10218 = vrot.lane.b32.xlu1 %v10217_v27, %s10609_s14 }
 0x62a   : > { %10138 = vrot.lane.b32.xlu2 %v14098_v45, %s10608_s1 }
 0x62d   : > { %v4910_v41 = vpop.f32.mrf.mxu3 }
 0x632   : > { %10148 = vrot.lane.b32.xlu2 %v10147_v3, %s10609_s14  ;;  %v9711_v3 = vld [vmem:[%s10730_s13 + $0x10] sm:$0xff] }
 0x633   : > { %5348 = vmatpush.bf16.msra.mxu0 %v9711_v3 }
 0x634   : > { %v4887_v60 = vpop.f32.mrf.mxu2 }
 0x635   : > { %v10162_v36 = vpack.i.bf16 %v4910_v41, %v4887_v60  ;;  %v10136_v60 = vunpack.i.h.bf16 %v10134_v54  ;;  %v10135_v41 = vunpack.i.l.bf16 %v10134_v54 }
 0x637   : > { %5349 = vmatpush.bf16.msra.mxu0 %v9710_v38  ;;  %v10146_v38 = vunpack.i.h.bf16 %v10144_v33 }
 0x639   : > { %v10124_v43 = vpop.permute.xlu1 %10123 }
 0x63a   : > { %10163 = vrot.lane.b32.xlu2 %v10162_v36, %s10611_s17  ;;  %v10126_v59 = vunpack.i.h.bf16 %v10124_v43  ;;  %v10125_v63 = vunpack.i.l.bf16 %v10124_v43 }
 0x63b   : > { %5350 = vmatpush.bf16.msra.mxu0 %v9709_v24 }
 0x63c   : > { %v5275_v18 = vsel %vm5273_vm7, %v5266_v9, %v10126_v59  ;;  %v5274_v16 = vsel %vm5273_vm7, %v5265_v13, %v10125_v63 }
 0x640   : > { %v4956_v12 = vpop.f32.mrf.mxu1 }
 0x642   : > { %10178 = vrot.lane.b32.xlu2 %v10177_v10, %s10606_s22 }
 0x64a   : > { %10193 = vrot.lane.b32.xlu2 %v10192_v58, %s10610_s3  ;;  %v5232_v58 = vsel %vm1102_vm2, %v12331_v29, %v10136_v60 }
 0x652   : > { %10208 = vrot.lane.b32.xlu2 %v10207_v15, %s10608_s1  ;;  %v5231_v15 = vsel %vm1102_vm2, %v12338_v21, %v10135_v41  ;;  %s14102_s1 = scalar_lea.vmem %s13950_s6, %s10708_s30 }
 0x65a   : > { %10223 = vrot.lane.b32.xlu2 %v10222_v48, %s10607_s27 }
 0x666   : > { %v4933_v5 = vpop.f32.mrf.mxu0 }
 0x667   : > { %v10197_v40 = vpack.i.bf16 %v4956_v12, %v4933_v5  ;;  %v10154_v5 = vpop.permute.xlu0 %10153 }
 0x668   : > { %v10155_v21 = vunpack.i.l.bf16 %v10154_v5 }
 0x669   : > { %10198 = vrot.lane.b32.xlu0 %v10197_v40, %s10611_s17 }
 0x66f   : > { %v10169_v28 = vpop.permute.xlu0 %10168 }
 0x670   : > { %v10171_v43 = vunpack.i.h.bf16 %v10169_v28 }
 0x671   : > { %10213 = vrot.lane.b32.xlu0 %v10212_v56, %s10606_s22  ;;  %v10156_v56 = vunpack.i.h.bf16 %v10154_v5 }
 0x672   : > { %v5234_v63 = vsel %vm1102_vm2, %v12347_v17, %v10171_v43 }
 0x676   : > { %v4979_v30 = vpop.f32.mrf.mxu2 }
 0x677   : > { %v5002_v37 = vpop.f32.mrf.mxu3  ;;  %v10184_v59 = vpop.permute.xlu0 %10183 }
 0x678   : > { %v10232_v1 = vpack.i.bf16 %v5002_v37, %v4979_v30  ;;  %v10159_v8 = vpop.permute.xlu1 %10158  ;;  %v10170_v37 = vunpack.i.l.bf16 %v10169_v28 }
 0x679   : > { %10228 = vrot.lane.b32.xlu0 %v10227_v42, %s10610_s3  ;;  %v10161_v23 = vunpack.i.h.bf16 %v10159_v8  ;;  %v10160_v32 = vunpack.i.l.bf16 %v10159_v8 }
 0x67a   : > { %10233 = vrot.lane.b32.xlu1 %v10232_v1, %s10611_s17  ;;  %v5233_v11 = vsel %vm1102_vm2, %v12343_v14, %v10170_v37 }
 0x67c   : > { %v10129_v47 = vpop.permute.xlu2 %10128 }
 0x67d   : > { %v10131_v31 = vunpack.i.h.bf16 %v10129_v47  ;;  %v10130_v50 = vunpack.i.l.bf16 %v10129_v47 }
 0x67f   : > { %v5284_v53 = vsel %vm5282_vm8, %v5275_v18, %v10131_v31  ;;  %v5283_v27 = vsel %vm5282_vm8, %v5274_v16, %v10130_v50  ;;  %v10186_v31 = vunpack.i.h.bf16 %v10184_v59  ;;  %v10185_v50 = vunpack.i.l.bf16 %v10184_v59 }
 0x680   : > { %v5291_v45 = vpack.c.bf16 %v5284_v53, %v5283_v27  ;;  %v10174_v55 = vpop.permute.xlu1 %10173 }
 0x681   : > { %v10176_v62 = vunpack.i.h.bf16 %v10174_v55  ;;  %v10175_v39 = vunpack.i.l.bf16 %v10174_v55 }
 0x682   : > { %8856 = vmatmul.msk.bf16.vlgmr.msra.gmra.mxu0 %vm733_vm1, %v5291_v45 }
 0x683   : > { %v5243_v54 = vsel %vm5237_vm3, %v5234_v63, %v10176_v62  ;;  %v5242_v47 = vsel %vm5237_vm3, %v5233_v11, %v10175_v39  ;;  %v10533_v63 = vld [vmem:[#allocation2] sm:$0xff] }
 0x684   : > { %v10139_v25 = vpop.permute.xlu2 %10138 }
 0x685   : > { %v10141_v36 = vunpack.i.h.bf16 %v10139_v25  ;;  %v10140_v10 = vunpack.i.l.bf16 %v10139_v25 }
 0x687   : > { %v5241_v34 = vsel %vm5237_vm3, %v5232_v58, %v10141_v36  ;;  %v5240_v48 = vsel %vm5237_vm3, %v5231_v15, %v10140_v10 }
 0x688   : > { %v5249_v40 = vsel %vm5246_vm4, %v5240_v48, %v10145_v44  ;;  %v5250_v26 = vsel %vm5246_vm4, %v5241_v34, %v10146_v38  ;;  %v10189_v1 = vpop.permute.xlu1 %10188 }
 0x689   : > { %v10191_v27 = vunpack.i.h.bf16 %v10189_v1  ;;  %v10190_v45 = vunpack.i.l.bf16 %v10189_v1 }
 0x68c   : > { %v10149_v3 = vpop.permute.xlu2 %10148 }
 0x68d   : > { %v10151_v24 = vunpack.i.h.bf16 %v10149_v3  ;;  %v10150_v12 = vunpack.i.l.bf16 %v10149_v3 }
 0x68f   : > { %v5258_v52 = vsel %vm5255_vm5, %v5249_v40, %v10150_v12  ;;  %v5259_v29 = vsel %vm5255_vm5, %v5250_v26, %v10151_v24 }
 0x690   : > { %v5267_v49 = vsel %vm5264_vm6, %v5258_v52, %v10155_v21  ;;  %v5268_v51 = vsel %vm5264_vm6, %v5259_v29, %v10156_v56  ;;  %v10204_v14 = vpop.permute.xlu1 %10203 }
 0x691   : > { %v5276_v20 = vsel %vm5273_vm7, %v5267_v49, %v10160_v32  ;;  %v5277_v2 = vsel %vm5273_vm7, %v5268_v51, %v10161_v23  ;;  %v10206_v38 = vunpack.i.h.bf16 %v10204_v14  ;;  %v10205_v44 = vunpack.i.l.bf16 %v10204_v14  ;;  %v10536_v14 = vld [vmem:[#allocation2 + $0x18] sm:$0xff] }
 0x693   : > { %v5236_v29 = vsel %vm1102_vm2, %v12358_v46, %v10206_v38  ;;  %v5235_v56 = vsel %vm1102_vm2, %v12355_v57, %v10205_v44  ;;  %v10538_v44 = vld [vmem:[#allocation2 + $0x28] sm:$0xff] }
 0x694   : > { %v10164_v61 = vpop.permute.xlu2 %10163 }
 0x695   : > { %v10166_v19 = vunpack.i.h.bf16 %v10164_v61  ;;  %v10165_v0 = vunpack.i.l.bf16 %v10164_v61 }
 0x697   : > { %v5285_v35 = vsel %vm5282_vm8, %v5276_v20, %v10165_v0  ;;  %v5286_v6 = vsel %vm5282_vm8, %v5277_v2, %v10166_v19 }
 0x698   : > { %v5292_v30 = vpack.c.bf16 %v5286_v6, %v5285_v35  ;;  %v10219_v40 = vpop.permute.xlu1 %10218 }
 0x699   : > { %v10221_v23 = vunpack.i.h.bf16 %v10219_v40  ;;  %v10220_v32 = vunpack.i.l.bf16 %v10219_v40 }
 0x69a   : > { %8857 = vmatmul.msk.bf16.gmra.mxu0 %vm733_vm1, %v5292_v30 }
 0x69c   : > { %v10179_v42 = vpop.permute.xlu2 %10178 }
 0x69d   : > { %v10181_v4 = vunpack.i.h.bf16 %v10179_v42  ;;  %v10180_v22 = vunpack.i.l.bf16 %v10179_v42 }
 0x69f   : > { %v5252_v13 = vsel %vm5246_vm4, %v5243_v54, %v10181_v4  ;;  %v5251_v9 = vsel %vm5246_vm4, %v5242_v47, %v10180_v22  ;;  %v10237_v4 = vld [vmem:[%s14099_s20] ss:$0 sm:$0xff] }
 0x6a0   : > { %v5261_v18 = vsel %vm5255_vm5, %v5252_v13, %v10186_v31  ;;  %v5260_v16 = vsel %vm5255_vm5, %v5251_v9, %v10185_v50  ;;  %v10534_v13 = vld [vmem:[#allocation2 + $0x8] sm:$0xff] }
 0x6a1   : > { %v5269_v33 = vsel %vm5264_vm6, %v5260_v16, %v10190_v45  ;;  %v5270_v60 = vsel %vm5264_vm6, %v5261_v18, %v10191_v27  ;;  %v10535_v16 = vld [vmem:[#allocation2 + $0x10] sm:$0xff] }
 0x6a4   : > { %v10194_v7 = vpop.permute.xlu2 %10193 }
 0x6a5   : > { %v10196_v53 = vunpack.i.h.bf16 %v10194_v7  ;;  %v10195_v17 = vunpack.i.l.bf16 %v10194_v7 }
 0x6a7   : > { %v5278_v10 = vsel %vm5273_vm7, %v5269_v33, %v10195_v17  ;;  %v5279_v58 = vsel %vm5273_vm7, %v5270_v60, %v10196_v53  ;;  %v10612_v60 = vmov 64.0  }
 0x6a8   : > { %10499 = vrcp.f32 %v10612_v60  ;;  %v9056_v60 = vld [vmem:[%s10744_s21 + $0x1c0] sm:$0xf0] }
 0x6ac   : > { %v10209_v15 = vpop.permute.xlu2 %10208 }
 0x6ad   : > { %v10211_v24 = vunpack.i.h.bf16 %v10209_v15  ;;  %v10210_v12 = vunpack.i.l.bf16 %v10209_v15 }
 0x6ae   : > { %v10500_v15 = vpop.eup %10499 }
 0x6af   : > { %v5245_v21 = vsel %vm5237_vm3, %v5236_v29, %v10211_v24  ;;  %v5244_v8 = vsel %vm5237_vm3, %v5235_v56, %v10210_v12  ;;  %v10539_v29 = vld [vmem:[#allocation2 + $0x30] sm:$0xff]  ;;  %vm5409_vm9 = vweird.f32 %v10500_v15 }
 0x6b4   : > { %v10224_v61 = vpop.permute.xlu2 %10223 }
 0x6b5   : > { %v10226_v20 = vunpack.i.h.bf16 %v10224_v61  ;;  %v10225_v46 = vunpack.i.l.bf16 %v10224_v61 }
 0x6db   : > { %v10199_v25 = vpop.permute.xlu0 %10198 }
 0x6dc   : > { %v10201_v41 = vunpack.i.h.bf16 %v10199_v25  ;;  %v10200_v36 = vunpack.i.l.bf16 %v10199_v25 }
 0x6de   : > { %v5288_v34 = vsel %vm5282_vm8, %v5279_v58, %v10201_v41  ;;  %v5287_v48 = vsel %vm5282_vm8, %v5278_v10, %v10200_v36  ;;  %v10537_v10 = vld [vmem:[#allocation2 + $0x20] sm:$0xff] }
 0x6df   : > { %v5293_v3 = vpack.c.bf16 %v5288_v34, %v5287_v48 }
 0x6e1   : > { %8858 = vmatmul.msk.bf16.gmra.mxu0 %vm733_vm1, %v5293_v3  ;;  %v5405_v3 = vmul.f32 64.0, %v10500_v15 }
 0x6e3   : > { %v10214_v5 = vpop.permute.xlu0 %10213  ;;  %v5406_v12 = vsub.f32 1.0, %v5405_v3 }
 0x6e4   : > { %v10216_v26 = vunpack.i.h.bf16 %v10214_v5  ;;  %v10215_v52 = vunpack.i.l.bf16 %v10214_v5 }
 0x6e5   : > { %v5407_v40 = vmul.f32 %v10500_v15, %v5406_v12 }
 0x6e6   : > { %v5254_v49 = vsel %vm5246_vm4, %v5245_v21, %v10216_v26  ;;  %v5253_v51 = vsel %vm5246_vm4, %v5244_v8, %v10215_v52 }
 0x6e7   : > { %v5263_v19 = vsel %vm5255_vm5, %v5254_v49, %v10221_v23  ;;  %v5262_v0 = vsel %vm5255_vm5, %v5253_v51, %v10220_v32  ;;  %v5408_v21 = vadd.f32 %v10500_v15, %v5407_v40  ;;  %v8992_v40 = vld [vmem:[%s10744_s21 + $0x140] sm:$0xf0] }
 0x6e8   : > { %v5271_v28 = vsel %vm5264_vm6, %v5262_v0, %v10225_v46  ;;  %v5272_v42 = vsel %vm5264_vm6, %v5263_v19, %v10226_v20 }
 0x6e9   : > { %v12729_v49 = vsel %vm5409_vm9, %v10500_v15, %v5408_v21  ;;  %v9000_v21 = vld [vmem:[%s10744_s21 + $0x148] sm:$0xf0] }
 0x6ea   : > { %14100 = vst [vmem:[#allocation12_spill] sm:$0xff] %v12729_v49 }
 0x6eb   : > { %v10229_v2 = vpop.permute.xlu0 %10228 }
 0x6ec   : > { %v10234_v57 = vpop.permute.xlu1 %10233  ;;  %v10231_v35 = vunpack.i.h.bf16 %v10229_v2  ;;  %v10230_v6 = vunpack.i.l.bf16 %v10229_v2 }
 0x6ed   : > { %v10236_v30 = vunpack.i.h.bf16 %v10234_v57  ;;  %v10235_v55 = vunpack.i.l.bf16 %v10234_v57 }
 0x6ee   : > { %v5280_v43 = vsel %vm5273_vm7, %v5271_v28, %v10230_v6  ;;  %v5281_v37 = vsel %vm5273_vm7, %v5272_v42, %v10231_v35  ;;  %v10540_v35 = vld [vmem:[#allocation2 + $0x38] sm:$0xff] }
 0x6ef   : > { %v5289_v1 = vsel %vm5282_vm8, %v5280_v43, %v10235_v55  ;;  %v5290_v62 = vsel %vm5282_vm8, %v5281_v37, %v10236_v30 }
 0x6f0   : > { %v5294_v39 = vpack.c.bf16 %v5290_v62, %v5289_v1 }
 0x6f2   : > { %8859 = vmatmul.msk.bf16.gmra.mxu0 %vm733_vm1, %v5294_v39 }
 0x6ff   : > { %v5352_v22 = vpop.f32.mrf.mxu0 }
 0x700   : > { %v5353_v59 = vadd.f32 %v10237_v4, %v5352_v22 }
 0x702   : > { %v5372_v11 = vadd.f32 %v10533_v63, %v5353_v59 }
 0x704   : > { %v5380_v7 = vsel %vm733_vm1, %v5372_v11, 0.0 }
 0x705   : > { %5381 = vadd.xlane.f32.xlu2 %v5380_v7 }
 0x707   : > { %v5354_v54 = vpop.f32.mrf.mxu0 }
 0x708   : > { %v5355_v47 = vadd.f32 %v10237_v4, %v5354_v54 }
 0x70a   : > { %v5373_v9 = vadd.f32 %v10534_v13, %v5355_v47 }
 0x70c   : > { %v5383_v31 = vsel %vm733_vm1, %v5373_v9, 0.0 }
 0x70d   : > { %5384 = vadd.xlane.f32.xlu0 %v5383_v31 }
 0x717   : > { %v5357_v50 = vpop.f32.mrf.mxu0 }
 0x718   : > { %v5358_v18 = vadd.f32 %v10237_v4, %v5357_v50 }
 0x71a   : > { %v5374_v53 = vadd.f32 %v10535_v16, %v5358_v18 }
 0x71c   : > { %v5386_v17 = vsel %vm733_vm1, %v5374_v53, 0.0 }
 0x71d   : > { %5387 = vadd.xlane.f32.xlu1 %v5386_v17 }
 0x71f   : > { %v5359_v27 = vpop.f32.mrf.mxu0 }
 0x720   : > { %v5360_v45 = vadd.f32 %v10237_v4, %v5359_v27 }
 0x722   : > { %v5375_v25 = vadd.f32 %v10536_v14, %v5360_v45  ;;  %v9054_v45 = vld [vmem:[%s10744_s21 + $0x180] sm:$0xf] }
 0x723   : > { %v9769_v14 = vld [vmem:[%s10744_s21 + $0x1bc] sm:$0xf0] }
 0x724   : > { %v5389_v33 = vsel %vm733_vm1, %v5375_v25, 0.0 }
 0x725   : > { %5390 = vadd.xlane.f32.xlu2 %v5389_v33  ;;  %v9055_v33 = vor.u32 %v9769_v14, %v9054_v45 }
 0x727   : > { %6027 = vmatpush.bf16.msrb.mxu1 %v9055_v33 }
 0x75e   : > { %v5362_v41 = vpop.f32.mrf.mxu0 }
 0x75f   : > { %v5363_v36 = vadd.f32 %v10237_v4, %v5362_v41  ;;  %v9062_v41 = vld [vmem:[%s10744_s21 + $0x188] sm:$0xf] }
 0x761   : > { %v5376_v58 = vadd.f32 %v10537_v10, %v5363_v36  ;;  %v9770_v36 = vld [vmem:[%s10744_s21 + $0x1c4] sm:$0xf0] }
 0x762   : > { %v9063_v15 = vor.u32 %v9770_v36, %v9062_v41 }
 0x763   : > { %v5392_v34 = vsel %vm733_vm1, %v5376_v58, 0.0 }
 0x764   : > { %5393 = vadd.xlane.f32.xlu0 %v5392_v34  ;;  %v9762_v34 = vld [vmem:[%s10744_s21 + $0x18c] sm:$0xf]  ;;  %6085 = vmatpush.bf16.msrb.mxu3 %v9063_v15 }
 0x766   : > { %v5364_v48 = vpop.f32.mrf.mxu0 }
 0x767   : > { %v5365_v38 = vadd.f32 %v10237_v4, %v5364_v48  ;;  %v9064_v48 = vld [vmem:[%s10744_s21 + $0x1c8] sm:$0xf0] }
 0x768   : > { %v9067_v3 = vor.u32 %v9762_v34, %v9064_v48 }
 0x769   : > { %v5377_v24 = vadd.f32 %v10538_v44, %v5365_v38  ;;  %v8990_v44 = vld [vmem:[%s10744_s21 + $0x100] sm:$0xf] }
 0x76a   : > { %6114 = vmatpush.bf16.msrb.mxu0 %v9067_v3 }
 0x76b   : > { %v5395_v5 = vsel %vm733_vm1, %v5377_v24, 0.0 }
 0x76c   : > { %5396 = vadd.xlane.f32.xlu1 %v5395_v5  ;;  %v9745_v5 = vld [vmem:[%s10744_s21 + $0x104] sm:$0xf] }
 0x76f   : > { %v5367_v26 = vpop.f32.mrf.mxu0 }
 0x770   : > { %v5368_v52 = vadd.f32 %v10237_v4, %v5367_v26  ;;  %v8998_v26 = vld [vmem:[%s10744_s21 + $0x108] sm:$0xf] }
 0x772   : > { %v5378_v56 = vadd.f32 %v10539_v29, %v5368_v52  ;;  %v8995_v52 = vor.u32 %v9745_v5, %v8992_v40  ;;  %v9754_v29 = vld [vmem:[%s10744_s21 + $0x144] sm:$0xf0] }
 0x774   : > { %v5398_v8 = vsel %vm733_vm1, %v5378_v56, 0.0 }
 0x775   : > { %5399 = vadd.xlane.f32.xlu1 %v5398_v8  ;;  %v8999_v8 = vor.u32 %v9754_v29, %v8998_v26  ;;  %v12824_v26 = vld [vmem:[%s14101_s29] ss:$0 sm:$0xff] }
 0x777   : > { %v5369_v61 = vpop.f32.mrf.mxu0  ;;  %6086 = vmatpush.bf16.msrb.mxu3 %v8999_v8  ;;  %v12832_v8 = vld [vmem:[%s14102_s1] ss:$0 sm:$0xff] }
 0x778   : > { %v5382_v51 = vpop.xlane.xlu2 %5381  ;;  %v5370_v0 = vadd.f32 %v10237_v4, %v5369_v61  ;;  %v8926_v61 = vld [vmem:[%s10744_s21 + $0x80] sm:$0xf] }
 0x779   : > { %v5411_v23 = vmul.f32 %v12729_v49, %v5382_v51 }
 0x77a   : > { %v12740_v6 = vadd.f32 %v10540_v35, %v5370_v0  ;;  %v9729_v0 = vld [vmem:[%s10744_s21 + $0x84] sm:$0xf]  ;;  %v8934_v35 = vld [vmem:[%s10744_s21 + $0x88] sm:$0xf] }
 0x77b   : > { %v12732_v32 = vsub.f32 %v5372_v11, %v5411_v23 }
 0x77c   : > { %v5401_v28 = vsel %vm733_vm1, %v12740_v6, 0.0 }
 0x77d   : > { %v5427_v19 = vmul.f32 %v12732_v32, %v12732_v32 }
 0x77f   : > { %v5435_v20 = vsel %vm733_vm1, %v5427_v19, 0.0  ;;  %v9737_v19 = vld [vmem:[%s10744_s21 + $0xbc] sm:$0xf0] }
 0x780   : > { %v5385_v46 = vpop.xlane.xlu0 %5384  ;;  %5436 = vadd.xlane.f32.xlu2 %v5435_v20 }
 0x781   : > { %v5412_v2 = vmul.f32 %v12729_v49, %v5385_v46  ;;  %v8927_v46 = vor.u32 %v9737_v19, %v8926_v61 }
 0x783   : > { %v12738_v57 = vsub.f32 %v5373_v9, %v5412_v2  ;;  %v8928_v2 = vld [vmem:[%s10744_s21 + $0xc0] sm:$0xf0] }
 0x785   : > { %v5428_v30 = vmul.f32 %v12738_v57, %v12738_v57 }
 0x787   : > { %v5438_v55 = vsel %vm733_vm1, %v5428_v30, 0.0  ;;  %v9738_v30 = vld [vmem:[%s10744_s21 + $0xc4] sm:$0xf0] }
 0x788   : > { %5439 = vadd.xlane.f32.xlu0 %v5438_v55  ;;  %5402 = vadd.xlane.f32.xlu2 %v5401_v28  ;;  %v8931_v55 = vor.u32 %v9729_v0, %v8928_v2  ;;  %v8935_v28 = vor.u32 %v9738_v30, %v8934_v35 }
 0x78a   : > { %6087 = vmatpush.bf16.msrb.mxu3 %v8935_v28 }
 0x790   : > { %v5388_v42 = vpop.xlane.xlu1 %5387 }
 0x791   : > { %v5413_v43 = vmul.f32 %v12729_v49, %v5388_v42  ;;  %v9730_v42 = vld [vmem:[%s10744_s21 + $0x8c] sm:$0xf] }
 0x793   : > { %v12748_v37 = vsub.f32 %v5374_v53, %v5413_v43  ;;  %v8936_v43 = vld [vmem:[%s10744_s21 + $0xc8] sm:$0xf0] }
 0x795   : > { %v5429_v1 = vmul.f32 %v12748_v37, %v12748_v37 }
 0x797   : > { %v5441_v62 = vsel %vm733_vm1, %v5429_v1, 0.0 }
 0x798   : > { %5442 = vadd.xlane.f32.xlu0 %v5441_v62  ;;  %v5391_v39 = vpop.xlane.xlu2 %5390  ;;  %v8939_v62 = vor.u32 %v9730_v42, %v8936_v43 }
 0x799   : > { %v5414_v4 = vmul.f32 %v12729_v49, %v5391_v39  ;;  %v8862_v39 = vld [vmem:[%s10744_s21] sm:$0xf] }
 0x79b   : > { %v12754_v22 = vsub.f32 %v5375_v25, %v5414_v4  ;;  %v9761_v25 = vld [vmem:[%s10744_s21 + $0x184] sm:$0xf]  ;;  %v9721_v4 = vld [vmem:[%s10744_s21 + $0x3c] sm:$0xf0] }
 0x79d   : > { %v5430_v59 = vmul.f32 %v12754_v22, %v12754_v22 }
 0x79f   : > { %v5444_v63 = vsel %vm733_vm1, %v5430_v59, 0.0  ;;  %v9713_v59 = vld [vmem:[%s10744_s21 + $0x4] sm:$0xf] }
 0x7a0   : > { %5445 = vadd.xlane.f32.xlu1 %v5444_v63  ;;  %v8863_v63 = vor.u32 %v9721_v4, %v8862_v39 }
 0x7d7   : > { %v5394_v11 = vpop.xlane.xlu0 %5393 }
 0x7d8   : > { %v5415_v7 = vmul.f32 %v12729_v49, %v5394_v11  ;;  %v8864_v11 = vld [vmem:[%s10744_s21 + $0x40] sm:$0xf0] }
 0x7da   : > { %v12760_v54 = vsub.f32 %v5376_v58, %v5415_v7  ;;  %v9059_v58 = vor.u32 %v9761_v25, %v9056_v60  ;;  %v8870_v7 = vld [vmem:[%s10744_s21 + $0x8] sm:$0xf] }
 0x7dc   : > { %v5431_v47 = vmul.f32 %v12760_v54, %v12760_v54  ;;  %6056 = vmatpush.bf16.msrb.mxu2 %v9059_v58 }
 0x7de   : > { %v5447_v13 = vsel %vm733_vm1, %v5431_v47, 0.0  ;;  %v9722_v47 = vld [vmem:[%s10744_s21 + $0x44] sm:$0xf0] }
 0x7df   : > { %v5397_v9 = vpop.xlane.xlu1 %5396  ;;  %5448 = vadd.xlane.f32.xlu2 %v5447_v13  ;;  %v8867_v13 = vor.u32 %v9713_v59, %v8864_v11 }
 0x7e0   : > { %v5416_v31 = vmul.f32 %v12729_v49, %v5397_v9  ;;  %6057 = vmatpush.bf16.msrb.mxu2 %v8995_v52  ;;  %v8871_v9 = vor.u32 %v9722_v47, %v8870_v7 }
 0x7e2   : > { %v12766_v50 = vsub.f32 %v5377_v24, %v5416_v31  ;;  %v9753_v24 = vld [vmem:[%s10744_s21 + $0x13c] sm:$0xf0]  ;;  %v9714_v31 = vld [vmem:[%s10744_s21 + $0xc] sm:$0xf]  ;;  %6088 = vmatpush.bf16.msrb.mxu3 %v8871_v9 }
 0x7e3   : > { %v8991_v12 = vor.u32 %v9753_v24, %v8990_v44 }
 0x7e4   : > { %v5432_v18 = vmul.f32 %v12766_v50, %v12766_v50  ;;  %6058 = vmatpush.bf16.msrb.mxu2 %v8931_v55 }
 0x7e5   : > { %6028 = vmatpush.bf16.msrb.mxu1 %v8991_v12 }
 0x7e6   : > { %v5450_v16 = vsel %vm733_vm1, %v5432_v18, 0.0  ;;  %v8872_v18 = vld [vmem:[%s10744_s21 + $0x48] sm:$0xf0] }
 0x7e7   : > { %5451 = vadd.xlane.f32.xlu0 %v5450_v16  ;;  %v8875_v16 = vor.u32 %v9714_v31, %v8872_v18 }
 0x7e8   : > { %v5400_v53 = vpop.xlane.xlu1 %5399  ;;  %6059 = vmatpush.bf16.msrb.mxu2 %v8867_v13 }
 0x7e9   : > { %v5417_v17 = vmul.f32 %v12729_v49, %v5400_v53  ;;  %6029 = vmatpush.bf16.msrb.mxu1 %v8927_v46 }
 0x7eb   : > { %v12772_v27 = vsub.f32 %v5378_v56, %v5417_v17  ;;  %v9746_v56 = vld [vmem:[%s10744_s21 + $0x10c] sm:$0xf] }
 0x7ec   : > { %v9003_v51 = vor.u32 %v9746_v56, %v9000_v21 }
 0x7ed   : > { %v5433_v10 = vmul.f32 %v12772_v27, %v12772_v27  ;;  %6030 = vmatpush.bf16.msrb.mxu1 %v8863_v63 }
 0x7ee   : > { %6115 = vmatpush.bf16.msrb.mxu0 %v9003_v51 }
 0x7ef   : > { %v5453_v38 = vsel %vm733_vm1, %v5433_v10, 0.0 }
 0x7f0   : > { %5454 = vadd.xlane.f32.xlu1 %v5453_v38 }
 0x7f2   : > { %6116 = vmatpush.bf16.msrb.mxu0 %v8939_v62 }
 0x7f3   : > { %v5437_v23 = vpop.xlane.xlu2 %5436 }
 0x7f4   : > { %v5459_v20 = vmul.f32 %v5437_v23, %v12729_v49 }
 0x7f6   : > { %v5467_v1 = vadd.f32 1e-05, %v5459_v20  ;;  %6117 = vmatpush.bf16.msrb.mxu0 %v8875_v16 }
 0x7f8   : > { %10501 = vrsqrt.f32 %v5467_v1  ;;  %vm5481_vm11 = vweird.f32 %v5467_v1 }
 0x7fb   : > { %v5440_v53 = vpop.xlane.xlu0 %5439  ;;  %v5403_v17 = vpop.xlane.xlu2 %5402 }
 0x7fc   : > { %v5460_v45 = vmul.f32 %v5440_v53, %v12729_v49  ;;  %v5418_v14 = vmul.f32 %v12729_v49, %v5403_v17 }
 0x7fe   : > { %v10502_v25 = vpop.eup %10501  ;;  %v5468_v33 = vadd.f32 1e-05, %v5460_v45  ;;  %v12813_v60 = vsub.f32 %v12740_v6, %v5418_v14 }
 0x7ff   : > { %v5476_v41 = vmul.f32 %v10502_v25, %v5467_v1  ;;  %vm5482_vm10 = vweird.f32 %v10502_v25 }
 0x800   : > { %10503 = vrsqrt.f32 %v5468_v33  ;;  %v5434_v36 = vmul.f32 %v12813_v60, %v12813_v60  ;;  %vm5483_vm12 = vmor %vm5481_vm11, %vm5482_vm10  ;;  %vm5491_vm14 = vweird.f32 %v5468_v33 }
 0x801   : > { %v5477_v10 = vmul.f32 %v10502_v25, %v5476_v41  ;;  %v9763_v41 = vld [vmem:[%s10744_s21 + $0x194] sm:$0xf] }
 0x802   : > { %v5456_v58 = vsel %vm733_vm1, %v5434_v36, 0.0  ;;  %v9072_v36 = vld [vmem:[%s10744_s21 + $0x1d0] sm:$0xf0] }
 0x803   : > { %v5478_v15 = vmul.f32 0.5, %v5477_v10  ;;  %5457 = vadd.xlane.f32.xlu2 %v5456_v58  ;;  %v9078_v10 = vld [vmem:[%s10744_s21 + $0x198] sm:$0xf]  ;;  %v9075_v58 = vor.u32 %v9763_v41, %v9072_v36 }
 0x804   : > { %v8950_v41 = vld [vmem:[%s10744_s21 + $0x98] sm:$0xf] }
 0x805   : > { %v5479_v34 = vsub.f32 1.5, %v5478_v15  ;;  %v9772_v15 = vld [vmem:[%s10744_s21 + $0x1d4] sm:$0xf0]  ;;  %6172 = vmatpush.bf16.msra.mxu2 %v9075_v58 }
 0x806   : > { %v10504_v48 = vpop.eup %10503  ;;  %v9740_v36 = vld [vmem:[%s10744_s21 + $0xd4] sm:$0xf0] }
 0x807   : > { %v5480_v3 = vmul.f32 %v10502_v25, %v5479_v34  ;;  %v5486_v38 = vmul.f32 %v10504_v48, %v5468_v33  ;;  %vm5492_vm13 = vweird.f32 %v10504_v48  ;;  %v9070_v34 = vld [vmem:[%s10744_s21 + $0x190] sm:$0xf] }
 0x808   : > { %vm5493_vm15 = vmor %vm5491_vm14, %vm5492_vm13 }
 0x809   : > { %v5487_v44 = vmul.f32 %v10504_v48, %v5486_v38  ;;  %v5484_v6 = vsel %vm5483_vm12, %v10502_v25, %v5480_v3  ;;  %v9079_v3 = vor.u32 %v9772_v15, %v9078_v10  ;;  %v9771_v38 = vld [vmem:[%s10744_s21 + $0x1cc] sm:$0xf0]  ;;  %v8951_v15 = vor.u32 %v9740_v36, %v8950_v41  ;;  %v9024_v41 = vld [vmem:[%s10744_s21 + $0x160] sm:$0xf0] }
 0x80a   : > { %v5555_v52 = vmul.f32 %v5484_v6, %v12732_v32  ;;  %v9080_v6 = vld [vmem:[%s10744_s21 + $0x1d8] sm:$0xf0]  ;;  %v8942_v10 = vld [vmem:[%s10744_s21 + $0x90] sm:$0xf] }
 0x80b   : > { %v5488_v24 = vmul.f32 0.5, %v5487_v44  ;;  %v5443_v12 = vpop.xlane.xlu0 %5442  ;;  %v9764_v44 = vld [vmem:[%s10744_s21 + $0x19c] sm:$0xf]  ;;  %6201 = vmatpush.bf16.msra.mxu3 %v9079_v3 }
 0x80c   : > { %v5461_v5 = vmul.f32 %v5443_v12, %v12729_v49  ;;  %v5567_v51 = vmul.f32 %v12824_v26, %v5555_v52  ;;  %v9083_v12 = vor.u32 %v9764_v44, %v9080_v6  ;;  %v8952_v3 = vld [vmem:[%s10744_s21 + $0xd8] sm:$0xf0] }
 0x80d   : > { %v5489_v40 = vsub.f32 1.5, %v5488_v24  ;;  %v9071_v24 = vor.u32 %v9771_v38, %v9070_v34  ;;  %v9739_v34 = vld [vmem:[%s10744_s21 + $0xcc] sm:$0xf0] }
 0x80e   : > { %v5469_v29 = vadd.f32 1e-05, %v5461_v5  ;;  %v12839_v20 = vadd.f32 %v12832_v8, %v5567_v51  ;;  %6230 = vmatpush.bf16.msra.mxu0 %v9083_v12  ;;  %v8943_v44 = vor.u32 %v9739_v34, %v8942_v10  ;;  %v9715_v12 = vld [vmem:[%s10744_s21 + $0x14] sm:$0xf]  ;;  %v9030_v10 = vld [vmem:[%s10744_s21 + $0x128] sm:$0xf] }
 0x80f   : > { %v5490_v56 = vmul.f32 %v10504_v48, %v5489_v40  ;;  %6143 = vmatpush.bf16.msra.mxu1 %v9071_v24  ;;  %v9022_v34 = vld [vmem:[%s10744_s21 + $0x120] sm:$0xf] }
 0x810   : > { %10505 = vrsqrt.f32 %v5469_v29  ;;  %14103 = vst [vmem:[#allocation31_spill] sm:$0xff] %v12839_v20  ;;  %vm5501_vm2 = vweird.f32 %v5469_v29 }
 0x811   : > { %v5494_v21 = vsel %vm5493_vm15, %v10504_v48, %v5490_v56 }
 0x812   : > { %v5556_v23 = vmul.f32 %v5494_v21, %v12738_v57 }
 0x813   : > { %v5446_v61 = vpop.xlane.xlu1 %5445 }
 0x814   : > { %v5568_v19 = vmul.f32 %v12824_v26, %v5556_v23  ;;  %v5462_v32 = vmul.f32 %v5446_v61, %v12729_v49 }
 0x816   : > { %v10506_v0 = vpop.eup %10505  ;;  %v12842_v46 = vadd.f32 %v12832_v8, %v5568_v19  ;;  %v5470_v2 = vadd.f32 1e-05, %v5462_v32 }
 0x817   : > { %v5496_v35 = vmul.f32 %v10506_v0, %v5469_v29  ;;  %vm5502_vm0 = vweird.f32 %v10506_v0 }
 0x818   : > { %14104 = vst [vmem:[#allocation11_spill] sm:$0xff] %v12842_v46  ;;  %v12846_v30 = vpack.c.bf16 %v12842_v46, %v12839_v20  ;;  %10507 = vrsqrt.f32 %v5470_v2  ;;  %vm5503_vm3 = vmor %vm5501_vm2, %vm5502_vm0  ;;  %vm5511_vm5 = vweird.f32 %v5470_v2 }
 0x819   : > { %v5497_v57 = vmul.f32 %v10506_v0, %v5496_v35 }
 0x81a   : > { %9116 = vmatmul.msk.bf16.vlgmr.msrb.gmra.mxu1 %vm733_vm1, %v12846_v30  ;;  %9120 = vmatmul.msk.bf16.vlgmr.msrb.gmra.mxu2 %vm733_vm1, %v12846_v30 }
 0x81b   : > { %v5498_v55 = vmul.f32 0.5, %v5497_v57  ;;  %9124 = vmatmul.msk.bf16.vlgmr.msrb.gmra.mxu3 %vm733_vm1, %v12846_v30  ;;  %9128 = vmatmul.msk.bf16.vlgmr.msrb.gmra.mxu0 %vm733_vm1, %v12846_v30 }
 0x81d   : > { %v5499_v28 = vsub.f32 1.5, %v5498_v55 }
 0x81e   : > { %v10508_v42 = vpop.eup %10507 }
 0x81f   : > { %v5500_v43 = vmul.f32 %v10506_v0, %v5499_v28  ;;  %v5506_v1 = vmul.f32 %v10508_v42, %v5470_v2  ;;  %vm5512_vm4 = vweird.f32 %v10508_v42 }
 0x820   : > { %vm5513_vm6 = vmor %vm5511_vm5, %vm5512_vm4 }
 0x821   : > { %v5507_v62 = vmul.f32 %v10508_v42, %v5506_v1  ;;  %v5504_v39 = vsel %vm5503_vm3, %v10506_v0, %v5500_v43 }
 0x822   : > { %v5557_v63 = vmul.f32 %v5504_v39, %v12748_v37 }
 0x823   : > { %v5508_v4 = vmul.f32 0.5, %v5507_v62  ;;  %v9747_v62 = vld [vmem:[%s10744_s21 + $0x114] sm:$0xf] }
 0x824   : > { %v5569_v47 = vmul.f32 %v12824_v26, %v5557_v63  ;;  %v9006_v63 = vld [vmem:[%s10744_s21 + $0x110] sm:$0xf] }
 0x825   : > { %v5509_v59 = vsub.f32 1.5, %v5508_v4  ;;  %v9014_v4 = vld [vmem:[%s10744_s21 + $0x118] sm:$0xf] }
 0x826   : > { %v12861_v31 = vadd.f32 %v12832_v8, %v5569_v47  ;;  %v9755_v47 = vld [vmem:[%s10744_s21 + $0x14c] sm:$0xf0] }
 0x827   : > { %v5510_v11 = vmul.f32 %v10508_v42, %v5509_v59  ;;  %v9756_v59 = vld [vmem:[%s10744_s21 + $0x154] sm:$0xf0] }
 0x828   : > { %14105 = vst [vmem:[#allocation29_spill] sm:$0xff] %v12861_v31 }
 0x829   : > { %v5514_v7 = vsel %vm5513_vm6, %v10508_v42, %v5510_v11 }
 0x82a   : > { %v5558_v13 = vmul.f32 %v5514_v7, %v12754_v22  ;;  %v9015_v7 = vor.u32 %v9756_v59, %v9014_v4  ;;  %v9088_v4 = vld [vmem:[%s10744_s21 + $0x1e0] sm:$0xf0]  ;;  %v9094_v59 = vld [vmem:[%s10744_s21 + $0x1a8] sm:$0xf] }
 0x82c   : > { %v5570_v9 = vmul.f32 %v12824_v26, %v5558_v13  ;;  %v9748_v13 = vld [vmem:[%s10744_s21 + $0x11c] sm:$0xf]  ;;  %6202 = vmatpush.bf16.msra.mxu3 %v9015_v7 }
 0x82e   : > { %v12864_v18 = vadd.f32 %v12832_v8, %v5570_v9 }
 0x830   : > { %14106 = vst [vmem:[#allocation22_spill] sm:$0xff] %v12864_v18  ;;  %v12868_v37 = vpack.c.bf16 %v12864_v18, %v12861_v31  ;;  %6203 = vmatpush.bf16.msra.mxu3 %v8951_v15  ;;  %v9793_v31 = vld [vmem:[%s10756_s16 + $0x80] sm:$0xff] }
 0x832   : > { %9117 = vmatmul.msk.bf16.gmra.mxu1 %vm733_vm1, %v12868_v37  ;;  %9121 = vmatmul.msk.bf16.gmra.mxu2 %vm733_vm1, %v12868_v37 }
 0x833   : > { %9125 = vmatmul.msk.bf16.gmra.mxu3 %vm733_vm1, %v12868_v37  ;;  %9129 = vmatmul.msk.bf16.gmra.mxu0 %vm733_vm1, %v12868_v37 }
 0x852   : > { %v5449_v22 = vpop.xlane.xlu2 %5448 }
 0x853   : > { %v5463_v16 = vmul.f32 %v5449_v22, %v12729_v49 }
 0x855   : > { %v5471_v53 = vadd.f32 1e-05, %v5463_v16  ;;  %v9007_v16 = vor.u32 %v9755_v47, %v9006_v63  ;;  %v9774_v47 = vld [vmem:[%s10744_s21 + $0x1e4] sm:$0xf0] }
 0x857   : > { %10509 = vrsqrt.f32 %v5471_v53  ;;  %vm5521_vm8 = vweird.f32 %v5471_v53  ;;  %6144 = vmatpush.bf16.msra.mxu1 %v9007_v16 }
 0x85a   : > { %v5452_v17 = vpop.xlane.xlu0 %5451 }
 0x85b   : > { %v5464_v45 = vmul.f32 %v5452_v17, %v12729_v49  ;;  %v9731_v17 = vld [vmem:[%s10744_s21 + $0x94] sm:$0xf]  ;;  %6145 = vmatpush.bf16.msra.mxu1 %v8943_v44  ;;  %v9032_v44 = vld [vmem:[%s10744_s21 + $0x168] sm:$0xf0] }
 0x85d   : > { %v10510_v14 = vpop.eup %10509  ;;  %v5472_v25 = vadd.f32 1e-05, %v5464_v45  ;;  %v8944_v45 = vld [vmem:[%s10744_s21 + $0xd0] sm:$0xf0] }
 0x85e   : > { %v5516_v33 = vmul.f32 %v10510_v14, %v5471_v53  ;;  %vm5522_vm7 = vweird.f32 %v10510_v14  ;;  %v9016_v53 = vld [vmem:[%s10744_s21 + $0x158] sm:$0xf0]  ;;  %v8947_v58 = vor.u32 %v9731_v17, %v8944_v45  ;;  %v9773_v17 = vld [vmem:[%s10744_s21 + $0x1dc] sm:$0xf0] }
 0x85f   : > { %10511 = vrsqrt.f32 %v5472_v25  ;;  %vm5523_vm9 = vmor %vm5521_vm8, %vm5522_vm7  ;;  %vm5531_vm11 = vweird.f32 %v5472_v25 }
 0x860   : > { %v5517_v48 = vmul.f32 %v10510_v14, %v5516_v33  ;;  %v9019_v33 = vor.u32 %v9748_v13, %v9016_v53 }
 0x862   : > { %v5518_v5 = vmul.f32 0.5, %v5517_v48  ;;  %v9732_v48 = vld [vmem:[%s10744_s21 + $0x9c] sm:$0xf]  ;;  %6231 = vmatpush.bf16.msra.mxu0 %v9019_v33  ;;  %v9749_v33 = vld [vmem:[%s10744_s21 + $0x124] sm:$0xf] }
 0x863   : > { %v5455_v40 = vpop.xlane.xlu1 %5454  ;;  %v8955_v24 = vor.u32 %v9732_v48, %v8952_v3  ;;  %v9027_v36 = vor.u32 %v9749_v33, %v9024_v41  ;;  %v9757_v48 = vld [vmem:[%s10744_s21 + $0x15c] sm:$0xf0]  ;;  %v9751_v41 = vld [vmem:[%s10744_s21 + $0x134] sm:$0xf] }
 0x864   : > { %v5519_v52 = vsub.f32 1.5, %v5518_v5  ;;  %v5465_v29 = vmul.f32 %v5455_v40, %v12729_v49  ;;  %v8880_v5 = vld [vmem:[%s10744_s21 + $0x50] sm:$0xf0]  ;;  %v9023_v3 = vor.u32 %v9757_v48, %v9022_v34  ;;  %v9760_v34 = vld [vmem:[%s10744_s21 + $0x174] sm:$0xf0] }
 0x865   : > { %v10512_v56 = vpop.eup %10511  ;;  %v8883_v40 = vor.u32 %v9715_v12, %v8880_v5  ;;  %v8960_v12 = vld [vmem:[%s10744_s21 + $0xe0] sm:$0xf0]  ;;  %v8966_v5 = vld [vmem:[%s10744_s21 + $0xa8] sm:$0xf]  ;;  %v9038_v48 = vld [vmem:[%s10744_s21 + $0x130] sm:$0xf] }
 0x866   : > { %v5520_v21 = vmul.f32 %v10510_v14, %v5519_v52  ;;  %v5526_v51 = vmul.f32 %v10512_v56, %v5472_v25  ;;  %v12889_v23 = vadd.f32 1e-05, %v5465_v29  ;;  %vm5532_vm10 = vweird.f32 %v10512_v56  ;;  %6232 = vmatpush.bf16.msra.mxu0 %v8955_v24 }
 0x867   : > { %vm5533_vm12 = vmor %vm5531_vm11, %vm5532_vm10 }
 0x868   : > { %v5527_v61 = vmul.f32 %v10512_v56, %v5526_v51  ;;  %10513 = vrsqrt.f32 %v12889_v23  ;;  %v5524_v19 = vsel %vm5523_vm9, %v10510_v14, %v5520_v21  ;;  %v9724_v21 = vld [vmem:[%s10744_s21 + $0x54] sm:$0xf0]  ;;  %vm5541_vm14 = vweird.f32 %v12889_v23 }
 0x869   : > { %v5559_v2 = vmul.f32 %v5524_v19, %v12760_v54  ;;  %v9008_v54 = vld [vmem:[%s10744_s21 + $0x150] sm:$0xf0] }
 0x86a   : > { %v5528_v32 = vmul.f32 0.5, %v5527_v61  ;;  %v9011_v39 = vor.u32 %v9747_v62, %v9008_v54 }
 0x86b   : > { %v5571_v28 = vmul.f32 %v12824_v26, %v5559_v2  ;;  %v9716_v2 = vld [vmem:[%s10744_s21 + $0x1c] sm:$0xf] }
 0x86c   : > { %v5529_v0 = vsub.f32 1.5, %v5528_v32  ;;  %6173 = vmatpush.bf16.msra.mxu2 %v9011_v39  ;;  %v8878_v32 = vld [vmem:[%s10744_s21 + $0x10] sm:$0xf] }
 0x86d   : > { %v12906_v11 = vadd.f32 %v12832_v8, %v5571_v28 }
 0x86e   : > { %v5530_v35 = vmul.f32 %v10512_v56, %v5529_v0  ;;  %v12893_v57 = vpop.eup %10513  ;;  %v9723_v0 = vld [vmem:[%s10744_s21 + $0x4c] sm:$0xf0] }
 0x86f   : > { %v5536_v43 = vmul.f32 %v12893_v57, %v12889_v23  ;;  %14107 = vst [vmem:[#allocation18_spill] sm:$0xff] %v12906_v11  ;;  %vm5542_vm13 = vweird.f32 %v12893_v57  ;;  %v9765_v23 = vld [vmem:[%s10744_s21 + $0x1a4] sm:$0xf] }
 0x870   : > { %v5534_v55 = vsel %vm5533_vm12, %v10512_v56, %v5530_v35  ;;  %6174 = vmatpush.bf16.msra.mxu2 %v8947_v58  ;;  %v8886_v56 = vld [vmem:[%s10744_s21 + $0x18] sm:$0xf]  ;;  %v8879_v35 = vor.u32 %v9723_v0, %v8878_v32  ;;  %vm5543_vm15 = vmor %vm5541_vm14, %vm5542_vm13  ;;  %v9091_v7 = vor.u32 %v9765_v23, %v9088_v4  ;;  %v9758_v58 = vld [vmem:[%s10744_s21 + $0x164] sm:$0xf0] }
 0x871   : > { %v5560_v42 = vmul.f32 %v5534_v55, %v12766_v50  ;;  %v5537_v9 = vmul.f32 %v12893_v57, %v5536_v43  ;;  %v8887_v19 = vor.u32 %v9724_v21, %v8886_v56  ;;  %v8888_v55 = vld [vmem:[%s10744_s21 + $0x58] sm:$0xf0]  ;;  %v9031_v15 = vor.u32 %v9758_v58, %v9030_v10  ;;  %v8958_v56 = vld [vmem:[%s10744_s21 + $0xa0] sm:$0xf]  ;;  %v9717_v32 = vld [vmem:[%s10744_s21 + $0x24] sm:$0xf] }
 0x872   : > { %6146 = vmatpush.bf16.msra.mxu1 %v8879_v35  ;;  %v9741_v21 = vld [vmem:[%s10744_s21 + $0xdc] sm:$0xf0]  ;;  %v8902_v35 = vld [vmem:[%s10744_s21 + $0x28] sm:$0xf]  ;;  %v9767_v4 = vld [vmem:[%s10744_s21 + $0x1b4] sm:$0xf] }
 0x873   : > { %v5572_v1 = vmul.f32 %v12824_v26, %v5560_v42  ;;  %v5538_v6 = vmul.f32 0.5, %v5537_v9  ;;  %6204 = vmatpush.bf16.msra.mxu3 %v8887_v19  ;;  %v8891_v42 = vor.u32 %v9716_v2, %v8888_v55  ;;  %v9095_v9 = vor.u32 %v9774_v47, %v9094_v59  ;;  %v8968_v19 = vld [vmem:[%s10744_s21 + $0xe8] sm:$0xf0]  ;;  %v8896_v2 = vld [vmem:[%s10744_s21 + $0x60] sm:$0xf0] }
 0x874   : > { %6175 = vmatpush.bf16.msra.mxu2 %v8883_v40  ;;  %v9742_v40 = vld [vmem:[%s10744_s21 + $0xe4] sm:$0xf0]  ;;  %v9104_v59 = vld [vmem:[%s10744_s21 + $0x1f0] sm:$0xf0]  ;;  %v9776_v47 = vld [vmem:[%s10744_s21 + $0x1f4] sm:$0xf0] }
 0x875   : > { %v12909_v50 = vadd.f32 %v12832_v8, %v5572_v1  ;;  %v5539_v52 = vsub.f32 1.5, %v5538_v6  ;;  %6233 = vmatpush.bf16.msra.mxu0 %v8891_v42  ;;  %v9733_v6 = vld [vmem:[%s10744_s21 + $0xa4] sm:$0xf]  ;;  %v9726_v55 = vld [vmem:[%s10744_s21 + $0x64] sm:$0xf0] }
 0x876   : > { %v5458_v22 = vpop.xlane.xlu2 %5457  ;;  %v8903_v42 = vor.u32 %v9726_v55, %v8902_v35 }
 0x877   : > { %14108 = vst [vmem:[#allocation21_spill] sm:$0xff] %v12909_v50  ;;  %v12919_v14 = vpack.c.bf16 %v12909_v50, %v12906_v11  ;;  %v5466_v25 = vmul.f32 %v5458_v22, %v12729_v49  ;;  %v5540_v51 = vmul.f32 %v12893_v57, %v5539_v52  ;;  %6317 = vmatpush.bf16.msrb.mxu3 %v9095_v9  ;;  %v9802_v50 = vld [vmem:[%s10756_s16 + $0xc8] sm:$0xff] }
 0x878   : > { %6288 = vmatpush.bf16.msrb.mxu2 %v9091_v7  ;;  %v8963_v52 = vor.u32 %v9733_v6, %v8960_v12  ;;  %v9107_v7 = vor.u32 %v9767_v4, %v9104_v59 }
 0x879   : > { %v5474_v38 = vadd.f32 1e-05, %v5466_v25  ;;  %9118 = vmatmul.msk.bf16.gmra.mxu1 %vm733_vm1, %v12919_v14  ;;  %9122 = vmatmul.msk.bf16.gmra.mxu2 %vm733_vm1, %v12919_v14  ;;  %v5544_v43 = vsel %vm5543_vm15, %v12893_v57, %v5540_v51  ;;  %v8959_v51 = vor.u32 %v9741_v21, %v8958_v56  ;;  %v8976_v56 = vld [vmem:[%s10744_s21 + $0xf0] sm:$0xf0]  ;;  %v8982_v21 = vld [vmem:[%s10744_s21 + $0xb8] sm:$0xf] }
 0x87a   : > { %9126 = vmatmul.msk.bf16.gmra.mxu3 %vm733_vm1, %v12919_v14  ;;  %9130 = vmatmul.msk.bf16.gmra.mxu0 %vm733_vm1, %v12919_v14  ;;  %v5561_v54 = vmul.f32 %v5544_v43, %v12772_v27  ;;  %v8894_v43 = vld [vmem:[%s10744_s21 + $0x20] sm:$0xf] }
 0x87b   : > { %10515 = vrsqrt.f32 %v5474_v38  ;;  %vm5551_vm2 = vweird.f32 %v5474_v38  ;;  %6318 = vmatpush.bf16.msrb.mxu3 %v9031_v15  ;;  %v9046_v15 = vld [vmem:[%s10744_s21 + $0x138] sm:$0xf] }
 0x87c   : > { %v5573_v13 = vmul.f32 %v12824_v26, %v5561_v54  ;;  %6289 = vmatpush.bf16.msrb.mxu2 %v9027_v36  ;;  %v9718_v54 = vld [vmem:[%s10744_s21 + $0x2c] sm:$0xf]  ;;  %v9040_v36 = vld [vmem:[%s10744_s21 + $0x170] sm:$0xf0] }
 0x87d   : > { %v9043_v10 = vor.u32 %v9751_v41, %v9040_v36 }
 0x87e   : > { %v12957_v22 = vadd.f32 %v12832_v8, %v5573_v13  ;;  %v9102_v13 = vld [vmem:[%s10744_s21 + $0x1b0] sm:$0xf] }
 0x880   : > { %14109 = vst [vmem:[#allocation10_spill] sm:$0xff] %v12957_v22  ;;  %6290 = vmatpush.bf16.msrb.mxu2 %v8963_v52  ;;  %v9735_v52 = vld [vmem:[%s10744_s21 + $0xb4] sm:$0xf] }
 0x881   : > { %v10516_v29 = vpop.eup %10515 }
 0x882   : > { %v5546_v61 = vmul.f32 %v10516_v29, %v5474_v38  ;;  %vm5552_vm0 = vweird.f32 %v10516_v29  ;;  %v9750_v38 = vld [vmem:[%s10744_s21 + $0x12c] sm:$0xf] }
 0x883   : > { %vm5553_vm3 = vmor %vm5551_vm2, %vm5552_vm0  ;;  %v9035_v24 = vor.u32 %v9750_v38, %v9032_v44  ;;  %v9047_v38 = vor.u32 %v9760_v34, %v9046_v15  ;;  %v9759_v44 = vld [vmem:[%s10744_s21 + $0x16c] sm:$0xf0] }
 0x884   : > { %v5547_v28 = vmul.f32 %v10516_v29, %v5546_v61  ;;  %v9734_v61 = vld [vmem:[%s10744_s21 + $0xac] sm:$0xf]  ;;  %v9039_v6 = vor.u32 %v9759_v44, %v9038_v48  ;;  %v9727_v15 = vld [vmem:[%s10744_s21 + $0x6c] sm:$0xf0]  ;;  %v8920_v44 = vld [vmem:[%s10744_s21 + $0x78] sm:$0xf0] }
 0x885   : > { %v8971_v0 = vor.u32 %v9734_v61, %v8968_v19  ;;  %v8979_v19 = vor.u32 %v9735_v52, %v8976_v56 }
 0x886   : > { %v5548_v1 = vmul.f32 0.5, %v5547_v28  ;;  %v8899_v28 = vor.u32 %v9717_v32, %v8896_v2  ;;  %v9743_v2 = vld [vmem:[%s10744_s21 + $0xec] sm:$0xf0] }
 0x888   : > { %v5549_v62 = vsub.f32 1.5, %v5548_v1  ;;  %v9725_v1 = vld [vmem:[%s10744_s21 + $0x5c] sm:$0xf0]  ;;  %6291 = vmatpush.bf16.msrb.mxu2 %v8899_v28 }
 0x88a   : > { %v5550_v39 = vmul.f32 %v10516_v29, %v5549_v62  ;;  %v8895_v62 = vor.u32 %v9725_v1, %v8894_v43 }
 0x88c   : > { %v5554_v63 = vsel %vm5553_vm3, %v10516_v29, %v5550_v39  ;;  %v8967_v29 = vor.u32 %v9742_v40, %v8966_v5  ;;  %v8904_v39 = vld [vmem:[%s10744_s21 + $0x68] sm:$0xf0]  ;;  %v9752_v5 = vld [vmem:[%s10744_s21 + $0x13c] sm:$0xf] }
 0x88d   : > { %v5562_v57 = vmul.f32 %v5554_v63, %v12813_v60  ;;  %v9086_v60 = vld [vmem:[%s10744_s21 + $0x1a0] sm:$0xf]  ;;  %v8907_v23 = vor.u32 %v9718_v54, %v8904_v39  ;;  %v9110_v63 = vld [vmem:[%s10744_s21 + $0x1b8] sm:$0xf]  ;;  %v9048_v40 = vld [vmem:[%s10744_s21 + $0x178] sm:$0xf0] }
 0x88e   : > { %v9087_v45 = vor.u32 %v9773_v17, %v9086_v60  ;;  %6319 = vmatpush.bf16.msrb.mxu3 %v8967_v29  ;;  %v9111_v9 = vor.u32 %v9776_v47, %v9110_v63  ;;  %v9051_v29 = vor.u32 %v9752_v5, %v9048_v40  ;;  %v8984_v54 = vld [vmem:[%s10744_s21 + $0xf8] sm:$0xf0]  ;;  %v8912_v47 = vld [vmem:[%s10744_s21 + $0x70] sm:$0xf0] }
 0x88f   : > { %v5574_v27 = vmul.f32 %v12824_v26, %v5562_v57  ;;  %v9766_v26 = vld [vmem:[%s10744_s21 + $0x1ac] sm:$0xf]  ;;  %v9775_v57 = vld [vmem:[%s10744_s21 + $0x1ec] sm:$0xf0] }
 0x890   : > { %6259 = vmatpush.bf16.msrb.mxu1 %v9087_v45  ;;  %v9768_v45 = vld [vmem:[%s10744_s21 + $0x1bc] sm:$0xf] }
 0x891   : > { %v12960_v16 = vadd.f32 %v12832_v8, %v5574_v27  ;;  %v9096_v8 = vld [vmem:[%s10744_s21 + $0x1e8] sm:$0xf0]  ;;  %v9103_v27 = vor.u32 %v9775_v57, %v9102_v13  ;;  %v8918_v13 = vld [vmem:[%s10744_s21 + $0x38] sm:$0xf] }
 0x892   : > { %v9099_v25 = vor.u32 %v9766_v26, %v9096_v8  ;;  %6320 = vmatpush.bf16.msrb.mxu3 %v8903_v42  ;;  %v9112_v26 = vld [vmem:[%s10744_s21 + $0x1f8] sm:$0xf0] }
 0x893   : > { %14110 = vst [vmem:[#allocation26_spill] sm:$0xff] %v12960_v16  ;;  %v12964_v53 = vpack.c.bf16 %v12960_v16, %v12957_v22  ;;  %v9115_v8 = vor.u32 %v9768_v45, %v9112_v26  ;;  %v9794_v22 = vld [vmem:[%s10756_s16 + $0x88] sm:$0xff] }
 0x894   : > { %6346 = vmatpush.bf16.msrb.mxu0 %v9099_v25  ;;  %6260 = vmatpush.bf16.msrb.mxu1 %v9023_v3 }
 0x895   : > { %9119 = vmatmul.msk.bf16.gmra.mxu1 %vm733_vm1, %v12964_v53  ;;  %9123 = vmatmul.msk.bf16.gmra.mxu2 %vm733_vm1, %v12964_v53 }
 0x896   : > { %9127 = vmatmul.msk.bf16.gmra.mxu3 %vm733_vm1, %v12964_v53  ;;  %9131 = vmatmul.msk.bf16.gmra.mxu0 %vm733_vm1, %v12964_v53 }
 0x897   : > { %v13046_v25 = vpop.f32.mrf.mxu1 }
 0x898   : > { %6347 = vmatpush.bf16.msrb.mxu0 %v9035_v24  ;;  %6261 = vmatpush.bf16.msrb.mxu1 %v8959_v51  ;;  %v13048_v33 = vpop.f32.mrf.mxu0  ;;  %v9744_v51 = vld [vmem:[%s10744_s21 + $0xf4] sm:$0xf0] }
 0x899   : > { %v8983_v32 = vor.u32 %v9744_v51, %v8982_v21 }
 0x89c   : > { %6348 = vmatpush.bf16.msrb.mxu0 %v8971_v0  ;;  %6262 = vmatpush.bf16.msrb.mxu1 %v8895_v62  ;;  %v8974_v0 = vld [vmem:[%s10744_s21 + $0xb0] sm:$0xf]  ;;  %v9736_v62 = vld [vmem:[%s10744_s21 + $0xbc] sm:$0xf] }
 0x89d   : > { %v13040_v60 = vpop.f32.mrf.mxu2  ;;  %v8975_v55 = vor.u32 %v9743_v2, %v8974_v0  ;;  %v8987_v39 = vor.u32 %v9736_v62, %v8984_v54  ;;  %v9792_v54 = vld [vmem:[%s10756_s16 + $0x78] sm:$0xff] }
 0x89e   : > { %v13042_v17 = vpop.f32.mrf.mxu3 }
 0x89f   : > { %v13064_v24 = vpop.f32.mrf.mxu1 }
 0x8a0   : > { %6349 = vmatpush.bf16.msrb.mxu0 %v8907_v23  ;;  %v13070_v12 = vpop.f32.mrf.mxu0 }
 0x8a5   : > { %9132 = vmatmul.msk.bf16.vlgmr.msra.gmra.mxu1 %vm733_vm1, %v12846_v30  ;;  %9136 = vmatmul.msk.bf16.vlgmr.msra.gmra.mxu2 %vm733_vm1, %v12846_v30  ;;  %v13052_v58 = vpop.f32.mrf.mxu2 }
 0x8a6   : > { %9140 = vmatmul.msk.bf16.vlgmr.msra.gmra.mxu3 %vm733_vm1, %v12846_v30  ;;  %9144 = vmatmul.msk.bf16.vlgmr.msra.gmra.mxu0 %vm733_vm1, %v12846_v30  ;;  %v13057_v3 = vpop.f32.mrf.mxu3 }
 0x8a7   : > { %6404 = vmatpush.bf16.msra.mxu2 %v9107_v7  ;;  %6433 = vmatpush.bf16.msra.mxu3 %v9111_v9  ;;  %v9719_v7 = vld [vmem:[%s10744_s21 + $0x34] sm:$0xf]  ;;  %v9728_v9 = vld [vmem:[%s10744_s21 + $0x74] sm:$0xf0] }
 0x8a8   : > { %6375 = vmatpush.bf16.msra.mxu1 %v9103_v27  ;;  %6462 = vmatpush.bf16.msra.mxu0 %v9115_v8  ;;  %v8915_v57 = vor.u32 %v9719_v7, %v8912_v47  ;;  %v13111_v27 = vld [vmem:[%s10750_s26] sm:$0xff]  ;;  %v8919_v26 = vor.u32 %v9728_v9, %v8918_v13  ;;  %v9784_v7 = vld [vmem:[%s10756_s16 + $0x38] sm:$0xff]  ;;  %v9791_v47 = vld [vmem:[%s10756_s16 + $0x70] sm:$0xff] }
 0x8a9   : > { %v13116_v8 = vperm.slane %v13111_v27, 1  ;;  %v13121_v36 = vperm.slane %v13111_v27, 2  ;;  %v9799_v13 = vld [vmem:[%s10756_s16 + $0xb0] sm:$0xff]  ;;  %v9808_v9 = vld [vmem:[%s10756_s16 + $0xf8] sm:$0xff] }
 0x8ab   : > { %6405 = vmatpush.bf16.msra.mxu2 %v9043_v10  ;;  %6434 = vmatpush.bf16.msra.mxu3 %v9047_v38  ;;  %v8910_v10 = vld [vmem:[%s10744_s21 + $0x30] sm:$0xf]  ;;  %v9720_v38 = vld [vmem:[%s10744_s21 + $0x3c] sm:$0xf] }
 0x8ac   : > { %6376 = vmatpush.bf16.msra.mxu1 %v9039_v6  ;;  %6463 = vmatpush.bf16.msra.mxu0 %v9051_v29  ;;  %v8911_v48 = vor.u32 %v9727_v15, %v8910_v10  ;;  %v8923_v40 = vor.u32 %v9720_v38, %v8920_v44 }
 0x8af   : > { %6406 = vmatpush.bf16.msra.mxu2 %v8979_v19  ;;  %6435 = vmatpush.bf16.msra.mxu3 %v8983_v32  ;;  %v13084_v28 = vpop.f32.mrf.mxu1 }
 0x8b0   : > { %6377 = vmatpush.bf16.msra.mxu1 %v8975_v55  ;;  %v13086_v42 = vpop.f32.mrf.mxu0  ;;  %6464 = vmatpush.bf16.msra.mxu0 %v8987_v39  ;;  %v9800_v39 = vld [vmem:[%s10756_s16 + $0xb8] sm:$0xff] }
 0x8b3   : > { %6407 = vmatpush.bf16.msra.mxu2 %v8915_v57  ;;  %6436 = vmatpush.bf16.msra.mxu3 %v8919_v26  ;;  %v13161_v57 = vperm.slane %v13111_v27, 0  ;;  %v13165_v26 = vperm.slane %v13111_v27, 3 }
 0x8b4   : > { %6378 = vmatpush.bf16.msra.mxu1 %v8911_v48  ;;  %6465 = vmatpush.bf16.msra.mxu0 %v8923_v40  ;;  %v9783_v40 = vld [vmem:[%s10756_s16 + $0x30] sm:$0xff] }
 0x8b5   : > { %9133 = vmatmul.msk.bf16.gmra.mxu1 %vm733_vm1, %v12868_v37  ;;  %9137 = vmatmul.msk.bf16.gmra.mxu2 %vm733_vm1, %v12868_v37  ;;  %v13078_v61 = vpop.f32.mrf.mxu2 }
 0x8b6   : > { %9141 = vmatmul.msk.bf16.gmra.mxu3 %vm733_vm1, %v12868_v37  ;;  %9145 = vmatmul.msk.bf16.gmra.mxu0 %vm733_vm1, %v12868_v37  ;;  %v13082_v35 = vpop.f32.mrf.mxu3 }
 0x8b7   : > { %v13102_v23 = vpop.f32.mrf.mxu1 }
 0x8b8   : > { %v13104_v4 = vpop.f32.mrf.mxu0 }
 0x8bd   : > { %v13088_v43 = vpop.f32.mrf.mxu2 }
 0x8be   : > { %v13090_v1 = vpop.f32.mrf.mxu3 }
 0x8c5   : > { %9134 = vmatmul.msk.bf16.gmra.mxu1 %vm733_vm1, %v12919_v14  ;;  %9138 = vmatmul.msk.bf16.gmra.mxu2 %vm733_vm1, %v12919_v14 }
 0x8c6   : > { %9142 = vmatmul.msk.bf16.gmra.mxu3 %vm733_vm1, %v12919_v14  ;;  %9146 = vmatmul.msk.bf16.gmra.mxu0 %vm733_vm1, %v12919_v14 }
 0x8d5   : > { %9135 = vmatmul.msk.bf16.gmra.mxu1 %vm733_vm1, %v12964_v53  ;;  %9139 = vmatmul.msk.bf16.gmra.mxu2 %vm733_vm1, %v12964_v53 }
 0x8d6   : > { %9143 = vmatmul.msk.bf16.gmra.mxu3 %vm733_vm1, %v12964_v53  ;;  %9147 = vmatmul.msk.bf16.gmra.mxu0 %vm733_vm1, %v12964_v53 }
 0x8e5   : > { %9148 = vmatmul.msk.bf16.vlgmr.msrb.gmra.mxu1 %vm733_vm1, %v12846_v30  ;;  %9152 = vmatmul.msk.bf16.vlgmr.msrb.gmra.mxu2 %vm733_vm1, %v12846_v30 }
 0x8e6   : > { %9156 = vmatmul.msk.bf16.vlgmr.msrb.gmra.mxu3 %vm733_vm1, %v12846_v30  ;;  %9160 = vmatmul.msk.bf16.vlgmr.msrb.gmra.mxu0 %vm733_vm1, %v12846_v30 }
 0x8e7   : > { %7736 = vmatpush.bf16.msrb.mxu2 %v9792_v54  ;;  %7765 = vmatpush.bf16.msrb.mxu3 %v9800_v39 }
 0x8e8   : > { %7707 = vmatpush.bf16.msrb.mxu1 %v9784_v7  ;;  %7794 = vmatpush.bf16.msrb.mxu0 %v9808_v9 }
 0x8eb   : > { %7737 = vmatpush.bf16.msrb.mxu2 %v9791_v47  ;;  %7766 = vmatpush.bf16.msrb.mxu3 %v9799_v13 }
 0x8ec   : > { %7708 = vmatpush.bf16.msrb.mxu1 %v9783_v40 }
 0x8f5   : > { %9149 = vmatmul.msk.bf16.gmra.mxu1 %vm733_vm1, %v12868_v37  ;;  %9153 = vmatmul.msk.bf16.gmra.mxu2 %vm733_vm1, %v12868_v37 }
 0x8f6   : > { %9157 = vmatmul.msk.bf16.gmra.mxu3 %vm733_vm1, %v12868_v37  ;;  %9161 = vmatmul.msk.bf16.gmra.mxu0 %vm733_vm1, %v12868_v37  ;;  %v13113_v45 = vpop.f32.mrf.mxu1 }
 0x8f7   : > { %v13118_v41 = vpop.f32.mrf.mxu0 }
 0x8fc   : > { %v6071_v59 = vpop.f32.mrf.mxu2 }
 0x8fd   : > { %v6100_v63 = vpop.f32.mrf.mxu3  ;;  %v6072_v34 = vadd.f32 %v6071_v59, %v13116_v8 }
 0x8fe   : > { %v6101_v6 = vadd.f32 %v6100_v63, %v13121_v36  ;;  %v13141_v2 = vpop.f32.mrf.mxu1 }
 0x8ff   : > { %v6552_v21 = vmax.f32 %v6072_v34, 0.0  ;;  %v13145_v62 = vpop.f32.mrf.mxu0 }
 0x900   : > { %v6553_v19 = vmax.f32 %v6101_v6, 0.0 }
 0x904   : > { %v6073_v5 = vpop.f32.mrf.mxu2 }
 0x905   : > { %v6074_v52 = vadd.f32 %v6073_v5, %v13116_v8  ;;  %v6102_v29 = vpop.f32.mrf.mxu3  ;;  %9150 = vmatmul.msk.bf16.gmra.mxu1 %vm733_vm1, %v12919_v14  ;;  %9154 = vmatmul.msk.bf16.gmra.mxu2 %vm733_vm1, %v12919_v14 }
 0x906   : > { %v6103_v56 = vadd.f32 %v6102_v29, %v13121_v36  ;;  %9158 = vmatmul.msk.bf16.gmra.mxu3 %vm733_vm1, %v12919_v14  ;;  %9162 = vmatmul.msk.bf16.gmra.mxu0 %vm733_vm1, %v12919_v14 }
 0x907   : > { %v6568_v51 = vmax.f32 %v6074_v52, 0.0 }
 0x908   : > { %v6569_v32 = vmax.f32 %v6103_v56, 0.0 }
 0x909   : > { %v13139_v0 = vpack.c.bf16 %v6568_v51, %v6552_v21  ;;  %v9790_v51 = vld [vmem:[%s10756_s16 + $0x68] sm:$0xff] }
 0x90a   : > { %v13143_v55 = vpack.c.bf16 %v6569_v32, %v6553_v19  ;;  %v9798_v19 = vld [vmem:[%s10756_s16 + $0xa8] sm:$0xff]  ;;  %v9807_v32 = vld [vmem:[%s10756_s16 + $0xf0] sm:$0xff]  ;;  %7738 = vmatpush.bf16.msrb.mxu2 %v9790_v51 }
 0x90b   : > { %7767 = vmatpush.bf16.msrb.mxu3 %v9798_v19  ;;  %7795 = vmatpush.bf16.msrb.mxu0 %v9807_v32 }
 0x912   : > { %v6047_v59 = vpop.f32.mrf.mxu1 }
 0x913   : > { %v6134_v63 = vpop.f32.mrf.mxu0  ;;  %v6048_v15 = vadd.f32 %v6047_v59, %v13161_v57 }
 0x914   : > { %v6135_v48 = vadd.f32 %v6134_v63, %v13165_v26 }
 0x915   : > { %9151 = vmatmul.msk.bf16.gmra.mxu1 %vm733_vm1, %v12964_v53  ;;  %9155 = vmatmul.msk.bf16.gmra.mxu2 %vm733_vm1, %v12964_v53  ;;  %v6583_v52 = vmax.f32 %v6048_v15, 0.0 }
 0x916   : > { %9159 = vmatmul.msk.bf16.gmra.mxu3 %vm733_vm1, %v12964_v53  ;;  %9163 = vmatmul.msk.bf16.gmra.mxu0 %vm733_vm1, %v12964_v53  ;;  %v6586_v56 = vmax.f32 %v6135_v48, 0.0 }
 0x918   : > { %v6076_v10 = vpop.f32.mrf.mxu2 }
 0x919   : > { %v6105_v34 = vpop.f32.mrf.mxu3  ;;  %v6077_v54 = vadd.f32 %v6076_v10, %v13116_v8 }
 0x91a   : > { %v6049_v38 = vpop.f32.mrf.mxu1  ;;  %v6106_v59 = vadd.f32 %v6105_v34, %v13121_v36 }
 0x91b   : > { %v6050_v44 = vadd.f32 %v6049_v38, %v13161_v57  ;;  %v6136_v6 = vpop.f32.mrf.mxu0  ;;  %v6584_v10 = vmax.f32 %v6077_v54, 0.0 }
 0x91c   : > { %v6137_v5 = vadd.f32 %v6136_v6, %v13165_v26  ;;  %v9782_v6 = vld [vmem:[%s10756_s16 + $0x28] sm:$0xff] }
 0x91d   : > { %v6599_v29 = vmax.f32 %v6050_v44, 0.0  ;;  %v6585_v44 = vmax.f32 %v6106_v59, 0.0  ;;  %7709 = vmatpush.bf16.msrb.mxu1 %v9782_v6 }
 0x91e   : > { %v6602_v21 = vmax.f32 %v6137_v5, 0.0  ;;  %v13185_v5 = vperm.slane %v13111_v27, 4 }
 0x91f   : > { %v13176_v39 = vpack.c.bf16 %v6599_v29, %v6583_v52  ;;  %v13194_v52 = vperm.slane %v13111_v27, 7  ;;  %v9789_v29 = vld [vmem:[%s10756_s16 + $0x60] sm:$0xff] }
 0x920   : > { %v6078_v63 = vpop.f32.mrf.mxu2  ;;  %v13179_v7 = vpack.c.bf16 %v6602_v21, %v6586_v56  ;;  %v9797_v56 = vld [vmem:[%s10756_s16 + $0xa0] sm:$0xff]  ;;  %v9806_v21 = vld [vmem:[%s10756_s16 + $0xe8] sm:$0xff]  ;;  %7739 = vmatpush.bf16.msrb.mxu2 %v9789_v29  ;;  %v9788_v29 = vld [vmem:[%s10756_s16 + $0x58] sm:$0xff] }
 0x921   : > { %v6079_v47 = vadd.f32 %v6078_v63, %v13116_v8  ;;  %v6107_v13 = vpop.f32.mrf.mxu3  ;;  %7768 = vmatpush.bf16.msrb.mxu3 %v9797_v56  ;;  %7796 = vmatpush.bf16.msrb.mxu0 %v9806_v21  ;;  %v13208_v63 = vperm.slane %v13111_v27, 5  ;;  %v9805_v56 = vld [vmem:[%s10756_s16 + $0xe0] sm:$0xff] }
 0x922   : > { %v6108_v9 = vadd.f32 %v6107_v13, %v13121_v36  ;;  %v6148_v15 = vpop.f32.mrf.mxu1 }
 0x923   : > { %v6600_v48 = vmax.f32 %v6079_v47, 0.0  ;;  %v6235_v38 = vpop.f32.mrf.mxu0  ;;  %v6149_v32 = vadd.f32 %v6148_v15, %v13185_v5  ;;  %v9781_v15 = vld [vmem:[%s10756_s16 + $0x20] sm:$0xff] }
 0x924   : > { %v6601_v34 = vmax.f32 %v6108_v9, 0.0  ;;  %v6236_v59 = vadd.f32 %v6235_v38, %v13194_v52  ;;  %v13212_v9 = vperm.slane %v13111_v27, 6  ;;  %7710 = vmatpush.bf16.msrb.mxu1 %v9781_v15  ;;  %v9796_v38 = vld [vmem:[%s10756_s16 + $0x98] sm:$0xff]  ;;  %7740 = vmatpush.bf16.msrb.mxu2 %v9788_v29  ;;  %v9795_v29 = vld [vmem:[%s10756_s16 + $0x90] sm:$0xff] }
 0x925   : > { %9164 = vmatmul.msk.bf16.vlgmr.msra.gmra.mxu1 %vm733_vm1, %v12846_v30  ;;  %9168 = vmatmul.msk.bf16.vlgmr.msra.gmra.mxu2 %vm733_vm1, %v12846_v30  ;;  %v13191_v40 = vpack.c.bf16 %v6600_v48, %v6584_v10  ;;  %v6491_v48 = vmax.f32 %v6149_v32, 0.0 }
 0x926   : > { %9172 = vmatmul.msk.bf16.vlgmr.msra.gmra.mxu3 %vm733_vm1, %v12846_v30  ;;  %9176 = vmatmul.msk.bf16.vlgmr.msra.gmra.mxu0 %vm733_vm1, %v12846_v30  ;;  %v13203_v51 = vpack.c.bf16 %v6601_v34, %v6585_v44  ;;  %v6494_v34 = vmax.f32 %v6236_v59, 0.0 }
 0x927   : > { %7769 = vmatpush.bf16.msrb.mxu3 %v9796_v38  ;;  %7797 = vmatpush.bf16.msrb.mxu0 %v9805_v56  ;;  %v9804_v38 = vld [vmem:[%s10756_s16 + $0xd8] sm:$0xff] }
 0x928   : > { %v6177_v19 = vpop.f32.mrf.mxu2 }
 0x929   : > { %v6206_v54 = vpop.f32.mrf.mxu3  ;;  %v6178_v21 = vadd.f32 %v6177_v19, %v13208_v63 }
 0x92a   : > { %v6150_v30 = vpop.f32.mrf.mxu1 }
 0x92b   : > { %v6151_v47 = vadd.f32 %v6150_v30, %v13185_v5  ;;  %v6237_v13 = vpop.f32.mrf.mxu0  ;;  %v6207_v30 = vadd.f32 %v6206_v54, %v13212_v9  ;;  %7770 = vmatpush.bf16.msrb.mxu3 %v9795_v29  ;;  %7798 = vmatpush.bf16.msrb.mxu0 %v9804_v38  ;;  %v9786_v29 = vld [vmem:[%s10756_s16 + $0x48] sm:$0xff] }
 0x92c   : > { %v6238_v10 = vadd.f32 %v6237_v13, %v13194_v52  ;;  %v6492_v13 = vmax.f32 %v6178_v21, 0.0  ;;  %v9778_v38 = vld [vmem:[%s10756_s16 + $0x8] sm:$0xff] }
 0x92d   : > { %v6507_v44 = vmax.f32 %v6151_v47, 0.0 }
 0x92e   : > { %v6510_v6 = vmax.f32 %v6238_v10, 0.0 }
 0x92f   : > { %v13220_v49 = vpack.c.bf16 %v6507_v44, %v6491_v48  ;;  %v6493_v48 = vmax.f32 %v6207_v30, 0.0  ;;  %v9780_v44 = vld [vmem:[%s10756_s16 + $0x18] sm:$0xff]  ;;  %7771 = vmatpush.bf16.msrb.mxu3 %v9794_v22  ;;  %v9801_v22 = vld [vmem:[%s10756_s16 + $0xc0] sm:$0xff] }
 0x930   : > { %v13223_v27 = vpack.c.bf16 %v6510_v6, %v6494_v34  ;;  %v6179_v16 = vpop.f32.mrf.mxu2  ;;  %v9787_v6 = vld [vmem:[%s10756_s16 + $0x50] sm:$0xff]  ;;  %7711 = vmatpush.bf16.msrb.mxu1 %v9780_v44 }
 0x931   : > { %v6180_v32 = vadd.f32 %v6179_v16, %v13208_v63  ;;  %v6208_v59 = vpop.f32.mrf.mxu3  ;;  %7741 = vmatpush.bf16.msrb.mxu2 %v9787_v6 }
 0x932   : > { %v6209_v47 = vadd.f32 %v6208_v59, %v13212_v9  ;;  %v6153_v19 = vpop.f32.mrf.mxu1 }
 0x933   : > { %v6508_v10 = vmax.f32 %v6180_v32, 0.0  ;;  %v6240_v15 = vpop.f32.mrf.mxu0  ;;  %v6154_v21 = vadd.f32 %v6153_v19, %v13185_v5  ;;  %7772 = vmatpush.bf16.msrb.mxu3 %v9793_v31 }
 0x934   : > { %v6509_v54 = vmax.f32 %v6209_v47, 0.0  ;;  %v6241_v32 = vadd.f32 %v6240_v15, %v13194_v52 }
 0x935   : > { %v13228_v34 = vpack.c.bf16 %v6508_v10, %v6492_v13  ;;  %9165 = vmatmul.msk.bf16.gmra.mxu1 %vm733_vm1, %v12868_v37  ;;  %9169 = vmatmul.msk.bf16.gmra.mxu2 %vm733_vm1, %v12868_v37  ;;  %v9779_v13 = vld [vmem:[%s10756_s16 + $0x10] sm:$0xff] }
 0x936   : > { %v13234_v16 = vpack.c.bf16 %v6509_v54, %v6493_v48  ;;  %9173 = vmatmul.msk.bf16.gmra.mxu3 %vm733_vm1, %v12868_v37  ;;  %9177 = vmatmul.msk.bf16.gmra.mxu0 %vm733_vm1, %v12868_v37  ;;  %v9803_v10 = vld [vmem:[%s10756_s16 + $0xd0] sm:$0xff]  ;;  %v6523_v54 = vmax.f32 %v6154_v21, 0.0  ;;  %v6526_v19 = vmax.f32 %v6241_v32, 0.0 }
 0x937   : > { %7712 = vmatpush.bf16.msrb.mxu1 %v9779_v13  ;;  %7799 = vmatpush.bf16.msrb.mxu0 %v9803_v10 }
 0x938   : > { %v6182_v56 = vpop.f32.mrf.mxu2  ;;  %7742 = vmatpush.bf16.msrb.mxu2 %v9786_v29 }
 0x939   : > { %v6211_v30 = vpop.f32.mrf.mxu3  ;;  %v6183_v15 = vadd.f32 %v6182_v56, %v13208_v63 }
 0x93a   : > { %v6155_v59 = vpop.f32.mrf.mxu1 }
 0x93b   : > { %v6156_v37 = vadd.f32 %v6155_v59, %v13185_v5  ;;  %v6242_v47 = vpop.f32.mrf.mxu0  ;;  %v6212_v59 = vadd.f32 %v6211_v30, %v13212_v9  ;;  %7713 = vmatpush.bf16.msrb.mxu1 %v9778_v38  ;;  %7800 = vmatpush.bf16.msrb.mxu0 %v9802_v50  ;;  %v6524_v13 = vmax.f32 %v6183_v15, 0.0  ;;  %v9785_v30 = vld [vmem:[%s10756_s16 + $0x40] sm:$0xff] }
 0x93c   : > { %v6243_v48 = vadd.f32 %v6242_v47, %v13194_v52  ;;  %7743 = vmatpush.bf16.msrb.mxu2 %v9785_v30 }
 0x93d   : > { %v6539_v44 = vmax.f32 %v6156_v37, 0.0 }
 0x93e   : > { %v6542_v6 = vmax.f32 %v6243_v48, 0.0 }
 0x93f   : > { %v13254_v11 = vpack.c.bf16 %v6539_v44, %v6523_v54  ;;  %v9777_v54 = vld [vmem:[%s10756_s16] sm:$0xff]  ;;  %v6525_v44 = vmax.f32 %v6212_v59, 0.0  ;;  %7801 = vmatpush.bf16.msrb.mxu0 %v9801_v22  ;;  %v9832_v22 = vld [vmem:[%s10756_s16 + $0x1b8] sm:$0xff] }
 0x940   : > { %v6184_v18 = vpop.f32.mrf.mxu2  ;;  %v13257_v21 = vpack.c.bf16 %v6542_v6, %v6526_v19  ;;  %7714 = vmatpush.bf16.msrb.mxu1 %v9777_v54  ;;  %7881 = vmatpush.bf16.msra.mxu3 %v9832_v22 }
 0x941   : > { %v6185_v32 = vadd.f32 %v6184_v18, %v13208_v63  ;;  %v6213_v37 = vpop.f32.mrf.mxu3 }
 0x942   : > { %v6214_v56 = vadd.f32 %v6213_v37, %v13212_v9  ;;  %v6158_v47 = vpop.f32.mrf.mxu1 }
 0x943   : > { %v6540_v10 = vmax.f32 %v6185_v32, 0.0  ;;  %v6245_v48 = vpop.f32.mrf.mxu0  ;;  %v6159_v6 = vadd.f32 %v6158_v47, %v13185_v5 }
 0x944   : > { %v6541_v29 = vmax.f32 %v6214_v56, 0.0  ;;  %v6246_v15 = vadd.f32 %v6245_v48, %v13194_v52 }
 0x945   : > { %9166 = vmatmul.msk.bf16.gmra.mxu1 %vm733_vm1, %v12919_v14  ;;  %9170 = vmatmul.msk.bf16.gmra.mxu2 %vm733_vm1, %v12919_v14  ;;  %v13269_v18 = vpack.c.bf16 %v6540_v10, %v6524_v13  ;;  %v6555_v56 = vmax.f32 %v6159_v6, 0.0 }
 0x946   : > { %9174 = vmatmul.msk.bf16.gmra.mxu3 %vm733_vm1, %v12919_v14  ;;  %9178 = vmatmul.msk.bf16.gmra.mxu0 %vm733_vm1, %v12919_v14  ;;  %v13275_v50 = vpack.c.bf16 %v6541_v29, %v6525_v44  ;;  %v6558_v10 = vmax.f32 %v6246_v15, 0.0  ;;  %v9824_v29 = vld [vmem:[%s10756_s16 + $0x178] sm:$0xff] }
 0x947   : > { %7852 = vmatpush.bf16.msra.mxu2 %v9824_v29 }
 0x948   : > { %v6187_v19 = vpop.f32.mrf.mxu2 }
 0x949   : > { %v6216_v38 = vpop.f32.mrf.mxu3  ;;  %v6188_v31 = vadd.f32 %v6187_v19, %v13208_v63 }
 0x94a   : > { %v6160_v59 = vpop.f32.mrf.mxu1  ;;  %v6217_v47 = vadd.f32 %v6216_v38, %v13212_v9 }
 0x94b   : > { %v6161_v32 = vadd.f32 %v6160_v59, %v13185_v5  ;;  %v6247_v37 = vpop.f32.mrf.mxu0  ;;  %v6556_v19 = vmax.f32 %v6188_v31, 0.0  ;;  %v9840_v31 = vld [vmem:[%s10756_s16 + $0x1f8] sm:$0xff] }
 0x94c   : > { %v6248_v14 = vadd.f32 %v6247_v37, %v13194_v52  ;;  %v6557_v37 = vmax.f32 %v6217_v47, 0.0  ;;  %7910 = vmatpush.bf16.msra.mxu0 %v9840_v31 }
 0x94d   : > { %v6571_v13 = vmax.f32 %v6161_v32, 0.0 }
 0x94e   : > { %v6574_v54 = vmax.f32 %v6248_v14, 0.0 }
 0x94f   : > { %v13282_v30 = vpack.c.bf16 %v6571_v13, %v6555_v56  ;;  %v9823_v13 = vld [vmem:[%s10756_s16 + $0x170] sm:$0xff] }
 0x950   : > { %v6189_v44 = vpop.f32.mrf.mxu2  ;;  %v13287_v48 = vpack.c.bf16 %v6574_v54, %v6558_v10  ;;  %v9831_v10 = vld [vmem:[%s10756_s16 + $0x1b0] sm:$0xff]  ;;  %7853 = vmatpush.bf16.msra.mxu2 %v9823_v13  ;;  %v6120_v13 = vadd.f32 %v13048_v33, %v13165_v26 }
 0x951   : > { %v6190_v59 = vadd.f32 %v6189_v44, %v13208_v63  ;;  %v6218_v46 = vpop.f32.mrf.mxu3  ;;  %7882 = vmatpush.bf16.msra.mxu3 %v9831_v10 }
 0x952   : > { %14111 = vst [vmem:[#allocation17_spill] sm:$0xff] %v13287_v48  ;;  %v6219_v6 = vadd.f32 %v6218_v46, %v13212_v9  ;;  %v6163_v15 = vpop.f32.mrf.mxu1  ;;  %v9816_v46 = vld [vmem:[%s10756_s16 + $0x138] sm:$0xff] }
 0x953   : > { %v6572_v32 = vmax.f32 %v6190_v59, 0.0  ;;  %v6250_v38 = vpop.f32.mrf.mxu0  ;;  %7823 = vmatpush.bf16.msra.mxu1 %v9816_v46  ;;  %v6164_v44 = vadd.f32 %v6163_v15, %v13185_v5  ;;  %v6122_v15 = vadd.f32 %v13070_v12, %v13165_v26  ;;  %v6091_v12 = vadd.f32 %v13042_v17, %v13121_v36 }
 0x954   : > { %v6573_v14 = vmax.f32 %v6219_v6, 0.0  ;;  %v6251_v22 = vadd.f32 %v6250_v38, %v13194_v52  ;;  %v6064_v6 = vadd.f32 %v13052_v58, %v13116_v8  ;;  %v6062_v58 = vadd.f32 %v13040_v60, %v13116_v8 }
 0x955   : > { %9167 = vmatmul.msk.bf16.gmra.mxu1 %vm733_vm1, %v12964_v53  ;;  %9171 = vmatmul.msk.bf16.gmra.mxu2 %vm733_vm1, %v12964_v53  ;;  %v13295_v56 = vpack.c.bf16 %v6572_v32, %v6556_v19  ;;  %v6587_v46 = vmax.f32 %v6164_v44, 0.0  ;;  %v6506_v60 = vmax.f32 %v6122_v15, 0.0  ;;  %v13340_v15 = vld [vmem:[%s10750_s26 + $0x8] sm:$0xff] }
 0x956   : > { %9175 = vmatmul.msk.bf16.gmra.mxu3 %vm733_vm1, %v12964_v53  ;;  %9179 = vmatmul.msk.bf16.gmra.mxu0 %vm733_vm1, %v12964_v53  ;;  %v13304_v54 = vpack.c.bf16 %v6573_v14, %v6557_v37  ;;  %v6035_v53 = vadd.f32 %v13064_v24, %v13161_v57  ;;  %v6093_v37 = vadd.f32 %v13057_v3, %v13121_v36  ;;  %v9815_v14 = vld [vmem:[%s10756_s16 + $0x130] sm:$0xff]  ;;  %v6590_v10 = vmax.f32 %v6251_v22, 0.0  ;;  %v9822_v3 = vld [vmem:[%s10756_s16 + $0x168] sm:$0xff] }
 0x957   : > { %v6033_v24 = vadd.f32 %v13046_v25, %v13161_v57  ;;  %7824 = vmatpush.bf16.msra.mxu1 %v9815_v14  ;;  %v6504_v20 = vmax.f32 %v6064_v6, 0.0  ;;  %7854 = vmatpush.bf16.msra.mxu2 %v9822_v3  ;;  %v6489_v6 = vmax.f32 %v6091_v12, 0.0  ;;  %v9821_v12 = vld [vmem:[%s10756_s16 + $0x160] sm:$0xff] }
 0x958   : > { %v6192_v47 = vpop.f32.mrf.mxu2  ;;  %v6505_v44 = vmax.f32 %v6093_v37, 0.0 }
 0x959   : > { %v6221_v29 = vpop.f32.mrf.mxu3  ;;  %v6193_v25 = vadd.f32 %v6192_v47, %v13208_v63  ;;  %v6487_v22 = vmax.f32 %v6033_v24, 0.0  ;;  %v6490_v47 = vmax.f32 %v6120_v13, 0.0  ;;  %v13344_v13 = vperm.slane %v13340_v15, 0 }
 0x95a   : > { %v6165_v59 = vpop.f32.mrf.mxu1  ;;  %v6222_v33 = vadd.f32 %v6221_v29, %v13212_v9 }
 0x95b   : > { %v6166_v19 = vadd.f32 %v6165_v59, %v13185_v5  ;;  %v6252_v32 = vpop.f32.mrf.mxu0  ;;  %v9839_v59 = vld [vmem:[%s10756_s16 + $0x1f0] sm:$0xff]  ;;  %v6588_v3 = vmax.f32 %v6193_v25, 0.0  ;;  %v9838_v25 = vld [vmem:[%s10756_s16 + $0x1e8] sm:$0xff]  ;;  %7855 = vmatpush.bf16.msra.mxu2 %v9821_v12  ;;  %v9837_v12 = vld [vmem:[%s10756_s16 + $0x1e0] sm:$0xff] }
 0x95c   : > { %v6253_v38 = vadd.f32 %v6252_v32, %v13194_v52  ;;  %v9830_v52 = vld [vmem:[%s10756_s16 + $0x1a8] sm:$0xff]  ;;  %v6503_v32 = vmax.f32 %v6035_v53, 0.0  ;;  %7911 = vmatpush.bf16.msra.mxu0 %v9839_v59 }
 0x95d   : > { %v6603_v5 = vmax.f32 %v6166_v19, 0.0  ;;  %7883 = vmatpush.bf16.msra.mxu3 %v9830_v52  ;;  %v9814_v59 = vld [vmem:[%s10756_s16 + $0x128] sm:$0xff] }
 0x95e   : > { %v6606_v31 = vmax.f32 %v6253_v38, 0.0  ;;  %v6488_v38 = vmax.f32 %v6062_v58, 0.0  ;;  %v6615_v29 = vpack.c.bf16 %v6503_v32, %v6487_v22  ;;  %v6618_v58 = vpack.c.bf16 %v6506_v60, %v6490_v47  ;;  %v9829_v32 = vld [vmem:[%s10756_s16 + $0x1a0] sm:$0xff]  ;;  %7825 = vmatpush.bf16.msra.mxu1 %v9814_v59  ;;  %v9828_v59 = vld [vmem:[%s10756_s16 + $0x198] sm:$0xff] }
 0x95f   : > { %v13332_v48 = vpack.c.bf16 %v6603_v5, %v6587_v46  ;;  %v13363_v47 = vperm.slane %v13340_v15, 1 }
 0x960   : > { %v6194_v19 = vpop.f32.mrf.mxu2  ;;  %v13335_v17 = vpack.c.bf16 %v6606_v31, %v6590_v10  ;;  %v6616_v5 = vpack.c.bf16 %v6504_v20, %v6488_v38  ;;  %v6589_v31 = vmax.f32 %v6222_v33, 0.0  ;;  %v13349_v20 = vperm.slane %v13340_v15, 3  ;;  %7912 = vmatpush.bf16.msra.mxu0 %v9838_v25 }
 0x961   : > { %v6195_v14 = vadd.f32 %v6194_v19, %v13208_v63  ;;  %v6223_v53 = vpop.f32.mrf.mxu3  ;;  %v6617_v63 = vpack.c.bf16 %v6505_v44, %v6489_v6  ;;  %7884 = vmatpush.bf16.msra.mxu3 %v9829_v32 }
 0x962   : > { %v6224_v46 = vadd.f32 %v6223_v53, %v13212_v9  ;;  %v6264_v37 = vpop.f32.mrf.mxu1  ;;  %v6069_v53 = vadd.f32 %v13088_v43, %v13116_v8 }
 0x963   : > { %v6604_v10 = vmax.f32 %v6195_v14, 0.0  ;;  %v6351_v24 = vpop.f32.mrf.mxu0  ;;  %v6265_v33 = vadd.f32 %v6264_v37, %v13344_v13  ;;  %v6040_v14 = vadd.f32 %v13102_v23, %v13161_v57  ;;  %v6127_v37 = vadd.f32 %v13104_v4, %v13165_v26 }
 0x964   : > { %v6605_v52 = vmax.f32 %v6224_v46, 0.0  ;;  %v6352_v22 = vadd.f32 %v6351_v24, %v13349_v20  ;;  %v13371_v23 = vperm.slane %v13340_v15, 2  ;;  %v6125_v4 = vadd.f32 %v13086_v42, %v13165_v26  ;;  %7913 = vmatpush.bf16.msra.mxu0 %v9837_v12  ;;  %v9836_v12 = vld [vmem:[%s10756_s16 + $0x1d8] sm:$0xff] }
 0x965   : > { %7715 = vmatmul.bf16.vlgmr.msrb.gmra.mxu1 %v6615_v29  ;;  %7744 = vmatmul.bf16.vlgmr.msrb.gmra.mxu2 %v6616_v5  ;;  %v13346_v9 = vpack.c.bf16 %v6604_v10, %v6588_v3  ;;  %v6098_v29 = vadd.f32 %v13090_v1, %v13121_v36  ;;  %v9813_v5 = vld [vmem:[%s10756_s16 + $0x120] sm:$0xff]  ;;  %v6038_v3 = vadd.f32 %v13084_v28, %v13161_v57  ;;  %v6495_v24 = vmax.f32 %v6265_v33, 0.0 }
 0x966   : > { %7773 = vmatmul.bf16.vlgmr.msrb.gmra.mxu3 %v6617_v63  ;;  %7802 = vmatmul.bf16.vlgmr.msrb.gmra.mxu0 %v6618_v58  ;;  %v13354_v60 = vpack.c.bf16 %v6605_v52, %v6589_v31  ;;  %v6067_v10 = vadd.f32 %v13078_v61, %v13116_v8  ;;  %v6096_v1 = vadd.f32 %v13082_v35, %v13121_v36  ;;  %v6498_v63 = vmax.f32 %v6352_v22, 0.0  ;;  %v9820_v52 = vld [vmem:[%s10756_s16 + $0x158] sm:$0xff] }
 0x967   : > { %7826 = vmatpush.bf16.msra.mxu1 %v9813_v5  ;;  %v6535_v32 = vmax.f32 %v6040_v14, 0.0  ;;  %v6536_v25 = vmax.f32 %v6069_v53, 0.0  ;;  %v6538_v61 = vmax.f32 %v6127_v37, 0.0  ;;  %v6537_v8 = vmax.f32 %v6098_v29, 0.0  ;;  %7856 = vmatpush.bf16.msra.mxu2 %v9820_v52 }
 0x968   : > { %v6293_v44 = vpop.f32.mrf.mxu2  ;;  %7885 = vmatpush.bf16.msra.mxu3 %v9828_v59  ;;  %v6519_v35 = vmax.f32 %v6038_v3, 0.0  ;;  %v6520_v36 = vmax.f32 %v6067_v10, 0.0  ;;  %v6522_v53 = vmax.f32 %v6125_v4, 0.0  ;;  %v9827_v59 = vld [vmem:[%s10756_s16 + $0x190] sm:$0xff]  ;;  %7914 = vmatpush.bf16.msra.mxu0 %v9836_v12 }
 0x969   : > { %v6322_v19 = vpop.f32.mrf.mxu3  ;;  %v6294_v28 = vadd.f32 %v6293_v44, %v13363_v47  ;;  %v6521_v44 = vmax.f32 %v6096_v1, 0.0  ;;  %v9819_v1 = vld [vmem:[%s10756_s16 + $0x150] sm:$0xff] }
 0x96a   : > { %v6266_v38 = vpop.f32.mrf.mxu1  ;;  %v6323_v33 = vadd.f32 %v6322_v19, %v13371_v23  ;;  %v6631_v5 = vpack.c.bf16 %v6535_v32, %v6519_v35 }
 0x96b   : > { %v6267_v6 = vadd.f32 %v6266_v38, %v13344_v13  ;;  %v6353_v46 = vpop.f32.mrf.mxu0  ;;  %v6496_v29 = vmax.f32 %v6294_v28, 0.0  ;;  %7857 = vmatpush.bf16.msra.mxu2 %v9819_v1 }
 0x96c   : > { %v6354_v43 = vadd.f32 %v6353_v46, %v13349_v20  ;;  %v6497_v3 = vmax.f32 %v6323_v33, 0.0  ;;  %7886 = vmatpush.bf16.msra.mxu3 %v9827_v59  ;;  %v6045_v33 = vadd.f32 %v13141_v2, %v13161_v57  ;;  %v6130_v2 = vadd.f32 %v13118_v41, %v13165_v26 }
 0x96d   : > { %v6511_v58 = vmax.f32 %v6267_v6, 0.0 }
 0x96e   : > { %v6514_v31 = vmax.f32 %v6354_v43, 0.0  ;;  %v6554_v59 = vmax.f32 %v6130_v2, 0.0 }
 0x96f   : > { %v13387_v38 = vpack.c.bf16 %v6511_v58, %v6495_v24  ;;  %v6632_v24 = vpack.c.bf16 %v6536_v25, %v6520_v36  ;;  %v6633_v58 = vpack.c.bf16 %v6537_v8, %v6521_v44  ;;  %v9811_v36 = vld [vmem:[%s10756_s16 + $0x110] sm:$0xff]  ;;  %v6043_v44 = vadd.f32 %v13113_v45, %v13161_v57 }
 0x970   : > { %v13390_v42 = vpack.c.bf16 %v6514_v31, %v6498_v63  ;;  %v6295_v6 = vpop.f32.mrf.mxu2  ;;  %v6634_v63 = vpack.c.bf16 %v6538_v61, %v6522_v53  ;;  %v9812_v31 = vld [vmem:[%s10756_s16 + $0x118] sm:$0xff] }
 0x971   : > { %v6296_v22 = vadd.f32 %v6295_v6, %v13363_v47  ;;  %v6324_v14 = vpop.f32.mrf.mxu3  ;;  %7827 = vmatpush.bf16.msra.mxu1 %v9812_v31 }
 0x972   : > { %v6325_v46 = vadd.f32 %v6324_v14, %v13371_v23  ;;  %v6269_v37 = vpop.f32.mrf.mxu1  ;;  %v6132_v14 = vadd.f32 %v13145_v62, %v13165_v26  ;;  %v6551_v26 = vmax.f32 %v6043_v44, 0.0 }
 0x973   : > { %v6512_v19 = vmax.f32 %v6296_v22, 0.0  ;;  %v6356_v43 = vpop.f32.mrf.mxu0  ;;  %v6270_v25 = vadd.f32 %v6269_v37, %v13344_v13  ;;  %v9835_v22 = vld [vmem:[%s10756_s16 + $0x1d0] sm:$0xff] }
 0x974   : > { %v6513_v10 = vmax.f32 %v6325_v46, 0.0  ;;  %v6357_v61 = vadd.f32 %v6356_v43, %v13349_v20  ;;  %7915 = vmatpush.bf16.msra.mxu0 %v9835_v22  ;;  %v9818_v43 = vld [vmem:[%s10756_s16 + $0x148] sm:$0xff] }
 0x975   : > { %v13395_v52 = vpack.c.bf16 %v6512_v19, %v6496_v29  ;;  %7720 = vmatmul.bf16.gmra.mxu1 %v6631_v5  ;;  %7749 = vmatmul.bf16.gmra.mxu2 %v6632_v24  ;;  %v6527_v46 = vmax.f32 %v6270_v25, 0.0  ;;  %v9810_v5 = vld [vmem:[%s10756_s16 + $0x108] sm:$0xff] }
 0x976   : > { %v13397_v4 = vpack.c.bf16 %v6513_v10, %v6497_v3  ;;  %7778 = vmatmul.bf16.gmra.mxu3 %v6633_v58  ;;  %7807 = vmatmul.bf16.gmra.mxu0 %v6634_v63  ;;  %v6530_v29 = vmax.f32 %v6357_v61, 0.0  ;;  %v9826_v24 = vld [vmem:[%s10756_s16 + $0x188] sm:$0xff]  ;;  %v6567_v3 = vmax.f32 %v6045_v33, 0.0  ;;  %v6570_v63 = vmax.f32 %v6132_v14, 0.0  ;;  %v9809_v33 = vld [vmem:[%s10756_s16 + $0x100] sm:$0xff] }
 0x977   : > { %7828 = vmatpush.bf16.msra.mxu1 %v9811_v36  ;;  %v9834_v10 = vld [vmem:[%s10756_s16 + $0x1c8] sm:$0xff]  ;;  %7858 = vmatpush.bf16.msra.mxu2 %v9818_v43  ;;  %v9825_v14 = vld [vmem:[%s10756_s16 + $0x180] sm:$0xff] }
 0x978   : > { %v6298_v32 = vpop.f32.mrf.mxu2  ;;  %7887 = vmatpush.bf16.msra.mxu3 %v9826_v24  ;;  %7916 = vmatpush.bf16.msra.mxu0 %v9834_v10  ;;  %v6650_v22 = vpack.c.bf16 %v6570_v63, %v6554_v59 }
 0x979   : > { %v6327_v28 = vpop.f32.mrf.mxu3  ;;  %v6299_v62 = vadd.f32 %v6298_v32, %v13363_v47 }
 0x97a   : > { %v6271_v8 = vpop.f32.mrf.mxu1  ;;  %v6328_v45 = vadd.f32 %v6327_v28, %v13371_v23 }
 0x97b   : > { %v6272_v6 = vadd.f32 %v6271_v8, %v13344_v13  ;;  %v6358_v35 = vpop.f32.mrf.mxu0  ;;  %7829 = vmatpush.bf16.msra.mxu1 %v9810_v5  ;;  %v6528_v25 = vmax.f32 %v6299_v62, 0.0  ;;  %v6647_v8 = vpack.c.bf16 %v6567_v3, %v6551_v26 }
 0x97c   : > { %v6359_v53 = vadd.f32 %v6358_v35, %v13349_v20  ;;  %v6529_v35 = vmax.f32 %v6328_v45, 0.0  ;;  %7888 = vmatpush.bf16.msra.mxu3 %v9825_v14  ;;  %v9855_v14 = vld [vmem:[%s10756_s16 + $0x270] sm:$0xff] }
 0x97d   : > { %v6543_v37 = vmax.f32 %v6272_v6, 0.0  ;;  %v9817_v6 = vld [vmem:[%s10756_s16 + $0x140] sm:$0xff] }
 0x97e   : > { %v6546_v19 = vmax.f32 %v6359_v53, 0.0  ;;  %v9833_v53 = vld [vmem:[%s10756_s16 + $0x1c0] sm:$0xff]  ;;  %7859 = vmatpush.bf16.msra.mxu2 %v9817_v6 }
 0x97f   : > { %v13421_v58 = vpack.c.bf16 %v6543_v37, %v6527_v46  ;;  %7830 = vmatpush.bf16.msra.mxu1 %v9809_v33  ;;  %7917 = vmatpush.bf16.msra.mxu0 %v9833_v53  ;;  %v9863_v53 = vld [vmem:[%s10756_s16 + $0x2b0] sm:$0xff] }
 0x980   : > { %v6300_v57 = vpop.f32.mrf.mxu2  ;;  %v13424_v41 = vpack.c.bf16 %v6546_v19, %v6530_v29 }
 0x981   : > { %v6301_v31 = vadd.f32 %v6300_v57, %v13363_v47  ;;  %v6329_v1 = vpop.f32.mrf.mxu3 }
 0x982   : > { %v6330_v12 = vadd.f32 %v6329_v1, %v13371_v23  ;;  %v6274_v32 = vpop.f32.mrf.mxu1  ;;  %v9864_v1 = vld [vmem:[%s10756_s16 + $0x2b8] sm:$0xff] }
 0x983   : > { %v6544_v28 = vmax.f32 %v6301_v31, 0.0  ;;  %v6361_v61 = vpop.f32.mrf.mxu0  ;;  %v6275_v2 = vadd.f32 %v6274_v32, %v13344_v13  ;;  %v9856_v31 = vld [vmem:[%s10756_s16 + $0x278] sm:$0xff]  ;;  %7997 = vmatpush.bf16.msrb.mxu3 %v9864_v1 }
 0x984   : > { %v6545_v36 = vmax.f32 %v6330_v12, 0.0  ;;  %v6362_v19 = vadd.f32 %v6361_v61, %v13349_v20  ;;  %7968 = vmatpush.bf16.msrb.mxu2 %v9856_v31 }
 0x985   : > { %7725 = vmatmul.bf16.gmra.mxu1 %v6647_v8  ;;  %7754 = vmatmul.bf16.gmra.mxu2 %v13139_v0  ;;  %v13433_v44 = vpack.c.bf16 %v6544_v28, %v6528_v25  ;;  %v6559_v24 = vmax.f32 %v6275_v2, 0.0  ;;  %v9872_v2 = vld [vmem:[%s10756_s16 + $0x2f8] sm:$0xff] }
 0x986   : > { %7783 = vmatmul.bf16.gmra.mxu3 %v13143_v55  ;;  %7812 = vmatmul.bf16.gmra.mxu0 %v6650_v22  ;;  %v13436_v46 = vpack.c.bf16 %v6545_v36, %v6529_v35  ;;  %v6562_v62 = vmax.f32 %v6362_v19, 0.0  ;;  %v9848_v22 = vld [vmem:[%s10756_s16 + $0x238] sm:$0xff] }
 0x987   : > { %7939 = vmatpush.bf16.msrb.mxu1 %v9848_v22  ;;  %7998 = vmatpush.bf16.msrb.mxu3 %v9863_v53  ;;  %v9846_v22 = vld [vmem:[%s10756_s16 + $0x228] sm:$0xff]  ;;  %v9853_v53 = vld [vmem:[%s10756_s16 + $0x260] sm:$0xff] }
 0x988   : > { %v6303_v37 = vpop.f32.mrf.mxu2  ;;  %7969 = vmatpush.bf16.msrb.mxu2 %v9855_v14  ;;  %8026 = vmatpush.bf16.msrb.mxu0 %v9872_v2  ;;  %v13482_v14 = vperm.slane %v13340_v15, 4  ;;  %v9861_v2 = vld [vmem:[%s10756_s16 + $0x2a0] sm:$0xff] }
 0x989   : > { %v6332_v29 = vpop.f32.mrf.mxu3  ;;  %v6304_v63 = vadd.f32 %v6303_v37, %v13363_v47 }
 0x98a   : > { %v6276_v0 = vpop.f32.mrf.mxu1  ;;  %v6333_v57 = vadd.f32 %v6332_v29, %v13371_v23 }
 0x98b   : > { %v6277_v43 = vadd.f32 %v6276_v0, %v13344_v13  ;;  %v6363_v5 = vpop.f32.mrf.mxu0  ;;  %v6560_v61 = vmax.f32 %v6304_v63, 0.0  ;;  %v9862_v63 = vld [vmem:[%s10756_s16 + $0x2a8] sm:$0xff] }
 0x98c   : > { %v6364_v55 = vadd.f32 %v6363_v5, %v13349_v20  ;;  %v6561_v6 = vmax.f32 %v6333_v57, 0.0  ;;  %v9847_v5 = vld [vmem:[%s10756_s16 + $0x230] sm:$0xff]  ;;  %7999 = vmatpush.bf16.msrb.mxu3 %v9862_v63  ;;  %v9860_v63 = vld [vmem:[%s10756_s16 + $0x298] sm:$0xff] }
 0x98d   : > { %v6575_v3 = vmax.f32 %v6277_v43, 0.0  ;;  %7940 = vmatpush.bf16.msrb.mxu1 %v9847_v5  ;;  %v9871_v57 = vld [vmem:[%s10756_s16 + $0x2f0] sm:$0xff]  ;;  %v9845_v5 = vld [vmem:[%s10756_s16 + $0x220] sm:$0xff] }
 0x98e   : > { %v6578_v10 = vmax.f32 %v6364_v55, 0.0  ;;  %8027 = vmatpush.bf16.msrb.mxu0 %v9871_v57  ;;  %v9869_v57 = vld [vmem:[%s10756_s16 + $0x2e0] sm:$0xff] }
 0x98f   : > { %v13443_v45 = vpack.c.bf16 %v6575_v3, %v6559_v24 }
 0x990   : > { %v6305_v26 = vpop.f32.mrf.mxu2  ;;  %v13448_v59 = vpack.c.bf16 %v6578_v10, %v6562_v62  ;;  %v9854_v10 = vld [vmem:[%s10756_s16 + $0x268] sm:$0xff]  ;;  %8000 = vmatpush.bf16.msrb.mxu3 %v9861_v2 }
 0x991   : > { %v6306_v12 = vadd.f32 %v6305_v26, %v13363_v47  ;;  %v6334_v32 = vpop.f32.mrf.mxu3  ;;  %7970 = vmatpush.bf16.msrb.mxu2 %v9854_v10  ;;  %7941 = vmatpush.bf16.msrb.mxu1 %v9846_v22  ;;  %v9852_v10 = vld [vmem:[%s10756_s16 + $0x258] sm:$0xff] }
 0x992   : > { %v6335_v25 = vadd.f32 %v6334_v32, %v13371_v23  ;;  %v6279_v28 = vpop.f32.mrf.mxu1 }
 0x993   : > { %v6576_v8 = vmax.f32 %v6306_v12, 0.0  ;;  %v6366_v33 = vpop.f32.mrf.mxu0 }
 0x994   : > { %v6577_v35 = vmax.f32 %v6335_v25, 0.0  ;;  %8001 = vmatpush.bf16.msrb.mxu3 %v9860_v63  ;;  %v9842_v63 = vld [vmem:[%s10756_s16 + $0x208] sm:$0xff] }
 0x995   : > { %7730 = vmatmul.bf16.gmra.mxu1 %v13176_v39  ;;  %7759 = vmatmul.bf16.gmra.mxu2 %v13191_v40  ;;  %v13454_v36 = vpack.c.bf16 %v6576_v8, %v6560_v61  ;;  %v6280_v39 = vadd.f32 %v6279_v28, %v13344_v13 }
 0x996   : > { %7788 = vmatmul.bf16.gmra.mxu3 %v13203_v51  ;;  %7817 = vmatmul.bf16.gmra.mxu0 %v13179_v7  ;;  %v13461_v37 = vpack.c.bf16 %v6577_v35, %v6561_v6  ;;  %v6367_v7 = vadd.f32 %v6366_v33, %v13349_v20 }
 0x997   : > { %v6591_v55 = vmax.f32 %v6280_v39, 0.0  ;;  %7971 = vmatpush.bf16.msrb.mxu2 %v9853_v53  ;;  %7942 = vmatpush.bf16.msrb.mxu1 %v9845_v5  ;;  %v9844_v53 = vld [vmem:[%s10756_s16 + $0x218] sm:$0xff] }
 0x998   : > { %v6308_v29 = vpop.f32.mrf.mxu2  ;;  %v6594_v3 = vmax.f32 %v6367_v7, 0.0  ;;  %v13501_v7 = vperm.slane %v13340_v15, 5 }
 0x999   : > { %v6337_v40 = vpop.f32.mrf.mxu3  ;;  %v6309_v26 = vadd.f32 %v6308_v29, %v13363_v47  ;;  %v9870_v29 = vld [vmem:[%s10756_s16 + $0x2e8] sm:$0xff] }
 0x99a   : > { %v6281_v51 = vpop.f32.mrf.mxu1  ;;  %v6338_v1 = vadd.f32 %v6337_v40, %v13371_v23  ;;  %8028 = vmatpush.bf16.msrb.mxu0 %v9870_v29 }
 0x99b   : > { %v6282_v19 = vadd.f32 %v6281_v51, %v13344_v13  ;;  %v6368_v0 = vpop.f32.mrf.mxu0  ;;  %v6592_v61 = vmax.f32 %v6309_v26, 0.0  ;;  %7972 = vmatpush.bf16.msrb.mxu2 %v9852_v10  ;;  %7943 = vmatpush.bf16.msrb.mxu1 %v9844_v53  ;;  %v9850_v10 = vld [vmem:[%s10756_s16 + $0x248] sm:$0xff] }
 0x99c   : > { %v6369_v43 = vadd.f32 %v6368_v0, %v13349_v20  ;;  %v6593_v6 = vmax.f32 %v6338_v1, 0.0  ;;  %v13505_v0 = vperm.slane %v13340_v15, 6 }
 0x99d   : > { %v6607_v24 = vmax.f32 %v6282_v19, 0.0 }
 0x99e   : > { %v6610_v62 = vmax.f32 %v6369_v43, 0.0  ;;  %8029 = vmatpush.bf16.msrb.mxu0 %v9869_v57  ;;  %v9858_v57 = vld [vmem:[%s10756_s16 + $0x288] sm:$0xff] }
 0x99f   : > { %v13473_v31 = vpack.c.bf16 %v6607_v24, %v6591_v55 }
 0x9a0   : > { %v6310_v13 = vpop.f32.mrf.mxu2  ;;  %v13476_v20 = vpack.c.bf16 %v6610_v62, %v6594_v3 }
 0x9a1   : > { %v6311_v12 = vadd.f32 %v6310_v13, %v13363_v47  ;;  %v6339_v32 = vpop.f32.mrf.mxu3 }
 0x9a2   : > { %v6340_v25 = vadd.f32 %v6339_v32, %v13371_v23  ;;  %v6380_v28 = vpop.f32.mrf.mxu1  ;;  %v13489_v23 = vperm.slane %v13340_v15, 7 }
 0x9a3   : > { %v6608_v8 = vmax.f32 %v6311_v12, 0.0  ;;  %v6467_v33 = vpop.f32.mrf.mxu0 }
 0x9a4   : > { %v6609_v35 = vmax.f32 %v6340_v25, 0.0 }
 0x9a5   : > { %7831 = vmatmul.bf16.vlgmr.msra.gmra.mxu1 %v13220_v49  ;;  %7860 = vmatmul.bf16.vlgmr.msra.gmra.mxu2 %v13228_v34  ;;  %v13486_v47 = vpack.c.bf16 %v6608_v8, %v6592_v61  ;;  %v6381_v49 = vadd.f32 %v6380_v28, %v13482_v14 }
 0x9a6   : > { %7889 = vmatmul.bf16.vlgmr.msra.gmra.mxu3 %v13234_v16  ;;  %7918 = vmatmul.bf16.vlgmr.msra.gmra.mxu0 %v13223_v27  ;;  %v13496_v39 = vpack.c.bf16 %v6609_v35, %v6593_v6  ;;  %v6468_v16 = vadd.f32 %v6467_v33, %v13489_v23 }
 0x9a7   : > { %v6499_v55 = vmax.f32 %v6381_v49, 0.0  ;;  %v9859_v49 = vld [vmem:[%s10756_s16 + $0x290] sm:$0xff] }
 0x9a8   : > { %v6409_v40 = vpop.f32.mrf.mxu2  ;;  %v6502_v3 = vmax.f32 %v6468_v16, 0.0  ;;  %8002 = vmatpush.bf16.msrb.mxu3 %v9859_v49  ;;  %v9849_v49 = vld [vmem:[%s10756_s16 + $0x240] sm:$0xff] }
 0x9a9   : > { %v6438_v34 = vpop.f32.mrf.mxu3  ;;  %v6410_v26 = vadd.f32 %v6409_v40, %v13501_v7  ;;  %v9851_v40 = vld [vmem:[%s10756_s16 + $0x250] sm:$0xff] }
 0x9aa   : > { %v6382_v27 = vpop.f32.mrf.mxu1  ;;  %v6439_v13 = vadd.f32 %v6438_v34, %v13505_v0  ;;  %v9868_v34 = vld [vmem:[%s10756_s16 + $0x2d8] sm:$0xff]  ;;  %7973 = vmatpush.bf16.msrb.mxu2 %v9851_v40  ;;  %v9841_v40 = vld [vmem:[%s10756_s16 + $0x200] sm:$0xff] }
 0x9ab   : > { %v6383_v51 = vadd.f32 %v6382_v27, %v13482_v14  ;;  %v6469_v19 = vpop.f32.mrf.mxu0  ;;  %v6500_v8 = vmax.f32 %v6410_v26, 0.0  ;;  %8030 = vmatpush.bf16.msrb.mxu0 %v9868_v34 }
 0x9ac   : > { %v6470_v43 = vadd.f32 %v6469_v19, %v13489_v23  ;;  %v6501_v35 = vmax.f32 %v6439_v13, 0.0  ;;  %v9843_v19 = vld [vmem:[%s10756_s16 + $0x210] sm:$0xff]  ;;  %v9866_v13 = vld [vmem:[%s10756_s16 + $0x2c8] sm:$0xff]  ;;  %8003 = vmatpush.bf16.msrb.mxu3 %v9858_v57 }
 0x9ad   : > { %v6515_v24 = vmax.f32 %v6383_v51, 0.0  ;;  %7944 = vmatpush.bf16.msrb.mxu1 %v9843_v19 }
 0x9ae   : > { %v6518_v62 = vmax.f32 %v6470_v43, 0.0  ;;  %v9867_v43 = vld [vmem:[%s10756_s16 + $0x2d0] sm:$0xff]  ;;  %7974 = vmatpush.bf16.msrb.mxu2 %v9850_v10 }
 0x9af   : > { %v13513_v1 = vpack.c.bf16 %v6515_v24, %v6499_v55  ;;  %8031 = vmatpush.bf16.msrb.mxu0 %v9867_v43 }
 0x9b0   : > { %v13516_v15 = vpack.c.bf16 %v6518_v62, %v6502_v3  ;;  %v6411_v12 = vpop.f32.mrf.mxu2 }
 0x9b1   : > { %v6412_v32 = vadd.f32 %v6411_v12, %v13501_v7  ;;  %v6440_v25 = vpop.f32.mrf.mxu3  ;;  %7945 = vmatpush.bf16.msrb.mxu1 %v9842_v63 }
 0x9b2   : > { %v6441_v28 = vadd.f32 %v6440_v25, %v13505_v0  ;;  %v6385_v61 = vpop.f32.mrf.mxu1  ;;  %7975 = vmatpush.bf16.msrb.mxu2 %v9849_v49  ;;  %v9880_v49 = vld [vmem:[%s10756_s16 + $0x338] sm:$0xff] }
 0x9b3   : > { %v6516_v33 = vmax.f32 %v6412_v32, 0.0  ;;  %v6472_v6 = vpop.f32.mrf.mxu0  ;;  %v6386_v27 = vadd.f32 %v6385_v61, %v13482_v14  ;;  %8032 = vmatpush.bf16.msrb.mxu0 %v9866_v13 }
 0x9b4   : > { %v6517_v22 = vmax.f32 %v6441_v28, 0.0 }
 0x9b5   : > { %v13521_v2 = vpack.c.bf16 %v6516_v33, %v6500_v8  ;;  %7836 = vmatmul.bf16.gmra.mxu1 %v13254_v11  ;;  %7865 = vmatmul.bf16.gmra.mxu2 %v13269_v18  ;;  %v6473_v18 = vadd.f32 %v6472_v6, %v13489_v23  ;;  %v6531_v55 = vmax.f32 %v6386_v27, 0.0  ;;  %v9857_v27 = vld [vmem:[%s10756_s16 + $0x280] sm:$0xff] }
 0x9b6   : > { %v13525_v29 = vpack.c.bf16 %v6517_v22, %v6501_v35  ;;  %7894 = vmatmul.bf16.gmra.mxu3 %v13275_v50  ;;  %7923 = vmatmul.bf16.gmra.mxu0 %v13257_v21 }
 0x9b7   : > { %v6534_v3 = vmax.f32 %v6473_v18, 0.0  ;;  %7946 = vmatpush.bf16.msrb.mxu1 %v9841_v40  ;;  %8004 = vmatpush.bf16.msrb.mxu3 %v9857_v27 }
 0x9b8   : > { %v6414_v16 = vpop.f32.mrf.mxu2 }
 0x9b9   : > { %v6443_v11 = vpop.f32.mrf.mxu3  ;;  %v6415_v26 = vadd.f32 %v6414_v16, %v13501_v7 }
 0x9ba   : > { %v6387_v50 = vpop.f32.mrf.mxu1  ;;  %v6444_v32 = vadd.f32 %v6443_v11, %v13505_v0  ;;  %v9865_v11 = vld [vmem:[%s10756_s16 + $0x2c0] sm:$0xff] }
 0x9bb   : > { %v6388_v21 = vadd.f32 %v6387_v50, %v13482_v14  ;;  %v6474_v51 = vpop.f32.mrf.mxu0  ;;  %v6532_v35 = vmax.f32 %v6415_v26, 0.0  ;;  %v14112_v50 = vld [vmem:[#allocation17_spill] sm:$0xff]  ;;  %8033 = vmatpush.bf16.msrb.mxu0 %v9865_v11  ;;  %8055 = vmatpush.bf16.msra.mxu1 %v9880_v49 }
 0x9bc   : > { %v6475_v5 = vadd.f32 %v6474_v51, %v13489_v23  ;;  %v6533_v34 = vmax.f32 %v6444_v32, 0.0 }
 0x9bd   : > { %v6547_v24 = vmax.f32 %v6388_v21, 0.0 }
 0x9be   : > { %v6550_v62 = vmax.f32 %v6475_v5, 0.0 }
 0x9bf   : > { %v13543_v12 = vpack.c.bf16 %v6547_v24, %v6531_v55  ;;  %v9888_v24 = vld [vmem:[%s10756_s16 + $0x378] sm:$0xff] }
 0x9c0   : > { %v6416_v25 = vpop.f32.mrf.mxu2  ;;  %v13546_v28 = vpack.c.bf16 %v6550_v62, %v6534_v3  ;;  %8084 = vmatpush.bf16.msra.mxu2 %v9888_v24  ;;  %v9894_v24 = vld [vmem:[%s10756_s16 + $0x3a8] sm:$0xff] }
 0x9c1   : > { %v6417_v61 = vadd.f32 %v6416_v25, %v13501_v7  ;;  %v6445_v8 = vpop.f32.mrf.mxu3 }
 0x9c2   : > { %v6446_v33 = vadd.f32 %v6445_v8, %v13505_v0  ;;  %v6390_v6 = vpop.f32.mrf.mxu1 }
 0x9c3   : > { %v6548_v22 = vmax.f32 %v6417_v61, 0.0  ;;  %v6477_v53 = vpop.f32.mrf.mxu0  ;;  %v6391_v19 = vadd.f32 %v6390_v6, %v13482_v14 }
 0x9c4   : > { %v6549_v16 = vmax.f32 %v6446_v33, 0.0 }
 0x9c5   : > { %7841 = vmatmul.bf16.gmra.mxu1 %v13282_v30  ;;  %7870 = vmatmul.bf16.gmra.mxu2 %v13295_v56  ;;  %v13556_v18 = vpack.c.bf16 %v6548_v22, %v6532_v35  ;;  %v6478_v56 = vadd.f32 %v6477_v53, %v13489_v23  ;;  %v6563_v62 = vmax.f32 %v6391_v19, 0.0 }
 0x9c6   : > { %7899 = vmatmul.bf16.gmra.mxu3 %v13304_v54  ;;  %7928 = vmatmul.bf16.gmra.mxu0 %v14112_v50  ;;  %v13560_v21 = vpack.c.bf16 %v6549_v16, %v6533_v34  ;;  %v9896_v54 = vld [vmem:[%s10756_s16 + $0x3b8] sm:$0xff]  ;;  %v9887_v34 = vld [vmem:[%s10756_s16 + $0x370] sm:$0xff] }
 0x9c7   : > { %8113 = vmatpush.bf16.msra.mxu3 %v9896_v54  ;;  %v6566_v63 = vmax.f32 %v6478_v56, 0.0  ;;  %v9895_v50 = vld [vmem:[%s10756_s16 + $0x3b0] sm:$0xff]  ;;  %8085 = vmatpush.bf16.msra.mxu2 %v9887_v34  ;;  %v9878_v34 = vld [vmem:[%s10756_s16 + $0x328] sm:$0xff] }
 0x9c8   : > { %v6419_v51 = vpop.f32.mrf.mxu2 }
 0x9c9   : > { %v6448_v30 = vpop.f32.mrf.mxu3  ;;  %v6420_v26 = vadd.f32 %v6419_v51, %v13501_v7  ;;  %v9904_v51 = vld [vmem:[%s10756_s16 + $0x3f8] sm:$0xff] }
 0x9ca   : > { %v6392_v43 = vpop.f32.mrf.mxu1  ;;  %v6449_v32 = vadd.f32 %v6448_v30, %v13505_v0  ;;  %8142 = vmatpush.bf16.msra.mxu0 %v9904_v51  ;;  %v9902_v51 = vld [vmem:[%s10756_s16 + $0x3e8] sm:$0xff] }
 0x9cb   : > { %v6393_v5 = vadd.f32 %v6392_v43, %v13482_v14  ;;  %v6479_v55 = vpop.f32.mrf.mxu0  ;;  %v6564_v22 = vmax.f32 %v6420_v26, 0.0  ;;  %8114 = vmatpush.bf16.msra.mxu3 %v9895_v50 }
 0x9cc   : > { %v6480_v3 = vadd.f32 %v6479_v55, %v13489_v23  ;;  %v6565_v16 = vmax.f32 %v6449_v32, 0.0  ;;  %v9886_v55 = vld [vmem:[%s10756_s16 + $0x368] sm:$0xff] }
 0x9cd   : > { %v6579_v10 = vmax.f32 %v6393_v5, 0.0  ;;  %v9879_v5 = vld [vmem:[%s10756_s16 + $0x330] sm:$0xff]  ;;  %8086 = vmatpush.bf16.msra.mxu2 %v9886_v55 }
 0x9ce   : > { %v6582_v57 = vmax.f32 %v6480_v3, 0.0  ;;  %v9903_v3 = vld [vmem:[%s10756_s16 + $0x3f0] sm:$0xff]  ;;  %8056 = vmatpush.bf16.msra.mxu1 %v9879_v5  ;;  %v9901_v5 = vld [vmem:[%s10756_s16 + $0x3e0] sm:$0xff] }
 0x9cf   : > { %v13569_v13 = vpack.c.bf16 %v6579_v10, %v6563_v62  ;;  %8115 = vmatpush.bf16.msra.mxu3 %v9894_v24  ;;  %8143 = vmatpush.bf16.msra.mxu0 %v9903_v3 }
 0x9d0   : > { %v6421_v25 = vpop.f32.mrf.mxu2  ;;  %v13572_v61 = vpack.c.bf16 %v6582_v57, %v6566_v63 }
 0x9d1   : > { %v6422_v8 = vadd.f32 %v6421_v25, %v13501_v7  ;;  %v6450_v33 = vpop.f32.mrf.mxu3 }
 0x9d2   : > { %v6451_v6 = vadd.f32 %v6450_v33, %v13505_v0  ;;  %v6395_v35 = vpop.f32.mrf.mxu1  ;;  %8057 = vmatpush.bf16.msra.mxu1 %v9878_v34  ;;  %v9882_v34 = vld [vmem:[%s10756_s16 + $0x348] sm:$0xff] }
 0x9d3   : > { %v6580_v53 = vmax.f32 %v6422_v8, 0.0  ;;  %v6482_v40 = vpop.f32.mrf.mxu0  ;;  %8144 = vmatpush.bf16.msra.mxu0 %v9902_v51 }
 0x9d4   : > { %v6581_v27 = vmax.f32 %v6451_v6, 0.0 }
 0x9d5   : > { %7846 = vmatmul.bf16.gmra.mxu1 %v13332_v48  ;;  %7875 = vmatmul.bf16.gmra.mxu2 %v13346_v9  ;;  %v13580_v11 = vpack.c.bf16 %v6580_v53, %v6564_v22  ;;  %v6396_v48 = vadd.f32 %v6395_v35, %v13482_v14 }
 0x9d6   : > { %7904 = vmatmul.bf16.gmra.mxu3 %v13354_v60  ;;  %7933 = vmatmul.bf16.gmra.mxu0 %v13335_v17  ;;  %v13586_v19 = vpack.c.bf16 %v6581_v27, %v6565_v16  ;;  %v6483_v60 = vadd.f32 %v6482_v40, %v13489_v23  ;;  %v13609_v40 = vld [vmem:[%s637_s19] ss:$0 sm:$0xff] }
 0x9d7   : > { %v6595_v62 = vmax.f32 %v6396_v48, 0.0  ;;  %v9885_v16 = vld [vmem:[%s10756_s16 + $0x360] sm:$0xff]  ;;  %8145 = vmatpush.bf16.msra.mxu0 %v9901_v5 }
 0x9d8   : > { %v6424_v30 = vpop.f32.mrf.mxu2  ;;  %v6598_v63 = vmax.f32 %v6483_v60, 0.0  ;;  %8087 = vmatpush.bf16.msra.mxu2 %v9885_v16  ;;  %v9890_v16 = vld [vmem:[%s10756_s16 + $0x388] sm:$0xff] }
 0x9d9   : > { %v6453_v9 = vpop.f32.mrf.mxu3 }
 0x9da   : > { %v6397_v56 = vpop.f32.mrf.mxu1  ;;  %v6454_v32 = vadd.f32 %v6453_v9, %v13505_v0 }
 0x9db   : > { %v6398_v17 = vadd.f32 %v6397_v56, %v13482_v14  ;;  %v6484_v43 = vpop.f32.mrf.mxu0  ;;  %v6425_v14 = vadd.f32 %v6424_v30, %v13501_v7 }
 0x9dc   : > { %v6485_v54 = vadd.f32 %v6484_v43, %v13489_v23  ;;  %v6597_v27 = vmax.f32 %v6454_v32, 0.0  ;;  %v9892_v43 = vld [vmem:[%s10756_s16 + $0x398] sm:$0xff]  ;;  %v9883_v32 = vld [vmem:[%s10756_s16 + $0x350] sm:$0xff] }
 0x9dd   : > { %v6611_v10 = vmax.f32 %v6398_v17, 0.0  ;;  %v6596_v22 = vmax.f32 %v6425_v14, 0.0  ;;  %v9884_v17 = vld [vmem:[%s10756_s16 + $0x358] sm:$0xff] }
 0x9de   : > { %v6614_v57 = vmax.f32 %v6485_v54, 0.0  ;;  %8088 = vmatpush.bf16.msra.mxu2 %v9884_v17  ;;  %v9876_v14 = vld [vmem:[%s10756_s16 + $0x318] sm:$0xff]  ;;  %v9889_v17 = vld [vmem:[%s10756_s16 + $0x380] sm:$0xff] }
 0x9df   : > { %v13597_v26 = vpack.c.bf16 %v6611_v10, %v6595_v62 }
 0x9e0   : > { %v6426_v25 = vpop.f32.mrf.mxu2  ;;  %v13600_v23 = vpack.c.bf16 %v6614_v57, %v6598_v63 }
 0x9e1   : > { %v6427_v8 = vadd.f32 %v6426_v25, %v13501_v7  ;;  %v6455_v33 = vpop.f32.mrf.mxu3 }
 0x9e2   : > { %v6456_v6 = vadd.f32 %v6455_v33, %v13505_v0  ;;  %v7716_v35 = vpop.f32.mrf.mxu1  ;;  %v9893_v0 = vld [vmem:[%s10756_s16 + $0x3a0] sm:$0xff]  ;;  %v9900_v33 = vld [vmem:[%s10756_s16 + $0x3d8] sm:$0xff]  ;;  %8089 = vmatpush.bf16.msra.mxu2 %v9883_v32 }
 0x9e3   : > { %v6612_v53 = vmax.f32 %v6427_v8, 0.0  ;;  %v7803_v49 = vpop.f32.mrf.mxu0  ;;  %v7717_v48 = vadd.f32 %v13609_v40, %v7716_v35  ;;  %8116 = vmatpush.bf16.msra.mxu3 %v9893_v0  ;;  %v9891_v8 = vld [vmem:[%s10756_s16 + $0x390] sm:$0xff]  ;;  %8146 = vmatpush.bf16.msra.mxu0 %v9900_v33 }
 0x9e4   : > { %v6613_v50 = vmax.f32 %v6456_v6, 0.0 }
 0x9e5   : > { %7947 = vmatmul.bf16.vlgmr.msrb.gmra.mxu1 %v13387_v38  ;;  %7976 = vmatmul.bf16.vlgmr.msrb.gmra.mxu2 %v13395_v52  ;;  %v13615_v7 = vpack.c.bf16 %v6612_v53, %v6596_v22 }
 0x9e6   : > { %8005 = vmatmul.bf16.vlgmr.msrb.gmra.mxu3 %v13397_v4  ;;  %8034 = vmatmul.bf16.vlgmr.msrb.gmra.mxu0 %v13390_v42  ;;  %v13621_v30 = vpack.c.bf16 %v6613_v50, %v6597_v27  ;;  %v9877_v42 = vld [vmem:[%s10756_s16 + $0x320] sm:$0xff]  ;;  %v9874_v27 = vld [vmem:[%s10756_s16 + $0x308] sm:$0xff] }
 0x9e7   : > { %8058 = vmatpush.bf16.msra.mxu1 %v9877_v42  ;;  %8117 = vmatpush.bf16.msra.mxu3 %v9892_v43  ;;  %v9898_v50 = vld [vmem:[%s10756_s16 + $0x3c8] sm:$0xff]  ;;  %v9881_v42 = vld [vmem:[%s10756_s16 + $0x340] sm:$0xff] }
 0x9e8   : > { %v7745_v38 = vpop.f32.mrf.mxu2  ;;  %8090 = vmatpush.bf16.msra.mxu2 %v9882_v34  ;;  %v9897_v43 = vld [vmem:[%s10756_s16 + $0x3c0] sm:$0xff] }
 0x9e9   : > { %v7746_v52 = vadd.f32 %v7745_v38, %v7717_v48  ;;  %v7774_v9 = vpop.f32.mrf.mxu3 }
 0x9ea   : > { %v7718_v4 = vpop.f32.mrf.mxu1 }
 0x9eb   : > { %v7775_v60 = vadd.f32 %v7774_v9, %v7746_v52  ;;  %v7805_v56 = vpop.f32.mrf.mxu0  ;;  %v7719_v24 = vadd.f32 %v13609_v40, %v7718_v4  ;;  %8059 = vmatpush.bf16.msra.mxu1 %v9876_v14  ;;  %8118 = vmatpush.bf16.msra.mxu3 %v9891_v8 }
 0x9ec   : > { %8091 = vmatpush.bf16.msra.mxu2 %v9881_v42 }
 0x9ed   : > { %v13628_v55 = vadd.f32 %v7803_v49, %v7775_v60  ;;  %v9875_v49 = vld [vmem:[%s10756_s16 + $0x310] sm:$0xff] }
 0x9ef   : > { %8060 = vmatpush.bf16.msra.mxu1 %v9875_v49  ;;  %8119 = vmatpush.bf16.msra.mxu3 %v9890_v16 }
 0x9f0   : > { %v7747_v54 = vpop.f32.mrf.mxu2 }
 0x9f1   : > { %v7748_v3 = vadd.f32 %v7747_v54, %v7719_v24  ;;  %v7776_v62 = vpop.f32.mrf.mxu3 }
 0x9f2   : > { %v7721_v10 = vpop.f32.mrf.mxu1 }
 0x9f3   : > { %v7777_v63 = vadd.f32 %v7776_v62, %v7748_v3  ;;  %v7808_v57 = vpop.f32.mrf.mxu0  ;;  %v7722_v6 = vadd.f32 %v13609_v40, %v7721_v10  ;;  %8061 = vmatpush.bf16.msra.mxu1 %v9874_v27  ;;  %8120 = vmatpush.bf16.msra.mxu3 %v9889_v17 }
 0x9f5   : > { %7952 = vmatmul.bf16.gmra.mxu1 %v13421_v58  ;;  %7981 = vmatmul.bf16.gmra.mxu2 %v13433_v44  ;;  %v13635_v25 = vadd.f32 %v7805_v56, %v7777_v63  ;;  %v9873_v56 = vld [vmem:[%s10756_s16 + $0x300] sm:$0xff] }
 0x9f6   : > { %8010 = vmatmul.bf16.gmra.mxu3 %v13436_v46  ;;  %8039 = vmatmul.bf16.gmra.mxu0 %v13424_v41  ;;  %v9899_v41 = vld [vmem:[%s10756_s16 + $0x3d0] sm:$0xff] }
 0x9f7   : > { %8147 = vmatpush.bf16.msra.mxu0 %v9899_v41  ;;  %8062 = vmatpush.bf16.msra.mxu1 %v9873_v56 }
 0x9f8   : > { %v7750_v58 = vpop.f32.mrf.mxu2 }
 0x9f9   : > { %v7751_v44 = vadd.f32 %v7750_v58, %v7722_v6  ;;  %v7779_v35 = vpop.f32.mrf.mxu3 }
 0x9fa   : > { %v7723_v22 = vpop.f32.mrf.mxu1 }
 0x9fb   : > { %v7780_v46 = vadd.f32 %v7779_v35, %v7751_v44  ;;  %v7810_v53 = vpop.f32.mrf.mxu0  ;;  %v7724_v51 = vadd.f32 %v13609_v40, %v7723_v22  ;;  %8148 = vmatpush.bf16.msra.mxu0 %v9898_v50 }
 0x9fd   : > { %v13648_v0 = vadd.f32 %v7808_v57, %v7780_v46 }
 0x9ff   : > { %8149 = vmatpush.bf16.msra.mxu0 %v9897_v43 }
 0xa00   : > { %v7752_v48 = vpop.f32.mrf.mxu2 }
 0xa01   : > { %v7753_v38 = vadd.f32 %v7752_v48, %v7724_v51  ;;  %v7781_v52 = vpop.f32.mrf.mxu3 }
 0xa02   : > { %v7726_v9 = vpop.f32.mrf.mxu1 }
 0xa03   : > { %v7782_v4 = vadd.f32 %v7781_v52, %v7753_v38  ;;  %v7813_v60 = vpop.f32.mrf.mxu0  ;;  %v7727_v24 = vadd.f32 %v13609_v40, %v7726_v9 }
 0xa05   : > { %7957 = vmatmul.bf16.gmra.mxu1 %v13443_v45  ;;  %7986 = vmatmul.bf16.gmra.mxu2 %v13454_v36  ;;  %v13657_v5 = vadd.f32 %v7810_v53, %v7782_v4 }
 0xa06   : > { %8015 = vmatmul.bf16.gmra.mxu3 %v13461_v37  ;;  %8044 = vmatmul.bf16.gmra.mxu0 %v13448_v59 }
 0xa08   : > { %v7755_v54 = vpop.f32.mrf.mxu2 }
 0xa09   : > { %v7756_v3 = vadd.f32 %v7755_v54, %v7727_v24  ;;  %v7784_v62 = vpop.f32.mrf.mxu3 }
 0xa0a   : > { %v7728_v10 = vpop.f32.mrf.mxu1 }
 0xa0b   : > { %v7785_v63 = vadd.f32 %v7784_v62, %v7756_v3  ;;  %v7815_v45 = vpop.f32.mrf.mxu0  ;;  %v7729_v36 = vadd.f32 %v13609_v40, %v7728_v10 }
 0xa0d   : > { %v13662_v57 = vadd.f32 %v7813_v60, %v7785_v63 }
 0xa10   : > { %v7757_v14 = vpop.f32.mrf.mxu2 }
 0xa11   : > { %v7758_v37 = vadd.f32 %v7757_v14, %v7729_v36  ;;  %v7786_v32 = vpop.f32.mrf.mxu3 }
 0xa12   : > { %v7731_v59 = vpop.f32.mrf.mxu1 }
 0xa13   : > { %v7787_v8 = vadd.f32 %v7786_v32, %v7758_v37  ;;  %v7818_v33 = vpop.f32.mrf.mxu0  ;;  %v7732_v58 = vadd.f32 %v13609_v40, %v7731_v59 }
 0xa15   : > { %7962 = vmatmul.bf16.gmra.mxu1 %v13473_v31  ;;  %7991 = vmatmul.bf16.gmra.mxu2 %v13486_v47  ;;  %v13667_v6 = vadd.f32 %v7815_v45, %v7787_v8 }
 0xa16   : > { %8020 = vmatmul.bf16.gmra.mxu3 %v13496_v39  ;;  %8049 = vmatmul.bf16.gmra.mxu0 %v13476_v20 }
 0xa18   : > { %v7760_v44 = vpop.f32.mrf.mxu2 }
 0xa19   : > { %v7761_v35 = vadd.f32 %v7760_v44, %v7732_v58  ;;  %v7789_v22 = vpop.f32.mrf.mxu3 }
 0xa1a   : > { %v7733_v46 = vpop.f32.mrf.mxu1 }
 0xa1b   : > { %v7790_v53 = vadd.f32 %v7789_v22, %v7761_v35  ;;  %v7820_v49 = vpop.f32.mrf.mxu0  ;;  %v7734_v31 = vadd.f32 %v13609_v40, %v7733_v46 }
 0xa1d   : > { %v13672_v41 = vadd.f32 %v7818_v33, %v7790_v53 }
 0xa20   : > { %v7762_v34 = vpop.f32.mrf.mxu2 }
 0xa21   : > { %v7763_v47 = vadd.f32 %v7762_v34, %v7734_v31  ;;  %v7791_v16 = vpop.f32.mrf.mxu3 }
 0xa22   : > { %v7832_v27 = vpop.f32.mrf.mxu1 }
 0xa23   : > { %v7792_v50 = vadd.f32 %v7791_v16, %v7763_v47  ;;  %v7833_v39 = vadd.f32 %v7832_v27, %v13628_v55  ;;  %v7919_v20 = vpop.f32.mrf.mxu0 }
 0xa25   : > { %8063 = vmatmul.bf16.vlgmr.msra.gmra.mxu1 %v13513_v1  ;;  %8092 = vmatmul.bf16.vlgmr.msra.gmra.mxu2 %v13521_v2  ;;  %v13678_v51 = vadd.f32 %v7820_v49, %v7792_v50 }
 0xa26   : > { %8121 = vmatmul.bf16.vlgmr.msra.gmra.mxu3 %v13525_v29  ;;  %8150 = vmatmul.bf16.vlgmr.msra.gmra.mxu0 %v13516_v15 }
 0xa28   : > { %v7861_v48 = vpop.f32.mrf.mxu2 }
 0xa29   : > { %v7862_v40 = vadd.f32 %v7861_v48, %v7833_v39  ;;  %v7890_v38 = vpop.f32.mrf.mxu3 }
 0xa2a   : > { %v7834_v52 = vpop.f32.mrf.mxu1 }
 0xa2b   : > { %v7891_v9 = vadd.f32 %v7890_v38, %v7862_v40  ;;  %v7835_v4 = vadd.f32 %v7834_v52, %v13635_v25  ;;  %v7921_v60 = vpop.f32.mrf.mxu0 }
 0xa2d   : > { %v13683_v55 = vadd.f32 %v7919_v20, %v7891_v9 }
 0xa30   : > { %v7863_v56 = vpop.f32.mrf.mxu2 }
 0xa31   : > { %v7864_v1 = vadd.f32 %v7863_v56, %v7835_v4  ;;  %v7892_v42 = vpop.f32.mrf.mxu3 }
 0xa32   : > { %v7837_v2 = vpop.f32.mrf.mxu1 }
 0xa33   : > { %v7893_v17 = vadd.f32 %v7892_v42, %v7864_v1  ;;  %v7838_v43 = vadd.f32 %v7837_v2, %v13648_v0  ;;  %v7924_v29 = vpop.f32.mrf.mxu0 }
 0xa35   : > { %8068 = vmatmul.bf16.gmra.mxu1 %v13543_v12  ;;  %8097 = vmatmul.bf16.gmra.mxu2 %v13556_v18  ;;  %v13688_v15 = vadd.f32 %v7921_v60, %v7893_v17 }
 0xa36   : > { %8126 = vmatmul.bf16.gmra.mxu3 %v13560_v21  ;;  %8155 = vmatmul.bf16.gmra.mxu0 %v13546_v28 }
 0xa38   : > { %v7866_v25 = vpop.f32.mrf.mxu2 }
 0xa39   : > { %v7867_v24 = vadd.f32 %v7866_v25, %v7838_v43  ;;  %v7895_v54 = vpop.f32.mrf.mxu3 }
 0xa3a   : > { %v7839_v3 = vpop.f32.mrf.mxu1 }
 0xa3b   : > { %v7896_v62 = vadd.f32 %v7895_v54, %v7867_v24  ;;  %v7840_v10 = vadd.f32 %v7839_v3, %v13657_v5  ;;  %v7926_v63 = vpop.f32.mrf.mxu0 }
 0xa3d   : > { %v13693_v0 = vadd.f32 %v7924_v29, %v7896_v62 }
 0xa40   : > { %v7868_v45 = vpop.f32.mrf.mxu2 }
 0xa41   : > { %v7869_v12 = vadd.f32 %v7868_v45, %v7840_v10  ;;  %v7897_v36 = vpop.f32.mrf.mxu3 }
 0xa42   : > { %v7842_v18 = vpop.f32.mrf.mxu1 }
 0xa43   : > { %v7898_v14 = vadd.f32 %v7897_v36, %v7869_v12  ;;  %v7843_v37 = vadd.f32 %v7842_v18, %v13662_v57  ;;  %v7929_v21 = vpop.f32.mrf.mxu0 }
 0xa45   : > { %8073 = vmatmul.bf16.gmra.mxu1 %v13569_v13  ;;  %8102 = vmatmul.bf16.gmra.mxu2 %v13580_v11  ;;  %v13698_v28 = vadd.f32 %v7926_v63, %v7898_v14 }
 0xa46   : > { %8131 = vmatmul.bf16.gmra.mxu3 %v13586_v19  ;;  %8160 = vmatmul.bf16.gmra.mxu0 %v13572_v61 }
 0xa48   : > { %v7871_v5 = vpop.f32.mrf.mxu2 }
 0xa49   : > { %v7872_v32 = vadd.f32 %v7871_v5, %v7843_v37  ;;  %v7900_v59 = vpop.f32.mrf.mxu3 }
 0xa4a   : > { %v7844_v8 = vpop.f32.mrf.mxu1 }
 0xa4b   : > { %v7901_v33 = vadd.f32 %v7900_v59, %v7872_v32  ;;  %v7845_v58 = vadd.f32 %v7844_v8, %v13667_v6  ;;  %v7931_v44 = vpop.f32.mrf.mxu0 }
 0xa4d   : > { %v13703_v57 = vadd.f32 %v7929_v21, %v7901_v33 }
 0xa50   : > { %v7873_v35 = vpop.f32.mrf.mxu2 }
 0xa51   : > { %v7874_v13 = vadd.f32 %v7873_v35, %v7845_v58  ;;  %v7902_v22 = vpop.f32.mrf.mxu3 }
 0xa52   : > { %v7847_v11 = vpop.f32.mrf.mxu1 }
 0xa53   : > { %v7903_v46 = vadd.f32 %v7902_v22, %v7874_v13  ;;  %v7848_v53 = vadd.f32 %v7847_v11, %v13672_v41  ;;  %v7934_v19 = vpop.f32.mrf.mxu0 }
 0xa55   : > { %8078 = vmatmul.bf16.gmra.mxu1 %v13597_v26  ;;  %8107 = vmatmul.bf16.gmra.mxu2 %v13615_v7  ;;  %v13708_v61 = vadd.f32 %v7931_v44, %v7903_v46 }
 0xa56   : > { %8136 = vmatmul.bf16.gmra.mxu3 %v13621_v30  ;;  %8165 = vmatmul.bf16.gmra.mxu0 %v13600_v23 }
 0xa58   : > { %v7876_v6 = vpop.f32.mrf.mxu2 }
 0xa59   : > { %v7877_v49 = vadd.f32 %v7876_v6, %v7848_v53  ;;  %v7905_v31 = vpop.f32.mrf.mxu3 }
 0xa5a   : > { %v7849_v34 = vpop.f32.mrf.mxu1 }
 0xa5b   : > { %v7906_v47 = vadd.f32 %v7905_v31, %v7877_v49  ;;  %v7850_v16 = vadd.f32 %v7849_v34, %v13678_v51  ;;  %v7936_v27 = vpop.f32.mrf.mxu0 }
 0xa5d   : > { %v13713_v41 = vadd.f32 %v7934_v19, %v7906_v47 }
 0xa60   : > { %v7878_v50 = vpop.f32.mrf.mxu2 }
 0xa61   : > { %v7879_v26 = vadd.f32 %v7878_v50, %v7850_v16  ;;  %v7907_v39 = vpop.f32.mrf.mxu3  ;;  %v14113_v50 = vld [vmem:[#allocation31_spill] sm:$0xff] }
 0xa62   : > { %v7948_v7 = vpop.f32.mrf.mxu1 }
 0xa63   : > { %v7908_v20 = vadd.f32 %v7907_v39, %v7879_v26  ;;  %v8035_v48 = vpop.f32.mrf.mxu0  ;;  %v7949_v37 = vadd.f32 %v7948_v7, %v13683_v55 }
 0xa65   : > { %v13715_v40 = vadd.f32 %v7936_v27, %v7908_v20 }
 0xa68   : > { %v7977_v30 = vpop.f32.mrf.mxu2 }
 0xa69   : > { %v8006_v23 = vpop.f32.mrf.mxu3  ;;  %v7978_v5 = vadd.f32 %v7977_v30, %v7949_v37 }
 0xa6a   : > { %v7950_v38 = vpop.f32.mrf.mxu1 }
 0xa6b   : > { %v8037_v52 = vpop.f32.mrf.mxu0  ;;  %v8007_v59 = vadd.f32 %v8006_v23, %v7978_v5  ;;  %v7951_v58 = vadd.f32 %v7950_v38, %v13688_v15 }
 0xa6d   : > { %v8036_v13 = vadd.f32 %v8035_v48, %v8007_v59 }
 0xa70   : > { %v7979_v9 = vpop.f32.mrf.mxu2 }
 0xa71   : > { %v8008_v4 = vpop.f32.mrf.mxu3  ;;  %v7980_v35 = vadd.f32 %v7979_v9, %v7951_v58 }
 0xa72   : > { %v7953_v60 = vpop.f32.mrf.mxu1 }
 0xa73   : > { %v8040_v56 = vpop.f32.mrf.mxu0  ;;  %v8009_v46 = vadd.f32 %v8008_v4, %v7980_v35  ;;  %v7954_v6 = vadd.f32 %v7953_v60, %v13693_v0 }
 0xa75   : > { %v8038_v16 = vadd.f32 %v8037_v52, %v8009_v46 }
 0xa78   : > { %v7982_v51 = vpop.f32.mrf.mxu2 }
 0xa79   : > { %v8011_v1 = vpop.f32.mrf.mxu3  ;;  %v7983_v34 = vadd.f32 %v7982_v51, %v7954_v6  ;;  %v14114_v51 = vld [vmem:[#allocation11_spill] sm:$0xff] }
 0xa7a   : > { %v7955_v42 = vpop.f32.mrf.mxu1 }
 0xa7b   : > { %v13717_v2 = vpop.f32.mrf.mxu0  ;;  %v8012_v39 = vadd.f32 %v8011_v1, %v7983_v34  ;;  %v7956_v0 = vadd.f32 %v7955_v42, %v13698_v28 }
 0xa7d   : > { %v8041_v52 = vadd.f32 %v8040_v56, %v8012_v39 }
 0xa80   : > { %v7984_v17 = vpop.f32.mrf.mxu2 }
 0xa81   : > { %v8013_v43 = vpop.f32.mrf.mxu3  ;;  %v7985_v9 = vadd.f32 %v7984_v17, %v7956_v0  ;;  %v14117_v0 = vld [vmem:[#allocation18_spill] sm:$0xff] }
 0xa82   : > { %v7958_v29 = vpop.f32.mrf.mxu1 }
 0xa83   : > { %v13719_v25 = vpop.f32.mrf.mxu0  ;;  %v8014_v1 = vadd.f32 %v8013_v43, %v7985_v9  ;;  %v7959_v28 = vadd.f32 %v7958_v29, %v13703_v57 }
 0xa85   : > { %v8043_v56 = vadd.f32 %v13717_v2, %v8014_v1 }
 0xa88   : > { %v7987_v24 = vpop.f32.mrf.mxu2 }
 0xa89   : > { %v13721_v54 = vpop.f32.mrf.mxu3  ;;  %v7988_v17 = vadd.f32 %v7987_v24, %v7959_v28 }
 0xa8a   : > { %v13723_v3 = vpop.f32.mrf.mxu1 }
 0xa8b   : > { %v13725_v62 = vpop.f32.mrf.mxu0  ;;  %v7961_v57 = vadd.f32 %v13723_v3, %v13708_v61 }
 0xa90   : > { %v13727_v10 = vpop.f32.mrf.mxu2 }
 0xa91   : > { %v13729_v63 = vpop.f32.mrf.mxu3  ;;  %v7990_v2 = vadd.f32 %v13727_v10, %v7961_v57 }
 0xa92   : > { %v13731_v45 = vpop.f32.mrf.mxu1 }
 0xa93   : > { %v13733_v12 = vpop.f32.mrf.mxu0  ;;  %v7964_v3 = vadd.f32 %v13731_v45, %v13713_v41 }
 0xa98   : > { %v13735_v36 = vpop.f32.mrf.mxu2 }
 0xa99   : > { %v13737_v18 = vpop.f32.mrf.mxu3 }
 0xa9a   : > { %v13739_v14 = vpop.f32.mrf.mxu1 }
 0xa9b   : > { %v13742_v21 = vpop.f32.mrf.mxu0  ;;  %v7966_v45 = vadd.f32 %v13739_v14, %v13715_v40 }
 0xaa0   : > { %v13744_v32 = vpop.f32.mrf.mxu2 }
 0xaa1   : > { %v13746_v8 = vpop.f32.mrf.mxu3 }
 0xaa2   : > { %v8064_v33 = vpop.f32.mrf.mxu1 }
 0xaa3   : > { %v8151_v44 = vpop.f32.mrf.mxu0  ;;  %v8065_v22 = vadd.f32 %v8064_v33, %v8036_v13 }
 0xaa8   : > { %v8093_v11 = vpop.f32.mrf.mxu2 }
 0xaa9   : > { %v8094_v53 = vadd.f32 %v8093_v11, %v8065_v22  ;;  %v8122_v19 = vpop.f32.mrf.mxu3  ;;  %v14115_v11 = vld [vmem:[#allocation29_spill] sm:$0xff] }
 0xaaa   : > { %v8066_v55 = vpop.f32.mrf.mxu1 }
 0xaab   : > { %v8123_v49 = vadd.f32 %v8122_v19, %v8094_v53  ;;  %v8153_v31 = vpop.f32.mrf.mxu0  ;;  %v8067_v27 = vadd.f32 %v8066_v55, %v8038_v16  ;;  %v8017_v53 = vadd.f32 %v13721_v54, %v7988_v17  ;;  %v14116_v16 = vld [vmem:[#allocation22_spill] sm:$0xff] }
 0xaad   : > { %v8152_v47 = vadd.f32 %v8151_v44, %v8123_v49 }
 0xaaf   : > { %v13751_v26 = vadd.f32 %v8152_v47, %v14113_v50  ;;  %v8019_v50 = vadd.f32 %v13729_v63, %v7990_v2  ;;  %v14121_v2 = vld [vmem:[#allocation12_spill] sm:$0xff] }
 0xab0   : > { %v8095_v15 = vpop.f32.mrf.mxu2 }
 0xab1   : > { %v8096_v7 = vadd.f32 %v8095_v15, %v8067_v27  ;;  %v8124_v20 = vpop.f32.mrf.mxu3  ;;  %v8179_v48 = vsel %vm733_vm1, %v13751_v26, 0.0 }
 0xab2   : > { %v8069_v30 = vpop.f32.mrf.mxu1  ;;  %8180 = vadd.xlane.f32.xlu0 %v8179_v48  ;;  %v8048_v48 = vadd.f32 %v13725_v62, %v8019_v50  ;;  %v7995_v62 = vadd.f32 %v13744_v32, %v7966_v45 }
 0xab3   : > { %v8125_v23 = vadd.f32 %v8124_v20, %v8096_v7  ;;  %v8156_v38 = vpop.f32.mrf.mxu0  ;;  %v8070_v60 = vadd.f32 %v8069_v30, %v8041_v52 }
 0xab5   : > { %v8154_v4 = vadd.f32 %v8153_v31, %v8125_v23  ;;  %v8046_v31 = vadd.f32 %v13719_v25, %v8017_v53  ;;  %v7993_v25 = vadd.f32 %v13735_v36, %v7964_v3 }
 0xab7   : > { %v13757_v37 = vadd.f32 %v8154_v4, %v14114_v51  ;;  %v8022_v9 = vadd.f32 %v13737_v18, %v7993_v25 }
 0xab8   : > { %v8098_v5 = vpop.f32.mrf.mxu2 }
 0xab9   : > { %v8099_v59 = vadd.f32 %v8098_v5, %v8070_v60  ;;  %v8127_v33 = vpop.f32.mrf.mxu3  ;;  %v8182_v58 = vsel %vm733_vm1, %v13757_v37, 0.0  ;;  %v8051_v5 = vadd.f32 %v13733_v12, %v8022_v9 }
 0xaba   : > { %v8071_v44 = vpop.f32.mrf.mxu1  ;;  %8183 = vadd.xlane.f32.xlu1 %v8182_v58  ;;  %v8024_v58 = vadd.f32 %v13746_v8, %v7995_v62 }
 0xabb   : > { %v8128_v42 = vadd.f32 %v8127_v33, %v8099_v59  ;;  %v8158_v35 = vpop.f32.mrf.mxu0  ;;  %v8072_v22 = vadd.f32 %v8071_v44, %v8043_v56  ;;  %v14118_v59 = vld [vmem:[#allocation21_spill] sm:$0xff]  ;;  %v14119_v56 = vld [vmem:[#allocation10_spill] sm:$0xff] }
 0xabc   : > { %v8053_v32 = vadd.f32 %v13742_v21, %v8024_v58 }
 0xabd   : > { %v8157_v13 = vadd.f32 %v8156_v38, %v8128_v42 }
 0xabf   : > { %v13764_v46 = vadd.f32 %v8157_v13, %v14115_v11 }
 0xac0   : > { %v8100_v43 = vpop.f32.mrf.mxu2 }
 0xac1   : > { %v8101_v19 = vadd.f32 %v8100_v43, %v8072_v22  ;;  %v8129_v55 = vpop.f32.mrf.mxu3  ;;  %v8185_v6 = vsel %vm733_vm1, %v13764_v46, 0.0 }
 0xac2   : > { %v8074_v49 = vpop.f32.mrf.mxu1  ;;  %8186 = vadd.xlane.f32.xlu2 %v8185_v6  ;;  %v14120_v6 = vld [vmem:[#allocation26_spill] sm:$0xff] }
 0xac3   : > { %v8130_v29 = vadd.f32 %v8129_v55, %v8101_v19  ;;  %v8161_v34 = vpop.f32.mrf.mxu0  ;;  %v8075_v47 = vadd.f32 %v8074_v49, %v8046_v31 }
 0xac5   : > { %v8159_v24 = vadd.f32 %v8158_v35, %v8130_v29 }
 0xac7   : > { %v13774_v54 = vadd.f32 %v8159_v24, %v14116_v16 }
 0xac8   : > { %v8103_v27 = vpop.f32.mrf.mxu2 }
 0xac9   : > { %v8104_v15 = vadd.f32 %v8103_v27, %v8075_v47  ;;  %v8132_v39 = vpop.f32.mrf.mxu3  ;;  %v8188_v7 = vsel %vm733_vm1, %v13774_v54, 0.0 }
 0xaca   : > { %v8076_v61 = vpop.f32.mrf.mxu1  ;;  %8189 = vadd.xlane.f32.xlu0 %v8188_v7 }
 0xacb   : > { %v8133_v10 = vadd.f32 %v8132_v39, %v8104_v15  ;;  %v8077_v30 = vadd.f32 %v8076_v61, %v8048_v48  ;;  %v8163_v63 = vpop.f32.mrf.mxu0 }
 0xacd   : > { %v8162_v20 = vadd.f32 %v8161_v34, %v8133_v10 }
 0xacf   : > { %v13784_v23 = vadd.f32 %v8162_v20, %v14117_v0 }
 0xad0   : > { %v8105_v38 = vpop.f32.mrf.mxu2 }
 0xad1   : > { %v8106_v4 = vadd.f32 %v8105_v38, %v8077_v30  ;;  %v8134_v52 = vpop.f32.mrf.mxu3  ;;  %v8191_v60 = vsel %vm733_vm1, %v13784_v23, 0.0 }
 0xad2   : > { %v8079_v41 = vpop.f32.mrf.mxu1  ;;  %8192 = vadd.xlane.f32.xlu1 %v8191_v60 }
 0xad3   : > { %v8135_v36 = vadd.f32 %v8134_v52, %v8106_v4  ;;  %v8080_v1 = vadd.f32 %v8079_v41, %v8051_v5  ;;  %v8166_v35 = vpop.f32.mrf.mxu0 }
 0xad5   : > { %v8164_v51 = vadd.f32 %v8163_v63, %v8135_v36 }
 0xad7   : > { %v8176_v33 = vadd.f32 %v8164_v51, %v14118_v59 }
 0xad8   : > { %v8108_v18 = vpop.f32.mrf.mxu2 }
 0xad9   : > { %v8109_v44 = vadd.f32 %v8108_v18, %v8080_v1  ;;  %v8137_v28 = vpop.f32.mrf.mxu3  ;;  %v8194_v42 = vsel %vm733_vm1, %v8176_v33, 0.0 }
 0xada   : > { %8195 = vadd.xlane.f32.xlu2 %v8194_v42  ;;  %v8081_v40 = vpop.f32.mrf.mxu1 }
 0xadb   : > { %v8138_v17 = vadd.f32 %v8137_v28, %v8109_v44  ;;  %v8082_v13 = vadd.f32 %v8081_v40, %v8053_v32  ;;  %v8168_v19 = vpop.f32.mrf.mxu0 }
 0xadd   : > { %v8167_v14 = vadd.f32 %v8166_v35, %v8138_v17 }
 0xadf   : > { %v8177_v12 = vadd.f32 %v8167_v14, %v14119_v56 }
 0xae0   : > { %v8110_v22 = vpop.f32.mrf.mxu2 }
 0xae1   : > { %v8111_v11 = vadd.f32 %v8110_v22, %v8082_v13  ;;  %v8197_v43 = vsel %vm733_vm1, %v8177_v12, 0.0  ;;  %v8139_v53 = vpop.f32.mrf.mxu3 }
 0xae2   : > { %8198 = vadd.xlane.f32.xlu0 %v8197_v43 }
 0xae3   : > { %v8140_v8 = vadd.f32 %v8139_v53, %v8111_v11 }
 0xae5   : > { %v8169_v55 = vadd.f32 %v8168_v19, %v8140_v8  ;;  %v13862_v8 = vld [vmem:[%s640_s15] ss:$0 sm:$0xff] }
 0xae7   : > { %v8178_v49 = vadd.f32 %v8169_v55, %v14120_v6  ;;  %v13869_v6 = vld [vmem:[%s643_s28] ss:$0 sm:$0xff] }
 0xae9   : > { %v8200_v57 = vsel %vm733_vm1, %v8178_v49, 0.0 }
 0xaea   : > { %8201 = vadd.xlane.f32.xlu1 %v8200_v57 }
 0xb25   : > { %v8181_v29 = vpop.xlane.xlu0 %8180 }
 0xb26   : > { %v8203_v21 = vmul.f32 %v8181_v29, %v14121_v2 }
 0xb28   : > { %v13803_v24 = vsub.f32 %v13751_v26, %v8203_v21 }
 0xb2a   : > { %v8219_v31 = vmul.f32 %v13803_v24, %v13803_v24 }
 0xb2c   : > { %v8227_v34 = vsel %vm733_vm1, %v8219_v31, 0.0 }
 0xb2d   : > { %v8184_v47 = vpop.xlane.xlu1 %8183  ;;  %8228 = vadd.xlane.f32.xlu2 %v8227_v34 }
 0xb2e   : > { %v8204_v16 = vmul.f32 %v8184_v47, %v14121_v2 }
 0xb30   : > { %v13810_v27 = vsub.f32 %v13757_v37, %v8204_v16 }
 0xb32   : > { %v8220_v50 = vmul.f32 %v13810_v27, %v13810_v27 }
 0xb34   : > { %v8230_v15 = vsel %vm733_vm1, %v8220_v50, 0.0 }
 0xb35   : > { %v8187_v39 = vpop.xlane.xlu2 %8186  ;;  %8231 = vadd.xlane.f32.xlu0 %v8230_v15 }
 0xb36   : > { %v8205_v26 = vmul.f32 %v8187_v39, %v14121_v2 }
 0xb38   : > { %v13817_v7 = vsub.f32 %v13764_v46, %v8205_v26 }
 0xb3a   : > { %v8221_v61 = vmul.f32 %v13817_v7, %v13817_v7 }
 0xb3c   : > { %v8233_v3 = vsel %vm733_vm1, %v8221_v61, 0.0 }
 0xb3d   : > { %v8190_v10 = vpop.xlane.xlu0 %8189  ;;  %8234 = vadd.xlane.f32.xlu1 %v8233_v3 }
 0xb3e   : > { %v8206_v37 = vmul.f32 %v8190_v10, %v14121_v2 }
 0xb40   : > { %v13824_v25 = vsub.f32 %v13774_v54, %v8206_v37 }
 0xb42   : > { %v8222_v20 = vmul.f32 %v13824_v25, %v13824_v25 }
 0xb44   : > { %v8236_v48 = vsel %vm733_vm1, %v8222_v20, 0.0 }
 0xb45   : > { %v8193_v30 = vpop.xlane.xlu1 %8192  ;;  %8237 = vadd.xlane.f32.xlu2 %v8236_v48 }
 0xb46   : > { %v8207_v46 = vmul.f32 %v8193_v30, %v14121_v2 }
 0xb48   : > { %v13831_v0 = vsub.f32 %v13784_v23, %v8207_v46 }
 0xb4a   : > { %v8223_v63 = vmul.f32 %v13831_v0, %v13831_v0 }
 0xb4c   : > { %v8239_v38 = vsel %vm733_vm1, %v8223_v63, 0.0 }
 0xb4d   : > { %v8196_v9 = vpop.xlane.xlu2 %8195  ;;  %8240 = vadd.xlane.f32.xlu0 %v8239_v38 }
 0xb4e   : > { %v8208_v54 = vmul.f32 %v8196_v9, %v14121_v2 }
 0xb50   : > { %v13837_v4 = vsub.f32 %v8176_v33, %v8208_v54 }
 0xb52   : > { %v8224_v52 = vmul.f32 %v13837_v4, %v13837_v4 }
 0xb54   : > { %v8242_v60 = vsel %vm733_vm1, %v8224_v52, 0.0 }
 0xb55   : > { %8243 = vadd.xlane.f32.xlu1 %v8242_v60  ;;  %v8199_v41 = vpop.xlane.xlu0 %8198 }
 0xb56   : > { %v8209_v23 = vmul.f32 %v8199_v41, %v14121_v2 }
 0xb58   : > { %v13843_v45 = vsub.f32 %v8177_v12, %v8209_v23 }
 0xb5a   : > { %v8225_v36 = vmul.f32 %v13843_v45, %v13843_v45 }
 0xb5c   : > { %v8245_v62 = vsel %vm733_vm1, %v8225_v36, 0.0 }
 0xb5d   : > { %v8202_v51 = vpop.xlane.xlu1 %8201  ;;  %8246 = vadd.xlane.f32.xlu2 %v8245_v62 }
 0xb5e   : > { %v8210_v5 = vmul.f32 %v8202_v51, %v14121_v2 }
 0xb60   : > { %v13849_v1 = vsub.f32 %v8178_v49, %v8210_v5 }
 0xb62   : > { %v8226_v59 = vmul.f32 %v13849_v1, %v13849_v1 }
 0xb64   : > { %v8248_v33 = vsel %vm733_vm1, %v8226_v59, 0.0 }
 0xb65   : > { %8249 = vadd.xlane.f32.xlu0 %v8248_v33 }
 0xba0   : > { %v8229_v18 = vpop.xlane.xlu2 %8228 }
 0xba1   : > { %v8251_v58 = vmul.f32 %v8229_v18, %v14121_v2 }
 0xba3   : > { %v8259_v44 = vadd.f32 1e-05, %v8251_v58 }
 0xba5   : > { %10517 = vrsqrt.f32 %v8259_v44  ;;  %vm8273_vm5 = vweird.f32 %v8259_v44 }
 0xba8   : > { %v8232_v28 = vpop.xlane.xlu0 %8231 }
 0xba9   : > { %v8252_v42 = vmul.f32 %v8232_v28, %v14121_v2 }
 0xbab   : > { %v10518_v35 = vpop.eup %10517  ;;  %v8260_v17 = vadd.f32 1e-05, %v8252_v42 }
 0xbac   : > { %v8268_v40 = vmul.f32 %v10518_v35, %v8259_v44  ;;  %vm8274_vm4 = vweird.f32 %v10518_v35 }
 0xbad   : > { %10519 = vrsqrt.f32 %v8260_v17  ;;  %vm8275_vm6 = vmor %vm8273_vm5, %vm8274_vm4  ;;  %vm8283_vm8 = vweird.f32 %v8260_v17 }
 0xbae   : > { %v8269_v14 = vmul.f32 %v10518_v35, %v8268_v40 }
 0xbb0   : > { %v8270_v32 = vmul.f32 0.5, %v8269_v14  ;;  %v8235_v13 = vpop.xlane.xlu1 %8234 }
 0xbb1   : > { %v8253_v56 = vmul.f32 %v8235_v13, %v14121_v2 }
 0xbb2   : > { %v8271_v12 = vsub.f32 1.5, %v8270_v32 }
 0xbb3   : > { %v10520_v22 = vpop.eup %10519  ;;  %v8261_v11 = vadd.f32 1e-05, %v8253_v56 }
 0xbb4   : > { %v8272_v43 = vmul.f32 %v10518_v35, %v8271_v12  ;;  %v8278_v53 = vmul.f32 %v10520_v22, %v8260_v17  ;;  %vm8284_vm7 = vweird.f32 %v10520_v22 }
 0xbb5   : > { %10521 = vrsqrt.f32 %v8261_v11  ;;  %vm8285_vm9 = vmor %vm8283_vm8, %vm8284_vm7  ;;  %vm8293_vm11 = vweird.f32 %v8261_v11 }
 0xbb6   : > { %v8276_v19 = vsel %vm8275_vm6, %v10518_v35, %v8272_v43  ;;  %v8279_v55 = vmul.f32 %v10520_v22, %v8278_v53 }
 0xbb7   : > { %v8347_v49 = vmul.f32 %v8276_v19, %v13803_v24 }
 0xbb8   : > { %v8280_v57 = vmul.f32 0.5, %v8279_v55  ;;  %v8238_v29 = vpop.xlane.xlu2 %8237 }
 0xbb9   : > { %v8359_v21 = vmul.f32 %v13862_v8, %v8347_v49  ;;  %v8254_v31 = vmul.f32 %v8238_v29, %v14121_v2 }
 0xbba   : > { %v8281_v34 = vsub.f32 1.5, %v8280_v57 }
 0xbbb   : > { %v10522_v47 = vpop.eup %10521  ;;  %v13875_v16 = vadd.f32 %v13869_v6, %v8359_v21  ;;  %v8262_v50 = vadd.f32 1e-05, %v8254_v31 }
 0xbbc   : > { %v8282_v15 = vmul.f32 %v10520_v22, %v8281_v34  ;;  %v8288_v39 = vmul.f32 %v10522_v47, %v8261_v11  ;;  %vm8294_vm10 = vweird.f32 %v10522_v47 }
 0xbbd   : > { %8379 = vst.msk [vmem:[#allocation2] sm:$0xff] %vm733_vm1, %v13875_v16  ;;  %10523 = vrsqrt.f32 %v8262_v50  ;;  %vm8295_vm12 = vmor %vm8293_vm11, %vm8294_vm10  ;;  %vm8303_vm14 = vweird.f32 %v8262_v50 }
 0xbbe   : > { %v8286_v24 = vsel %vm8285_vm9, %v10520_v22, %v8282_v15  ;;  %v8289_v26 = vmul.f32 %v10522_v47, %v8288_v39 }
 0xbbf   : > { %v8348_v61 = vmul.f32 %v8286_v24, %v13810_v27 }
 0xbc0   : > { %v8290_v3 = vmul.f32 0.5, %v8289_v26  ;;  %v8241_v10 = vpop.xlane.xlu0 %8240 }
 0xbc1   : > { %v8360_v37 = vmul.f32 %v13862_v8, %v8348_v61  ;;  %v8255_v20 = vmul.f32 %v8241_v10, %v14121_v2 }
 0xbc2   : > { %v8291_v48 = vsub.f32 1.5, %v8290_v3 }
 0xbc3   : > { %v10524_v30 = vpop.eup %10523  ;;  %v13883_v46 = vadd.f32 %v13869_v6, %v8360_v37  ;;  %v8263_v63 = vadd.f32 1e-05, %v8255_v20 }
 0xbc4   : > { %v8292_v38 = vmul.f32 %v10522_v47, %v8291_v48  ;;  %v8298_v9 = vmul.f32 %v10524_v30, %v8262_v50  ;;  %vm8304_vm13 = vweird.f32 %v10524_v30 }
 0xbc5   : > { %8380 = vst.msk [vmem:[#allocation2 + $0x8] sm:$0xff] %vm733_vm1, %v13883_v46  ;;  %10525 = vrsqrt.f32 %v8263_v63  ;;  %vm8305_vm15 = vmor %vm8303_vm14, %vm8304_vm13  ;;  %vm8313_vm2 = vweird.f32 %v8263_v63 }
 0xbc6   : > { %v8296_v27 = vsel %vm8295_vm12, %v10522_v47, %v8292_v38  ;;  %v8299_v54 = vmul.f32 %v10524_v30, %v8298_v9 }
 0xbc7   : > { %v8349_v52 = vmul.f32 %v8296_v27, %v13817_v7 }
 0xbc8   : > { %v8300_v60 = vmul.f32 0.5, %v8299_v54  ;;  %v8244_v41 = vpop.xlane.xlu1 %8243 }
 0xbc9   : > { %v8361_v23 = vmul.f32 %v13862_v8, %v8349_v52  ;;  %v8256_v36 = vmul.f32 %v8244_v41, %v14121_v2 }
 0xbca   : > { %v8301_v62 = vsub.f32 1.5, %v8300_v60 }
 0xbcb   : > { %v10526_v51 = vpop.eup %10525  ;;  %v13891_v5 = vadd.f32 %v13869_v6, %v8361_v23  ;;  %v8264_v59 = vadd.f32 1e-05, %v8256_v36 }
 0xbcc   : > { %v8302_v33 = vmul.f32 %v10524_v30, %v8301_v62  ;;  %v8308_v18 = vmul.f32 %v10526_v51, %v8263_v63  ;;  %vm8314_vm0 = vweird.f32 %v10526_v51 }
 0xbcd   : > { %8381 = vst.msk [vmem:[#allocation2 + $0x10] sm:$0xff] %vm733_vm1, %v13891_v5  ;;  %10527 = vrsqrt.f32 %v8264_v59  ;;  %vm8315_vm3 = vmor %vm8313_vm2, %vm8314_vm0  ;;  %vm8323_vm5 = vweird.f32 %v8264_v59 }
 0xbce   : > { %v8306_v7 = vsel %vm8305_vm15, %v10524_v30, %v8302_v33  ;;  %v8309_v58 = vmul.f32 %v10526_v51, %v8308_v18 }
 0xbcf   : > { %v8350_v44 = vmul.f32 %v8306_v7, %v13824_v25 }
 0xbd0   : > { %v8310_v28 = vmul.f32 0.5, %v8309_v58  ;;  %v8247_v42 = vpop.xlane.xlu2 %8246 }
 0xbd1   : > { %v8362_v35 = vmul.f32 %v13862_v8, %v8350_v44  ;;  %v8257_v17 = vmul.f32 %v8247_v42, %v14121_v2 }
 0xbd2   : > { %v8311_v40 = vsub.f32 1.5, %v8310_v28 }
 0xbd3   : > { %v10528_v14 = vpop.eup %10527  ;;  %v8374_v32 = vadd.f32 %v13869_v6, %v8362_v35  ;;  %v8265_v13 = vadd.f32 1e-05, %v8257_v17 }
 0xbd4   : > { %v8312_v56 = vmul.f32 %v10526_v51, %v8311_v40  ;;  %v8318_v12 = vmul.f32 %v10528_v14, %v8264_v59  ;;  %vm8324_vm4 = vweird.f32 %v10528_v14 }
 0xbd5   : > { %8382 = vst.msk [vmem:[#allocation2 + $0x18] sm:$0xff] %vm733_vm1, %v8374_v32  ;;  %10529 = vrsqrt.f32 %v8265_v13  ;;  %vm8325_vm6 = vmor %vm8323_vm5, %vm8324_vm4  ;;  %vm8333_vm8 = vweird.f32 %v8265_v13 }
 0xbd6   : > { %v8316_v25 = vsel %vm8315_vm3, %v10526_v51, %v8312_v56  ;;  %v8319_v22 = vmul.f32 %v10528_v14, %v8318_v12 }
 0xbd7   : > { %v8351_v11 = vmul.f32 %v8316_v25, %v13831_v0 }
 0xbd8   : > { %v8320_v43 = vmul.f32 0.5, %v8319_v22  ;;  %v8250_v53 = vpop.xlane.xlu0 %8249 }
 0xbd9   : > { %v8363_v19 = vmul.f32 %v13862_v8, %v8351_v11  ;;  %v8258_v55 = vmul.f32 %v8250_v53, %v14121_v2 }
 0xbda   : > { %v8321_v49 = vsub.f32 1.5, %v8320_v43 }
 0xbdb   : > { %v10530_v57 = vpop.eup %10529  ;;  %v8375_v29 = vadd.f32 %v13869_v6, %v8363_v19  ;;  %v8266_v21 = vadd.f32 1e-05, %v8258_v55 }
 0xbdc   : > { %v8322_v31 = vmul.f32 %v10528_v14, %v8321_v49  ;;  %v8328_v34 = vmul.f32 %v10530_v57, %v8265_v13  ;;  %vm8334_vm7 = vweird.f32 %v10530_v57 }
 0xbdd   : > { %8383 = vst.msk [vmem:[#allocation2 + $0x20] sm:$0xff] %vm733_vm1, %v8375_v29  ;;  %10531 = vrsqrt.f32 %v8266_v21  ;;  %vm8335_vm9 = vmor %vm8333_vm8, %vm8334_vm7  ;;  %vm8343_vm11 = vweird.f32 %v8266_v21 }
 0xbde   : > { %v8326_v0 = vsel %vm8325_vm6, %v10528_v14, %v8322_v31  ;;  %v8329_v47 = vmul.f32 %v10530_v57, %v8328_v34 }
 0xbdf   : > { %v8352_v50 = vmul.f32 %v8326_v0, %v13837_v4 }
 0xbe0   : > { %v8330_v15 = vmul.f32 0.5, %v8329_v47 }
 0xbe1   : > { %v8364_v2 = vmul.f32 %v13862_v8, %v8352_v50 }
 0xbe2   : > { %v8331_v39 = vsub.f32 1.5, %v8330_v15 }
 0xbe3   : > { %v10532_v24 = vpop.eup %10531  ;;  %v8376_v26 = vadd.f32 %v13869_v6, %v8364_v2 }
 0xbe4   : > { %v8332_v61 = vmul.f32 %v10530_v57, %v8331_v39  ;;  %v8338_v3 = vmul.f32 %v10532_v24, %v8266_v21  ;;  %vm8344_vm10 = vweird.f32 %v10532_v24 }
 0xbe5   : > { %8384 = vst.msk [vmem:[#allocation2 + $0x28] sm:$0xff] %vm733_vm1, %v8376_v26  ;;  %vm8345_vm12 = vmor %vm8343_vm11, %vm8344_vm10 }
 0xbe6   : > { %v8336_v10 = vsel %vm8335_vm9, %v10530_v57, %v8332_v61  ;;  %v8339_v37 = vmul.f32 %v10532_v24, %v8338_v3 }
 0xbe7   : > { %v8353_v20 = vmul.f32 %v8336_v10, %v13843_v45 }
 0xbe8   : > { %v8340_v48 = vmul.f32 0.5, %v8339_v37 }
 0xbe9   : > { %v8365_v4 = vmul.f32 %v13862_v8, %v8353_v20 }
 0xbea   : > { %v8341_v30 = vsub.f32 1.5, %v8340_v48 }
 0xbeb   : > { %v8377_v63 = vadd.f32 %v13869_v6, %v8365_v4 }
 0xbec   : > { %v8342_v38 = vmul.f32 %v10532_v24, %v8341_v30 }
 0xbed   : > { %8385 = vst.msk [vmem:[#allocation2 + $0x30] sm:$0xff] %vm733_vm1, %v8377_v63 }
 0xbee   : > { %v8346_v9 = vsel %vm8345_vm12, %v10532_v24, %v8342_v38 }
 0xbef   : > { %v8354_v27 = vmul.f32 %v8346_v9, %v13849_v1 }
 0xbf1   : > { %v8366_v54 = vmul.f32 %v13862_v8, %v8354_v27  ;;  %8390 = sbr.rel (%p9692_p6) target bundleno = 3070 (0xbfe), region = 80 }
 0xbf3   : > { %v8378_v52 = vadd.f32 %v13869_v6, %v8366_v54 }
 0xbf5   : > { %8386 = vst.msk [vmem:[#allocation2 + $0x38] sm:$0xff] %vm733_vm1, %v8378_v52 }
 0xbf6   : > { %8391 = vst.msk [vmem:[#allocation3] sm:$0xff] %vm733_vm1, %v13875_v16 }
 0xbf7   : > { %8392 = vst.msk [vmem:[#allocation3 + $0x8] sm:$0xff] %vm733_vm1, %v13883_v46 }
 0xbf8   : > { %8393 = vst.msk [vmem:[#allocation3 + $0x10] sm:$0xff] %vm733_vm1, %v13891_v5 }
 0xbf9   : > { %8394 = vst.msk [vmem:[#allocation3 + $0x18] sm:$0xff] %vm733_vm1, %v8374_v32 }
 0xbfa   : > { %8395 = vst.msk [vmem:[#allocation3 + $0x20] sm:$0xff] %vm733_vm1, %v8375_v29 }
 0xbfb   : > { %8396 = vst.msk [vmem:[#allocation3 + $0x28] sm:$0xff] %vm733_vm1, %v8376_v26 }
 0xbfc   : > { %8397 = vst.msk [vmem:[#allocation3 + $0x30] sm:$0xff] %vm733_vm1, %v8377_v63 }
 0xbfd   : > { %8398 = vst.msk [vmem:[#allocation3 + $0x38] sm:$0xff] %vm733_vm1, %v8378_v52 }
 0xbfe PF: > { %s14122_s25 = sld [smem:[#allocation7_spill]]  ;;  %s10613_s2 = smov [#allocation3]  }
 0xbff   : > { %s14124_s17 = sld [smem:[#allocation39_spill]]  ;;  %s8407_s20 = sshll.u32 %s10613_s2, 4  ;;  %s8408_s20 = int_to_ptr.vmem [resolvable:$true] %s8407_s20 }
 0xc00   : > { %s10614_s23 = smov 128  }
 0xc04   : > { %s14123_s30 = sadd.s32 4294967295, %s14122_s25  }
 0xc05   : > { %p9913_p7 = scmp.eq.s32.totalorder %s14123_s30, 1  ;;  %s8409_s13 = sshll.u32 %s14124_s17, 4  ;;  %s8410_s13 = int_to_ptr.hbm [resolvable:$true] %s8409_s13 }
 0xc07   : > { %9910 = dma.vmem_to_hbm [thread:$0]  (%p9913_p7), %s8408_s20, 1024, %s8410_s13, [#allocation4], %s10614_s23, %s10614_s23, %s10605_s18  }
 0xc08   : > { %10582 = dma.done.wait (%p9913_p7), [#allocation4], 1024  }
 0xc09   : > { %10584 = vsyncadd (%p9913_p7), [#allocation4], 4294966272 }
 0xc0a PF: > { %s14125_s24 = sld [smem:[#allocation7_spill]] }
 0xc0b   : > { %s14126_s25 = sld [smem:[#allocation6_spill]] }
 0xc0c   : > { %s14127_s26 = sld [smem:[#allocation8_spill]] }
 0xc10   : > { %s24_s27 = sadd.s32 1, %s14125_s24  }
 0xc11   : > { %p21_p8 = scmp.ge.s32.totalorder %s24_s27, 4  }
 0xc13   :  { %23 = sbr.rel (!%p21_p8) target bundleno = 7 (0x7), region = 144 }
 0xc18   :  { %8426 = vsyncpa [#allocation4], 1 }
 0xc19   :  { %8428 = vsyncpa [#allocation4 + $0x1], 1 }

</bundles_post_ra>
